<compile_context>
chip_gen: v5e
topology: v5e:2x2
jax: 0.10.0
libtpu: 0.0.40
codegen_flags: <defaults>
</compile_context>

<pallas_src>
import jax
import jax.numpy as jnp
from jax.experimental import pallas as pl
from jax.experimental.pallas import tpu as pltpu

C = 512
BN_EPS = 1e-5
GLN_EPS = 1e-8


def _dsconv1d_kernel(x_ref, scale_ref, shift_ref, w_dw_ref, alpha_ref,
                     w2f_ref, beta_row_ref, o_ref):
    # x_ref:        (1, 512, T) f32   -- one batch element, NCT (C on sublanes,
    #                                    T on lanes: no transposes anywhere)
    # scale/shift:  (512, 1) f32      -- folded eval-mode BatchNorm
    # w_dw_ref:     (3, 512, 1) f32   -- depthwise taps, (k, c, 1)
    # alpha_ref:    (1,) f32 in SMEM  -- PReLU (single shared parameter)
    # w2f_ref:      (512, 512) bf16   -- 1x1 conv weight with gLN gamma folded in
    # beta_row_ref: (512, 1) f32      -- w2 @ gln_beta (exact f32 fold)
    # o_ref:        (1, 512, T)
    t = x_ref.shape[2]
    x = x_ref[0]                                          # (512, T) f32

    # ReLU + folded eval-mode BatchNorm (per-channel affine) -- VPU work.
    b = jnp.maximum(x, 0.0) * scale_ref[...] + shift_ref[...]

    # Depthwise Conv1d(k=3, pad=1, groups=512): +/-1 lane shifts with zero
    # boundary columns, built in registers (XLU lane shifts, no VMEM scratch).
    zero_col = jnp.zeros((C, 1), dtype=jnp.float32)
    b_prev = jnp.concatenate([zero_col, b[:, :t - 1]], axis=1)   # b[c, t-1]
    b_next = jnp.concatenate([b[:, 1:], zero_col], axis=1)       # b[c, t+1]
    d = (w_dw_ref[0] * b_prev + w_dw_ref[1] * b + w_dw_ref[2] * b_next)

    # PReLU (single shared alpha, read from the scalar path).
    alpha = alpha_ref[0]
    p = jnp.where(d > 0, d, alpha * d)

    # GlobalLayerNorm, single-pass stats over the whole (C, T) slab.
    inv_n = 1.0 / (C * t)                                 # static at trace time
    s1 = jnp.sum(p, keepdims=True)                        # (1, 1)
    s2 = jnp.sum(p * p, keepdims=True)                    # (1, 1)
    mu = s1 * inv_n
    var = jnp.maximum(s2 * inv_n - mu * mu, 0.0)
    z = (p - mu) * jax.lax.rsqrt(var + GLN_EPS)           # gamma/beta folded out

    # 1x1 Conv (512 -> 512): bf16 MXU matmul with f32 accumulation.
    # M = 512 always (rows of w2f), independent of T.
    out = jnp.dot(w2f_ref[...], z.astype(jnp.bfloat16),
                  preferred_element_type=jnp.float32)

    # + folded gLN beta contribution + residual.
    o_ref[0] = (out + beta_row_ref[...] + x).astype(o_ref.dtype)


def dsconv1d(x_nct, params, out_dtype=None):
    """x_nct: (N, 512, T) float32 -> (N, 512, T) out_dtype (default: x dtype)."""
    n, c_in, t = x_nct.shape
    assert c_in == C
    assert t >= 2
    out_dtype = out_dtype or x_nct.dtype
    (w_dw, bn_gamma, bn_beta, bn_mean, bn_var,
     alpha, gln_gamma, gln_beta, w2) = params

    # ---- host-side (exact) parameter folding -------------------------------
    # eval-mode BatchNorm -> per-channel scale/shift
    scale = (bn_gamma * jax.lax.rsqrt(bn_var + BN_EPS)).astype(jnp.float32)
    shift = (bn_beta - bn_mean * scale).astype(jnp.float32)
    # gLN affine folded into the 1x1 conv:  w2' = w2 * gamma,  beta_row = w2 @ beta
    g_vec = gln_gamma.reshape(C).astype(jnp.float32)
    b_vec = gln_beta.reshape(C).astype(jnp.float32)
    w2_2d = w2.reshape(C, C).astype(jnp.float32)          # (C_out, C_in)
    w2f = (w2_2d * g_vec[None, :]).astype(jnp.bfloat16)
    beta_row = (w2_2d @ b_vec).reshape(C, 1).astype(jnp.float32)
    # depthwise taps: PyTorch (C, 1, 3) -> (3, C, 1) for per-tap broadcast
    w_dw_k = jnp.moveaxis(w_dw.astype(jnp.float32), 2, 0)
    alpha_1 = jnp.asarray(alpha, jnp.float32).reshape(1)

    col = lambda v: v.reshape(C, 1)

    # VMEM budget sized from the actual slab (double-buffered in/out + live
    # temporaries + weights), clamped.  For very long T on v7x use the tiled
    # two-pass design instead (see TODO above).
    slab_bytes = C * t * 4
    vmem_limit = int(min(96 * 2**20, max(8 * 2**20, 14 * slab_bytes + 4 * 2**20)))

    grid_spec = pltpu.PrefetchScalarGridSpec(
        num_scalar_prefetch=0,
        grid=(n,),
        in_specs=[
            pl.BlockSpec((1, C, t), lambda i: (i, 0, 0)),     # x (NCT)
            pl.BlockSpec((C, 1), lambda i: (0, 0)),           # BN scale
            pl.BlockSpec((C, 1), lambda i: (0, 0)),           # BN shift
            pl.BlockSpec((3, C, 1), lambda i: (0, 0, 0)),     # depthwise taps
            pl.BlockSpec(memory_space=pltpu.MemorySpace.SMEM),  # PReLU alpha
            pl.BlockSpec((C, C), lambda i: (0, 0)),           # w2 * gln_gamma (bf16)
            pl.BlockSpec((C, 1), lambda i: (0, 0)),           # w2 @ gln_beta
        ],
        out_specs=pl.BlockSpec((1, C, t), lambda i: (i, 0, 0)),
    )

    return pl.pallas_call(
        _dsconv1d_kernel,
        out_shape=jax.ShapeDtypeStruct((n, C, t), out_dtype),
        grid_spec=grid_spec,
        compiler_params=pltpu.CompilerParams(
            dimension_semantics=("parallel",),
            vmem_limit_bytes=vmem_limit),
    )(x_nct, col(scale), col(shift), w_dw_k, alpha_1, w2f, beta_row)


def _reference(x, params):
    """Pure-JAX f32 reference (NCT layout) for correctness check."""
    (w_dw, bn_gamma, bn_beta, bn_mean, bn_var,
     alpha, gln_gamma, gln_beta, w2) = params
    x = x.astype(jnp.float32)
    t = x.shape[2]
    r = jnp.maximum(x, 0.0)
    scale = bn_gamma * jax.lax.rsqrt(bn_var + BN_EPS)
    b = r * scale[None, :, None] + (bn_beta - bn_mean * scale)[None, :, None]
    bp = jnp.pad(b, ((0, 0), (0, 0), (1, 1)))
    w = w_dw[:, 0, :]                                      # (C, 3)
    d = (w[None, :, 0:1] * bp[:, :, 0:t]
         + w[None, :, 1:2] * bp[:, :, 1:t + 1]
         + w[None, :, 2:3] * bp[:, :, 2:t + 2])
    p = jnp.where(d > 0, d, alpha * d)
    mu = jnp.mean(p, axis=(1, 2), keepdims=True)
    var = jnp.mean((p - mu) ** 2, axis=(1, 2), keepdims=True)
    g = gln_gamma * (p - mu) * jax.lax.rsqrt(var + GLN_EPS) + gln_beta
    out = jnp.einsum('oc,nct->not', w2[:, :, 0], g) + x
    return out


def make_params(key):
    """Parameters in PyTorch-native layouts."""
    ks = jax.random.split(key, 8)
    w_dw = jax.random.normal(ks[0], (C, 1, 3), jnp.float32) * 0.3   # Conv1d(512,512,3,groups=512)
    bn_gamma = 1.0 + 0.1 * jax.random.normal(ks[1], (C,), jnp.float32)
    bn_beta = 0.1 * jax.random.normal(ks[2], (C,), jnp.float32)
    bn_mean = 0.1 * jax.random.normal(ks[3], (C,), jnp.float32)
    bn_var = jnp.abs(jax.random.normal(ks[4], (C,), jnp.float32)) + 0.5
    alpha = jnp.array(0.25, jnp.float32)                    # nn.PReLU() default
    gln_gamma = 1.0 + 0.1 * jax.random.normal(ks[5], (1, C, 1), jnp.float32)
    gln_beta = 0.1 * jax.random.normal(ks[6], (1, C, 1), jnp.float32)
    w2 = jax.random.normal(ks[7], (C, C, 1), jnp.float32) * 0.05    # Conv1d(512,512,1)
    return (w_dw, bn_gamma, bn_beta, bn_mean, bn_var,
            alpha, gln_gamma, gln_beta, w2)


if __name__ == "__main__":
    key = jax.random.PRNGKey(0)
    k_x, k_p = jax.random.split(key)
    N, T = 2, 16
    x = jax.random.normal(k_x, (N, C, T), jnp.float32)      # PyTorch NCT layout
    params = make_params(k_p)

    out = jax.block_until_ready(dsconv1d(x, params))
    assert out.shape == (N, C, T), out.shape

    ref = _reference(x, params)
    max_err = float(jnp.max(jnp.abs(out - ref)))
    # bf16 matmul inputs (f32 accumulation) -> relaxed tolerance vs f32 reference.
    assert jnp.allclose(out, ref, rtol=5e-2, atol=5e-2), max_err

    print("KERNEL_OK")
</pallas_src>

<mosaic_0001>
module attributes {stable_mosaic.version = 11 : i64} {
  func.func @_dsconv1d_kernel(%arg0: i32, %arg1: memref<1x512x16xf32, #tpu.memory_space<vmem>>, %arg2: memref<512x1xf32, #tpu.memory_space<vmem>>, %arg3: memref<512x1xf32, #tpu.memory_space<vmem>>, %arg4: memref<3x512x1xf32, #tpu.memory_space<vmem>>, %arg5: memref<1xf32, #tpu.memory_space<smem>>, %arg6: memref<512x512xbf16, #tpu.memory_space<vmem>>, %arg7: memref<512x1xf32, #tpu.memory_space<vmem>>, %arg8: memref<1x512x16xf32, #tpu.memory_space<vmem>>) attributes {dimension_semantics = [#tpu.dimension_semantics<parallel>], iteration_bounds = array<i64: 2>, scalar_prefetch = 0 : i64, scratch_operands = 0 : i64, tpu.core_type = #tpu.core_type<tc>, window_params = [{transform_indices = @transform_0, window_bounds = array<i64: 1, 512, 16>}, {pipeline_mode = #tpu.pipeline_mode<synchronous>, transform_indices = @transform_1, window_bounds = array<i64: 512, 1>}, {pipeline_mode = #tpu.pipeline_mode<synchronous>, transform_indices = @transform_2, window_bounds = array<i64: 512, 1>}, {pipeline_mode = #tpu.pipeline_mode<synchronous>, transform_indices = @transform_3, window_bounds = array<i64: 3, 512, 1>}, {transform_indices = @transform_4, window_bounds = array<i64: 1>}, {pipeline_mode = #tpu.pipeline_mode<synchronous>, transform_indices = @transform_5, window_bounds = array<i64: 512, 512>}, {pipeline_mode = #tpu.pipeline_mode<synchronous>, transform_indices = @transform_6, window_bounds = array<i64: 512, 1>}, {transform_indices = @transform_7, window_bounds = array<i64: 1, 512, 16>}]} {
    %c0 = arith.constant 0 : index
    %c0_0 = arith.constant 0 : index
    %c0_1 = arith.constant 0 : index
    %0 = vector.load %arg1[%c0, %c0_0, %c0_1] : memref<1x512x16xf32, #tpu.memory_space<vmem>>, vector<1x512x16xf32>
    %1 = vector.shape_cast %0 : vector<1x512x16xf32> to vector<512x16xf32>
    %cst = arith.constant 0.000000e+00 : f32
    %2 = vector.broadcast %cst : f32 to vector<512x16xf32>
    %3 = arith.maximumf %1, %2 : vector<512x16xf32>
    %c0_2 = arith.constant 0 : index
    %c0_3 = arith.constant 0 : index
    %4 = vector.load %arg2[%c0_2, %c0_3] : memref<512x1xf32, #tpu.memory_space<vmem>>, vector<512x1xf32>
    %5 = vector.broadcast %4 : vector<512x1xf32> to vector<512x16xf32>
    %6 = arith.mulf %3, %5 : vector<512x16xf32>
    %c0_4 = arith.constant 0 : index
    %c0_5 = arith.constant 0 : index
    %7 = vector.load %arg3[%c0_4, %c0_5] : memref<512x1xf32, #tpu.memory_space<vmem>>, vector<512x1xf32>
    %8 = vector.broadcast %7 : vector<512x1xf32> to vector<512x16xf32>
    %9 = arith.addf %6, %8 : vector<512x16xf32>
    %cst_6 = arith.constant 0.000000e+00 : f32
    %10 = vector.broadcast %cst_6 : f32 to vector<512x1xf32>
    %11 = vector.extract_strided_slice %9 {offsets = [0, 0], sizes = [512, 15], strides = [1, 1]} : vector<512x16xf32> to vector<512x15xf32>
    %12 = tpu.concatenate %10, %11 in 1 : vector<512x1xf32>, vector<512x15xf32> -> vector<512x16xf32>
    %13 = vector.extract_strided_slice %9 {offsets = [0, 1], sizes = [512, 15], strides = [1, 1]} : vector<512x16xf32> to vector<512x15xf32>
    %14 = tpu.concatenate %13, %10 in 1 : vector<512x15xf32>, vector<512x1xf32> -> vector<512x16xf32>
    %c0_7 = arith.constant 0 : index
    %c0_8 = arith.constant 0 : index
    %c0_9 = arith.constant 0 : index
    %15 = vector.load %arg4[%c0_7, %c0_8, %c0_9] : memref<3x512x1xf32, #tpu.memory_space<vmem>>, vector<1x512x1xf32>
    %16 = vector.shape_cast %15 : vector<1x512x1xf32> to vector<512x1xf32>
    %17 = vector.broadcast %16 : vector<512x1xf32> to vector<512x16xf32>
    %18 = arith.mulf %17, %12 : vector<512x16xf32>
    %c1 = arith.constant 1 : index
    %c0_10 = arith.constant 0 : index
    %c0_11 = arith.constant 0 : index
    %19 = vector.load %arg4[%c1, %c0_10, %c0_11] : memref<3x512x1xf32, #tpu.memory_space<vmem>>, vector<1x512x1xf32>
    %20 = vector.shape_cast %19 : vector<1x512x1xf32> to vector<512x1xf32>
    %21 = vector.broadcast %20 : vector<512x1xf32> to vector<512x16xf32>
    %22 = arith.mulf %21, %9 : vector<512x16xf32>
    %23 = arith.addf %18, %22 : vector<512x16xf32>
    %c2 = arith.constant 2 : index
    %c0_12 = arith.constant 0 : index
    %c0_13 = arith.constant 0 : index
    %24 = vector.load %arg4[%c2, %c0_12, %c0_13] : memref<3x512x1xf32, #tpu.memory_space<vmem>>, vector<1x512x1xf32>
    %25 = vector.shape_cast %24 : vector<1x512x1xf32> to vector<512x1xf32>
    %26 = vector.broadcast %25 : vector<512x1xf32> to vector<512x16xf32>
    %27 = arith.mulf %26, %14 : vector<512x16xf32>
    %28 = arith.addf %23, %27 : vector<512x16xf32>
    %c0_14 = arith.constant 0 : index
    %29 = memref.load %arg5[%c0_14] : memref<1xf32, #tpu.memory_space<smem>>
    %cst_15 = arith.constant 0.000000e+00 : f32
    %30 = vector.broadcast %cst_15 : f32 to vector<512x16xf32>
    %31 = arith.cmpf ogt, %28, %30 : vector<512x16xf32>
    %32 = vector.broadcast %29 : f32 to vector<512x16xf32>
    %33 = arith.mulf %32, %28 : vector<512x16xf32>
    %34 = arith.select %31, %28, %33 : vector<512x16xi1>, vector<512x16xf32>
    %35 = vector.shape_cast %34 : vector<512x16xf32> to vector<1x512x16xf32>
    %cst_16 = arith.constant dense<0.000000e+00> : vector<1xf32>
    %36 = vector.multi_reduction <add>, %35, %cst_16 [1, 2] : vector<1x512x16xf32> to vector<1xf32>
    %37 = vector.shape_cast %36 : vector<1xf32> to vector<1x1x1xf32>
    %38 = vector.extract %37[0, 0, 0] : f32 from vector<1x1x1xf32>
    %39 = vector.broadcast %38 : f32 to vector<1x1xf32>
    %40 = arith.mulf %34, %34 : vector<512x16xf32>
    %41 = vector.shape_cast %40 : vector<512x16xf32> to vector<1x512x16xf32>
    %cst_17 = arith.constant dense<0.000000e+00> : vector<1xf32>
    %42 = vector.multi_reduction <add>, %41, %cst_17 [1, 2] : vector<1x512x16xf32> to vector<1xf32>
    %43 = vector.shape_cast %42 : vector<1xf32> to vector<1x1x1xf32>
    %44 = vector.extract %43[0, 0, 0] : f32 from vector<1x1x1xf32>
    %45 = vector.broadcast %44 : f32 to vector<1x1xf32>
    %cst_18 = arith.constant 1.22070313E-4 : f32
    %46 = vector.broadcast %cst_18 : f32 to vector<1x1xf32>
    %47 = arith.mulf %39, %46 : vector<1x1xf32>
    %cst_19 = arith.constant 1.22070313E-4 : f32
    %48 = vector.broadcast %cst_19 : f32 to vector<1x1xf32>
    %49 = arith.mulf %45, %48 : vector<1x1xf32>
    %50 = arith.mulf %47, %47 : vector<1x1xf32>
    %51 = arith.subf %49, %50 : vector<1x1xf32>
    %cst_20 = arith.constant 0.000000e+00 : f32
    %52 = vector.broadcast %cst_20 : f32 to vector<1x1xf32>
    %53 = arith.maximumf %51, %52 : vector<1x1xf32>
    %54 = vector.broadcast %47 : vector<1x1xf32> to vector<512x16xf32>
    %55 = arith.subf %34, %54 : vector<512x16xf32>
    %cst_21 = arith.constant 9.99999993E-9 : f32
    %56 = vector.broadcast %cst_21 : f32 to vector<1x1xf32>
    %57 = arith.addf %53, %56 : vector<1x1xf32>
    %58 = math.rsqrt %57 : vector<1x1xf32>
    %59 = vector.broadcast %58 : vector<1x1xf32> to vector<512x16xf32>
    %60 = arith.mulf %55, %59 : vector<512x16xf32>
    %c0_22 = arith.constant 0 : index
    %c0_23 = arith.constant 0 : index
    %61 = vector.load %arg6[%c0_22, %c0_23] : memref<512x512xbf16, #tpu.memory_space<vmem>>, vector<512x512xbf16>
    %62 = arith.truncf %60 : vector<512x16xf32> to vector<512x16xbf16>
    %cst_24 = arith.constant dense<0.000000e+00> : vector<512x16xf32>
    %63 = tpu.matmul %61, %62, %cst_24 {dimension_numbers = #tpu.dot_dimension_numbers<[1], [0], [0], [1], [0, 0, 1, 1], [], []>} : vector<512x512xbf16>, vector<512x16xbf16>, vector<512x16xf32> -> vector<512x16xf32>
    %c0_25 = arith.constant 0 : index
    %c0_26 = arith.constant 0 : index
    %64 = vector.load %arg7[%c0_25, %c0_26] : memref<512x1xf32, #tpu.memory_space<vmem>>, vector<512x1xf32>
    %65 = vector.broadcast %64 : vector<512x1xf32> to vector<512x16xf32>
    %66 = arith.addf %63, %65 : vector<512x16xf32>
    %67 = arith.addf %66, %1 : vector<512x16xf32>
    %c0_27 = arith.constant 0 : index
    %c0_28 = arith.constant 0 : index
    %c0_29 = arith.constant 0 : index
    %68 = vector.load %arg8[%c0_27, %c0_28, %c0_29] : memref<1x512x16xf32, #tpu.memory_space<vmem>>, vector<1x512x16xf32>
    %69 = vector.shape_cast %68 : vector<1x512x16xf32> to vector<512x16xf32>
    %70 = vector.shape_cast %67 : vector<512x16xf32> to vector<1x512x16xf32>
    tpu.vector_store %arg8[%c0_27, %c0_28, %c0_29], %70 {strides = array<i32>} : memref<1x512x16xf32, #tpu.memory_space<vmem>>, vector<1x512x16xf32>,
    return
  }
  func.func @transform_0(%arg0: i32) -> (i32, i32, i32) {
    %c0_i32 = arith.constant 0 : i32
    %c0_i32_0 = arith.constant 0 : i32
    %c0_i32_1 = arith.constant 0 : i32
    return %arg0, %c0_i32, %c0_i32_0 : i32, i32, i32
  }
  func.func @transform_1(%arg0: i32) -> (i32, i32) {
    %c0_i32 = arith.constant 0 : i32
    %c0_i32_0 = arith.constant 0 : i32
    %c0_i32_1 = arith.constant 0 : i32
    return %c0_i32, %c0_i32_0 : i32, i32
  }
  func.func @transform_2(%arg0: i32) -> (i32, i32) {
    %c0_i32 = arith.constant 0 : i32
    %c0_i32_0 = arith.constant 0 : i32
    %c0_i32_1 = arith.constant 0 : i32
    return %c0_i32, %c0_i32_0 : i32, i32
  }
  func.func @transform_3(%arg0: i32) -> (i32, i32, i32) {
    %c0_i32 = arith.constant 0 : i32
    %c0_i32_0 = arith.constant 0 : i32
    %c0_i32_1 = arith.constant 0 : i32
    %c0_i32_2 = arith.constant 0 : i32
    return %c0_i32, %c0_i32_0, %c0_i32_1 : i32, i32, i32
  }
  func.func @transform_4(%arg0: i32) -> i32 {
    %c0_i32 = arith.constant 0 : i32
    %c0_i32_0 = arith.constant 0 : i32
    return %c0_i32 : i32
  }
  func.func @transform_5(%arg0: i32) -> (i32, i32) {
    %c0_i32 = arith.constant 0 : i32
    %c0_i32_0 = arith.constant 0 : i32
    %c0_i32_1 = arith.constant 0 : i32
    return %c0_i32, %c0_i32_0 : i32, i32
  }
  func.func @transform_6(%arg0: i32) -> (i32, i32) {
    %c0_i32 = arith.constant 0 : i32
    %c0_i32_0 = arith.constant 0 : i32
    %c0_i32_1 = arith.constant 0 : i32
    return %c0_i32, %c0_i32_0 : i32, i32
  }
  func.func @transform_7(%arg0: i32) -> (i32, i32, i32) {
    %c0_i32 = arith.constant 0 : i32
    %c0_i32_0 = arith.constant 0 : i32
    %c0_i32_1 = arith.constant 0 : i32
    return %arg0, %c0_i32, %c0_i32_0 : i32, i32, i32
  }
}

</mosaic_0001>

<bundles_post_ra>
// kernel: tpu_custom_call.1
= control target key start
LH: loop header
LB: loop body
LE: loop exit
PB: predicated region body
PF: predicated region fallthrough
CT: control target
= control target key end

     0   :  { %s6995_s26 = smov 0   ;;  %s12518_s0 = inlined_call_operand.vmem [shape: f32[2,512,16], index: 0, kind: input, shape index: {}]   ;;  %s12519_s1 = inlined_call_operand.vmem [shape: f32[512,1], index: 1, kind: input, shape index: {}]   ;;  %s12520_s2 = inlined_call_operand.vmem [shape: f32[512,1], index: 2, kind: input, shape index: {}]   ;;  %s12521_s3 = inlined_call_operand.vmem [shape: f32[3,512,1], index: 3, kind: input, shape index: {}]   ;;  %s12522_s4 = inlined_call_operand.<no memory space> [shape: f32[1], index: 4, kind: input, shape index: {}]   ;;  %s12523_s5 = inlined_call_operand.vmem [shape: bf16[512,512], index: 5, kind: input, shape index: {}]   ;;  %s12524_s6 = inlined_call_operand.vmem [shape: f32[512,1], index: 6, kind: input, shape index: {}]   ;;  %s12525_s7 = inlined_call_operand.vmem [shape: f32[2,512,16], index: 7, kind: output, shape index: {}]  }
   0x1   :  { %12 = sst [smem:[#allocation2]] %s12522_s4 }
   0x2 LB: > { %s6076_s27 = sadd.s32 4294967295, %s6947_s26   ;;  %p6080_p0 = scmp.ge.s32.totalorder %s6947_s26, 1  ;;  %s6947_s26 = sphi %s6995_s26, %s18_s26  }
   0x3   : > { %p238_p1 = scmp.lt.s32.totalorder %s6947_s26, 3 }
   0x5   : > { %p239_p2 = pnand %p6080_p0, %p238_p1 }
   0x7   : > { %242 = sbr.rel (%p239_p2) target bundleno = 2262 (0x8d6), region = 48 }
   0xc   : > { %v412_v0 = vld [vmem:[%s12519_s1 + $0x20] sm:$0xff]  ;;  %v410_v1 = vld [vmem:[%s12519_s1 + $0x10] sm:$0xff]  ;;  %v6949_v3 = vmov 0   ;;  %v413_v4 = vld [vmem:[%s12519_s1 + $0x28] sm:$0xff]  ;;  %p270_p3 = scmp.lt.s32.totalorder %s6076_s27, 1  ;;  %s6950_s22 = smov 1  }
   0xd   : > { %v408_v2 = vld [vmem:[%s12519_s1] sm:$0xff]  ;;  %6874 = vset.pattern.permute.xlu2 %v6949_v3  ;;  %6873 = vset.pattern.permute.xlu1 %v6949_v3  ;;  %v411_v5 = vld [vmem:[%s12519_s1 + $0x18] sm:$0xff]  ;;  %v409_v6 = vld [vmem:[%s12519_s1 + $0x8] sm:$0xff]  ;;  %s6951_s23 = smov 127   ;;  %vm1560_vm0 = vcmask 7168   ;;  %vm1817_vm1 = vcmask 121856  }
   0xe   : > { %6872 = vset.pattern.permute.xlu0 %v6949_v3  ;;  %494 = vperm.xlu2 %6874, %v412_v0   ;;  %v416_v7 = vld [vmem:[%s12519_s1 + $0x40] sm:$0xff]  ;;  %v415_v8 = vld [vmem:[%s12519_s1 + $0x38] sm:$0xff]  ;;  %v414_v9 = vld [vmem:[%s12519_s1 + $0x30] sm:$0xff]  ;;  %s13612_s27 = smov (!%p270_p3, %s6076_s27), 1  ;;  %s9629_s20 = sld [smem:[#allocation2]]  ;;  %vm3550_vm5 = vcmask 130048  }
   0xf   : > { %484 = vperm.xlu1 %6873, %v410_v1   ;;  %474 = vperm.xlu0 %6872, %v408_v2   ;;  %v419_v10 = vld [vmem:[%s12519_s1 + $0x58] sm:$0xff]  ;;  %v418_v11 = vld [vmem:[%s12519_s1 + $0x50] sm:$0xff]  ;;  %v417_v12 = vld [vmem:[%s12519_s1 + $0x48] sm:$0xff]  ;;  %s6727_s8 = sshll.u32 %s13612_s27, 9 }
  0x10   : > { %v422_v13 = vld [vmem:[%s12519_s1 + $0x70] sm:$0xff]  ;;  %v421_v14 = vld [vmem:[%s12519_s1 + $0x68] sm:$0xff]  ;;  %v420_v15 = vld [vmem:[%s12519_s1 + $0x60] sm:$0xff]  ;;  %s7546_s11 = scalar_lea.vmem %s12518_s0, %s6727_s8  ;;  %s11769_s25 = scalar_lea.vmem %s12525_s7, %s6727_s8 }
  0x11   : > { %v425_v16 = vld [vmem:[%s12519_s1 + $0x88] sm:$0xff]  ;;  %v424_v17 = vld [vmem:[%s12519_s1 + $0x80] sm:$0xff]  ;;  %v423_v18 = vld [vmem:[%s12519_s1 + $0x78] sm:$0xff] }
  0x12   : > { %v428_v19 = vld [vmem:[%s12519_s1 + $0xa0] sm:$0xff]  ;;  %v427_v20 = vld [vmem:[%s12519_s1 + $0x98] sm:$0xff]  ;;  %v426_v21 = vld [vmem:[%s12519_s1 + $0x90] sm:$0xff] }
  0x13   : > { %v431_v22 = vld [vmem:[%s12519_s1 + $0xb8] sm:$0xff]  ;;  %v430_v23 = vld [vmem:[%s12519_s1 + $0xb0] sm:$0xff]  ;;  %v429_v24 = vld [vmem:[%s12519_s1 + $0xa8] sm:$0xff] }
  0x14   : > { %v434_v25 = vld [vmem:[%s12519_s1 + $0xd0] sm:$0xff]  ;;  %v433_v26 = vld [vmem:[%s12519_s1 + $0xc8] sm:$0xff]  ;;  %v432_v27 = vld [vmem:[%s12519_s1 + $0xc0] sm:$0xff] }
  0x15   : > { %v437_v28 = vld [vmem:[%s12519_s1 + $0xe8] sm:$0xff]  ;;  %v436_v29 = vld [vmem:[%s12519_s1 + $0xe0] sm:$0xff]  ;;  %v435_v30 = vld [vmem:[%s12519_s1 + $0xd8] sm:$0xff] }
  0x16   : > { %499 = vperm.xlu2 %6874, %v413_v4   ;;  %v440_v31 = vld [vmem:[%s12519_s1 + $0x100] sm:$0xff]  ;;  %v439_v32 = vld [vmem:[%s12519_s1 + $0xf8] sm:$0xff]  ;;  %v438_v33 = vld [vmem:[%s12519_s1 + $0xf0] sm:$0xff] }
  0x17   : > { %489 = vperm.xlu1 %6873, %v411_v5   ;;  %479 = vperm.xlu0 %6872, %v409_v6   ;;  %v443_v34 = vld [vmem:[%s12519_s1 + $0x118] sm:$0xff]  ;;  %v442_v35 = vld [vmem:[%s12519_s1 + $0x110] sm:$0xff]  ;;  %v441_v36 = vld [vmem:[%s12519_s1 + $0x108] sm:$0xff] }
  0x18   : > { %v446_v38 = vld [vmem:[%s12519_s1 + $0x130] sm:$0xff]  ;;  %v445_v39 = vld [vmem:[%s12519_s1 + $0x128] sm:$0xff]  ;;  %v444_v40 = vld [vmem:[%s12519_s1 + $0x120] sm:$0xff] }
  0x19   : > { %v449_v42 = vld [vmem:[%s12519_s1 + $0x148] sm:$0xff]  ;;  %v448_v43 = vld [vmem:[%s12519_s1 + $0x140] sm:$0xff]  ;;  %v447_v44 = vld [vmem:[%s12519_s1 + $0x138] sm:$0xff] }
  0x1a   : > { %v452_v46 = vld [vmem:[%s12519_s1 + $0x160] sm:$0xff]  ;;  %v451_v47 = vld [vmem:[%s12519_s1 + $0x158] sm:$0xff]  ;;  %v450_v48 = vld [vmem:[%s12519_s1 + $0x150] sm:$0xff] }
  0x1b   : > { %v455_v52 = vld [vmem:[%s12519_s1 + $0x178] sm:$0xff]  ;;  %v454_v53 = vld [vmem:[%s12519_s1 + $0x170] sm:$0xff]  ;;  %v453_v54 = vld [vmem:[%s12519_s1 + $0x168] sm:$0xff] }
  0x1c   : > { %v458_v58 = vld [vmem:[%s12519_s1 + $0x190] sm:$0xff]  ;;  %v457_v59 = vld [vmem:[%s12519_s1 + $0x188] sm:$0xff]  ;;  %v456_v60 = vld [vmem:[%s12519_s1 + $0x180] sm:$0xff] }
  0x1d   : > { %v461_v0 = vld [vmem:[%s12519_s1 + $0x1a8] sm:$0xff]  ;;  %v460_v1 = vld [vmem:[%s12519_s1 + $0x1a0] sm:$0xff]  ;;  %v459_v2 = vld [vmem:[%s12519_s1 + $0x198] sm:$0xff] }
  0x1e   : > { %514 = vperm.xlu2 %6874, %v416_v7   ;;  %v464_v6 = vld [vmem:[%s12519_s1 + $0x1c0] sm:$0xff]  ;;  %v463_v7 = vld [vmem:[%s12519_s1 + $0x1b8] sm:$0xff] }
  0x1f   : > { %509 = vperm.xlu1 %6873, %v415_v8   ;;  %504 = vperm.xlu0 %6872, %v414_v9   ;;  %v462_v8 = vld [vmem:[%s12519_s1 + $0x1b0] sm:$0xff] }
  0x26   : > { %529 = vperm.xlu2 %6874, %v419_v10  }
  0x27   : > { %524 = vperm.xlu1 %6873, %v418_v11   ;;  %519 = vperm.xlu0 %6872, %v417_v12   ;;  %v467_v12 = vld [vmem:[%s12519_s1 + $0x1d8] sm:$0xff] }
  0x2e   : > { %544 = vperm.xlu2 %6874, %v422_v13   ;;  %v466_v13 = vld [vmem:[%s12519_s1 + $0x1d0] sm:$0xff] }
  0x2f   : > { %539 = vperm.xlu1 %6873, %v421_v14   ;;  %534 = vperm.xlu0 %6872, %v420_v15   ;;  %v465_v14 = vld [vmem:[%s12519_s1 + $0x1c8] sm:$0xff] }
  0x36   : > { %559 = vperm.xlu2 %6874, %v425_v16  }
  0x37   : > { %554 = vperm.xlu1 %6873, %v424_v17   ;;  %549 = vperm.xlu0 %6872, %v423_v18   ;;  %v470_v18 = vld [vmem:[%s12519_s1 + $0x1f0] sm:$0xff] }
  0x3e   : > { %574 = vperm.xlu2 %6874, %v428_v19   ;;  %v469_v19 = vld [vmem:[%s12519_s1 + $0x1e8] sm:$0xff] }
  0x3f   : > { %569 = vperm.xlu1 %6873, %v427_v20   ;;  %564 = vperm.xlu0 %6872, %v426_v21   ;;  %v468_v20 = vld [vmem:[%s12519_s1 + $0x1e0] sm:$0xff] }
  0x46   : > { %589 = vperm.xlu2 %6874, %v431_v22  }
  0x47   : > { %584 = vperm.xlu1 %6873, %v430_v23   ;;  %579 = vperm.xlu0 %6872, %v429_v24   ;;  %v857_v24 = vld [vmem:[%s12520_s2 + $0x8] sm:$0xff] }
  0x4e   : > { %604 = vperm.xlu2 %6874, %v434_v25   ;;  %v856_v25 = vld [vmem:[%s12520_s2] sm:$0xff] }
  0x4f   : > { %599 = vperm.xlu1 %6873, %v433_v26   ;;  %594 = vperm.xlu0 %6872, %v432_v27   ;;  %v471_v26 = vld [vmem:[%s12519_s1 + $0x1f8] sm:$0xff] }
  0x56   : > { %619 = vperm.xlu2 %6874, %v437_v28  }
  0x57   : > { %614 = vperm.xlu1 %6873, %v436_v29   ;;  %609 = vperm.xlu0 %6872, %v435_v30   ;;  %v860_v30 = vld [vmem:[%s12520_s2 + $0x20] sm:$0xff] }
  0x5e   : > { %634 = vperm.xlu2 %6874, %v440_v31   ;;  %v859_v31 = vld [vmem:[%s12520_s2 + $0x18] sm:$0xff] }
  0x5f   : > { %629 = vperm.xlu1 %6873, %v439_v32   ;;  %624 = vperm.xlu0 %6872, %v438_v33   ;;  %v858_v32 = vld [vmem:[%s12520_s2 + $0x10] sm:$0xff] }
  0x66   : > { %649 = vperm.xlu2 %6874, %v443_v34  }
  0x67   : > { %644 = vperm.xlu1 %6873, %v442_v35   ;;  %639 = vperm.xlu0 %6872, %v441_v36   ;;  %v863_v36 = vld [vmem:[%s12520_s2 + $0x38] sm:$0xff] }
  0x68   : > { %v7111_v37 = vpop.permute.xlu2 %494 }
  0x6e   : > { %664 = vperm.xlu2 %6874, %v446_v38   ;;  %v862_v38 = vld [vmem:[%s12520_s2 + $0x30] sm:$0xff] }
  0x6f   : > { %659 = vperm.xlu1 %6873, %v445_v39   ;;  %654 = vperm.xlu0 %6872, %v444_v40   ;;  %v861_v39 = vld [vmem:[%s12520_s2 + $0x28] sm:$0xff] }
  0x70   : > { %v7122_v41 = vpop.permute.xlu2 %499 }
  0x76   : > { %679 = vperm.xlu2 %6874, %v449_v42  }
  0x77   : > { %674 = vperm.xlu1 %6873, %v448_v43   ;;  %669 = vperm.xlu0 %6872, %v447_v44   ;;  %v866_v44 = vld [vmem:[%s12520_s2 + $0x50] sm:$0xff] }
  0x78   : > { %v7133_v45 = vpop.permute.xlu2 %514 }
  0x7e   : > { %694 = vperm.xlu2 %6874, %v452_v46   ;;  %v865_v46 = vld [vmem:[%s12520_s2 + $0x48] sm:$0xff] }
  0x7f   : > { %689 = vperm.xlu1 %6873, %v451_v47   ;;  %684 = vperm.xlu0 %6872, %v450_v48   ;;  %v864_v47 = vld [vmem:[%s12520_s2 + $0x40] sm:$0xff] }
  0x80   : > { %v7144_v49 = vpop.permute.xlu2 %529 }
  0x81   : > { %v7146_v50 = vpop.permute.xlu1 %484  ;;  %v7148_v51 = vpop.permute.xlu0 %474 }
  0x86   : > { %709 = vperm.xlu2 %6874, %v455_v52  }
  0x87   : > { %704 = vperm.xlu1 %6873, %v454_v53   ;;  %699 = vperm.xlu0 %6872, %v453_v54   ;;  %v869_v54 = vld [vmem:[%s12520_s2 + $0x68] sm:$0xff] }
  0x88   : > { %v7159_v55 = vpop.permute.xlu2 %544 }
  0x89   : > { %v7161_v56 = vpop.permute.xlu1 %489  ;;  %v7163_v57 = vpop.permute.xlu0 %479 }
  0x8e   : > { %724 = vperm.xlu2 %6874, %v458_v58   ;;  %v868_v58 = vld [vmem:[%s12520_s2 + $0x60] sm:$0xff] }
  0x8f   : > { %719 = vperm.xlu1 %6873, %v457_v59   ;;  %714 = vperm.xlu0 %6872, %v456_v60   ;;  %v867_v59 = vld [vmem:[%s12520_s2 + $0x58] sm:$0xff] }
  0x90   : > { %v7174_v61 = vpop.permute.xlu2 %559 }
  0x91   : > { %v7176_v62 = vpop.permute.xlu1 %509  ;;  %v7178_v63 = vpop.permute.xlu0 %504 }
  0x96   : > { %739 = vperm.xlu2 %6874, %v461_v0  }
  0x97   : > { %734 = vperm.xlu1 %6873, %v460_v1   ;;  %729 = vperm.xlu0 %6872, %v459_v2   ;;  %v872_v2 = vld [vmem:[%s12520_s2 + $0x80] sm:$0xff] }
  0x98   : > { %v7189_v3 = vpop.permute.xlu2 %574 }
  0x99   : > { %v7191_v4 = vpop.permute.xlu1 %524  ;;  %v7193_v5 = vpop.permute.xlu0 %519 }
  0x9e   : > { %754 = vperm.xlu2 %6874, %v464_v6   ;;  %v871_v6 = vld [vmem:[%s12520_s2 + $0x78] sm:$0xff] }
  0x9f   : > { %749 = vperm.xlu1 %6873, %v463_v7   ;;  %744 = vperm.xlu0 %6872, %v462_v8   ;;  %v870_v7 = vld [vmem:[%s12520_s2 + $0x70] sm:$0xff] }
  0xa0   : > { %v7204_v9 = vpop.permute.xlu2 %589 }
  0xa1   : > { %v7206_v10 = vpop.permute.xlu1 %539  ;;  %v7208_v11 = vpop.permute.xlu0 %534 }
  0xa6   : > { %769 = vperm.xlu2 %6874, %v467_v12  }
  0xa7   : > { %764 = vperm.xlu1 %6873, %v466_v13   ;;  %759 = vperm.xlu0 %6872, %v465_v14   ;;  %v875_v14 = vld [vmem:[%s12520_s2 + $0x98] sm:$0xff] }
  0xa8   : > { %v7219_v15 = vpop.permute.xlu2 %604 }
  0xa9   : > { %v7221_v16 = vpop.permute.xlu1 %554  ;;  %v7223_v17 = vpop.permute.xlu0 %549 }
  0xae   : > { %784 = vperm.xlu2 %6874, %v470_v18   ;;  %v874_v18 = vld [vmem:[%s12520_s2 + $0x90] sm:$0xff] }
  0xaf   : > { %779 = vperm.xlu1 %6873, %v469_v19   ;;  %774 = vperm.xlu0 %6872, %v468_v20   ;;  %v873_v19 = vld [vmem:[%s12520_s2 + $0x88] sm:$0xff] }
  0xb0   : > { %v7234_v21 = vpop.permute.xlu2 %619 }
  0xb1   : > { %12689 = vst [vmem:[#allocation3_spill] sm:$0xff] %v7234_v21  ;;  %v7236_v22 = vpop.permute.xlu1 %569  ;;  %v7238_v23 = vpop.permute.xlu0 %564  ;;  %v286_v21 = vld [vmem:[%s7546_s11 + $0x30] sm:$0xff] }
  0xb6   : > { %927 = vperm.xlu2 %6874, %v857_v24  }
  0xb7   : > { %922 = vperm.xlu1 %6873, %v856_v25   ;;  %789 = vperm.xlu0 %6872, %v471_v26   ;;  %v878_v26 = vld [vmem:[%s12520_s2 + $0xb0] sm:$0xff] }
  0xb8   : > { %v7249_v27 = vpop.permute.xlu2 %634 }
  0xb9   : > { %12690 = vst [vmem:[#allocation4_spill] sm:$0xff] %v7249_v27  ;;  %v7251_v28 = vpop.permute.xlu1 %584  ;;  %v7253_v29 = vpop.permute.xlu0 %579  ;;  %v281_v27 = vld [vmem:[%s7546_s11 + $0x8] sm:$0xff] }
  0xbe   : > { %942 = vperm.xlu2 %6874, %v860_v30   ;;  %v877_v30 = vld [vmem:[%s12520_s2 + $0xa8] sm:$0xff] }
  0xbf   : > { %937 = vperm.xlu1 %6873, %v859_v31   ;;  %932 = vperm.xlu0 %6872, %v858_v32   ;;  %v876_v31 = vld [vmem:[%s12520_s2 + $0xa0] sm:$0xff] }
  0xc0   : > { %v7264_v33 = vpop.permute.xlu2 %649 }
  0xc1   : > { %12691 = vst [vmem:[#allocation5_spill] sm:$0xff] %v7264_v33  ;;  %v7266_v34 = vpop.permute.xlu1 %599  ;;  %v7268_v35 = vpop.permute.xlu0 %594 }
  0xc6   : > { %957 = vperm.xlu2 %6874, %v863_v36  }
  0xc7   : > { %952 = vperm.xlu1 %6873, %v862_v38   ;;  %947 = vperm.xlu0 %6872, %v861_v39   ;;  %v881_v39 = vld [vmem:[%s12520_s2 + $0xc8] sm:$0xff] }
  0xc8   : > { %v7279_v40 = vpop.permute.xlu2 %664 }
  0xc9   : > { %12692 = vst [vmem:[#allocation6_spill] sm:$0xff] %v7279_v40  ;;  %v7281_v42 = vpop.permute.xlu1 %614  ;;  %v7283_v43 = vpop.permute.xlu0 %609 }
  0xca   : > { %12693 = vst [vmem:[#allocation7_spill] sm:$0xff] %v7281_v42 }
  0xce   : > { %972 = vperm.xlu2 %6874, %v866_v44   ;;  %v880_v44 = vld [vmem:[%s12520_s2 + $0xc0] sm:$0xff] }
  0xcf   : > { %967 = vperm.xlu1 %6873, %v865_v46   ;;  %962 = vperm.xlu0 %6872, %v864_v47   ;;  %v879_v46 = vld [vmem:[%s12520_s2 + $0xb8] sm:$0xff] }
  0xd0   : > { %v7294_v48 = vpop.permute.xlu2 %679 }
  0xd1   : > { %12694 = vst [vmem:[#allocation8_spill] sm:$0xff] %v7294_v48  ;;  %v7296_v52 = vpop.permute.xlu1 %629  ;;  %v7298_v53 = vpop.permute.xlu0 %624 }
  0xd2   : > { %12695 = vst [vmem:[#allocation9_spill] sm:$0xff] %v7296_v52  ;;  %v283_v52 = vld [vmem:[%s7546_s11 + $0x18] sm:$0xff] }
  0xd3   : > { %12696 = vst [vmem:[#allocation10_spill] sm:$0xff] %v7298_v53  ;;  %v284_v53 = vld [vmem:[%s7546_s11 + $0x20] sm:$0xff] }
  0xd6   : > { %987 = vperm.xlu2 %6874, %v869_v54  }
  0xd7   : > { %982 = vperm.xlu1 %6873, %v868_v58   ;;  %977 = vperm.xlu0 %6872, %v867_v59   ;;  %v884_v59 = vld [vmem:[%s12520_s2 + $0xe0] sm:$0xff] }
  0xd8   : > { %v7309_v60 = vpop.permute.xlu2 %694 }
  0xd9   : > { %12697 = vst [vmem:[#allocation11_spill] sm:$0xff] %v7309_v60  ;;  %v7311_v0 = vpop.permute.xlu1 %644  ;;  %v7313_v1 = vpop.permute.xlu0 %639 }
  0xda   : > { %12698 = vst [vmem:[#allocation12_spill] sm:$0xff] %v7311_v0 }
  0xdb   : > { %12699 = vst [vmem:[#allocation13_spill] sm:$0xff] %v7313_v1 }
  0xde   : > { %1002 = vperm.xlu2 %6874, %v872_v2   ;;  %v883_v2 = vld [vmem:[%s12520_s2 + $0xd8] sm:$0xff] }
  0xdf   : > { %997 = vperm.xlu1 %6873, %v871_v6   ;;  %992 = vperm.xlu0 %6872, %v870_v7   ;;  %v882_v6 = vld [vmem:[%s12520_s2 + $0xd0] sm:$0xff] }
  0xe0   : > { %v7324_v8 = vpop.permute.xlu2 %709 }
  0xe1   : > { %12700 = vst [vmem:[#allocation14_spill] sm:$0xff] %v7324_v8  ;;  %v7326_v12 = vpop.permute.xlu1 %659  ;;  %v7328_v13 = vpop.permute.xlu0 %654 }
  0xe2   : > { %12701 = vst [vmem:[#allocation15_spill] sm:$0xff] %v7326_v12 }
  0xe3   : > { %12702 = vst [vmem:[#allocation16_spill] sm:$0xff] %v7328_v13  ;;  %v282_v13 = vld [vmem:[%s7546_s11 + $0x10] sm:$0xff] }
  0xe6   : > { %1017 = vperm.xlu2 %6874, %v875_v14  }
  0xe7   : > { %1012 = vperm.xlu1 %6873, %v874_v18   ;;  %1007 = vperm.xlu0 %6872, %v873_v19   ;;  %v887_v19 = vld [vmem:[%s12520_s2 + $0xf8] sm:$0xff] }
  0xe8   : > { %v7339_v20 = vpop.permute.xlu2 %724 }
  0xe9   : > { %12703 = vst [vmem:[#allocation17_spill] sm:$0xff] %v7339_v20  ;;  %v7341_v24 = vpop.permute.xlu1 %674  ;;  %v7343_v25 = vpop.permute.xlu0 %669 }
  0xea   : > { %12704 = vst [vmem:[#allocation18_spill] sm:$0xff] %v7341_v24 }
  0xeb   : > { %12705 = vst [vmem:[#allocation19_spill] sm:$0xff] %v7343_v25 }
  0xee   : > { %1032 = vperm.xlu2 %6874, %v878_v26   ;;  %v886_v26 = vld [vmem:[%s12520_s2 + $0xf0] sm:$0xff] }
  0xef   : > { %1027 = vperm.xlu1 %6873, %v877_v30   ;;  %1022 = vperm.xlu0 %6872, %v876_v31   ;;  %v885_v30 = vld [vmem:[%s12520_s2 + $0xe8] sm:$0xff] }
  0xf0   : > { %v7354_v32 = vpop.permute.xlu2 %739 }
  0xf1   : > { %12706 = vst [vmem:[#allocation20_spill] sm:$0xff] %v7354_v32  ;;  %v7356_v36 = vpop.permute.xlu1 %689  ;;  %v7358_v38 = vpop.permute.xlu0 %684  ;;  %v901_v32 = vld [vmem:[%s12520_s2 + $0x168] sm:$0xff] }
  0xf2   : > { %12707 = vst [vmem:[#allocation21_spill] sm:$0xff] %v7356_v36  ;;  %v910_v36 = vld [vmem:[%s12520_s2 + $0x1b0] sm:$0xff] }
  0xf3   : > { %12708 = vst [vmem:[#allocation22_spill] sm:$0xff] %v7358_v38  ;;  %v280_v38 = vld [vmem:[%s7546_s11] sm:$0xff] }
  0xf4   : > { %v344_v12 = vmax.f32 %v280_v38, 0.0  ;;  %v919_v38 = vld [vmem:[%s12520_s2 + $0x1f8] sm:$0xff] }
  0xf6   : > { %1047 = vperm.xlu2 %6874, %v881_v39   ;;  %v792_v33 = vmul.f32 %v7148_v51, %v344_v12  ;;  %v346_v51 = vmax.f32 %v282_v13, 0.0  ;;  %v345_v12 = vmax.f32 %v281_v27, 0.0 }
  0xf7   : > { %1042 = vperm.xlu1 %6873, %v880_v44   ;;  %1037 = vperm.xlu0 %6872, %v879_v46   ;;  %v890_v46 = vld [vmem:[%s12520_s2 + $0x110] sm:$0xff] }
  0xf8   : > { %v7369_v47 = vpop.permute.xlu2 %754  ;;  %v794_v42 = vmul.f32 %v7146_v50, %v346_v51  ;;  %v348_v50 = vmax.f32 %v284_v53, 0.0  ;;  %v289_v53 = vld [vmem:[%s7546_s11 + $0x48] sm:$0xff] }
  0xf9   : > { %12709 = vst [vmem:[#allocation23_spill] sm:$0xff] %v7369_v47  ;;  %v7371_v54 = vpop.permute.xlu1 %704  ;;  %v7373_v58 = vpop.permute.xlu0 %699  ;;  %v895_v47 = vld [vmem:[%s12520_s2 + $0x138] sm:$0xff] }
  0xfa   : > { %12710 = vst [vmem:[#allocation24_spill] sm:$0xff] %v7371_v54  ;;  %v907_v54 = vld [vmem:[%s12520_s2 + $0x198] sm:$0xff] }
  0xfb   : > { %12711 = vst [vmem:[#allocation25_spill] sm:$0xff] %v7373_v58  ;;  %v914_v58 = vld [vmem:[%s12520_s2 + $0x1d0] sm:$0xff] }
  0xfe   : > { %1062 = vperm.xlu2 %6874, %v884_v59   ;;  %v889_v59 = vld [vmem:[%s12520_s2 + $0x108] sm:$0xff] }
  0xff   : > { %1057 = vperm.xlu1 %6873, %v883_v2   ;;  %1052 = vperm.xlu0 %6872, %v882_v6   ;;  %v888_v2 = vld [vmem:[%s12520_s2 + $0x100] sm:$0xff] }
 0x100   : > { %v7384_v7 = vpop.permute.xlu2 %769 }
 0x101   : > { %12712 = vst [vmem:[#allocation26_spill] sm:$0xff] %v7384_v7  ;;  %v7386_v14 = vpop.permute.xlu1 %719  ;;  %v7388_v18 = vpop.permute.xlu0 %714 }
 0x102   : > { %12713 = vst [vmem:[#allocation27_spill] sm:$0xff] %v7386_v14  ;;  %v904_v14 = vld [vmem:[%s12520_s2 + $0x180] sm:$0xff] }
 0x103   : > { %12714 = vst [vmem:[#allocation28_spill] sm:$0xff] %v7388_v18  ;;  %v911_v18 = vld [vmem:[%s12520_s2 + $0x1b8] sm:$0xff] }
 0x106   : > { %1077 = vperm.xlu2 %6874, %v887_v19  }
 0x107   : > { %1072 = vperm.xlu1 %6873, %v886_v26   ;;  %1067 = vperm.xlu0 %6872, %v885_v30   ;;  %v893_v30 = vld [vmem:[%s12520_s2 + $0x128] sm:$0xff] }
 0x108   : > { %v7399_v31 = vpop.permute.xlu2 %784 }
 0x109   : > { %12715 = vst [vmem:[#allocation29_spill] sm:$0xff] %v7399_v31  ;;  %v7401_v39 = vpop.permute.xlu1 %734  ;;  %v7403_v44 = vpop.permute.xlu0 %729  ;;  %v892_v31 = vld [vmem:[%s12520_s2 + $0x120] sm:$0xff] }
 0x10a   : > { %12716 = vst [vmem:[#allocation30_spill] sm:$0xff] %v7401_v39  ;;  %v898_v39 = vld [vmem:[%s12520_s2 + $0x150] sm:$0xff] }
 0x10b   : > { %12717 = vst [vmem:[#allocation31_spill] sm:$0xff] %v7403_v44  ;;  %v908_v44 = vld [vmem:[%s12520_s2 + $0x1a0] sm:$0xff] }
 0x10e   : > { %1092 = vperm.xlu2 %6874, %v890_v46   ;;  %v891_v46 = vld [vmem:[%s12520_s2 + $0x118] sm:$0xff] }
 0x10f   : > { %1087 = vperm.xlu1 %6873, %v889_v59   ;;  %1082 = vperm.xlu0 %6872, %v888_v2  }
 0x110   : > { %v7414_v6 = vpop.permute.xlu2 %927 }
 0x111   : > { %v7416_v19 = vpop.permute.xlu1 %749  ;;  %v7418_v26 = vpop.permute.xlu0 %744 }
 0x112   : > { %12718 = vst [vmem:[#allocation32_spill] sm:$0xff] %v7416_v19  ;;  %v896_v19 = vld [vmem:[%s12520_s2 + $0x140] sm:$0xff] }
 0x113   : > { %12719 = vst [vmem:[#allocation33_spill] sm:$0xff] %v7418_v26  ;;  %v905_v26 = vld [vmem:[%s12520_s2 + $0x188] sm:$0xff] }
 0x116   : > { %1107 = vperm.xlu2 %6874, %v893_v30   ;;  %v894_v30 = vld [vmem:[%s12520_s2 + $0x130] sm:$0xff] }
 0x117   : > { %1102 = vperm.xlu1 %6873, %v892_v31   ;;  %1097 = vperm.xlu0 %6872, %v891_v46  }
 0x118   : > { %v7429_v59 = vpop.permute.xlu2 %942 }
 0x119   : > { %v7431_v2 = vpop.permute.xlu1 %764  ;;  %v7433_v7 = vpop.permute.xlu0 %759 }
 0x11a   : > { %12720 = vst [vmem:[#allocation34_spill] sm:$0xff] %v7431_v2 }
 0x11b   : > { %12721 = vst [vmem:[#allocation35_spill] sm:$0xff] %v7433_v7  ;;  %v899_v7 = vld [vmem:[%s12520_s2 + $0x158] sm:$0xff] }
 0x11e   : > { %1122 = vperm.xlu2 %6874, %v896_v19   ;;  %v897_v19 = vld [vmem:[%s12520_s2 + $0x148] sm:$0xff] }
 0x11f   : > { %1117 = vperm.xlu1 %6873, %v895_v47   ;;  %1112 = vperm.xlu0 %6872, %v894_v30  }
 0x120   : > { %v7444_v31 = vpop.permute.xlu2 %957 }
 0x121   : > { %v7446_v46 = vpop.permute.xlu1 %779  ;;  %v7448_v2 = vpop.permute.xlu0 %774 }
 0x122   : > { %12722 = vst [vmem:[#allocation36_spill] sm:$0xff] %v7446_v46 }
 0x123   : > { %12723 = vst [vmem:[#allocation37_spill] sm:$0xff] %v7448_v2  ;;  %v902_v2 = vld [vmem:[%s12520_s2 + $0x170] sm:$0xff] }
 0x126   : > { %1137 = vperm.xlu2 %6874, %v899_v7   ;;  %v900_v7 = vld [vmem:[%s12520_s2 + $0x160] sm:$0xff] }
 0x127   : > { %1132 = vperm.xlu1 %6873, %v898_v39   ;;  %1127 = vperm.xlu0 %6872, %v897_v19  }
 0x128   : > { %v7459_v47 = vpop.permute.xlu2 %972 }
 0x129   : > { %v7461_v30 = vpop.permute.xlu1 %922  ;;  %v7463_v46 = vpop.permute.xlu0 %789 }
 0x12a   : > { %12724 = vst [vmem:[#allocation38_spill] sm:$0xff] %v7463_v46  ;;  %v7575_v1 = vadd.f32 %v7461_v30, %v792_v33 }
 0x12c   : > { %12727 = vst [vmem:[#allocation41_spill] sm:$0xff] %v7575_v1 }
 0x12e   : > { %1152 = vperm.xlu2 %6874, %v902_v2   ;;  %v903_v2 = vld [vmem:[%s12520_s2 + $0x178] sm:$0xff] }
 0x12f   : > { %1147 = vperm.xlu1 %6873, %v901_v32   ;;  %1142 = vperm.xlu0 %6872, %v900_v7  }
 0x130   : > { %v7474_v39 = vpop.permute.xlu2 %987 }
 0x131   : > { %v7476_v19 = vpop.permute.xlu1 %937  ;;  %v7478_v46 = vpop.permute.xlu0 %932 }
 0x136   : > { %1167 = vperm.xlu2 %6874, %v905_v26  }
 0x137   : > { %1162 = vperm.xlu1 %6873, %v904_v14   ;;  %1157 = vperm.xlu0 %6872, %v903_v2   ;;  %v906_v14 = vld [vmem:[%s12520_s2 + $0x190] sm:$0xff] }
 0x138   : > { %v7489_v32 = vpop.permute.xlu2 %1002 }
 0x139   : > { %v7491_v7 = vpop.permute.xlu1 %952  ;;  %v7493_v20 = vpop.permute.xlu0 %947 }
 0x13e   : > { %1182 = vperm.xlu2 %6874, %v908_v44   ;;  %v909_v44 = vld [vmem:[%s12520_s2 + $0x1a8] sm:$0xff] }
 0x13f   : > { %1177 = vperm.xlu1 %6873, %v907_v54   ;;  %1172 = vperm.xlu0 %6872, %v906_v14  }
 0x140   : > { %v7504_v26 = vpop.permute.xlu2 %1017 }
 0x141   : > { %v7506_v2 = vpop.permute.xlu1 %967  ;;  %v7508_v8 = vpop.permute.xlu0 %962 }
 0x146   : > { %1197 = vperm.xlu2 %6874, %v911_v18   ;;  %v912_v18 = vld [vmem:[%s12520_s2 + $0x1c0] sm:$0xff] }
 0x147   : > { %1192 = vperm.xlu1 %6873, %v910_v36   ;;  %1187 = vperm.xlu0 %6872, %v909_v44   ;;  %v913_v36 = vld [vmem:[%s12520_s2 + $0x1c8] sm:$0xff] }
 0x148   : > { %v7521_v54 = vpop.permute.xlu2 %1032 }
 0x149   : > { %v7527_v14 = vpop.permute.xlu1 %982  ;;  %v7529_v60 = vpop.permute.xlu0 %977 }
 0x14e   : > { %1212 = vperm.xlu2 %6874, %v914_v58   ;;  %v917_v58 = vld [vmem:[%s12520_s2 + $0x1e8] sm:$0xff] }
 0x14f   : > { %1207 = vperm.xlu1 %6873, %v913_v36   ;;  %1202 = vperm.xlu0 %6872, %v912_v18   ;;  %v916_v36 = vld [vmem:[%s12520_s2 + $0x1e0] sm:$0xff]  ;;  %v915_v18 = vld [vmem:[%s12520_s2 + $0x1d8] sm:$0xff] }
 0x150   : > { %v7548_v44 = vpop.permute.xlu2 %1047 }
 0x151   : > { %12725 = vst [vmem:[#allocation39_spill] sm:$0xff] %v7548_v44  ;;  %v7550_v24 = vpop.permute.xlu1 %997  ;;  %v7552_v48 = vpop.permute.xlu0 %992  ;;  %v285_v44 = vld [vmem:[%s7546_s11 + $0x28] sm:$0xff] }
 0x156   : > { %1227 = vperm.xlu2 %6874, %v917_v58   ;;  %v918_v58 = vld [vmem:[%s12520_s2 + $0x1f0] sm:$0xff] }
 0x157   : > { %1222 = vperm.xlu1 %6873, %v916_v36   ;;  %1217 = vperm.xlu0 %6872, %v915_v18   ;;  %v347_v36 = vmax.f32 %v283_v52, 0.0  ;;  %v793_v52 = vmul.f32 %v7163_v57, %v345_v12  ;;  %v349_v57 = vmax.f32 %v285_v44, 0.0  ;;  %v288_v44 = vld [vmem:[%s7546_s11 + $0x40] sm:$0xff] }
 0x158   : > { %v7564_v40 = vpop.permute.xlu2 %1062 }
 0x159   : > { %12726 = vst [vmem:[#allocation40_spill] sm:$0xff] %v7564_v40  ;;  %v7566_v25 = vpop.permute.xlu1 %1012  ;;  %v7568_v0 = vpop.permute.xlu0 %1007  ;;  %v795_v40 = vmul.f32 %v7161_v56, %v347_v36  ;;  %v7601_v13 = vadd.f32 %v7414_v6, %v793_v52  ;;  %v350_v56 = vmax.f32 %v286_v21, 0.0  ;;  %v796_v21 = vmul.f32 %v7111_v37, %v348_v50 }
 0x15a   : > { %v352_v37 = vmax.f32 %v288_v44, 0.0 }
 0x15b   : > { %v7598_v27 = vadd.f32 %v7476_v19, %v795_v40  ;;  %12729 = vst [vmem:[#allocation43_spill] sm:$0xff] %v7601_v13  ;;  %v7628_v51 = vadd.f32 %v7429_v59, %v796_v21  ;;  %v290_v21 = vld [vmem:[%s7546_s11 + $0x50] sm:$0xff] }
 0x15d   : > { %12728 = vst [vmem:[#allocation42_spill] sm:$0xff] %v7598_v27 }
 0x15e   : > { %1368 = vrot.lane.b32.xlu2 %v7575_v1, %s6950_s22  ;;  %12732 = vst [vmem:[#allocation46_spill] sm:$0xff] %v7628_v51 }
 0x15f   : > { %1237 = vperm.xlu1 %6873, %v919_v38   ;;  %1232 = vperm.xlu0 %6872, %v918_v58   ;;  %v7604_v38 = vadd.f32 %v7478_v46, %v794_v42  ;;  %v798_v42 = vmul.f32 %v7178_v63, %v350_v56  ;;  %v797_v46 = vmul.f32 %v7122_v41, %v349_v57  ;;  %v287_v58 = vld [vmem:[%s7546_s11 + $0x38] sm:$0xff]  ;;  %v353_v63 = vmax.f32 %v289_v53, 0.0  ;;  %v292_v57 = vld [vmem:[%s7546_s11 + $0x60] sm:$0xff] }
 0x160   : > { %v7585_v33 = vpop.permute.xlu2 %1077  ;;  %v351_v41 = vmax.f32 %v287_v58, 0.0  ;;  %v800_v56 = vmul.f32 %v7133_v45, %v352_v37 }
 0x161   : > { %v7587_v30 = vpop.permute.xlu1 %1027  ;;  %v7589_v18 = vpop.permute.xlu0 %1022  ;;  %12730 = vst [vmem:[#allocation44_spill] sm:$0xff] %v7604_v38  ;;  %v7625_v36 = vadd.f32 %v7491_v7, %v798_v42  ;;  %v7631_v12 = vadd.f32 %v7493_v20, %v797_v46  ;;  %v801_v20 = vmul.f32 %v7193_v5, %v353_v63  ;;  %v291_v42 = vld [vmem:[%s7546_s11 + $0x58] sm:$0xff]  ;;  %v356_v5 = vmax.f32 %v292_v57, 0.0 }
 0x162   : > { %v799_v50 = vmul.f32 %v7176_v62, %v351_v41  ;;  %v7658_v44 = vadd.f32 %v7508_v8, %v800_v56  ;;  %v355_v45 = vmax.f32 %v291_v42, 0.0  ;;  %v354_v62 = vmax.f32 %v290_v21, 0.0  ;;  %v295_v41 = vld [vmem:[%s7546_s11 + $0x78] sm:$0xff]  ;;  %v293_v56 = vld [vmem:[%s7546_s11 + $0x68] sm:$0xff] }
 0x163   : > { %12731 = vst [vmem:[#allocation45_spill] sm:$0xff] %v7625_v36  ;;  %v7652_v46 = vadd.f32 %v7506_v2, %v801_v20  ;;  %v804_v8 = vmul.f32 %v7208_v11, %v356_v5  ;;  %v294_v20 = vld [vmem:[%s7546_s11 + $0x70] sm:$0xff]  ;;  %v359_v11 = vmax.f32 %v295_v41, 0.0 }
 0x164   : > { %12733 = vst [vmem:[#allocation47_spill] sm:$0xff] %v7631_v12  ;;  %v7655_v53 = vadd.f32 %v7444_v31, %v799_v50  ;;  %v803_v63 = vmul.f32 %v7144_v49, %v355_v45  ;;  %v802_v37 = vmul.f32 %v7191_v4, %v354_v62  ;;  %v358_v49 = vmax.f32 %v294_v20, 0.0  ;;  %v298_v62 = vld [vmem:[%s7546_s11 + $0x90] sm:$0xff] }
 0x165   : > { %12734 = vst [vmem:[#allocation48_spill] sm:$0xff] %v7652_v46  ;;  %v7679_v50 = vadd.f32 %v7527_v14, %v804_v8  ;;  %v357_v4 = vmax.f32 %v293_v56, 0.0  ;;  %v297_v8 = vld [vmem:[%s7546_s11 + $0x88] sm:$0xff] }
 0x166   : > { %1374 = vrot.lane.b32.xlu2 %v7598_v27, %s6950_s22  ;;  %12735 = vst [vmem:[#allocation49_spill] sm:$0xff] %v7655_v53  ;;  %v7682_v57 = vadd.f32 %v7459_v47, %v802_v37  ;;  %v7685_v42 = vadd.f32 %v7529_v60, %v803_v63  ;;  %v807_v60 = vmul.f32 %v7223_v17, %v359_v11  ;;  %v296_v63 = vld [vmem:[%s7546_s11 + $0x80] sm:$0xff]  ;;  %v362_v17 = vmax.f32 %v298_v62, 0.0 }
 0x167   : > { %1372 = vrot.lane.b32.xlu1 %v7604_v38, %s6950_s22  ;;  %1370 = vrot.lane.b32.xlu0 %v7601_v13, %s6950_s22  ;;  %12736 = vst [vmem:[#allocation50_spill] sm:$0xff] %v7658_v44  ;;  %v806_v5 = vmul.f32 %v7159_v55, %v358_v49  ;;  %v805_v45 = vmul.f32 %v7206_v10, %v357_v4  ;;  %v361_v55 = vmax.f32 %v297_v8, 0.0  ;;  %v360_v10 = vmax.f32 %v296_v63, 0.0  ;;  %v301_v4 = vld [vmem:[%s7546_s11 + $0xa8] sm:$0xff] }
 0x168   : > { %v7612_v40 = vpop.permute.xlu2 %1092  ;;  %12737 = vst [vmem:[#allocation51_spill] sm:$0xff] %v7679_v50  ;;  %v7706_v37 = vadd.f32 %v7550_v24, %v807_v60  ;;  %v300_v60 = vld [vmem:[%s7546_s11 + $0xa0] sm:$0xff] }
 0x169   : > { %v7614_v6 = vpop.permute.xlu1 %1042  ;;  %v7616_v19 = vpop.permute.xlu0 %1037  ;;  %12738 = vst [vmem:[#allocation52_spill] sm:$0xff] %v7682_v57  ;;  %v7709_v41 = vadd.f32 %v7474_v39, %v805_v45  ;;  %v7712_v20 = vadd.f32 %v7552_v48, %v806_v5  ;;  %v810_v48 = vmul.f32 %v7238_v23, %v362_v17  ;;  %v809_v11 = vmul.f32 %v7174_v61, %v361_v55  ;;  %v299_v5 = vld [vmem:[%s7546_s11 + $0x98] sm:$0xff] }
 0x16a   : > { %12739 = vst [vmem:[#allocation53_spill] sm:$0xff] %v7685_v42  ;;  %v808_v49 = vmul.f32 %v7221_v16, %v360_v10  ;;  %v365_v23 = vmax.f32 %v301_v4, 0.0  ;;  %v364_v61 = vmax.f32 %v300_v60, 0.0  ;;  %v363_v16 = vmax.f32 %v299_v5, 0.0  ;;  %v304_v10 = vld [vmem:[%s7546_s11 + $0xc0] sm:$0xff] }
 0x16b   : > { %12740 = vst [vmem:[#allocation54_spill] sm:$0xff] %v7706_v37  ;;  %v7733_v45 = vadd.f32 %v7566_v25, %v810_v48  ;;  %v7739_v8 = vadd.f32 %v7568_v0, %v809_v11  ;;  %v303_v48 = vld [vmem:[%s7546_s11 + $0xb8] sm:$0xff]  ;;  %v302_v11 = vld [vmem:[%s7546_s11 + $0xb0] sm:$0xff] }
 0x16c   : > { %12741 = vst [vmem:[#allocation55_spill] sm:$0xff] %v7709_v41  ;;  %v7736_v62 = vadd.f32 %v7489_v32, %v808_v49  ;;  %v813_v0 = vmul.f32 %v7253_v29, %v365_v23  ;;  %v812_v17 = vmul.f32 %v7189_v3, %v364_v61  ;;  %v811_v55 = vmul.f32 %v7236_v22, %v363_v16  ;;  %v307_v16 = vld [vmem:[%s7546_s11 + $0xd8] sm:$0xff] }
 0x16d   : > { %12742 = vst [vmem:[#allocation56_spill] sm:$0xff] %v7712_v20  ;;  %v368_v29 = vmax.f32 %v304_v10, 0.0  ;;  %v367_v3 = vmax.f32 %v303_v48, 0.0  ;;  %v366_v22 = vmax.f32 %v302_v11, 0.0 }
 0x16e   : > { %1380 = vrot.lane.b32.xlu2 %v7625_v36, %s6950_s22  ;;  %12743 = vst [vmem:[#allocation57_spill] sm:$0xff] %v7733_v45  ;;  %v7760_v49 = vadd.f32 %v7587_v30, %v813_v0  ;;  %v7763_v4 = vadd.f32 %v7504_v26, %v811_v55  ;;  %v7766_v60 = vadd.f32 %v7589_v18, %v812_v17  ;;  %v306_v0 = vld [vmem:[%s7546_s11 + $0xd0] sm:$0xff]  ;;  %v305_v17 = vld [vmem:[%s7546_s11 + $0xc8] sm:$0xff] }
 0x16f   : > { %1378 = vrot.lane.b32.xlu1 %v7631_v12, %s6950_s22  ;;  %1376 = vrot.lane.b32.xlu0 %v7628_v51, %s6950_s22  ;;  %12744 = vst [vmem:[#allocation58_spill] sm:$0xff] %v7736_v62  ;;  %v816_v18 = vmul.f32 %v7268_v35, %v368_v29  ;;  %v815_v23 = vmul.f32 %v7204_v9, %v367_v3  ;;  %v371_v35 = vmax.f32 %v307_v16, 0.0  ;;  %v370_v9 = vmax.f32 %v306_v0, 0.0  ;;  %v12753_v16 = vld [vmem:[#allocation39_spill] sm:$0xff] }
 0x170   : > { %v7639_v7 = vpop.permute.xlu2 %1107  ;;  %12745 = vst [vmem:[#allocation59_spill] sm:$0xff] %v7739_v8  ;;  %v814_v61 = vmul.f32 %v7251_v28, %v366_v22  ;;  %v369_v28 = vmax.f32 %v305_v17, 0.0  ;;  %v310_v22 = vld [vmem:[%s7546_s11 + $0xf0] sm:$0xff] }
 0x171   : > { %v7641_v59 = vpop.permute.xlu1 %1057  ;;  %v7643_v52 = vpop.permute.xlu0 %1052  ;;  %12746 = vst [vmem:[#allocation60_spill] sm:$0xff] %v7760_v49  ;;  %v7787_v55 = vadd.f32 %v7614_v6, %v816_v18  ;;  %v7793_v48 = vadd.f32 %v7616_v19, %v815_v23  ;;  %v819_v19 = vmul.f32 %v7283_v43, %v371_v35  ;;  %v818_v29 = vmul.f32 %v7219_v15, %v370_v9  ;;  %v309_v18 = vld [vmem:[%s7546_s11 + $0xe8] sm:$0xff]  ;;  %v308_v23 = vld [vmem:[%s7546_s11 + $0xe0] sm:$0xff] }
 0x172   : > { %12747 = vst [vmem:[#allocation61_spill] sm:$0xff] %v7763_v4  ;;  %v7790_v10 = vadd.f32 %v7521_v54, %v814_v61  ;;  %v817_v3 = vmul.f32 %v7266_v34, %v369_v28  ;;  %v374_v43 = vmax.f32 %v310_v22, 0.0  ;;  %v373_v15 = vmax.f32 %v309_v18, 0.0  ;;  %v313_v18 = vld [vmem:[%s7546_s11 + $0x108] sm:$0xff] }
 0x173   : > { %12748 = vst [vmem:[#allocation62_spill] sm:$0xff] %v7766_v60  ;;  %v7814_v61 = vadd.f32 %v7641_v59, %v819_v19  ;;  %v7820_v17 = vadd.f32 %v7643_v52, %v818_v29  ;;  %v372_v34 = vmax.f32 %v308_v23, 0.0  ;;  %v12756_v52 = vld [vmem:[#allocation10_spill] sm:$0xff]  ;;  %v12757_v19 = vld [vmem:[#allocation3_spill] sm:$0xff] }
 0x174   : > { %12749 = vst [vmem:[#allocation63_spill] sm:$0xff] %v7787_v55  ;;  %v7817_v0 = vadd.f32 %v12753_v16, %v817_v3  ;;  %v822_v28 = vmul.f32 %v12756_v52, %v374_v43  ;;  %v821_v29 = vmul.f32 %v12757_v19, %v373_v15  ;;  %v12758_v3 = vld [vmem:[#allocation7_spill] sm:$0xff]  ;;  %v311_v16 = vld [vmem:[%s7546_s11 + $0xf8] sm:$0xff]  ;;  %v377_v43 = vmax.f32 %v313_v18, 0.0  ;;  %v12764_v19 = vld [vmem:[#allocation4_spill] sm:$0xff] }
 0x175   : > { %12750 = vst [vmem:[#allocation64_spill] sm:$0xff] %v7790_v10  ;;  %v820_v22 = vmul.f32 %v12758_v3, %v372_v34  ;;  %v312_v23 = vld [vmem:[%s7546_s11 + $0x100] sm:$0xff]  ;;  %v375_v34 = vmax.f32 %v311_v16, 0.0  ;;  %v12765_v3 = vld [vmem:[#allocation9_spill] sm:$0xff] }
 0x176   : > { %1386 = vrot.lane.b32.xlu2 %v7652_v46, %s6950_s22  ;;  %12751 = vst [vmem:[#allocation65_spill] sm:$0xff] %v7793_v48  ;;  %v376_v15 = vmax.f32 %v312_v23, 0.0  ;;  %v316_v18 = vld [vmem:[%s7546_s11 + $0x120] sm:$0xff]  ;;  %v315_v23 = vld [vmem:[%s7546_s11 + $0x118] sm:$0xff]  ;;  %v314_v16 = vld [vmem:[%s7546_s11 + $0x110] sm:$0xff] }
 0x177   : > { %1384 = vrot.lane.b32.xlu1 %v7658_v44, %s6950_s22  ;;  %1382 = vrot.lane.b32.xlu0 %v7655_v53, %s6950_s22  ;;  %12752 = vst [vmem:[#allocation66_spill] sm:$0xff] %v7814_v61 }
 0x178   : > { %v7666_v2 = vpop.permute.xlu2 %1122  ;;  %12754 = vst [vmem:[#allocation39_spill] sm:$0xff] %v7817_v0 }
 0x179   : > { %v7668_v31 = vpop.permute.xlu1 %1072  ;;  %v7670_v58 = vpop.permute.xlu0 %1067  ;;  %12755 = vst [vmem:[#allocation67_spill] sm:$0xff] %v7820_v17 }
 0x17e   : > { %1392 = vrot.lane.b32.xlu2 %v7679_v50, %s6950_s22 }
 0x17f   : > { %1390 = vrot.lane.b32.xlu1 %v7685_v42, %s6950_s22  ;;  %1388 = vrot.lane.b32.xlu0 %v7682_v57, %s6950_s22 }
 0x180   : > { %v7693_v14 = vpop.permute.xlu2 %1137 }
 0x181   : > { %v7695_v47 = vpop.permute.xlu1 %1087  ;;  %v7697_v21 = vpop.permute.xlu0 %1082 }
 0x186   : > { %1398 = vrot.lane.b32.xlu2 %v7706_v37, %s6950_s22 }
 0x187   : > { %1396 = vrot.lane.b32.xlu1 %v7712_v20, %s6950_s22  ;;  %1394 = vrot.lane.b32.xlu0 %v7709_v41, %s6950_s22 }
 0x188   : > { %v7720_v24 = vpop.permute.xlu2 %1152 }
 0x189   : > { %v7722_v39 = vpop.permute.xlu1 %1102  ;;  %v7724_v56 = vpop.permute.xlu0 %1097 }
 0x18e   : > { %1404 = vrot.lane.b32.xlu2 %v7733_v45, %s6950_s22 }
 0x18f   : > { %1402 = vrot.lane.b32.xlu1 %v7739_v8, %s6950_s22  ;;  %1400 = vrot.lane.b32.xlu0 %v7736_v62, %s6950_s22 }
 0x190   : > { %v7747_v25 = vpop.permute.xlu2 %1167 }
 0x191   : > { %v7749_v32 = vpop.permute.xlu1 %1117  ;;  %v7751_v63 = vpop.permute.xlu0 %1112 }
 0x196   : > { %1410 = vrot.lane.b32.xlu2 %v7760_v49, %s6950_s22 }
 0x197   : > { %1408 = vrot.lane.b32.xlu1 %v7766_v60, %s6950_s22  ;;  %1406 = vrot.lane.b32.xlu0 %v7763_v4, %s6950_s22 }
 0x198   : > { %v7774_v30 = vpop.permute.xlu2 %1182 }
 0x199   : > { %v7776_v26 = vpop.permute.xlu1 %1132  ;;  %v7778_v5 = vpop.permute.xlu0 %1127 }
 0x19e   : > { %1416 = vrot.lane.b32.xlu2 %v7787_v55, %s6950_s22  ;;  %v12760_v55 = vld [vmem:[#allocation40_spill] sm:$0xff] }
 0x19f   : > { %1414 = vrot.lane.b32.xlu1 %v7793_v48, %s6950_s22  ;;  %1412 = vrot.lane.b32.xlu0 %v7790_v10, %s6950_s22 }
 0x1a0   : > { %v7801_v6 = vpop.permute.xlu2 %1197 }
 0x1a1   : > { %v7803_v54 = vpop.permute.xlu1 %1147  ;;  %v7805_v11 = vpop.permute.xlu0 %1142 }
 0x1a6   : > { %1422 = vrot.lane.b32.xlu2 %v7814_v61, %s6950_s22  ;;  %v7841_v61 = vadd.f32 %v7668_v31, %v822_v28 }
 0x1a7   : > { %1420 = vrot.lane.b32.xlu1 %v7820_v17, %s6950_s22  ;;  %1418 = vrot.lane.b32.xlu0 %v7817_v0, %s6950_s22  ;;  %v7844_v0 = vadd.f32 %v12760_v55, %v820_v22  ;;  %v7847_v17 = vadd.f32 %v7670_v58, %v821_v29  ;;  %v12763_v58 = vld [vmem:[#allocation13_spill] sm:$0xff]  ;;  %v824_v29 = vmul.f32 %v12764_v19, %v376_v15  ;;  %v379_v15 = vmax.f32 %v315_v23, 0.0 }
 0x1a8   : > { %v7828_v59 = vpop.permute.xlu2 %1212  ;;  %12759 = vst [vmem:[#allocation10_spill] sm:$0xff] %v7841_v61  ;;  %v825_v28 = vmul.f32 %v12763_v58, %v377_v43  ;;  %v823_v22 = vmul.f32 %v12765_v3, %v375_v34  ;;  %v380_v43 = vmax.f32 %v316_v18, 0.0  ;;  %v378_v34 = vmax.f32 %v314_v16, 0.0  ;;  %v12771_v19 = vld [vmem:[#allocation5_spill] sm:$0xff]  ;;  %v12772_v3 = vld [vmem:[#allocation12_spill] sm:$0xff]  ;;  %v319_v18 = vld [vmem:[%s7546_s11 + $0x138] sm:$0xff] }
 0x1a9   : > { %v7830_v35 = vpop.permute.xlu1 %1162  ;;  %v7832_v9 = vpop.permute.xlu0 %1157  ;;  %12761 = vst [vmem:[#allocation3_spill] sm:$0xff] %v7844_v0  ;;  %v318_v23 = vld [vmem:[%s7546_s11 + $0x130] sm:$0xff]  ;;  %v317_v16 = vld [vmem:[%s7546_s11 + $0x128] sm:$0xff] }
 0x1aa   : > { %12762 = vst [vmem:[#allocation7_spill] sm:$0xff] %v7847_v17 }
 0x1ae   : > { %1428 = vrot.lane.b32.xlu2 %v7841_v61, %s6950_s22  ;;  %v7868_v61 = vadd.f32 %v7695_v47, %v825_v28 }
 0x1af   : > { %1426 = vrot.lane.b32.xlu1 %v7847_v17, %s6950_s22  ;;  %1424 = vrot.lane.b32.xlu0 %v7844_v0, %s6950_s22  ;;  %v7871_v0 = vadd.f32 %v7585_v33, %v823_v22  ;;  %v7874_v17 = vadd.f32 %v7697_v21, %v824_v29  ;;  %v12770_v21 = vld [vmem:[#allocation16_spill] sm:$0xff]  ;;  %v827_v29 = vmul.f32 %v12771_v19, %v379_v15  ;;  %v382_v15 = vmax.f32 %v318_v23, 0.0  ;;  %v12778_v19 = vld [vmem:[#allocation6_spill] sm:$0xff] }
 0x1b0   : > { %v7855_v31 = vpop.permute.xlu2 %1227  ;;  %12766 = vst [vmem:[#allocation40_spill] sm:$0xff] %v7868_v61  ;;  %v828_v28 = vmul.f32 %v12770_v21, %v380_v43  ;;  %v826_v22 = vmul.f32 %v12772_v3, %v378_v34  ;;  %v383_v43 = vmax.f32 %v319_v18, 0.0  ;;  %v381_v34 = vmax.f32 %v317_v16, 0.0  ;;  %v12779_v3 = vld [vmem:[#allocation15_spill] sm:$0xff]  ;;  %v322_v18 = vld [vmem:[%s7546_s11 + $0x150] sm:$0xff]  ;;  %v321_v23 = vld [vmem:[%s7546_s11 + $0x148] sm:$0xff] }
 0x1b1   : > { %v7857_v55 = vpop.permute.xlu1 %1177  ;;  %v7859_v52 = vpop.permute.xlu0 %1172  ;;  %12767 = vst [vmem:[#allocation13_spill] sm:$0xff] %v7871_v0  ;;  %v320_v16 = vld [vmem:[%s7546_s11 + $0x140] sm:$0xff] }
 0x1b2   : > { %12768 = vst [vmem:[#allocation4_spill] sm:$0xff] %v7874_v17 }
 0x1b6   : > { %1434 = vrot.lane.b32.xlu2 %v7868_v61, %s6950_s22  ;;  %v7895_v61 = vadd.f32 %v7722_v39, %v828_v28 }
 0x1b7   : > { %1432 = vrot.lane.b32.xlu1 %v7874_v17, %s6950_s22  ;;  %1430 = vrot.lane.b32.xlu0 %v7871_v0, %s6950_s22  ;;  %v7901_v0 = vadd.f32 %v7724_v56, %v827_v29  ;;  %v12777_v56 = vld [vmem:[#allocation19_spill] sm:$0xff]  ;;  %v830_v29 = vmul.f32 %v12778_v19, %v382_v15  ;;  %v385_v15 = vmax.f32 %v321_v23, 0.0  ;;  %v12785_v19 = vld [vmem:[#allocation8_spill] sm:$0xff] }
 0x1b8   : > { %v7882_v47 = vpop.permute.xlu2 %1368  ;;  %12773 = vst [vmem:[#allocation16_spill] sm:$0xff] %v7895_v61  ;;  %v831_v28 = vmul.f32 %v12777_v56, %v383_v43  ;;  %v386_v43 = vmax.f32 %v322_v18, 0.0  ;;  %v325_v18 = vld [vmem:[%s7546_s11 + $0x168] sm:$0xff]  ;;  %v324_v23 = vld [vmem:[%s7546_s11 + $0x160] sm:$0xff] }
 0x1b9   : > { %12769 = vst [vmem:[#allocation9_spill] sm:$0xff] %v7882_v47  ;;  %v7884_v33 = vpop.permute.xlu1 %1192  ;;  %v7886_v58 = vpop.permute.xlu0 %1187  ;;  %v7898_v47 = vadd.f32 %v7612_v40, %v826_v22  ;;  %v829_v22 = vmul.f32 %v12779_v3, %v381_v34  ;;  %v384_v34 = vmax.f32 %v320_v16, 0.0  ;;  %v12786_v3 = vld [vmem:[#allocation18_spill] sm:$0xff] }
 0x1ba   : > { %12775 = vst [vmem:[#allocation12_spill] sm:$0xff] %v7901_v0  ;;  %v323_v16 = vld [vmem:[%s7546_s11 + $0x158] sm:$0xff] }
 0x1bb   : > { %12774 = vst [vmem:[#allocation5_spill] sm:$0xff] %v7898_v47 }
 0x1be   : > { %1440 = vrot.lane.b32.xlu2 %v7895_v61, %s6950_s22  ;;  %v7922_v61 = vadd.f32 %v7749_v32, %v831_v28 }
 0x1bf   : > { %1438 = vrot.lane.b32.xlu1 %v7901_v0, %s6950_s22  ;;  %1436 = vrot.lane.b32.xlu0 %v7898_v47, %s6950_s22  ;;  %v7928_v47 = vadd.f32 %v7751_v63, %v830_v29  ;;  %v12784_v63 = vld [vmem:[#allocation22_spill] sm:$0xff]  ;;  %v833_v29 = vmul.f32 %v12785_v19, %v385_v15  ;;  %v388_v15 = vmax.f32 %v324_v23, 0.0  ;;  %v12792_v19 = vld [vmem:[#allocation11_spill] sm:$0xff] }
 0x1c0   : > { %v7909_v39 = vpop.permute.xlu2 %1374  ;;  %12780 = vst [vmem:[#allocation19_spill] sm:$0xff] %v7922_v61  ;;  %v834_v28 = vmul.f32 %v12784_v63, %v386_v43  ;;  %v389_v43 = vmax.f32 %v325_v18, 0.0  ;;  %v328_v18 = vld [vmem:[%s7546_s11 + $0x180] sm:$0xff]  ;;  %v327_v23 = vld [vmem:[%s7546_s11 + $0x178] sm:$0xff] }
 0x1c1   : > { %12776 = vst [vmem:[#allocation68_spill] sm:$0xff] %v7909_v39  ;;  %v7911_v40 = vpop.permute.xlu1 %1207  ;;  %v7913_v21 = vpop.permute.xlu0 %1202  ;;  %v7925_v39 = vadd.f32 %v7639_v7, %v829_v22  ;;  %v832_v22 = vmul.f32 %v12786_v3, %v384_v34  ;;  %v387_v34 = vmax.f32 %v323_v16, 0.0  ;;  %v12793_v3 = vld [vmem:[#allocation21_spill] sm:$0xff] }
 0x1c2   : > { %12782 = vst [vmem:[#allocation15_spill] sm:$0xff] %v7928_v47  ;;  %v326_v16 = vld [vmem:[%s7546_s11 + $0x170] sm:$0xff] }
 0x1c3   : > { %12781 = vst [vmem:[#allocation6_spill] sm:$0xff] %v7925_v39 }
 0x1c6   : > { %1446 = vrot.lane.b32.xlu2 %v7922_v61, %s6950_s22  ;;  %v7949_v61 = vadd.f32 %v7776_v26, %v834_v28 }
 0x1c7   : > { %1444 = vrot.lane.b32.xlu1 %v7928_v47, %s6950_s22  ;;  %1442 = vrot.lane.b32.xlu0 %v7925_v39, %s6950_s22  ;;  %v7955_v39 = vadd.f32 %v7778_v5, %v833_v29  ;;  %v12791_v5 = vld [vmem:[#allocation25_spill] sm:$0xff]  ;;  %v836_v29 = vmul.f32 %v12792_v19, %v388_v15  ;;  %v391_v15 = vmax.f32 %v327_v23, 0.0  ;;  %v12801_v19 = vld [vmem:[#allocation14_spill] sm:$0xff] }
 0x1c8   : > { %v7936_v32 = vpop.permute.xlu2 %1380  ;;  %12787 = vst [vmem:[#allocation22_spill] sm:$0xff] %v7949_v61  ;;  %v837_v28 = vmul.f32 %v12791_v5, %v389_v43  ;;  %v392_v43 = vmax.f32 %v328_v18, 0.0  ;;  %v331_v18 = vld [vmem:[%s7546_s11 + $0x198] sm:$0xff]  ;;  %v330_v23 = vld [vmem:[%s7546_s11 + $0x190] sm:$0xff] }
 0x1c9   : > { %12783 = vst [vmem:[#allocation69_spill] sm:$0xff] %v7936_v32  ;;  %v7938_v7 = vpop.permute.xlu1 %1222  ;;  %v7940_v56 = vpop.permute.xlu0 %1217  ;;  %v7952_v32 = vadd.f32 %v7666_v2, %v832_v22  ;;  %v835_v22 = vmul.f32 %v12793_v3, %v387_v34  ;;  %v390_v34 = vmax.f32 %v326_v16, 0.0  ;;  %v12802_v3 = vld [vmem:[#allocation24_spill] sm:$0xff] }
 0x1ca   : > { %12789 = vst [vmem:[#allocation18_spill] sm:$0xff] %v7955_v39  ;;  %v329_v16 = vld [vmem:[%s7546_s11 + $0x188] sm:$0xff] }
 0x1cb   : > { %12788 = vst [vmem:[#allocation8_spill] sm:$0xff] %v7952_v32 }
 0x1ce   : > { %1452 = vrot.lane.b32.xlu2 %v7949_v61, %s6950_s22  ;;  %v7976_v61 = vadd.f32 %v7803_v54, %v837_v28 }
 0x1cf   : > { %1450 = vrot.lane.b32.xlu1 %v7955_v39, %s6950_s22  ;;  %1448 = vrot.lane.b32.xlu0 %v7952_v32, %s6950_s22  ;;  %v7982_v32 = vadd.f32 %v7805_v11, %v836_v29  ;;  %v12800_v11 = vld [vmem:[#allocation28_spill] sm:$0xff]  ;;  %v839_v29 = vmul.f32 %v12801_v19, %v391_v15  ;;  %v394_v15 = vmax.f32 %v330_v23, 0.0  ;;  %v12810_v19 = vld [vmem:[#allocation17_spill] sm:$0xff] }
 0x1d0   : > { %v7963_v26 = vpop.permute.xlu2 %1386  ;;  %12794 = vst [vmem:[#allocation25_spill] sm:$0xff] %v7976_v61  ;;  %v840_v28 = vmul.f32 %v12800_v11, %v392_v43  ;;  %v395_v43 = vmax.f32 %v331_v18, 0.0  ;;  %v334_v18 = vld [vmem:[%s7546_s11 + $0x1b0] sm:$0xff]  ;;  %v333_v23 = vld [vmem:[%s7546_s11 + $0x1a8] sm:$0xff] }
 0x1d1   : > { %12790 = vst [vmem:[#allocation70_spill] sm:$0xff] %v7963_v26  ;;  %v7965_v2 = vpop.permute.xlu1 %1237  ;;  %v7967_v63 = vpop.permute.xlu0 %1232  ;;  %v7979_v26 = vadd.f32 %v7693_v14, %v835_v22  ;;  %v838_v22 = vmul.f32 %v12802_v3, %v390_v34  ;;  %v393_v34 = vmax.f32 %v329_v16, 0.0  ;;  %v12811_v3 = vld [vmem:[#allocation27_spill] sm:$0xff] }
 0x1d2   : > { %12796 = vst [vmem:[#allocation21_spill] sm:$0xff] %v7982_v32  ;;  %v332_v16 = vld [vmem:[%s7546_s11 + $0x1a0] sm:$0xff] }
 0x1d3   : > { %12795 = vst [vmem:[#allocation11_spill] sm:$0xff] %v7979_v26 }
 0x1d6   : > { %1458 = vrot.lane.b32.xlu2 %v7976_v61, %s6950_s22  ;;  %v8003_v61 = vadd.f32 %v7830_v35, %v840_v28 }
 0x1d7   : > { %1456 = vrot.lane.b32.xlu1 %v7982_v32, %s6950_s22  ;;  %1454 = vrot.lane.b32.xlu0 %v7979_v26, %s6950_s22 }
 0x1d8   : > { %v7990_v54 = vpop.permute.xlu2 %1392  ;;  %12803 = vst [vmem:[#allocation28_spill] sm:$0xff] %v8003_v61 }
 0x1d9   : > { %12797 = vst [vmem:[#allocation71_spill] sm:$0xff] %v7990_v54  ;;  %v7992_v14 = vpop.permute.xlu1 %1372  ;;  %v7994_v5 = vpop.permute.xlu0 %1370  ;;  %v8006_v54 = vadd.f32 %v7720_v24, %v838_v22  ;;  %v841_v22 = vmul.f32 %v12811_v3, %v393_v34  ;;  %v396_v34 = vmax.f32 %v332_v16, 0.0  ;;  %v12820_v3 = vld [vmem:[#allocation30_spill] sm:$0xff] }
 0x1da   : > { %12798 = vst [vmem:[#allocation72_spill] sm:$0xff] %v7992_v14  ;;  %v335_v16 = vld [vmem:[%s7546_s11 + $0x1b8] sm:$0xff] }
 0x1db   : > { %12799 = vst [vmem:[#allocation73_spill] sm:$0xff] %v7994_v5  ;;  %v8009_v5 = vadd.f32 %v7832_v9, %v839_v29  ;;  %v12809_v9 = vld [vmem:[#allocation31_spill] sm:$0xff]  ;;  %v842_v29 = vmul.f32 %v12810_v19, %v394_v15  ;;  %v397_v15 = vmax.f32 %v333_v23, 0.0  ;;  %v12819_v19 = vld [vmem:[#allocation20_spill] sm:$0xff] }
 0x1dc   : > { %12804 = vst [vmem:[#allocation14_spill] sm:$0xff] %v8006_v54  ;;  %v843_v28 = vmul.f32 %v12809_v9, %v395_v43  ;;  %v398_v43 = vmax.f32 %v334_v18, 0.0  ;;  %v337_v18 = vld [vmem:[%s7546_s11 + $0x1c8] sm:$0xff]  ;;  %v336_v23 = vld [vmem:[%s7546_s11 + $0x1c0] sm:$0xff] }
 0x1dd   : > { %12805 = vst [vmem:[#allocation24_spill] sm:$0xff] %v8009_v5 }
 0x1de   : > { %1464 = vrot.lane.b32.xlu2 %v8003_v61, %s6950_s22  ;;  %v8030_v14 = vadd.f32 %v7857_v55, %v843_v28 }
 0x1df   : > { %1462 = vrot.lane.b32.xlu1 %v8009_v5, %s6950_s22  ;;  %1460 = vrot.lane.b32.xlu0 %v8006_v54, %s6950_s22 }
 0x1e0   : > { %v8017_v35 = vpop.permute.xlu2 %1398  ;;  %12812 = vst [vmem:[#allocation31_spill] sm:$0xff] %v8030_v14 }
 0x1e1   : > { %12806 = vst [vmem:[#allocation74_spill] sm:$0xff] %v8017_v35  ;;  %v8019_v24 = vpop.permute.xlu1 %1378  ;;  %v8021_v11 = vpop.permute.xlu0 %1376  ;;  %v8033_v35 = vadd.f32 %v7747_v25, %v841_v22  ;;  %v844_v22 = vmul.f32 %v12820_v3, %v396_v34  ;;  %v399_v34 = vmax.f32 %v335_v16, 0.0  ;;  %v12829_v3 = vld [vmem:[#allocation32_spill] sm:$0xff]  ;;  %v338_v16 = vld [vmem:[%s7546_s11 + $0x1d0] sm:$0xff] }
 0x1e2   : > { %12807 = vst [vmem:[#allocation75_spill] sm:$0xff] %v8019_v24 }
 0x1e3   : > { %12808 = vst [vmem:[#allocation76_spill] sm:$0xff] %v8021_v11  ;;  %v8036_v11 = vadd.f32 %v7859_v52, %v842_v29  ;;  %v12818_v52 = vld [vmem:[#allocation33_spill] sm:$0xff]  ;;  %v845_v29 = vmul.f32 %v12819_v19, %v397_v15  ;;  %v400_v15 = vmax.f32 %v336_v23, 0.0  ;;  %v12828_v19 = vld [vmem:[#allocation23_spill] sm:$0xff]  ;;  %v339_v23 = vld [vmem:[%s7546_s11 + $0x1d8] sm:$0xff] }
 0x1e4   : > { %12813 = vst [vmem:[#allocation17_spill] sm:$0xff] %v8033_v35  ;;  %v846_v28 = vmul.f32 %v12818_v52, %v398_v43  ;;  %v401_v43 = vmax.f32 %v337_v18, 0.0  ;;  %v340_v18 = vld [vmem:[%s7546_s11 + $0x1e0] sm:$0xff] }
 0x1e5   : > { %12814 = vst [vmem:[#allocation27_spill] sm:$0xff] %v8036_v11 }
 0x1e6   : > { %1470 = vrot.lane.b32.xlu2 %v8030_v14, %s6950_s22  ;;  %v8057_v24 = vadd.f32 %v7884_v33, %v846_v28 }
 0x1e7   : > { %1468 = vrot.lane.b32.xlu1 %v8036_v11, %s6950_s22  ;;  %1466 = vrot.lane.b32.xlu0 %v8033_v35, %s6950_s22 }
 0x1e8   : > { %v8044_v55 = vpop.permute.xlu2 %1404  ;;  %12821 = vst [vmem:[#allocation33_spill] sm:$0xff] %v8057_v24 }
 0x1e9   : > { %12815 = vst [vmem:[#allocation77_spill] sm:$0xff] %v8044_v55  ;;  %v8046_v25 = vpop.permute.xlu1 %1384  ;;  %v8048_v9 = vpop.permute.xlu0 %1382  ;;  %v8060_v55 = vadd.f32 %v7774_v30, %v844_v22  ;;  %v847_v22 = vmul.f32 %v12829_v3, %v399_v34  ;;  %v402_v34 = vmax.f32 %v338_v16, 0.0  ;;  %v12837_v3 = vld [vmem:[#allocation34_spill] sm:$0xff]  ;;  %v341_v16 = vld [vmem:[%s7546_s11 + $0x1e8] sm:$0xff] }
 0x1ea   : > { %12816 = vst [vmem:[#allocation78_spill] sm:$0xff] %v8046_v25 }
 0x1eb   : > { %12817 = vst [vmem:[#allocation79_spill] sm:$0xff] %v8048_v9  ;;  %v8063_v9 = vadd.f32 %v7886_v58, %v845_v29  ;;  %v12827_v58 = vld [vmem:[#allocation35_spill] sm:$0xff]  ;;  %v848_v29 = vmul.f32 %v12828_v19, %v400_v15  ;;  %v403_v15 = vmax.f32 %v339_v23, 0.0  ;;  %v12836_v19 = vld [vmem:[#allocation26_spill] sm:$0xff]  ;;  %v342_v23 = vld [vmem:[%s7546_s11 + $0x1f0] sm:$0xff] }
 0x1ec   : > { %12822 = vst [vmem:[#allocation20_spill] sm:$0xff] %v8060_v55  ;;  %v849_v28 = vmul.f32 %v12827_v58, %v401_v43  ;;  %v404_v43 = vmax.f32 %v340_v18, 0.0  ;;  %v343_v18 = vld [vmem:[%s7546_s11 + $0x1f8] sm:$0xff] }
 0x1ed   : > { %12823 = vst [vmem:[#allocation30_spill] sm:$0xff] %v8063_v9 }
 0x1ee   : > { %1476 = vrot.lane.b32.xlu2 %v8057_v24, %s6950_s22  ;;  %v8084_v25 = vadd.f32 %v7911_v40, %v849_v28 }
 0x1ef   : > { %1474 = vrot.lane.b32.xlu1 %v8063_v9, %s6950_s22  ;;  %1472 = vrot.lane.b32.xlu0 %v8060_v55, %s6950_s22 }
 0x1f0   : > { %v8071_v33 = vpop.permute.xlu2 %1410  ;;  %12830 = vst [vmem:[#allocation35_spill] sm:$0xff] %v8084_v25 }
 0x1f1   : > { %12824 = vst [vmem:[#allocation80_spill] sm:$0xff] %v8071_v33  ;;  %v8073_v30 = vpop.permute.xlu1 %1390  ;;  %v8075_v52 = vpop.permute.xlu0 %1388  ;;  %v8087_v33 = vadd.f32 %v7801_v6, %v847_v22  ;;  %v850_v22 = vmul.f32 %v12837_v3, %v402_v34 }
 0x1f2   : > { %12825 = vst [vmem:[#allocation81_spill] sm:$0xff] %v8073_v30 }
 0x1f3   : > { %12826 = vst [vmem:[#allocation82_spill] sm:$0xff] %v8075_v52  ;;  %v8090_v52 = vadd.f32 %v7913_v21, %v848_v29  ;;  %v12835_v21 = vld [vmem:[#allocation37_spill] sm:$0xff]  ;;  %v851_v29 = vmul.f32 %v12836_v19, %v403_v15  ;;  %v405_v15 = vmax.f32 %v341_v16, 0.0 }
 0x1f4   : > { %12831 = vst [vmem:[#allocation23_spill] sm:$0xff] %v8087_v33  ;;  %v852_v28 = vmul.f32 %v12835_v21, %v404_v43  ;;  %v406_v43 = vmax.f32 %v342_v23, 0.0 }
 0x1f5   : > { %12832 = vst [vmem:[#allocation32_spill] sm:$0xff] %v8090_v52 }
 0x1f6   : > { %1482 = vrot.lane.b32.xlu2 %v8084_v25, %s6950_s22  ;;  %v8111_v30 = vadd.f32 %v7938_v7, %v852_v28  ;;  %v8114_v25 = vadd.f32 %v7828_v59, %v850_v22  ;;  %v12842_v28 = vld [vmem:[#allocation29_spill] sm:$0xff] }
 0x1f7   : > { %1480 = vrot.lane.b32.xlu1 %v8090_v52, %s6950_s22  ;;  %1478 = vrot.lane.b32.xlu0 %v8087_v33, %s6950_s22  ;;  %v854_v19 = vmul.f32 %v12842_v28, %v406_v43 }
 0x1f8   : > { %v8098_v40 = vpop.permute.xlu2 %1416  ;;  %12838 = vst [vmem:[#allocation37_spill] sm:$0xff] %v8111_v30 }
 0x1f9   : > { %12833 = vst [vmem:[#allocation83_spill] sm:$0xff] %v8098_v40  ;;  %v8100_v6 = vpop.permute.xlu1 %1396  ;;  %v8102_v58 = vpop.permute.xlu0 %1394  ;;  %v8117_v40 = vadd.f32 %v7940_v56, %v851_v29  ;;  %v12841_v56 = vld [vmem:[#allocation38_spill] sm:$0xff]  ;;  %v12843_v29 = vld [vmem:[#allocation36_spill] sm:$0xff]  ;;  %v8141_v23 = vadd.f32 %v7967_v63, %v854_v19 }
 0x1fa   : > { %12834 = vst [vmem:[#allocation84_spill] sm:$0xff] %v8100_v6  ;;  %v407_v6 = vmax.f32 %v343_v18, 0.0  ;;  %v853_v3 = vmul.f32 %v12843_v29, %v405_v15 }
 0x1fb   : > { %12839 = vst [vmem:[#allocation26_spill] sm:$0xff] %v8114_v25 }
 0x1fc   : > { %12840 = vst [vmem:[#allocation34_spill] sm:$0xff] %v8117_v40  ;;  %v855_v21 = vmul.f32 %v12841_v56, %v407_v6  ;;  %v8138_v18 = vadd.f32 %v7855_v31, %v853_v3 }
 0x1fd   : > { %12846 = vst [vmem:[#allocation36_spill] sm:$0xff] %v8141_v23 }
 0x1fe   : > { %1488 = vrot.lane.b32.xlu2 %v8111_v30, %s6950_s22  ;;  %v8135_v22 = vadd.f32 %v7965_v2, %v855_v21  ;;  %12845 = vst [vmem:[#allocation29_spill] sm:$0xff] %v8138_v18 }
 0x1ff   : > { %1486 = vrot.lane.b32.xlu1 %v8117_v40, %s6950_s22  ;;  %1484 = vrot.lane.b32.xlu0 %v8114_v25, %s6950_s22 }
 0x200   : > { %v8125_v7 = vpop.permute.xlu2 %1422  ;;  %12844 = vst [vmem:[#allocation38_spill] sm:$0xff] %v8135_v22 }
 0x201   : > { %v8127_v34 = vpop.permute.xlu1 %1402  ;;  %v8129_v59 = vpop.permute.xlu0 %1400 }
 0x206   : > { %1494 = vrot.lane.b32.xlu2 %v8135_v22, %s6950_s22 }
 0x207   : > { %1492 = vrot.lane.b32.xlu1 %v8141_v23, %s6950_s22  ;;  %1490 = vrot.lane.b32.xlu0 %v8138_v18, %s6950_s22 }
 0x208   : > { %v8149_v6 = vpop.permute.xlu2 %1428 }
 0x209   : > { %v8151_v16 = vpop.permute.xlu1 %1408  ;;  %v8153_v2 = vpop.permute.xlu0 %1406 }
 0x20e   : > { %1629 = vrot.lane.b32.xlu2 %v7604_v38, %s6951_s23  ;;  %v12852_v38 = vld [vmem:[#allocation3_spill] sm:$0xff] }
 0x20f   : > { %1627 = vrot.lane.b32.xlu1 %v7601_v13, %s6951_s23  ;;  %1625 = vrot.lane.b32.xlu0 %v7575_v1, %s6951_s23  ;;  %v12856_v13 = vld [vmem:[#allocation13_spill] sm:$0xff] }
 0x210   : > { %v8161_v31 = vpop.permute.xlu2 %1434 }
 0x211   : > { %v8163_v63 = vpop.permute.xlu1 %1414  ;;  %v8165_v43 = vpop.permute.xlu0 %1412 }
 0x216   : > { %1635 = vrot.lane.b32.xlu2 %v7631_v12, %s6951_s23  ;;  %v12847_v12 = vld [vmem:[#allocation67_spill] sm:$0xff] }
 0x217   : > { %1633 = vrot.lane.b32.xlu1 %v7628_v51, %s6951_s23  ;;  %1631 = vrot.lane.b32.xlu0 %v7598_v27, %s6951_s23  ;;  %v12851_v27 = vld [vmem:[#allocation7_spill] sm:$0xff] }
 0x218   : > { %v8173_v15 = vpop.permute.xlu2 %1440 }
 0x219   : > { %v8175_v56 = vpop.permute.xlu1 %1420  ;;  %v8177_v21 = vpop.permute.xlu0 %1418 }
 0x21e   : > { %1641 = vrot.lane.b32.xlu2 %v7658_v44, %s6951_s23 }
 0x21f   : > { %1639 = vrot.lane.b32.xlu1 %v7655_v53, %s6951_s23  ;;  %1637 = vrot.lane.b32.xlu0 %v7625_v36, %s6951_s23  ;;  %v12848_v36 = vld [vmem:[#allocation39_spill] sm:$0xff] }
 0x220   : > { %v8185_v28 = vpop.permute.xlu2 %1446 }
 0x221   : > { %v8187_v19 = vpop.permute.xlu1 %1426  ;;  %v8189_v29 = vpop.permute.xlu0 %1424 }
 0x226   : > { %1647 = vrot.lane.b32.xlu2 %v7685_v42, %s6951_s23 }
 0x227   : > { %1645 = vrot.lane.b32.xlu1 %v7682_v57, %s6951_s23  ;;  %1643 = vrot.lane.b32.xlu0 %v7652_v46, %s6951_s23 }
 0x228   : > { %v8197_v3 = vpop.permute.xlu2 %1452 }
 0x229   : > { %v8199_v44 = vpop.permute.xlu1 %1432  ;;  %v8201_v53 = vpop.permute.xlu0 %1430 }
 0x22e   : > { %1653 = vrot.lane.b32.xlu2 %v7712_v20, %s6951_s23 }
 0x22f   : > { %1651 = vrot.lane.b32.xlu1 %v7709_v41, %s6951_s23  ;;  %1649 = vrot.lane.b32.xlu0 %v7679_v50, %s6951_s23 }
 0x230   : > { %v8209_v42 = vpop.permute.xlu2 %1458 }
 0x231   : > { %v8211_v57 = vpop.permute.xlu1 %1438  ;;  %v8213_v46 = vpop.permute.xlu0 %1436 }
 0x236   : > { %1659 = vrot.lane.b32.xlu2 %v7739_v8, %s6951_s23 }
 0x237   : > { %1657 = vrot.lane.b32.xlu1 %v7736_v62, %s6951_s23  ;;  %1655 = vrot.lane.b32.xlu0 %v7706_v37, %s6951_s23 }
 0x238   : > { %v8221_v20 = vpop.permute.xlu2 %1464 }
 0x239   : > { %v8223_v41 = vpop.permute.xlu1 %1444  ;;  %v8225_v50 = vpop.permute.xlu0 %1442 }
 0x23e   : > { %1665 = vrot.lane.b32.xlu2 %v7766_v60, %s6951_s23 }
 0x23f   : > { %1663 = vrot.lane.b32.xlu1 %v7763_v4, %s6951_s23  ;;  %1661 = vrot.lane.b32.xlu0 %v7733_v45, %s6951_s23 }
 0x240   : > { %v8233_v8 = vpop.permute.xlu2 %1470 }
 0x241   : > { %v8235_v62 = vpop.permute.xlu1 %1450  ;;  %v8237_v37 = vpop.permute.xlu0 %1448 }
 0x246   : > { %1671 = vrot.lane.b32.xlu2 %v7793_v48, %s6951_s23  ;;  %v12849_v48 = vld [vmem:[#allocation63_spill] sm:$0xff] }
 0x247   : > { %1669 = vrot.lane.b32.xlu1 %v7790_v10, %s6951_s23  ;;  %1667 = vrot.lane.b32.xlu0 %v7760_v49, %s6951_s23 }
 0x248   : > { %v8245_v60 = vpop.permute.xlu2 %1476 }
 0x249   : > { %v8247_v4 = vpop.permute.xlu1 %1456  ;;  %v8249_v45 = vpop.permute.xlu0 %1454 }
 0x24e   : > { %1677 = vrot.lane.b32.xlu2 %v12847_v12, %s6951_s23  ;;  %v12853_v12 = vld [vmem:[#allocation66_spill] sm:$0xff] }
 0x24f   : > { %1675 = vrot.lane.b32.xlu1 %v12848_v36, %s6951_s23  ;;  %1673 = vrot.lane.b32.xlu0 %v12849_v48, %s6951_s23 }
 0x250   : > { %v8257_v51 = vpop.permute.xlu2 %1482 }
 0x251   : > { %v8259_v10 = vpop.permute.xlu1 %1462  ;;  %v8261_v49 = vpop.permute.xlu0 %1460 }
 0x252   : > { %12850 = vst [vmem:[#allocation85_spill] sm:$0xff] %v8261_v49 }
 0x256   : > { %1683 = vrot.lane.b32.xlu2 %v12851_v27, %s6951_s23  ;;  %v12857_v27 = vld [vmem:[#allocation10_spill] sm:$0xff] }
 0x257   : > { %1681 = vrot.lane.b32.xlu1 %v12852_v38, %s6951_s23  ;;  %1679 = vrot.lane.b32.xlu0 %v12853_v12, %s6951_s23 }
 0x258   : > { %v8269_v1 = vpop.permute.xlu2 %1488 }
 0x259   : > { %12854 = vst [vmem:[#allocation86_spill] sm:$0xff] %v8269_v1  ;;  %v8271_v36 = vpop.permute.xlu1 %1468  ;;  %v8273_v48 = vpop.permute.xlu0 %1466 }
 0x25a   : > { %12855 = vst [vmem:[#allocation87_spill] sm:$0xff] %v8273_v48  ;;  %v12860_v48 = vld [vmem:[#allocation5_spill] sm:$0xff] }
 0x25e   : > { %1689 = vrot.lane.b32.xlu2 %v7874_v17, %s6951_s23  ;;  %v12861_v17 = vld [vmem:[#allocation40_spill] sm:$0xff] }
 0x25f   : > { %1687 = vrot.lane.b32.xlu1 %v12856_v13, %s6951_s23  ;;  %1685 = vrot.lane.b32.xlu0 %v12857_v27, %s6951_s23 }
 0x260   : > { %v8281_v49 = vpop.permute.xlu2 %1494 }
 0x261   : > { %12858 = vst [vmem:[#allocation88_spill] sm:$0xff] %v8281_v49  ;;  %v8283_v38 = vpop.permute.xlu1 %1474  ;;  %v8285_v12 = vpop.permute.xlu0 %1472  ;;  %v12864_v49 = vld [vmem:[#allocation6_spill] sm:$0xff] }
 0x262   : > { %12859 = vst [vmem:[#allocation89_spill] sm:$0xff] %v8285_v12  ;;  %v12865_v12 = vld [vmem:[#allocation16_spill] sm:$0xff] }
 0x266   : > { %1695 = vrot.lane.b32.xlu2 %v7901_v0, %s6951_s23 }
 0x267   : > { %1693 = vrot.lane.b32.xlu1 %v12860_v48, %s6951_s23  ;;  %1691 = vrot.lane.b32.xlu0 %v12861_v17, %s6951_s23 }
 0x268   : > { %v8293_v1 = vpop.permute.xlu2 %1629 }
 0x269   : > { %v8295_v13 = vpop.permute.xlu1 %1480  ;;  %v8297_v27 = vpop.permute.xlu0 %1478 }
 0x26a   : > { %12862 = vst [vmem:[#allocation90_spill] sm:$0xff] %v8295_v13  ;;  %v12869_v13 = vld [vmem:[#allocation19_spill] sm:$0xff] }
 0x26b   : > { %12863 = vst [vmem:[#allocation91_spill] sm:$0xff] %v8297_v27  ;;  %v12868_v27 = vld [vmem:[#allocation8_spill] sm:$0xff] }
 0x26e   : > { %1701 = vrot.lane.b32.xlu2 %v7928_v47, %s6951_s23 }
 0x26f   : > { %1699 = vrot.lane.b32.xlu1 %v12864_v49, %s6951_s23  ;;  %1697 = vrot.lane.b32.xlu0 %v12865_v12, %s6951_s23 }
 0x270   : > { %v8305_v0 = vpop.permute.xlu2 %1635 }
 0x271   : > { %v8307_v48 = vpop.permute.xlu1 %1486  ;;  %v8309_v17 = vpop.permute.xlu0 %1484 }
 0x272   : > { %12866 = vst [vmem:[#allocation92_spill] sm:$0xff] %v8307_v48 }
 0x273   : > { %12867 = vst [vmem:[#allocation93_spill] sm:$0xff] %v8309_v17  ;;  %v12872_v17 = vld [vmem:[#allocation22_spill] sm:$0xff] }
 0x276   : > { %1707 = vrot.lane.b32.xlu2 %v7955_v39, %s6951_s23  ;;  %v1883_v39 = vld [vmem:[%s12521_s3 + $0x8] sm:$0xff] }
 0x277   : > { %1705 = vrot.lane.b32.xlu1 %v12868_v27, %s6951_s23  ;;  %1703 = vrot.lane.b32.xlu0 %v12869_v13, %s6951_s23 }
 0x278   : > { %v8317_v47 = vpop.permute.xlu2 %1641 }
 0x279   : > { %v8319_v49 = vpop.permute.xlu1 %1492  ;;  %v8321_v12 = vpop.permute.xlu0 %1490 }
 0x27a   : > { %12870 = vst [vmem:[#allocation94_spill] sm:$0xff] %v8319_v49 }
 0x27b   : > { %12871 = vst [vmem:[#allocation95_spill] sm:$0xff] %v8321_v12 }
 0x27e   : > { %1713 = vrot.lane.b32.xlu2 %v7982_v32, %s6951_s23  ;;  %v12873_v32 = vld [vmem:[#allocation25_spill] sm:$0xff] }
 0x27f   : > { %1711 = vrot.lane.b32.xlu1 %v7979_v26, %s6951_s23  ;;  %1709 = vrot.lane.b32.xlu0 %v12872_v17, %s6951_s23 }
 0x280   : > { %v8329_v48 = vpop.permute.xlu2 %1647 }
 0x281   : > { %v8331_v27 = vpop.permute.xlu1 %1627  ;;  %v8333_v13 = vpop.permute.xlu0 %1625 }
 0x286   : > { %1719 = vrot.lane.b32.xlu2 %v8009_v5, %s6951_s23 }
 0x287   : > { %1717 = vrot.lane.b32.xlu1 %v8006_v54, %s6951_s23  ;;  %1715 = vrot.lane.b32.xlu0 %v12873_v32, %s6951_s23 }
 0x288   : > { %v8341_v12 = vpop.permute.xlu2 %1653 }
 0x289   : > { %v8343_v49 = vpop.permute.xlu1 %1633  ;;  %v8345_v26 = vpop.permute.xlu0 %1631 }
 0x28e   : > { %1725 = vrot.lane.b32.xlu2 %v8036_v11, %s6951_s23 }
 0x28f   : > { %1723 = vrot.lane.b32.xlu1 %v8033_v35, %s6951_s23  ;;  %1721 = vrot.lane.b32.xlu0 %v8003_v61, %s6951_s23 }
 0x290   : > { %v8353_v5 = vpop.permute.xlu2 %1659 }
 0x291   : > { %v8355_v54 = vpop.permute.xlu1 %1639  ;;  %v8357_v32 = vpop.permute.xlu0 %1637 }
 0x296   : > { %1731 = vrot.lane.b32.xlu2 %v8063_v9, %s6951_s23 }
 0x297   : > { %1729 = vrot.lane.b32.xlu1 %v8060_v55, %s6951_s23  ;;  %1727 = vrot.lane.b32.xlu0 %v8030_v14, %s6951_s23 }
 0x298   : > { %v8365_v11 = vpop.permute.xlu2 %1665 }
 0x299   : > { %v8367_v35 = vpop.permute.xlu1 %1645  ;;  %v8369_v61 = vpop.permute.xlu0 %1643 }
 0x29a   : > { %12874 = vst [vmem:[#allocation96_spill] sm:$0xff] %v8369_v61  ;;  %v13040_v61 = vld [vmem:[#allocation73_spill] sm:$0xff] }
 0x29e   : > { %1737 = vrot.lane.b32.xlu2 %v8090_v52, %s6951_s23  ;;  %v12877_v52 = vld [vmem:[#allocation35_spill] sm:$0xff] }
 0x29f   : > { %1735 = vrot.lane.b32.xlu1 %v8087_v33, %s6951_s23  ;;  %1733 = vrot.lane.b32.xlu0 %v8057_v24, %s6951_s23 }
 0x2a0   : > { %v8377_v9 = vpop.permute.xlu2 %1671 }
 0x2a1   : > { %12875 = vst [vmem:[#allocation97_spill] sm:$0xff] %v8377_v9  ;;  %v8379_v55 = vpop.permute.xlu1 %1651  ;;  %v8381_v14 = vpop.permute.xlu0 %1649  ;;  %v13038_v9 = vld [vmem:[#allocation72_spill] sm:$0xff] }
 0x2a2   : > { %12876 = vst [vmem:[#allocation98_spill] sm:$0xff] %v8381_v14  ;;  %v9168_v14 = vsel %vm1560_vm0, 0.0, %v13038_v9  ;;  %v13046_v9 = vld [vmem:[#allocation74_spill] sm:$0xff] }
 0x2a6   : > { %1743 = vrot.lane.b32.xlu2 %v8117_v40, %s6951_s23 }
 0x2a7   : > { %1741 = vrot.lane.b32.xlu1 %v8114_v25, %s6951_s23  ;;  %1739 = vrot.lane.b32.xlu0 %v12877_v52, %s6951_s23 }
 0x2a8   : > { %v8389_v17 = vpop.permute.xlu2 %1677 }
 0x2a9   : > { %12878 = vst [vmem:[#allocation99_spill] sm:$0xff] %v8389_v17  ;;  %v8391_v33 = vpop.permute.xlu1 %1657  ;;  %v8393_v24 = vpop.permute.xlu0 %1655 }
 0x2aa   : > { %12879 = vst [vmem:[#allocation100_spill] sm:$0xff] %v8391_v33 }
 0x2ab   : > { %12880 = vst [vmem:[#allocation101_spill] sm:$0xff] %v8393_v24  ;;  %v13036_v24 = vld [vmem:[#allocation70_spill] sm:$0xff] }
 0x2ac   : > { %v9164_v33 = vsel %vm1560_vm0, 0.0, %v13036_v24  ;;  %13039 = vst [vmem:[#allocation70_spill] sm:$0xff] %v9168_v14  ;;  %v13045_v24 = vld [vmem:[#allocation76_spill] sm:$0xff] }
 0x2ae   : > { %1749 = vrot.lane.b32.xlu2 %v8141_v23, %s6951_s23  ;;  %v1882_v23 = vld [vmem:[%s12521_s3] sm:$0xff] }
 0x2af   : > { %1747 = vrot.lane.b32.xlu1 %v8138_v18, %s6951_s23  ;;  %1745 = vrot.lane.b32.xlu0 %v8111_v30, %s6951_s23 }
 0x2b0   : > { %v8401_v40 = vpop.permute.xlu2 %1683 }
 0x2b1   : > { %12881 = vst [vmem:[#allocation102_spill] sm:$0xff] %v8401_v40  ;;  %v8403_v25 = vpop.permute.xlu1 %1663  ;;  %v8405_v52 = vpop.permute.xlu0 %1661  ;;  %v1885_v40 = vld [vmem:[%s12521_s3 + $0x18] sm:$0xff] }
 0x2b2   : > { %12882 = vst [vmem:[#allocation103_spill] sm:$0xff] %v8403_v25 }
 0x2b3   : > { %12883 = vst [vmem:[#allocation104_spill] sm:$0xff] %v8405_v52  ;;  %v1886_v52 = vld [vmem:[%s12521_s3 + $0x20] sm:$0xff] }
 0x2b6   : > { %1953 = vperm.xlu2 %6874, %v1883_v39   ;;  %v1884_v39 = vld [vmem:[%s12521_s3 + $0x10] sm:$0xff] }
 0x2b7   : > { %1948 = vperm.xlu1 %6873, %v1882_v23   ;;  %1751 = vrot.lane.b32.xlu0 %v8135_v22, %s6951_s23 }
 0x2b8   : > { %v8415_v18 = vpop.permute.xlu2 %1689 }
 0x2b9   : > { %12884 = vst [vmem:[#allocation105_spill] sm:$0xff] %v8415_v18  ;;  %v8417_v30 = vpop.permute.xlu1 %1669  ;;  %v8419_v25 = vpop.permute.xlu0 %1667  ;;  %v1889_v18 = vld [vmem:[%s12521_s3 + $0x38] sm:$0xff] }
 0x2ba   : > { %12885 = vst [vmem:[#allocation106_spill] sm:$0xff] %v8417_v30  ;;  %v1888_v30 = vld [vmem:[%s12521_s3 + $0x30] sm:$0xff] }
 0x2bb   : > { %12886 = vst [vmem:[#allocation107_spill] sm:$0xff] %v8419_v25 }
 0x2be   : > { %1968 = vperm.xlu2 %6874, %v1886_v52   ;;  %v1887_v52 = vld [vmem:[%s12521_s3 + $0x28] sm:$0xff] }
 0x2bf   : > { %1963 = vperm.xlu1 %6873, %v1885_v40   ;;  %1958 = vperm.xlu0 %6872, %v1884_v39  }
 0x2c0   : > { %v8430_v23 = vpop.permute.xlu2 %1695 }
 0x2c1   : > { %12887 = vst [vmem:[#allocation108_spill] sm:$0xff] %v8430_v23  ;;  %v8432_v22 = vpop.permute.xlu1 %1675  ;;  %v8434_v25 = vpop.permute.xlu0 %1673 }
 0x2c2   : > { %12888 = vst [vmem:[#allocation109_spill] sm:$0xff] %v8432_v22  ;;  %v1891_v22 = vld [vmem:[%s12521_s3 + $0x48] sm:$0xff] }
 0x2c3   : > { %12889 = vst [vmem:[#allocation110_spill] sm:$0xff] %v8434_v25  ;;  %v1892_v25 = vld [vmem:[%s12521_s3 + $0x50] sm:$0xff] }
 0x2c6   : > { %1983 = vperm.xlu2 %6874, %v1889_v18   ;;  %v1890_v18 = vld [vmem:[%s12521_s3 + $0x40] sm:$0xff] }
 0x2c7   : > { %1978 = vperm.xlu1 %6873, %v1888_v30   ;;  %1973 = vperm.xlu0 %6872, %v1887_v52  }
 0x2c8   : > { %v8445_v40 = vpop.permute.xlu2 %1701 }
 0x2c9   : > { %12890 = vst [vmem:[#allocation111_spill] sm:$0xff] %v8445_v40  ;;  %v8447_v39 = vpop.permute.xlu1 %1681  ;;  %v8449_v23 = vpop.permute.xlu0 %1679 }
 0x2ca   : > { %12891 = vst [vmem:[#allocation112_spill] sm:$0xff] %v8447_v39  ;;  %v1895_v39 = vld [vmem:[%s12521_s3 + $0x68] sm:$0xff] }
 0x2cb   : > { %12892 = vst [vmem:[#allocation113_spill] sm:$0xff] %v8449_v23  ;;  %v1894_v23 = vld [vmem:[%s12521_s3 + $0x60] sm:$0xff] }
 0x2ce   : > { %1998 = vperm.xlu2 %6874, %v1892_v25   ;;  %v1893_v25 = vld [vmem:[%s12521_s3 + $0x58] sm:$0xff] }
 0x2cf   : > { %1993 = vperm.xlu1 %6873, %v1891_v22   ;;  %1988 = vperm.xlu0 %6872, %v1890_v18  }
 0x2d0   : > { %v8460_v30 = vpop.permute.xlu2 %1707 }
 0x2d1   : > { %12893 = vst [vmem:[#allocation114_spill] sm:$0xff] %v8460_v30  ;;  %v8462_v52 = vpop.permute.xlu1 %1687  ;;  %v8464_v40 = vpop.permute.xlu0 %1685  ;;  %v1897_v30 = vld [vmem:[%s12521_s3 + $0x78] sm:$0xff] }
 0x2d2   : > { %12894 = vst [vmem:[#allocation115_spill] sm:$0xff] %v8462_v52 }
 0x2d3   : > { %12895 = vst [vmem:[#allocation116_spill] sm:$0xff] %v8464_v40  ;;  %v1898_v40 = vld [vmem:[%s12521_s3 + $0x80] sm:$0xff] }
 0x2d6   : > { %2013 = vperm.xlu2 %6874, %v1895_v39   ;;  %v1896_v39 = vld [vmem:[%s12521_s3 + $0x70] sm:$0xff] }
 0x2d7   : > { %2008 = vperm.xlu1 %6873, %v1894_v23   ;;  %2003 = vperm.xlu0 %6872, %v1893_v25  }
 0x2d8   : > { %v8475_v22 = vpop.permute.xlu2 %1713 }
 0x2d9   : > { %12896 = vst [vmem:[#allocation117_spill] sm:$0xff] %v8475_v22  ;;  %v8477_v18 = vpop.permute.xlu1 %1693  ;;  %v8479_v52 = vpop.permute.xlu0 %1691 }
 0x2da   : > { %12897 = vst [vmem:[#allocation118_spill] sm:$0xff] %v8477_v18  ;;  %v1901_v18 = vld [vmem:[%s12521_s3 + $0x98] sm:$0xff] }
 0x2db   : > { %12898 = vst [vmem:[#allocation119_spill] sm:$0xff] %v8479_v52  ;;  %v1900_v52 = vld [vmem:[%s12521_s3 + $0x90] sm:$0xff] }
 0x2de   : > { %2028 = vperm.xlu2 %6874, %v1898_v40   ;;  %v1899_v40 = vld [vmem:[%s12521_s3 + $0x88] sm:$0xff] }
 0x2df   : > { %2023 = vperm.xlu1 %6873, %v1897_v30   ;;  %2018 = vperm.xlu0 %6872, %v1896_v39  }
 0x2e0   : > { %v8490_v23 = vpop.permute.xlu2 %1719 }
 0x2e1   : > { %12899 = vst [vmem:[#allocation120_spill] sm:$0xff] %v8490_v23  ;;  %v8492_v25 = vpop.permute.xlu1 %1699  ;;  %v8494_v22 = vpop.permute.xlu0 %1697 }
 0x2e2   : > { %12900 = vst [vmem:[#allocation121_spill] sm:$0xff] %v8492_v25  ;;  %v1904_v25 = vld [vmem:[%s12521_s3 + $0xb0] sm:$0xff] }
 0x2e3   : > { %12901 = vst [vmem:[#allocation122_spill] sm:$0xff] %v8494_v22  ;;  %v1903_v22 = vld [vmem:[%s12521_s3 + $0xa8] sm:$0xff] }
 0x2e6   : > { %2043 = vperm.xlu2 %6874, %v1901_v18   ;;  %v1902_v18 = vld [vmem:[%s12521_s3 + $0xa0] sm:$0xff] }
 0x2e7   : > { %2038 = vperm.xlu1 %6873, %v1900_v52   ;;  %2033 = vperm.xlu0 %6872, %v1899_v40  }
 0x2e8   : > { %v8505_v30 = vpop.permute.xlu2 %1725 }
 0x2e9   : > { %12902 = vst [vmem:[#allocation123_spill] sm:$0xff] %v8505_v30  ;;  %v8507_v39 = vpop.permute.xlu1 %1705  ;;  %v8509_v23 = vpop.permute.xlu0 %1703 }
 0x2ea   : > { %12903 = vst [vmem:[#allocation124_spill] sm:$0xff] %v8507_v39  ;;  %v1907_v39 = vld [vmem:[%s12521_s3 + $0xc8] sm:$0xff] }
 0x2eb   : > { %12904 = vst [vmem:[#allocation125_spill] sm:$0xff] %v8509_v23  ;;  %v1906_v23 = vld [vmem:[%s12521_s3 + $0xc0] sm:$0xff] }
 0x2ee   : > { %2058 = vperm.xlu2 %6874, %v1904_v25   ;;  %v1905_v25 = vld [vmem:[%s12521_s3 + $0xb8] sm:$0xff] }
 0x2ef   : > { %2053 = vperm.xlu1 %6873, %v1903_v22   ;;  %2048 = vperm.xlu0 %6872, %v1902_v18  }
 0x2f0   : > { %v8520_v52 = vpop.permute.xlu2 %1731 }
 0x2f1   : > { %12905 = vst [vmem:[#allocation126_spill] sm:$0xff] %v8520_v52  ;;  %v8522_v40 = vpop.permute.xlu1 %1711  ;;  %v8524_v30 = vpop.permute.xlu0 %1709 }
 0x2f2   : > { %12906 = vst [vmem:[#allocation127_spill] sm:$0xff] %v8522_v40  ;;  %v1910_v40 = vld [vmem:[%s12521_s3 + $0xe0] sm:$0xff] }
 0x2f3   : > { %12907 = vst [vmem:[#allocation128_spill] sm:$0xff] %v8524_v30  ;;  %v1909_v30 = vld [vmem:[%s12521_s3 + $0xd8] sm:$0xff] }
 0x2f6   : > { %2073 = vperm.xlu2 %6874, %v1907_v39   ;;  %v1908_v39 = vld [vmem:[%s12521_s3 + $0xd0] sm:$0xff] }
 0x2f7   : > { %2068 = vperm.xlu1 %6873, %v1906_v23   ;;  %2063 = vperm.xlu0 %6872, %v1905_v25  }
 0x2f8   : > { %v8535_v22 = vpop.permute.xlu2 %1737 }
 0x2f9   : > { %12908 = vst [vmem:[#allocation129_spill] sm:$0xff] %v8535_v22  ;;  %v8537_v18 = vpop.permute.xlu1 %1717  ;;  %v8539_v52 = vpop.permute.xlu0 %1715  ;;  %v1913_v22 = vld [vmem:[%s12521_s3 + $0xf8] sm:$0xff] }
 0x2fa   : > { %12909 = vst [vmem:[#allocation130_spill] sm:$0xff] %v8537_v18 }
 0x2fb   : > { %12910 = vst [vmem:[#allocation131_spill] sm:$0xff] %v8539_v52  ;;  %v1912_v52 = vld [vmem:[%s12521_s3 + $0xf0] sm:$0xff] }
 0x2fe   : > { %2088 = vperm.xlu2 %6874, %v1910_v40   ;;  %v1911_v40 = vld [vmem:[%s12521_s3 + $0xe8] sm:$0xff] }
 0x2ff   : > { %2083 = vperm.xlu1 %6873, %v1909_v30   ;;  %2078 = vperm.xlu0 %6872, %v1908_v39  }
 0x300   : > { %v8550_v23 = vpop.permute.xlu2 %1743 }
 0x301   : > { %12911 = vst [vmem:[#allocation132_spill] sm:$0xff] %v8550_v23  ;;  %v8552_v25 = vpop.permute.xlu1 %1723  ;;  %v8554_v18 = vpop.permute.xlu0 %1721  ;;  %v1915_v23 = vld [vmem:[%s12521_s3 + $0x108] sm:$0xff] }
 0x302   : > { %12912 = vst [vmem:[#allocation133_spill] sm:$0xff] %v8552_v25 }
 0x303   : > { %12913 = vst [vmem:[#allocation134_spill] sm:$0xff] %v8554_v18  ;;  %v1916_v18 = vld [vmem:[%s12521_s3 + $0x110] sm:$0xff] }
 0x306   : > { %2103 = vperm.xlu2 %6874, %v1913_v22   ;;  %v1914_v22 = vld [vmem:[%s12521_s3 + $0x100] sm:$0xff] }
 0x307   : > { %2098 = vperm.xlu1 %6873, %v1912_v52   ;;  %2093 = vperm.xlu0 %6872, %v1911_v40  }
 0x308   : > { %v8565_v30 = vpop.permute.xlu2 %1749 }
 0x309   : > { %12914 = vst [vmem:[#allocation135_spill] sm:$0xff] %v8565_v30  ;;  %v8567_v39 = vpop.permute.xlu1 %1729  ;;  %v8569_v25 = vpop.permute.xlu0 %1727  ;;  %v1918_v30 = vld [vmem:[%s12521_s3 + $0x120] sm:$0xff] }
 0x30a   : > { %12915 = vst [vmem:[#allocation136_spill] sm:$0xff] %v8567_v39 }
 0x30b   : > { %12916 = vst [vmem:[#allocation137_spill] sm:$0xff] %v8569_v25  ;;  %v1919_v25 = vld [vmem:[%s12521_s3 + $0x128] sm:$0xff] }
 0x30e   : > { %2118 = vperm.xlu2 %6874, %v1916_v18   ;;  %v1917_v18 = vld [vmem:[%s12521_s3 + $0x118] sm:$0xff] }
 0x30f   : > { %2113 = vperm.xlu1 %6873, %v1915_v23   ;;  %2108 = vperm.xlu0 %6872, %v1914_v22  }
 0x310   : > { %v8580_v52 = vpop.permute.xlu2 %1953 }
 0x311   : > { %12917 = vst [vmem:[#allocation138_spill] sm:$0xff] %v8580_v52  ;;  %v8582_v40 = vpop.permute.xlu1 %1735  ;;  %v8584_v39 = vpop.permute.xlu0 %1733  ;;  %v1921_v52 = vld [vmem:[%s12521_s3 + $0x138] sm:$0xff] }
 0x312   : > { %12918 = vst [vmem:[#allocation139_spill] sm:$0xff] %v8582_v40 }
 0x313   : > { %12919 = vst [vmem:[#allocation140_spill] sm:$0xff] %v8584_v39  ;;  %v1922_v39 = vld [vmem:[%s12521_s3 + $0x140] sm:$0xff] }
 0x316   : > { %2133 = vperm.xlu2 %6874, %v1919_v25   ;;  %v1920_v25 = vld [vmem:[%s12521_s3 + $0x130] sm:$0xff] }
 0x317   : > { %2128 = vperm.xlu1 %6873, %v1918_v30   ;;  %2123 = vperm.xlu0 %6872, %v1917_v18  }
 0x318   : > { %v8595_v23 = vpop.permute.xlu2 %1968 }
 0x319   : > { %12920 = vst [vmem:[#allocation141_spill] sm:$0xff] %v8595_v23  ;;  %v8597_v22 = vpop.permute.xlu1 %1741  ;;  %v8599_v40 = vpop.permute.xlu0 %1739  ;;  %v1924_v23 = vld [vmem:[%s12521_s3 + $0x150] sm:$0xff] }
 0x31a   : > { %12921 = vst [vmem:[#allocation142_spill] sm:$0xff] %v8597_v22 }
 0x31b   : > { %12922 = vst [vmem:[#allocation143_spill] sm:$0xff] %v8599_v40  ;;  %v1925_v40 = vld [vmem:[%s12521_s3 + $0x158] sm:$0xff] }
 0x31e   : > { %2148 = vperm.xlu2 %6874, %v1922_v39   ;;  %v1923_v39 = vld [vmem:[%s12521_s3 + $0x148] sm:$0xff] }
 0x31f   : > { %2143 = vperm.xlu1 %6873, %v1921_v52   ;;  %2138 = vperm.xlu0 %6872, %v1920_v25  }
 0x320   : > { %v8610_v30 = vpop.permute.xlu2 %1983 }
 0x321   : > { %12923 = vst [vmem:[#allocation144_spill] sm:$0xff] %v8610_v30  ;;  %v8612_v18 = vpop.permute.xlu1 %1747  ;;  %v8614_v22 = vpop.permute.xlu0 %1745  ;;  %v1927_v30 = vld [vmem:[%s12521_s3 + $0x168] sm:$0xff] }
 0x322   : > { %12924 = vst [vmem:[#allocation145_spill] sm:$0xff] %v8612_v18 }
 0x323   : > { %12925 = vst [vmem:[#allocation146_spill] sm:$0xff] %v8614_v22  ;;  %v1928_v22 = vld [vmem:[%s12521_s3 + $0x170] sm:$0xff] }
 0x326   : > { %2163 = vperm.xlu2 %6874, %v1925_v40   ;;  %v1926_v40 = vld [vmem:[%s12521_s3 + $0x160] sm:$0xff] }
 0x327   : > { %2158 = vperm.xlu1 %6873, %v1924_v23   ;;  %2153 = vperm.xlu0 %6872, %v1923_v39  }
 0x328   : > { %v8625_v52 = vpop.permute.xlu2 %1998 }
 0x329   : > { %12926 = vst [vmem:[#allocation147_spill] sm:$0xff] %v8625_v52  ;;  %v8627_v25 = vpop.permute.xlu1 %1948  ;;  %v8629_v18 = vpop.permute.xlu0 %1751  ;;  %v1930_v52 = vld [vmem:[%s12521_s3 + $0x180] sm:$0xff] }
 0x32a   : > { %12927 = vst [vmem:[#allocation148_spill] sm:$0xff] %v8627_v25  ;;  %v1931_v25 = vld [vmem:[%s12521_s3 + $0x188] sm:$0xff] }
 0x32b   : > { %12928 = vst [vmem:[#allocation149_spill] sm:$0xff] %v8629_v18 }
 0x32e   : > { %2178 = vperm.xlu2 %6874, %v1928_v22   ;;  %v1929_v22 = vld [vmem:[%s12521_s3 + $0x178] sm:$0xff] }
 0x32f   : > { %2173 = vperm.xlu1 %6873, %v1927_v30   ;;  %2168 = vperm.xlu0 %6872, %v1926_v40  }
 0x330   : > { %v8640_v23 = vpop.permute.xlu2 %2013 }
 0x331   : > { %12929 = vst [vmem:[#allocation150_spill] sm:$0xff] %v8640_v23  ;;  %v8642_v39 = vpop.permute.xlu1 %1963  ;;  %v8644_v18 = vpop.permute.xlu0 %1958  ;;  %v1934_v23 = vld [vmem:[%s12521_s3 + $0x1a0] sm:$0xff] }
 0x332   : > { %12930 = vst [vmem:[#allocation151_spill] sm:$0xff] %v8642_v39  ;;  %v1933_v39 = vld [vmem:[%s12521_s3 + $0x198] sm:$0xff] }
 0x333   : > { %12931 = vst [vmem:[#allocation152_spill] sm:$0xff] %v8644_v18 }
 0x336   : > { %2193 = vperm.xlu2 %6874, %v1931_v25   ;;  %v1932_v25 = vld [vmem:[%s12521_s3 + $0x190] sm:$0xff] }
 0x337   : > { %2188 = vperm.xlu1 %6873, %v1930_v52   ;;  %2183 = vperm.xlu0 %6872, %v1929_v22  }
 0x338   : > { %v8655_v30 = vpop.permute.xlu2 %2028 }
 0x339   : > { %12932 = vst [vmem:[#allocation153_spill] sm:$0xff] %v8655_v30  ;;  %v8657_v40 = vpop.permute.xlu1 %1978  ;;  %v8659_v18 = vpop.permute.xlu0 %1973  ;;  %v1937_v30 = vld [vmem:[%s12521_s3 + $0x1b8] sm:$0xff] }
 0x33a   : > { %12933 = vst [vmem:[#allocation154_spill] sm:$0xff] %v8657_v40  ;;  %v1936_v40 = vld [vmem:[%s12521_s3 + $0x1b0] sm:$0xff] }
 0x33b   : > { %12934 = vst [vmem:[#allocation155_spill] sm:$0xff] %v8659_v18 }
 0x33e   : > { %2208 = vperm.xlu2 %6874, %v1934_v23   ;;  %v1935_v23 = vld [vmem:[%s12521_s3 + $0x1a8] sm:$0xff] }
 0x33f   : > { %2203 = vperm.xlu1 %6873, %v1933_v39   ;;  %2198 = vperm.xlu0 %6872, %v1932_v25  }
 0x340   : > { %v8670_v52 = vpop.permute.xlu2 %2043 }
 0x341   : > { %12935 = vst [vmem:[#allocation156_spill] sm:$0xff] %v8670_v52  ;;  %v8672_v22 = vpop.permute.xlu1 %1993  ;;  %v8674_v18 = vpop.permute.xlu0 %1988 }
 0x342   : > { %12936 = vst [vmem:[#allocation157_spill] sm:$0xff] %v8672_v22  ;;  %v1939_v22 = vld [vmem:[%s12521_s3 + $0x1c8] sm:$0xff] }
 0x343   : > { %12937 = vst [vmem:[#allocation158_spill] sm:$0xff] %v8674_v18  ;;  %v1940_v18 = vld [vmem:[%s12521_s3 + $0x1d0] sm:$0xff] }
 0x346   : > { %2223 = vperm.xlu2 %6874, %v1937_v30   ;;  %v1938_v30 = vld [vmem:[%s12521_s3 + $0x1c0] sm:$0xff] }
 0x347   : > { %2218 = vperm.xlu1 %6873, %v1936_v40   ;;  %2213 = vperm.xlu0 %6872, %v1935_v23  }
 0x348   : > { %v8685_v39 = vpop.permute.xlu2 %2058 }
 0x349   : > { %12938 = vst [vmem:[#allocation159_spill] sm:$0xff] %v8685_v39  ;;  %v8687_v25 = vpop.permute.xlu1 %2008  ;;  %v8689_v52 = vpop.permute.xlu0 %2003  ;;  %v1943_v39 = vld [vmem:[%s12521_s3 + $0x1e8] sm:$0xff] }
 0x34a   : > { %12939 = vst [vmem:[#allocation160_spill] sm:$0xff] %v8687_v25  ;;  %v1942_v25 = vld [vmem:[%s12521_s3 + $0x1e0] sm:$0xff] }
 0x34b   : > { %12940 = vst [vmem:[#allocation161_spill] sm:$0xff] %v8689_v52 }
 0x34e   : > { %2238 = vperm.xlu2 %6874, %v1940_v18   ;;  %v1941_v18 = vld [vmem:[%s12521_s3 + $0x1d8] sm:$0xff] }
 0x34f   : > { %2233 = vperm.xlu1 %6873, %v1939_v22   ;;  %2228 = vperm.xlu0 %6872, %v1938_v30  }
 0x350   : > { %v8700_v40 = vpop.permute.xlu2 %2073 }
 0x351   : > { %12941 = vst [vmem:[#allocation162_spill] sm:$0xff] %v8700_v40  ;;  %v8702_v23 = vpop.permute.xlu1 %2023  ;;  %v8704_v52 = vpop.permute.xlu0 %2018 }
 0x352   : > { %12942 = vst [vmem:[#allocation163_spill] sm:$0xff] %v8702_v23  ;;  %v1945_v23 = vld [vmem:[%s12521_s3 + $0x1f8] sm:$0xff] }
 0x353   : > { %12943 = vst [vmem:[#allocation164_spill] sm:$0xff] %v8704_v52  ;;  %v6085_v52 = vld [vmem:[%s12521_s3 + $0x200] sm:$0xff] }
 0x356   : > { %2253 = vperm.xlu2 %6874, %v1943_v39   ;;  %v1944_v39 = vld [vmem:[%s12521_s3 + $0x1f0] sm:$0xff] }
 0x357   : > { %2248 = vperm.xlu1 %6873, %v1942_v25   ;;  %2243 = vperm.xlu0 %6872, %v1941_v18  }
 0x358   : > { %v8715_v22 = vpop.permute.xlu2 %2088 }
 0x359   : > { %12944 = vst [vmem:[#allocation165_spill] sm:$0xff] %v8715_v22  ;;  %v8717_v30 = vpop.permute.xlu1 %2038  ;;  %v8719_v40 = vpop.permute.xlu0 %2033  ;;  %v6088_v22 = vld [vmem:[%s12521_s3 + $0x218] sm:$0xff] }
 0x35a   : > { %12945 = vst [vmem:[#allocation166_spill] sm:$0xff] %v8717_v30  ;;  %v6087_v30 = vld [vmem:[%s12521_s3 + $0x210] sm:$0xff] }
 0x35b   : > { %12946 = vst [vmem:[#allocation167_spill] sm:$0xff] %v8719_v40 }
 0x35e   : > { %2397 = vperm.xlu2 %6874, %v6085_v52   ;;  %v6086_v52 = vld [vmem:[%s12521_s3 + $0x208] sm:$0xff] }
 0x35f   : > { %2263 = vperm.xlu1 %6873, %v1945_v23   ;;  %2258 = vperm.xlu0 %6872, %v1944_v39  }
 0x360   : > { %v8730_v25 = vpop.permute.xlu2 %2103 }
 0x361   : > { %12947 = vst [vmem:[#allocation168_spill] sm:$0xff] %v8730_v25  ;;  %v8732_v18 = vpop.permute.xlu1 %2053  ;;  %v8734_v40 = vpop.permute.xlu0 %2048 }
 0x362   : > { %12948 = vst [vmem:[#allocation169_spill] sm:$0xff] %v8732_v18  ;;  %v6090_v18 = vld [vmem:[%s12521_s3 + $0x228] sm:$0xff] }
 0x363   : > { %12949 = vst [vmem:[#allocation170_spill] sm:$0xff] %v8734_v40  ;;  %v6091_v40 = vld [vmem:[%s12521_s3 + $0x230] sm:$0xff] }
 0x366   : > { %2412 = vperm.xlu2 %6874, %v6088_v22   ;;  %v6089_v22 = vld [vmem:[%s12521_s3 + $0x220] sm:$0xff] }
 0x367   : > { %2407 = vperm.xlu1 %6873, %v6087_v30   ;;  %2402 = vperm.xlu0 %6872, %v6086_v52  }
 0x368   : > { %v8745_v23 = vpop.permute.xlu2 %2118 }
 0x369   : > { %12950 = vst [vmem:[#allocation171_spill] sm:$0xff] %v8745_v23  ;;  %v8747_v39 = vpop.permute.xlu1 %2068  ;;  %v8749_v25 = vpop.permute.xlu0 %2063  ;;  %v6093_v23 = vld [vmem:[%s12521_s3 + $0x240] sm:$0xff] }
 0x36a   : > { %12951 = vst [vmem:[#allocation172_spill] sm:$0xff] %v8747_v39  ;;  %v6094_v39 = vld [vmem:[%s12521_s3 + $0x248] sm:$0xff] }
 0x36b   : > { %12952 = vst [vmem:[#allocation173_spill] sm:$0xff] %v8749_v25 }
 0x36e   : > { %2427 = vperm.xlu2 %6874, %v6091_v40   ;;  %v6092_v40 = vld [vmem:[%s12521_s3 + $0x238] sm:$0xff] }
 0x36f   : > { %2422 = vperm.xlu1 %6873, %v6090_v18   ;;  %2417 = vperm.xlu0 %6872, %v6089_v22  }
 0x370   : > { %v8760_v30 = vpop.permute.xlu2 %2133 }
 0x371   : > { %12953 = vst [vmem:[#allocation174_spill] sm:$0xff] %v8760_v30  ;;  %v8762_v52 = vpop.permute.xlu1 %2083  ;;  %v8764_v25 = vpop.permute.xlu0 %2078  ;;  %v6096_v30 = vld [vmem:[%s12521_s3 + $0x258] sm:$0xff] }
 0x372   : > { %12954 = vst [vmem:[#allocation175_spill] sm:$0xff] %v8762_v52  ;;  %v6097_v52 = vld [vmem:[%s12521_s3 + $0x260] sm:$0xff] }
 0x373   : > { %12955 = vst [vmem:[#allocation176_spill] sm:$0xff] %v8764_v25 }
 0x376   : > { %2442 = vperm.xlu2 %6874, %v6094_v39   ;;  %v6095_v39 = vld [vmem:[%s12521_s3 + $0x250] sm:$0xff] }
 0x377   : > { %2437 = vperm.xlu1 %6873, %v6093_v23   ;;  %2432 = vperm.xlu0 %6872, %v6092_v40  }
 0x378   : > { %v8775_v18 = vpop.permute.xlu2 %2148 }
 0x379   : > { %12956 = vst [vmem:[#allocation177_spill] sm:$0xff] %v8775_v18  ;;  %v8777_v22 = vpop.permute.xlu1 %2098  ;;  %v8779_v25 = vpop.permute.xlu0 %2093  ;;  %v6100_v18 = vld [vmem:[%s12521_s3 + $0x278] sm:$0xff] }
 0x37a   : > { %12957 = vst [vmem:[#allocation178_spill] sm:$0xff] %v8777_v22  ;;  %v6099_v22 = vld [vmem:[%s12521_s3 + $0x270] sm:$0xff] }
 0x37b   : > { %12958 = vst [vmem:[#allocation179_spill] sm:$0xff] %v8779_v25 }
 0x37e   : > { %2457 = vperm.xlu2 %6874, %v6097_v52   ;;  %v6098_v52 = vld [vmem:[%s12521_s3 + $0x268] sm:$0xff] }
 0x37f   : > { %2452 = vperm.xlu1 %6873, %v6096_v30   ;;  %2447 = vperm.xlu0 %6872, %v6095_v39  }
 0x380   : > { %v8790_v23 = vpop.permute.xlu2 %2163 }
 0x381   : > { %12959 = vst [vmem:[#allocation180_spill] sm:$0xff] %v8790_v23  ;;  %v8792_v40 = vpop.permute.xlu1 %2113  ;;  %v8794_v25 = vpop.permute.xlu0 %2108  ;;  %v6103_v23 = vld [vmem:[%s12521_s3 + $0x290] sm:$0xff] }
 0x382   : > { %12960 = vst [vmem:[#allocation181_spill] sm:$0xff] %v8792_v40  ;;  %v6102_v40 = vld [vmem:[%s12521_s3 + $0x288] sm:$0xff] }
 0x383   : > { %12961 = vst [vmem:[#allocation182_spill] sm:$0xff] %v8794_v25 }
 0x386   : > { %2472 = vperm.xlu2 %6874, %v6100_v18   ;;  %v6101_v18 = vld [vmem:[%s12521_s3 + $0x280] sm:$0xff] }
 0x387   : > { %2467 = vperm.xlu1 %6873, %v6099_v22   ;;  %2462 = vperm.xlu0 %6872, %v6098_v52  }
 0x388   : > { %v8805_v30 = vpop.permute.xlu2 %2178 }
 0x389   : > { %12962 = vst [vmem:[#allocation183_spill] sm:$0xff] %v8805_v30  ;;  %v8807_v39 = vpop.permute.xlu1 %2128  ;;  %v8809_v25 = vpop.permute.xlu0 %2123 }
 0x38a   : > { %12963 = vst [vmem:[#allocation184_spill] sm:$0xff] %v8807_v39  ;;  %v6105_v39 = vld [vmem:[%s12521_s3 + $0x2a0] sm:$0xff] }
 0x38b   : > { %12964 = vst [vmem:[#allocation185_spill] sm:$0xff] %v8809_v25  ;;  %v6106_v25 = vld [vmem:[%s12521_s3 + $0x2a8] sm:$0xff] }
 0x38e   : > { %2487 = vperm.xlu2 %6874, %v6103_v23   ;;  %v6104_v23 = vld [vmem:[%s12521_s3 + $0x298] sm:$0xff] }
 0x38f   : > { %2482 = vperm.xlu1 %6873, %v6102_v40   ;;  %2477 = vperm.xlu0 %6872, %v6101_v18  }
 0x390   : > { %v8820_v22 = vpop.permute.xlu2 %2193 }
 0x391   : > { %12965 = vst [vmem:[#allocation186_spill] sm:$0xff] %v8820_v22  ;;  %v8822_v52 = vpop.permute.xlu1 %2143  ;;  %v8824_v30 = vpop.permute.xlu0 %2138 }
 0x392   : > { %12966 = vst [vmem:[#allocation187_spill] sm:$0xff] %v8822_v52  ;;  %v6108_v52 = vld [vmem:[%s12521_s3 + $0x2b8] sm:$0xff] }
 0x393   : > { %12967 = vst [vmem:[#allocation188_spill] sm:$0xff] %v8824_v30  ;;  %v6109_v30 = vld [vmem:[%s12521_s3 + $0x2c0] sm:$0xff] }
 0x396   : > { %2502 = vperm.xlu2 %6874, %v6106_v25   ;;  %v6107_v25 = vld [vmem:[%s12521_s3 + $0x2b0] sm:$0xff] }
 0x397   : > { %2497 = vperm.xlu1 %6873, %v6105_v39   ;;  %2492 = vperm.xlu0 %6872, %v6104_v23  }
 0x398   : > { %v8835_v40 = vpop.permute.xlu2 %2208 }
 0x399   : > { %12968 = vst [vmem:[#allocation189_spill] sm:$0xff] %v8835_v40  ;;  %v8837_v18 = vpop.permute.xlu1 %2158  ;;  %v8839_v22 = vpop.permute.xlu0 %2153 }
 0x39a   : > { %12969 = vst [vmem:[#allocation190_spill] sm:$0xff] %v8837_v18  ;;  %v6112_v18 = vld [vmem:[%s12521_s3 + $0x2d8] sm:$0xff] }
 0x39b   : > { %12970 = vst [vmem:[#allocation191_spill] sm:$0xff] %v8839_v22  ;;  %v6111_v22 = vld [vmem:[%s12521_s3 + $0x2d0] sm:$0xff] }
 0x39e   : > { %2517 = vperm.xlu2 %6874, %v6109_v30   ;;  %v6110_v30 = vld [vmem:[%s12521_s3 + $0x2c8] sm:$0xff] }
 0x39f   : > { %2512 = vperm.xlu1 %6873, %v6108_v52   ;;  %2507 = vperm.xlu0 %6872, %v6107_v25  }
 0x3a0   : > { %v8850_v39 = vpop.permute.xlu2 %2223 }
 0x3a1   : > { %12971 = vst [vmem:[#allocation192_spill] sm:$0xff] %v8850_v39  ;;  %v8852_v23 = vpop.permute.xlu1 %2173  ;;  %v8854_v40 = vpop.permute.xlu0 %2168 }
 0x3a2   : > { %12972 = vst [vmem:[#allocation193_spill] sm:$0xff] %v8852_v23  ;;  %v6115_v23 = vld [vmem:[%s12521_s3 + $0x2f0] sm:$0xff] }
 0x3a3   : > { %12973 = vst [vmem:[#allocation194_spill] sm:$0xff] %v8854_v40  ;;  %v6114_v40 = vld [vmem:[%s12521_s3 + $0x2e8] sm:$0xff] }
 0x3a6   : > { %2532 = vperm.xlu2 %6874, %v6112_v18   ;;  %v6113_v18 = vld [vmem:[%s12521_s3 + $0x2e0] sm:$0xff] }
 0x3a7   : > { %2527 = vperm.xlu1 %6873, %v6111_v22   ;;  %2522 = vperm.xlu0 %6872, %v6110_v30  }
 0x3a8   : > { %v8865_v52 = vpop.permute.xlu2 %2238 }
 0x3a9   : > { %12974 = vst [vmem:[#allocation195_spill] sm:$0xff] %v8865_v52  ;;  %v8867_v25 = vpop.permute.xlu1 %2188  ;;  %v8869_v39 = vpop.permute.xlu0 %2183  ;;  %v6117_v52 = vld [vmem:[%s12521_s3 + $0x300] sm:$0xff] }
 0x3aa   : > { %12975 = vst [vmem:[#allocation196_spill] sm:$0xff] %v8867_v25  ;;  %v6149_v25 = vld [vmem:[%s12521_s3 + $0x400] sm:$0xff] }
 0x3ab   : > { %12976 = vst [vmem:[#allocation197_spill] sm:$0xff] %v8869_v39 }
 0x3ae   : > { %2547 = vperm.xlu2 %6874, %v6115_v23   ;;  %v6116_v23 = vld [vmem:[%s12521_s3 + $0x2f8] sm:$0xff] }
 0x3af   : > { %2542 = vperm.xlu1 %6873, %v6114_v40   ;;  %2537 = vperm.xlu0 %6872, %v6113_v18  }
 0x3b0   : > { %v8880_v22 = vpop.permute.xlu2 %2253 }
 0x3b1   : > { %12977 = vst [vmem:[#allocation198_spill] sm:$0xff] %v8880_v22  ;;  %v8882_v30 = vpop.permute.xlu1 %2203  ;;  %v8884_v39 = vpop.permute.xlu0 %2198 }
 0x3b2   : > { %12978 = vst [vmem:[#allocation199_spill] sm:$0xff] %v8882_v30  ;;  %v6151_v30 = vld [vmem:[%s12521_s3 + $0x410] sm:$0xff] }
 0x3b3   : > { %12979 = vst [vmem:[#allocation200_spill] sm:$0xff] %v8884_v39  ;;  %v6152_v39 = vld [vmem:[%s12521_s3 + $0x418] sm:$0xff] }
 0x3b6   : > { %2910 = vperm.xlu2 %6874, %v6149_v25   ;;  %v6150_v25 = vld [vmem:[%s12521_s3 + $0x408] sm:$0xff] }
 0x3b7   : > { %2557 = vperm.xlu1 %6873, %v6117_v52   ;;  %2552 = vperm.xlu0 %6872, %v6116_v23  }
 0x3b8   : > { %v8895_v40 = vpop.permute.xlu2 %2397 }
 0x3b9   : > { %12980 = vst [vmem:[#allocation201_spill] sm:$0xff] %v8895_v40  ;;  %v8897_v18 = vpop.permute.xlu1 %2218  ;;  %v8899_v22 = vpop.permute.xlu0 %2213  ;;  %v6154_v40 = vld [vmem:[%s12521_s3 + $0x428] sm:$0xff] }
 0x3ba   : > { %12981 = vst [vmem:[#allocation202_spill] sm:$0xff] %v8897_v18  ;;  %v6155_v18 = vld [vmem:[%s12521_s3 + $0x430] sm:$0xff] }
 0x3bb   : > { %12982 = vst [vmem:[#allocation203_spill] sm:$0xff] %v8899_v22 }
 0x3be   : > { %2925 = vperm.xlu2 %6874, %v6152_v39   ;;  %v6153_v39 = vld [vmem:[%s12521_s3 + $0x420] sm:$0xff] }
 0x3bf   : > { %2920 = vperm.xlu1 %6873, %v6151_v30   ;;  %2915 = vperm.xlu0 %6872, %v6150_v25  }
 0x3c0   : > { %v8910_v52 = vpop.permute.xlu2 %2412 }
 0x3c1   : > { %12983 = vst [vmem:[#allocation204_spill] sm:$0xff] %v8910_v52  ;;  %v8912_v23 = vpop.permute.xlu1 %2233  ;;  %v8914_v22 = vpop.permute.xlu0 %2228  ;;  %v6157_v52 = vld [vmem:[%s12521_s3 + $0x440] sm:$0xff] }
 0x3c2   : > { %12984 = vst [vmem:[#allocation205_spill] sm:$0xff] %v8912_v23  ;;  %v6158_v23 = vld [vmem:[%s12521_s3 + $0x448] sm:$0xff] }
 0x3c3   : > { %12985 = vst [vmem:[#allocation206_spill] sm:$0xff] %v8914_v22 }
 0x3c6   : > { %2940 = vperm.xlu2 %6874, %v6155_v18   ;;  %v6156_v18 = vld [vmem:[%s12521_s3 + $0x438] sm:$0xff] }
 0x3c7   : > { %2935 = vperm.xlu1 %6873, %v6154_v40   ;;  %2930 = vperm.xlu0 %6872, %v6153_v39  }
 0x3c8   : > { %v8925_v30 = vpop.permute.xlu2 %2427 }
 0x3c9   : > { %12986 = vst [vmem:[#allocation207_spill] sm:$0xff] %v8925_v30  ;;  %v8927_v25 = vpop.permute.xlu1 %2248  ;;  %v8929_v22 = vpop.permute.xlu0 %2243  ;;  %v6160_v30 = vld [vmem:[%s12521_s3 + $0x458] sm:$0xff] }
 0x3ca   : > { %12987 = vst [vmem:[#allocation208_spill] sm:$0xff] %v8927_v25 }
 0x3cb   : > { %12988 = vst [vmem:[#allocation209_spill] sm:$0xff] %v8929_v22  ;;  %v6161_v22 = vld [vmem:[%s12521_s3 + $0x460] sm:$0xff] }
 0x3ce   : > { %2955 = vperm.xlu2 %6874, %v6158_v23   ;;  %v6159_v23 = vld [vmem:[%s12521_s3 + $0x450] sm:$0xff] }
 0x3cf   : > { %2950 = vperm.xlu1 %6873, %v6157_v52   ;;  %2945 = vperm.xlu0 %6872, %v6156_v18  }
 0x3d0   : > { %v8940_v40 = vpop.permute.xlu2 %2442 }
 0x3d1   : > { %12989 = vst [vmem:[#allocation210_spill] sm:$0xff] %v8940_v40  ;;  %v8942_v39 = vpop.permute.xlu1 %2263  ;;  %v8944_v25 = vpop.permute.xlu0 %2258  ;;  %v6163_v40 = vld [vmem:[%s12521_s3 + $0x470] sm:$0xff] }
 0x3d2   : > { %12990 = vst [vmem:[#allocation211_spill] sm:$0xff] %v8942_v39 }
 0x3d3   : > { %12991 = vst [vmem:[#allocation212_spill] sm:$0xff] %v8944_v25  ;;  %v6164_v25 = vld [vmem:[%s12521_s3 + $0x478] sm:$0xff] }
 0x3d6   : > { %2970 = vperm.xlu2 %6874, %v6161_v22   ;;  %v6162_v22 = vld [vmem:[%s12521_s3 + $0x468] sm:$0xff] }
 0x3d7   : > { %2965 = vperm.xlu1 %6873, %v6160_v30   ;;  %2960 = vperm.xlu0 %6872, %v6159_v23  }
 0x3d8   : > { %v8955_v52 = vpop.permute.xlu2 %2457 }
 0x3d9   : > { %12992 = vst [vmem:[#allocation213_spill] sm:$0xff] %v8955_v52  ;;  %v8957_v18 = vpop.permute.xlu1 %2407  ;;  %v8959_v39 = vpop.permute.xlu0 %2402 }
 0x3da   : > { %12993 = vst [vmem:[#allocation214_spill] sm:$0xff] %v8957_v18  ;;  %v6167_v18 = vld [vmem:[%s12521_s3 + $0x490] sm:$0xff] }
 0x3db   : > { %12994 = vst [vmem:[#allocation215_spill] sm:$0xff] %v8959_v39  ;;  %v6166_v39 = vld [vmem:[%s12521_s3 + $0x488] sm:$0xff] }
 0x3de   : > { %2985 = vperm.xlu2 %6874, %v6164_v25   ;;  %v6165_v25 = vld [vmem:[%s12521_s3 + $0x480] sm:$0xff] }
 0x3df   : > { %2980 = vperm.xlu1 %6873, %v6163_v40   ;;  %2975 = vperm.xlu0 %6872, %v6162_v22  }
 0x3e0   : > { %v8970_v30 = vpop.permute.xlu2 %2472 }
 0x3e1   : > { %12995 = vst [vmem:[#allocation216_spill] sm:$0xff] %v8970_v30  ;;  %v8972_v23 = vpop.permute.xlu1 %2422  ;;  %v8974_v52 = vpop.permute.xlu0 %2417 }
 0x3e2   : > { %12996 = vst [vmem:[#allocation217_spill] sm:$0xff] %v8972_v23  ;;  %v6170_v23 = vld [vmem:[%s12521_s3 + $0x4a8] sm:$0xff] }
 0x3e3   : > { %12997 = vst [vmem:[#allocation218_spill] sm:$0xff] %v8974_v52  ;;  %v6169_v52 = vld [vmem:[%s12521_s3 + $0x4a0] sm:$0xff] }
 0x3e6   : > { %3000 = vperm.xlu2 %6874, %v6167_v18   ;;  %v6168_v18 = vld [vmem:[%s12521_s3 + $0x498] sm:$0xff] }
 0x3e7   : > { %2995 = vperm.xlu1 %6873, %v6166_v39   ;;  %2990 = vperm.xlu0 %6872, %v6165_v25  }
 0x3e8   : > { %v8985_v40 = vpop.permute.xlu2 %2487 }
 0x3e9   : > { %12998 = vst [vmem:[#allocation219_spill] sm:$0xff] %v8985_v40  ;;  %v8987_v22 = vpop.permute.xlu1 %2437  ;;  %v8989_v30 = vpop.permute.xlu0 %2432 }
 0x3ea   : > { %12999 = vst [vmem:[#allocation220_spill] sm:$0xff] %v8987_v22  ;;  %v6173_v22 = vld [vmem:[%s12521_s3 + $0x4c0] sm:$0xff] }
 0x3eb   : > { %13000 = vst [vmem:[#allocation221_spill] sm:$0xff] %v8989_v30  ;;  %v6172_v30 = vld [vmem:[%s12521_s3 + $0x4b8] sm:$0xff] }
 0x3ee   : > { %3015 = vperm.xlu2 %6874, %v6170_v23   ;;  %v6171_v23 = vld [vmem:[%s12521_s3 + $0x4b0] sm:$0xff] }
 0x3ef   : > { %3010 = vperm.xlu1 %6873, %v6169_v52   ;;  %3005 = vperm.xlu0 %6872, %v6168_v18  }
 0x3f0   : > { %v9000_v39 = vpop.permute.xlu2 %2502 }
 0x3f1   : > { %13001 = vst [vmem:[#allocation222_spill] sm:$0xff] %v9000_v39  ;;  %v9002_v25 = vpop.permute.xlu1 %2452  ;;  %v9004_v40 = vpop.permute.xlu0 %2447 }
 0x3f2   : > { %13002 = vst [vmem:[#allocation223_spill] sm:$0xff] %v9002_v25  ;;  %v6176_v25 = vld [vmem:[%s12521_s3 + $0x4d8] sm:$0xff] }
 0x3f3   : > { %13003 = vst [vmem:[#allocation224_spill] sm:$0xff] %v9004_v40  ;;  %v6175_v40 = vld [vmem:[%s12521_s3 + $0x4d0] sm:$0xff] }
 0x3f6   : > { %3030 = vperm.xlu2 %6874, %v6173_v22   ;;  %v6174_v22 = vld [vmem:[%s12521_s3 + $0x4c8] sm:$0xff] }
 0x3f7   : > { %3025 = vperm.xlu1 %6873, %v6172_v30   ;;  %3020 = vperm.xlu0 %6872, %v6171_v23  }
 0x3f8   : > { %v9015_v52 = vpop.permute.xlu2 %2517 }
 0x3f9   : > { %13004 = vst [vmem:[#allocation225_spill] sm:$0xff] %v9015_v52  ;;  %v9017_v18 = vpop.permute.xlu1 %2467  ;;  %v9019_v39 = vpop.permute.xlu0 %2462 }
 0x3fa   : > { %13005 = vst [vmem:[#allocation226_spill] sm:$0xff] %v9017_v18  ;;  %v6178_v18 = vld [vmem:[%s12521_s3 + $0x4e8] sm:$0xff] }
 0x3fb   : > { %13006 = vst [vmem:[#allocation227_spill] sm:$0xff] %v9019_v39  ;;  %v6179_v39 = vld [vmem:[%s12521_s3 + $0x4f0] sm:$0xff] }
 0x3fe   : > { %3045 = vperm.xlu2 %6874, %v6176_v25   ;;  %v6177_v25 = vld [vmem:[%s12521_s3 + $0x4e0] sm:$0xff] }
 0x3ff   : > { %3040 = vperm.xlu1 %6873, %v6175_v40   ;;  %3035 = vperm.xlu0 %6872, %v6174_v22  }
 0x400   : > { %v9030_v30 = vpop.permute.xlu2 %2532 }
 0x401   : > { %13007 = vst [vmem:[#allocation228_spill] sm:$0xff] %v9030_v30  ;;  %v9032_v23 = vpop.permute.xlu1 %2482  ;;  %v9034_v52 = vpop.permute.xlu0 %2477 }
 0x402   : > { %13008 = vst [vmem:[#allocation229_spill] sm:$0xff] %v9032_v23  ;;  %v6118_v23 = vld [vmem:[%s12521_s3 + $0x308] sm:$0xff] }
 0x403   : > { %13009 = vst [vmem:[#allocation230_spill] sm:$0xff] %v9034_v52  ;;  %v6181_v52 = vld [vmem:[%s12521_s3 + $0x500] sm:$0xff] }
 0x406   : > { %3060 = vperm.xlu2 %6874, %v6179_v39   ;;  %v6180_v39 = vld [vmem:[%s12521_s3 + $0x4f8] sm:$0xff] }
 0x407   : > { %3055 = vperm.xlu1 %6873, %v6178_v18   ;;  %3050 = vperm.xlu0 %6872, %v6177_v25  }
 0x408   : > { %v9045_v40 = vpop.permute.xlu2 %2547 }
 0x409   : > { %13010 = vst [vmem:[#allocation231_spill] sm:$0xff] %v9045_v40  ;;  %v9047_v22 = vpop.permute.xlu1 %2497  ;;  %v9049_v30 = vpop.permute.xlu0 %2492 }
 0x40a   : > { %13011 = vst [vmem:[#allocation232_spill] sm:$0xff] %v9047_v22  ;;  %v6182_v22 = vld [vmem:[%s12521_s3 + $0x508] sm:$0xff] }
 0x40b   : > { %13012 = vst [vmem:[#allocation233_spill] sm:$0xff] %v9049_v30  ;;  %v6120_v30 = vld [vmem:[%s12521_s3 + $0x318] sm:$0xff] }
 0x40e   : > { %3070 = vperm.xlu2 %6874, %v6181_v52   ;;  %v6119_v52 = vld [vmem:[%s12521_s3 + $0x310] sm:$0xff] }
 0x40f   : > { %2562 = vperm.xlu1 %6873, %v6118_v23   ;;  %3065 = vperm.xlu0 %6872, %v6180_v39  }
 0x410   : > { %v9060_v18 = vpop.permute.xlu2 %2910 }
 0x411   : > { %13013 = vst [vmem:[#allocation234_spill] sm:$0xff] %v9060_v18  ;;  %v9062_v25 = vpop.permute.xlu1 %2512  ;;  %v9064_v40 = vpop.permute.xlu0 %2507  ;;  %v6121_v18 = vld [vmem:[%s12521_s3 + $0x320] sm:$0xff] }
 0x412   : > { %13014 = vst [vmem:[#allocation235_spill] sm:$0xff] %v9062_v25 }
 0x413   : > { %13015 = vst [vmem:[#allocation236_spill] sm:$0xff] %v9064_v40  ;;  %v6184_v40 = vld [vmem:[%s12521_s3 + $0x518] sm:$0xff] }
 0x416   : > { %2572 = vperm.xlu2 %6874, %v6120_v30   ;;  %v6183_v30 = vld [vmem:[%s12521_s3 + $0x510] sm:$0xff] }
 0x417   : > { %3075 = vperm.xlu1 %6873, %v6182_v22   ;;  %2567 = vperm.xlu0 %6872, %v6119_v52  }
 0x418   : > { %v9075_v23 = vpop.permute.xlu2 %2925 }
 0x419   : > { %13016 = vst [vmem:[#allocation237_spill] sm:$0xff] %v9075_v23  ;;  %v9077_v39 = vpop.permute.xlu1 %2527  ;;  %v9079_v25 = vpop.permute.xlu0 %2522  ;;  %v6185_v23 = vld [vmem:[%s12521_s3 + $0x520] sm:$0xff] }
 0x41a   : > { %13017 = vst [vmem:[#allocation238_spill] sm:$0xff] %v9077_v39  ;;  %v6123_v39 = vld [vmem:[%s12521_s3 + $0x330] sm:$0xff] }
 0x41b   : > { %13018 = vst [vmem:[#allocation239_spill] sm:$0xff] %v9079_v25 }
 0x41e   : > { %3085 = vperm.xlu2 %6874, %v6184_v40   ;;  %v6122_v40 = vld [vmem:[%s12521_s3 + $0x328] sm:$0xff] }
 0x41f   : > { %2577 = vperm.xlu1 %6873, %v6121_v18   ;;  %3080 = vperm.xlu0 %6872, %v6183_v30  }
 0x420   : > { %v9090_v22 = vpop.permute.xlu2 %2940 }
 0x421   : > { %13019 = vst [vmem:[#allocation240_spill] sm:$0xff] %v9090_v22  ;;  %v9092_v52 = vpop.permute.xlu1 %2542  ;;  %v9094_v25 = vpop.permute.xlu0 %2537  ;;  %v6124_v22 = vld [vmem:[%s12521_s3 + $0x338] sm:$0xff] }
 0x422   : > { %13020 = vst [vmem:[#allocation241_spill] sm:$0xff] %v9092_v52  ;;  %v6187_v52 = vld [vmem:[%s12521_s3 + $0x530] sm:$0xff] }
 0x423   : > { %13021 = vst [vmem:[#allocation242_spill] sm:$0xff] %v9094_v25 }
 0x426   : > { %2587 = vperm.xlu2 %6874, %v6123_v39   ;;  %v6186_v39 = vld [vmem:[%s12521_s3 + $0x528] sm:$0xff] }
 0x427   : > { %3090 = vperm.xlu1 %6873, %v6185_v23   ;;  %2582 = vperm.xlu0 %6872, %v6122_v40  }
 0x428   : > { %v9105_v18 = vpop.permute.xlu2 %2955 }
 0x429   : > { %13022 = vst [vmem:[#allocation243_spill] sm:$0xff] %v9105_v18  ;;  %v9107_v30 = vpop.permute.xlu1 %2557  ;;  %v9109_v25 = vpop.permute.xlu0 %2552  ;;  %v6188_v18 = vld [vmem:[%s12521_s3 + $0x538] sm:$0xff] }
 0x42a   : > { %13023 = vst [vmem:[#allocation244_spill] sm:$0xff] %v9107_v30 }
 0x42b   : > { %13024 = vst [vmem:[#allocation245_spill] sm:$0xff] %v9109_v25  ;;  %v6126_v25 = vld [vmem:[%s12521_s3 + $0x348] sm:$0xff] }
 0x42e   : > { %3100 = vperm.xlu2 %6874, %v6187_v52   ;;  %v6125_v52 = vld [vmem:[%s12521_s3 + $0x340] sm:$0xff] }
 0x42f   : > { %2592 = vperm.xlu1 %6873, %v6124_v22   ;;  %3095 = vperm.xlu0 %6872, %v6186_v39  }
 0x430   : > { %v9120_v23 = vpop.permute.xlu2 %2970 }
 0x431   : > { %13025 = vst [vmem:[#allocation246_spill] sm:$0xff] %v9120_v23  ;;  %v9122_v40 = vpop.permute.xlu1 %2920  ;;  %v9124_v30 = vpop.permute.xlu0 %2915 }
 0x432   : > { %13026 = vst [vmem:[#allocation247_spill] sm:$0xff] %v9122_v40  ;;  %v6190_v40 = vld [vmem:[%s12521_s3 + $0x548] sm:$0xff] }
 0x433   : > { %13027 = vst [vmem:[#allocation248_spill] sm:$0xff] %v9124_v30  ;;  %v6127_v30 = vld [vmem:[%s12521_s3 + $0x350] sm:$0xff] }
 0x436   : > { %2602 = vperm.xlu2 %6874, %v6126_v25   ;;  %v6189_v25 = vld [vmem:[%s12521_s3 + $0x540] sm:$0xff] }
 0x437   : > { %3105 = vperm.xlu1 %6873, %v6188_v18   ;;  %2597 = vperm.xlu0 %6872, %v6125_v52   ;;  %v13031_v18 = vld [vmem:[#allocation9_spill] sm:$0xff] }
 0x438   : > { %v9135_v22 = vpop.permute.xlu2 %2985  ;;  %v9152_v52 = vsel %vm1560_vm0, 0.0, %v13031_v18  ;;  %v9172_v18 = vsel %vm1560_vm0, 0.0, %v13040_v61  ;;  %v13048_v61 = vld [vmem:[#allocation77_spill] sm:$0xff] }
 0x439   : > { %13028 = vst [vmem:[#allocation249_spill] sm:$0xff] %v9135_v22  ;;  %v9137_v39 = vpop.permute.xlu1 %2935  ;;  %v9139_v23 = vpop.permute.xlu0 %2930  ;;  %v13033_v22 = vld [vmem:[#allocation68_spill] sm:$0xff]  ;;  %v9192_v14 = vsel %vm1560_vm0, 0.0, %v13048_v61 }
 0x43a   : > { %13029 = vst [vmem:[#allocation250_spill] sm:$0xff] %v9137_v39  ;;  %v9156_v39 = vsel %vm1560_vm0, 0.0, %v13033_v22 }
 0x43b   : > { %13030 = vst [vmem:[#allocation251_spill] sm:$0xff] %v9139_v23  ;;  %v13034_v23 = vld [vmem:[#allocation69_spill] sm:$0xff] }
 0x43c   : > { %13032 = vst [vmem:[#allocation9_spill] sm:$0xff] %v9152_v52  ;;  %v9160_v17 = vsel %vm1560_vm0, 0.0, %v13034_v23  ;;  %v13041_v52 = vld [vmem:[#allocation71_spill] sm:$0xff] }
 0x43d   : > { %13035 = vst [vmem:[#allocation68_spill] sm:$0xff] %v9160_v17  ;;  %v9176_v22 = vsel %vm1560_vm0, 0.0, %v13041_v52  ;;  %v13043_v23 = vld [vmem:[#allocation75_spill] sm:$0xff]  ;;  %v9188_v17 = vsel %vm1560_vm0, 0.0, %v13046_v9  ;;  %v13056_v9 = vld [vmem:[#allocation80_spill] sm:$0xff] }
 0x43e   : > { %3115 = vperm.xlu2 %6874, %v6190_v40   ;;  %13037 = vst [vmem:[#allocation69_spill] sm:$0xff] %v9164_v33  ;;  %v9180_v40 = vsel %vm1560_vm0, 0.0, %v13043_v23  ;;  %v9184_v33 = vsel %vm1560_vm0, 0.0, %v13045_v24  ;;  %v13053_v23 = vld [vmem:[#allocation79_spill] sm:$0xff]  ;;  %v13054_v24 = vld [vmem:[#allocation81_spill] sm:$0xff] }
 0x43f   : > { %13042 = vst [vmem:[#allocation72_spill] sm:$0xff] %v9176_v22  ;;  %2607 = vperm.xlu1 %6873, %v6127_v30   ;;  %3110 = vperm.xlu0 %6872, %v6189_v25   ;;  %v13051_v30 = vld [vmem:[#allocation78_spill] sm:$0xff]  ;;  %v9202_v22 = vsel %vm1560_vm0, 0.0, %v13053_v23 }
 0x440   : > { %13044 = vst [vmem:[#allocation73_spill] sm:$0xff] %v9180_v40  ;;  %v9194_v52 = vpop.permute.xlu2 %3000  ;;  %v9198_v25 = vsel %vm1560_vm0, 0.0, %v13051_v30  ;;  %v9206_v40 = vsel %vm1560_vm0, 0.0, %v13054_v24  ;;  %v9226_v24 = vsel %vm1560_vm0, 0.0, %v8102_v58  ;;  %v9246_v58 = vsel %vm1560_vm0, 0.0, %v8149_v6 }
 0x441   : > { %13047 = vst [vmem:[#allocation71_spill] sm:$0xff] %v9188_v17  ;;  %v9210_v17 = vsel %vm1560_vm0, 0.0, %v13056_v9  ;;  %v9212_v61 = vpop.permute.xlu1 %2950  ;;  %v9265_v6 = vsel %vm1560_vm0, 0.0, %v8161_v31  ;;  %v9283_v31 = vsel %vm1560_vm0, 0.0, %v8177_v21  ;;  %v9303_v21 = vsel %vm1560_vm0, 0.0, %v8197_v3 }
 0x442   : > { %13049 = vst [vmem:[#allocation75_spill] sm:$0xff] %v9192_v14  ;;  %v9214_v14 = vpop.permute.xlu0 %2945  ;;  %v9323_v3 = vsel %vm1560_vm0, 0.0, %v8213_v46  ;;  %v9345_v46 = vsel %vm1560_vm0, 0.0, %v8237_v37  ;;  %v9365_v37 = vsel %vm1560_vm0, 0.0, %v8245_v60 }
 0x443   : > { %13050 = vst [vmem:[#allocation76_spill] sm:$0xff] %v9194_v52  ;;  %v13059_v52 = vld [vmem:[#allocation82_spill] sm:$0xff] }
 0x444   : > { %13052 = vst [vmem:[#allocation74_spill] sm:$0xff] %v9198_v25  ;;  %v9218_v30 = vsel %vm1560_vm0, 0.0, %v13059_v52  ;;  %v13060_v25 = vld [vmem:[#allocation84_spill] sm:$0xff]  ;;  %v9238_v52 = vsel %vm1560_vm0, 0.0, %v8129_v59  ;;  %v9257_v59 = vsel %vm1560_vm0, 0.0, %v8153_v2  ;;  %v9275_v2 = vsel %vm1560_vm0, 0.0, %v8165_v43 }
 0x445   : > { %13055 = vst [vmem:[#allocation77_spill] sm:$0xff] %v9206_v40  ;;  %v9222_v23 = vsel %vm1560_vm0, 0.0, %v13060_v25  ;;  %v13061_v40 = vld [vmem:[#allocation83_spill] sm:$0xff]  ;;  %v9242_v25 = vsel %vm1560_vm0, 0.0, %v8125_v7  ;;  %v9261_v7 = vsel %vm1560_vm0, 0.0, %v8163_v63  ;;  %v9279_v63 = vsel %vm1560_vm0, 0.0, %v8175_v56 }
 0x446   : > { %13057 = vst [vmem:[#allocation78_spill] sm:$0xff] %v9212_v61  ;;  %v9230_v9 = vsel %vm1560_vm0, 0.0, %v13061_v40  ;;  %v9234_v61 = vsel %vm1560_vm0, 0.0, %v8127_v34  ;;  %v6129_v40 = vld [vmem:[%s12521_s3 + $0x360] sm:$0xff]  ;;  %v9253_v34 = vsel %vm1560_vm0, 0.0, %v8151_v16  ;;  %v6128_v16 = vld [vmem:[%s12521_s3 + $0x358] sm:$0xff] }
 0x447   : > { %13058 = vst [vmem:[#allocation79_spill] sm:$0xff] %v9214_v14  ;;  %v6191_v14 = vld [vmem:[%s12521_s3 + $0x550] sm:$0xff]  ;;  %v9295_v43 = vsel %vm1560_vm0, 0.0, %v8189_v29  ;;  %v9299_v56 = vsel %vm1560_vm0, 0.0, %v8185_v28  ;;  %2617 = vperm.xlu2 %6874, %v6129_v40   ;;  %v9315_v29 = vsel %vm1560_vm0, 0.0, %v8211_v57  ;;  %v9319_v28 = vsel %vm1560_vm0, 0.0, %v8209_v42  ;;  %2612 = vperm.xlu0 %6872, %v6128_v16  }
 0x448   : > { %13062 = vst [vmem:[#allocation81_spill] sm:$0xff] %v9246_v58  ;;  %v9291_v58 = vsel %vm1560_vm0, 0.0, %v8187_v19  ;;  %v9311_v19 = vsel %vm1560_vm0, 0.0, %v8201_v53  ;;  %3120 = vperm.xlu1 %6873, %v6191_v14   ;;  %v9331_v53 = vsel %vm1560_vm0, 0.0, %v8225_v50  ;;  %v9335_v57 = vsel %vm1560_vm0, 0.0, %v8221_v20  ;;  %v9337_v42 = vpop.permute.xlu2 %3015 }
 0x449   : > { %13063 = vst [vmem:[#allocation80_spill] sm:$0xff] %v9265_v6  ;;  %v9287_v6 = vsel %vm1560_vm0, 0.0, %v8173_v15  ;;  %v9307_v15 = vsel %vm1560_vm0, 0.0, %v8199_v44  ;;  %v9327_v44 = vsel %vm1560_vm0, 0.0, %v8223_v41  ;;  %v9341_v14 = vsel %vm1560_vm0, 0.0, %v8235_v62  ;;  %v9351_v50 = vpop.permute.xlu1 %2965 }
 0x44a   : > { %13064 = vst [vmem:[#allocation82_spill] sm:$0xff] %v9303_v21  ;;  %v9349_v41 = vsel %vm1560_vm0, 0.0, %v8233_v8  ;;  %v9353_v40 = vpop.permute.xlu0 %2960  ;;  %v9357_v20 = vsel %vm1560_vm0, 0.0, %v8247_v4  ;;  %v9361_v62 = vsel %vm1560_vm0, 0.0, %v8249_v45  ;;  %v9369_v8 = vsel %vm1560_vm0, 0.0, %v8257_v51  ;;  %v6193_v51 = vld [vmem:[%s12521_s3 + $0x560] sm:$0xff] }
 0x44b   : > { %13065 = vst [vmem:[#allocation84_spill] sm:$0xff] %v9307_v15  ;;  %v9373_v16 = vsel %vm1560_vm0, 0.0, %v8259_v10  ;;  %v9381_v45 = vsel %vm1560_vm0, 0.0, %v8271_v36  ;;  %v9400_v36 = vsel %vm1817_vm1, %v8293_v1, 0.0  ;;  %v9418_v1 = vsel %vm1817_vm1, %v8333_v13, 0.0  ;;  %v13103_v15 = vld [vmem:[#allocation103_spill] sm:$0xff] }
 0x44c   : > { %13066 = vst [vmem:[#allocation83_spill] sm:$0xff] %v9319_v28  ;;  %v9438_v13 = vsel %vm1817_vm1, %v8341_v12, 0.0  ;;  %v9458_v12 = vsel %vm1817_vm1, %v8365_v11, 0.0  ;;  %v13093_v11 = vld [vmem:[#allocation100_spill] sm:$0xff]  ;;  %v13105_v21 = vld [vmem:[#allocation106_spill] sm:$0xff] }
 0x44d   : > { %13067 = vst [vmem:[#allocation252_spill] sm:$0xff] %v9335_v57  ;;  %v13078_v57 = vld [vmem:[#allocation86_spill] sm:$0xff] }
 0x44e   : > { %13068 = vst [vmem:[#allocation253_spill] sm:$0xff] %v9337_v42  ;;  %v9385_v60 = vsel %vm1560_vm0, 0.0, %v13078_v57  ;;  %v9404_v57 = vsel %vm1817_vm1, %v8305_v0, 0.0  ;;  %v9422_v0 = vsel %vm1817_vm1, %v8317_v47, 0.0  ;;  %v9442_v47 = vsel %vm1817_vm1, %v8353_v5, 0.0  ;;  %v13115_v42 = vld [vmem:[#allocation110_spill] sm:$0xff] }
 0x44f   : > { %13069 = vst [vmem:[#allocation254_spill] sm:$0xff] %v9349_v41  ;;  %v13075_v41 = vld [vmem:[#allocation85_spill] sm:$0xff]  ;;  %3130 = vperm.xlu2 %6874, %v6193_v51   ;;  %v9462_v5 = vsel %vm1817_vm1, %v8379_v55, 0.0 }
 0x450   : > { %13070 = vst [vmem:[#allocation255_spill] sm:$0xff] %v9351_v50  ;;  %v9377_v4 = vsel %vm1560_vm0, 0.0, %v13075_v41  ;;  %v9396_v41 = vsel %vm1560_vm0, 0.0, %v8283_v38  ;;  %v9414_v38 = vsel %vm1817_vm1, %v8331_v27, 0.0  ;;  %v9434_v27 = vsel %vm1817_vm1, %v8345_v26, 0.0  ;;  %v13095_v55 = vld [vmem:[#allocation101_spill] sm:$0xff] }
 0x451   : > { %13071 = vst [vmem:[#allocation256_spill] sm:$0xff] %v9357_v20  ;;  %v9454_v26 = vsel %vm1817_vm1, %v8367_v35, 0.0  ;;  %v9472_v35 = vpop.permute.xlu2 %3030  ;;  %v9484_v28 = vsel %vm1817_vm1, %v13095_v55, 0.0  ;;  %v9504_v55 = vsel %vm1817_vm1, %v13105_v21, 0.0  ;;  %v9524_v21 = vsel %vm1817_vm1, %v13115_v42, 0.0 }
 0x452   : > { %13072 = vst [vmem:[#allocation257_spill] sm:$0xff] %v9365_v37  ;;  %v9430_v37 = vsel %vm1817_vm1, %v8343_v49, 0.0  ;;  %v9450_v49 = vsel %vm1817_vm1, %v8357_v32, 0.0  ;;  %v13089_v32 = vld [vmem:[#allocation98_spill] sm:$0xff]  ;;  %v9488_v20 = vpop.permute.xlu0 %2975 }
 0x453   : > { %13073 = vst [vmem:[#allocation258_spill] sm:$0xff] %v9369_v8  ;;  %v13080_v8 = vld [vmem:[#allocation87_spill] sm:$0xff] }
 0x454   : > { %13074 = vst [vmem:[#allocation259_spill] sm:$0xff] %v9373_v16  ;;  %v9392_v10 = vsel %vm1560_vm0, 0.0, %v13080_v8  ;;  %v6192_v8 = vld [vmem:[%s12521_s3 + $0x558] sm:$0xff]  ;;  %v9480_v16 = vsel %vm1817_vm1, %v13093_v11, 0.0  ;;  %v9500_v11 = vsel %vm1817_vm1, %v13103_v15, 0.0 }
 0x455   : > { %13076 = vst [vmem:[#allocation85_spill] sm:$0xff] %v9377_v4  ;;  %3125 = vperm.xlu0 %6872, %v6192_v8   ;;  %v13101_v4 = vld [vmem:[#allocation102_spill] sm:$0xff] }
 0x456   : > { %13077 = vst [vmem:[#allocation260_spill] sm:$0xff] %v9381_v45  ;;  %v9470_v45 = vsel %vm1817_vm1, %v13089_v32, 0.0  ;;  %v13099_v32 = vld [vmem:[#allocation99_spill] sm:$0xff] }
 0x457   : > { %13079 = vst [vmem:[#allocation86_spill] sm:$0xff] %v9385_v60  ;;  %v6130_v60 = vld [vmem:[%s12521_s3 + $0x368] sm:$0xff] }
 0x458   : > { %13081 = vst [vmem:[#allocation87_spill] sm:$0xff] %v9392_v10  ;;  %2622 = vperm.xlu1 %6873, %v6130_v60   ;;  %v13091_v60 = vld [vmem:[#allocation97_spill] sm:$0xff]  ;;  %v9492_v10 = vsel %vm1817_vm1, %v13099_v32, 0.0 }
 0x459   : > { %13082 = vst [vmem:[#allocation261_spill] sm:$0xff] %v9396_v41  ;;  %v9426_v41 = vsel %vm1817_vm1, %v8329_v48, 0.0  ;;  %v9446_v48 = vsel %vm1817_vm1, %v8355_v54, 0.0  ;;  %v13088_v54 = vld [vmem:[#allocation96_spill] sm:$0xff]  ;;  %v9476_v8 = vsel %vm1817_vm1, %v13091_v60, 0.0  ;;  %v9496_v60 = vsel %vm1817_vm1, %v13101_v4, 0.0 }
 0x45a   : > { %13083 = vst [vmem:[#allocation262_spill] sm:$0xff] %v9426_v41  ;;  %v9466_v51 = vsel %vm1817_vm1, %v13088_v54, 0.0  ;;  %v9486_v54 = vpop.permute.xlu1 %2980 }
 0x45b   : > { %13084 = vst [vmem:[#allocation263_spill] sm:$0xff] %v9438_v13 }
 0x45c   : > { %13085 = vst [vmem:[#allocation264_spill] sm:$0xff] %v9442_v47 }
 0x45d   : > { %13086 = vst [vmem:[#allocation265_spill] sm:$0xff] %v9458_v12  ;;  %v13109_v12 = vld [vmem:[#allocation105_spill] sm:$0xff] }
 0x45e   : > { %13087 = vst [vmem:[#allocation266_spill] sm:$0xff] %v9462_v5  ;;  %v9512_v32 = vsel %vm1817_vm1, %v13109_v12, 0.0  ;;  %v13157_v5 = vld [vmem:[#allocation157_spill] sm:$0xff] }
 0x45f   : > { %13090 = vst [vmem:[#allocation96_spill] sm:$0xff] %v9472_v35  ;;  %v13107_v35 = vld [vmem:[#allocation104_spill] sm:$0xff] }
 0x460   : > { %13092 = vst [vmem:[#allocation98_spill] sm:$0xff] %v9476_v8  ;;  %v9508_v8 = vsel %vm1817_vm1, %v13107_v35, 0.0  ;;  %v6132_v35 = vld [vmem:[%s12521_s3 + $0x378] sm:$0xff] }
 0x461   : > { %13094 = vst [vmem:[#allocation97_spill] sm:$0xff] %v9480_v16  ;;  %2632 = vperm.xlu2 %6874, %v6132_v35  }
 0x462   : > { %13096 = vst [vmem:[#allocation100_spill] sm:$0xff] %v9484_v28 }
 0x463   : > { %13097 = vst [vmem:[#allocation101_spill] sm:$0xff] %v9486_v54  ;;  %v13128_v54 = vld [vmem:[#allocation115_spill] sm:$0xff] }
 0x464   : > { %13098 = vst [vmem:[#allocation267_spill] sm:$0xff] %v9488_v20  ;;  %v13155_v20 = vld [vmem:[#allocation155_spill] sm:$0xff] }
 0x465   : > { %13100 = vst [vmem:[#allocation99_spill] sm:$0xff] %v9492_v10  ;;  %v13111_v10 = vld [vmem:[#allocation109_spill] sm:$0xff] }
 0x466   : > { %13102 = vst [vmem:[#allocation102_spill] sm:$0xff] %v9496_v60  ;;  %v9516_v4 = vsel %vm1817_vm1, %v13111_v10, 0.0  ;;  %v13113_v60 = vld [vmem:[#allocation107_spill] sm:$0xff]  ;;  %v6194_v10 = vld [vmem:[%s12521_s3 + $0x568] sm:$0xff] }
 0x467   : > { %13104 = vst [vmem:[#allocation103_spill] sm:$0xff] %v9500_v11  ;;  %v9520_v15 = vsel %vm1817_vm1, %v13113_v60, 0.0  ;;  %v6131_v60 = vld [vmem:[%s12521_s3 + $0x370] sm:$0xff]  ;;  %v13124_v11 = vld [vmem:[#allocation114_spill] sm:$0xff]  ;;  %3135 = vperm.xlu1 %6873, %v6194_v10   ;;  %v9611_v10 = vpop.permute.xlu2 %3045 }
 0x468   : > { %13106 = vst [vmem:[#allocation106_spill] sm:$0xff] %v9504_v55  ;;  %v13117_v55 = vld [vmem:[#allocation108_spill] sm:$0xff]  ;;  %v9553_v47 = vsel %vm1817_vm1, %v13124_v11, 0.0  ;;  %2627 = vperm.xlu0 %6872, %v6131_v60   ;;  %v13154_v60 = vld [vmem:[#allocation73_spill] sm:$0xff] }
 0x469   : > { %13108 = vst [vmem:[#allocation104_spill] sm:$0xff] %v9508_v8  ;;  %v9531_v12 = vsel %vm1817_vm1, %v13117_v55, 0.0  ;;  %v13126_v8 = vld [vmem:[#allocation116_spill] sm:$0xff] }
 0x46a   : > { %13110 = vst [vmem:[#allocation105_spill] sm:$0xff] %v9512_v32  ;;  %v13118_v32 = vld [vmem:[#allocation113_spill] sm:$0xff]  ;;  %v9557_v16 = vsel %vm1817_vm1, %v13126_v8, 0.0  ;;  %v13136_v8 = vld [vmem:[#allocation144_spill] sm:$0xff] }
 0x46b   : > { %13112 = vst [vmem:[#allocation109_spill] sm:$0xff] %v9516_v4  ;;  %v9541_v42 = vsel %vm1817_vm1, %v13118_v32, 0.0  ;;  %v13120_v4 = vld [vmem:[#allocation112_spill] sm:$0xff]  ;;  %v9561_v32 = vsel %vm1817_vm1, %v13128_v54, 0.0  ;;  %v13137_v54 = vld [vmem:[#allocation147_spill] sm:$0xff] }
 0x46c   : > { %13114 = vst [vmem:[#allocation107_spill] sm:$0xff] %v9520_v15  ;;  %v13122_v15 = vld [vmem:[#allocation111_spill] sm:$0xff] }
 0x46d   : > { %13116 = vst [vmem:[#allocation110_spill] sm:$0xff] %v9524_v21  ;;  %v9545_v21 = vsel %vm1817_vm1, %v13120_v4, 0.0  ;;  %v9549_v55 = vsel %vm1817_vm1, %v13122_v15, 0.0 }
 0x46e   : > { %13119 = vst [vmem:[#allocation108_spill] sm:$0xff] %v9541_v42  ;;  %v13130_v42 = vld [vmem:[#allocation119_spill] sm:$0xff] }
 0x46f   : > { %13121 = vst [vmem:[#allocation113_spill] sm:$0xff] %v9545_v21  ;;  %v9565_v4 = vsel %vm1817_vm1, %v13130_v42, 0.0  ;;  %v13132_v21 = vld [vmem:[#allocation118_spill] sm:$0xff]  ;;  %v13138_v42 = vld [vmem:[#allocation9_spill] sm:$0xff] }
 0x470   : > { %13123 = vst [vmem:[#allocation112_spill] sm:$0xff] %v9549_v55  ;;  %v9569_v15 = vsel %vm1817_vm1, %v13132_v21, 0.0  ;;  %v13134_v55 = vld [vmem:[#allocation138_spill] sm:$0xff] }
 0x471   : > { %13125 = vst [vmem:[#allocation111_spill] sm:$0xff] %v9553_v47  ;;  %v2267_v11 = vmul.f32 %v13134_v55, %v9172_v18  ;;  %v13135_v47 = vld [vmem:[#allocation141_spill] sm:$0xff]  ;;  %v13141_v18 = vld [vmem:[#allocation150_spill] sm:$0xff]  ;;  %v13146_v55 = vld [vmem:[#allocation152_spill] sm:$0xff] }
 0x472   : > { %13127 = vst [vmem:[#allocation114_spill] sm:$0xff] %v9557_v16  ;;  %v9575_v13 = vmul.f32 %v13135_v47, %v9184_v33  ;;  %v9579_v16 = vmul.f32 %v13136_v8, %v9202_v22  ;;  %v9593_v33 = vmul.f32 %v13141_v18, %v9226_v24  ;;  %v13143_v22 = vld [vmem:[#allocation122_spill] sm:$0xff]  ;;  %v13147_v8 = vld [vmem:[#allocation68_spill] sm:$0xff]  ;;  %v13152_v24 = vld [vmem:[#allocation215_spill] sm:$0xff] }
 0x473   : > { %13129 = vst [vmem:[#allocation116_spill] sm:$0xff] %v9561_v32  ;;  %v9583_v32 = vmul.f32 %v13137_v54, %v9218_v30  ;;  %v9597_v47 = vsel %vm1817_vm1, %v13143_v22, 0.0  ;;  %v13145_v30 = vld [vmem:[#allocation70_spill] sm:$0xff]  ;;  %v9615_v22 = vmul.f32 %v13155_v20, %v13154_v60  ;;  %v13164_v20 = vld [vmem:[#allocation72_spill] sm:$0xff] }
 0x474   : > { %13131 = vst [vmem:[#allocation115_spill] sm:$0xff] %v9565_v4  ;;  %v13139_v4 = vld [vmem:[#allocation148_spill] sm:$0xff]  ;;  %v2268_v35 = vmul.f32 %v13146_v55, %v13145_v30  ;;  %v13148_v54 = vld [vmem:[#allocation154_spill] sm:$0xff] }
 0x475   : > { %13133 = vst [vmem:[#allocation119_spill] sm:$0xff] %v9569_v15  ;;  %v2266_v21 = vmul.f32 %v13139_v4, %v13138_v42  ;;  %v13140_v15 = vld [vmem:[#allocation151_spill] sm:$0xff]  ;;  %v9603_v4 = vmul.f32 %v13148_v54, %v13147_v8  ;;  %v13158_v55 = vld [vmem:[#allocation74_spill] sm:$0xff]  ;;  %v13165_v60 = vld [vmem:[#allocation160_spill] sm:$0xff] }
 0x476   : > { %v9589_v28 = vmul.f32 %v13140_v15, %v9156_v39  ;;  %13142 = vst [vmem:[#allocation118_spill] sm:$0xff] %v9593_v33  ;;  %v13149_v39 = vld [vmem:[#allocation153_spill] sm:$0xff]  ;;  %v13151_v42 = vld [vmem:[#allocation43_spill] sm:$0xff]  ;;  %v13159_v8 = vld [vmem:[#allocation158_spill] sm:$0xff] }
 0x477   : > { %13144 = vst [vmem:[#allocation138_spill] sm:$0xff] %v9597_v47  ;;  %v9607_v15 = vmul.f32 %v13149_v39, %v9238_v52  ;;  %v2716_v18 = vmul.f32 %v13152_v24, %v13151_v42  ;;  %v13156_v47 = vld [vmem:[#allocation69_spill] sm:$0xff]  ;;  %v9623_v54 = vmul.f32 %v13159_v8, %v13158_v55  ;;  %v13160_v52 = vld [vmem:[#allocation156_spill] sm:$0xff]  ;;  %v9631_v42 = vpop.permute.xlu1 %2995  ;;  %v9633_v24 = vpop.permute.xlu0 %2990 }
 0x478   : > { %13153 = vst [vmem:[#allocation144_spill] sm:$0xff] %v9611_v10  ;;  %v9619_v30 = vmul.f32 %v13157_v5, %v13156_v47  ;;  %v9627_v39 = vmul.f32 %v13160_v52, %v9257_v59  ;;  %v9637_v10 = vmul.f32 %v13165_v60, %v13164_v20  ;;  %v13166_v5 = vld [vmem:[#allocation159_spill] sm:$0xff]  ;;  %v13168_v55 = vld [vmem:[#allocation41_spill] sm:$0xff]  ;;  %v13170_v59 = vld [vmem:[#allocation248_spill] sm:$0xff] }
 0x479   : > { %13150 = vst [vmem:[#allocation141_spill] sm:$0xff] %v9607_v15  ;;  %v9641_v47 = vmul.f32 %v13166_v5, %v9275_v2  ;;  %v13169_v8 = vld [vmem:[#allocation201_spill] sm:$0xff]  ;;  %v3229_v52 = vmul.f32 %v13170_v59, %v9414_v38  ;;  %v13175_v20 = vld [vmem:[#allocation164_spill] sm:$0xff]  ;;  %v13176_v2 = vld [vmem:[#allocation162_spill] sm:$0xff] }
 0x47a   : > { %13161 = vst [vmem:[#allocation147_spill] sm:$0xff] %v9627_v39  ;;  %v2715_v15 = vmul.f32 %v13169_v8, %v13168_v55  ;;  %v13171_v39 = vld [vmem:[#allocation77_spill] sm:$0xff]  ;;  %v9657_v60 = vmul.f32 %v13175_v20, %v9222_v23  ;;  %v9661_v5 = vmul.f32 %v13176_v2, %v9283_v31  ;;  %v6196_v38 = vld [vmem:[%s12521_s3 + $0x578] sm:$0xff]  ;;  %v13178_v55 = vld [vmem:[#allocation75_spill] sm:$0xff] }
 0x47b   : > { %13162 = vst [vmem:[#allocation9_spill] sm:$0xff] %v9631_v42  ;;  %v13172_v33 = vld [vmem:[#allocation161_spill] sm:$0xff]  ;;  %v13173_v42 = vld [vmem:[#allocation71_spill] sm:$0xff]  ;;  %v13179_v8 = vld [vmem:[#allocation166_spill] sm:$0xff]  ;;  %3145 = vperm.xlu2 %6874, %v6196_v38  }
 0x47c   : > { %13163 = vst [vmem:[#allocation148_spill] sm:$0xff] %v9633_v24  ;;  %v9649_v50 = vmul.f32 %v13172_v33, %v13171_v39  ;;  %v13174_v24 = vld [vmem:[#allocation163_spill] sm:$0xff]  ;;  %v9668_v33 = vmul.f32 %v13179_v8, %v13178_v55  ;;  %v13180_v39 = vld [vmem:[#allocation165_spill] sm:$0xff]  ;;  %v13182_v23 = vld [vmem:[#allocation234_spill] sm:$0xff] }
 0x47d   : > { %13167 = vst [vmem:[#allocation151_spill] sm:$0xff] %v9641_v47  ;;  %v9653_v41 = vmul.f32 %v13174_v24, %v13173_v42  ;;  %v9672_v42 = vmul.f32 %v13180_v39, %v9295_v43  ;;  %v2780_v24 = vadd.f32 %v2716_v18, %v2267_v11  ;;  %v3228_v59 = vmul.f32 %v13182_v23, %v9418_v1  ;;  %v6133_v31 = vld [vmem:[%s12521_s3 + $0x380] sm:$0xff]  ;;  %v6195_v20 = vld [vmem:[%s12521_s3 + $0x570] sm:$0xff]  ;;  %v13186_v11 = vld [vmem:[#allocation170_spill] sm:$0xff] }
 0x47e   : > { %13177 = vst [vmem:[#allocation150_spill] sm:$0xff] %v9661_v5  ;;  %v13183_v2 = vld [vmem:[#allocation167_spill] sm:$0xff]  ;;  %v13185_v8 = vld [vmem:[#allocation169_spill] sm:$0xff]  ;;  %v9692_v18 = vmul.f32 %v13186_v11, %v9253_v34  ;;  %v13187_v1 = vld [vmem:[#allocation168_spill] sm:$0xff]  ;;  %v2779_v5 = vadd.f32 %v2715_v15, %v2266_v21  ;;  %2637 = vperm.xlu1 %6873, %v6133_v31   ;;  %3140 = vperm.xlu0 %6872, %v6195_v20  }
 0x47f   : > { %13181 = vst [vmem:[#allocation122_spill] sm:$0xff] %v9672_v42  ;;  %v9684_v55 = vmul.f32 %v13183_v2, %v9234_v61  ;;  %v9688_v43 = vmul.f32 %v13185_v8, %v9210_v17  ;;  %v9696_v39 = vmul.f32 %v13187_v1, %v9311_v19  ;;  %v13189_v23 = vld [vmem:[#allocation171_spill] sm:$0xff]  ;;  %v13190_v47 = vld [vmem:[#allocation44_spill] sm:$0xff]  ;;  %v13191_v61 = vld [vmem:[#allocation214_spill] sm:$0xff] }
 0x480   : > { %v9700_v42 = vmul.f32 %v13189_v23, %v9323_v3  ;;  %v2717_v2 = vmul.f32 %v13191_v61, %v13190_v47  ;;  %v13192_v17 = vld [vmem:[#allocation172_spill] sm:$0xff]  ;;  %v13194_v34 = vld [vmem:[#allocation173_spill] sm:$0xff]  ;;  %v13195_v19 = vld [vmem:[#allocation174_spill] sm:$0xff] }
 0x481   : > { %13184 = vst [vmem:[#allocation70_spill] sm:$0xff] %v9684_v55  ;;  %v3293_v55 = vadd.f32 %v3229_v52, %v2780_v24  ;;  %v9706_v8 = vmul.f32 %v13192_v17, %v9230_v9  ;;  %v9710_v11 = vmul.f32 %v13194_v34, %v9261_v7  ;;  %v9714_v1 = vmul.f32 %v13195_v19, %v9331_v53  ;;  %v13196_v3 = vld [vmem:[#allocation121_spill] sm:$0xff]  ;;  %v13197_v15 = vld [vmem:[#allocation175_spill] sm:$0xff]  ;;  %v13199_v9 = vld [vmem:[#allocation176_spill] sm:$0xff]  ;;  %v9730_v53 = vpop.permute.xlu2 %3060 }
 0x482   : > { %13188 = vst [vmem:[#allocation152_spill] sm:$0xff] %v9696_v39  ;;  %v9718_v21 = vsel %vm1817_vm1, %v13196_v3, 0.0  ;;  %v9722_v47 = vmul.f32 %v13197_v15, %v9242_v25  ;;  %v9726_v52 = vmul.f32 %v13199_v9, %v9279_v63  ;;  %v3292_v7 = vadd.f32 %v3228_v59, %v2779_v5  ;;  %v13201_v38 = vld [vmem:[#allocation247_spill] sm:$0xff]  ;;  %v13203_v31 = vld [vmem:[#allocation81_spill] sm:$0xff]  ;;  %v13204_v20 = vld [vmem:[#allocation178_spill] sm:$0xff]  ;;  %v9745_v63 = vpop.permute.xlu1 %3010  ;;  %v9747_v5 = vpop.permute.xlu0 %3005 }
 0x483   : > { %13193 = vst [vmem:[#allocation68_spill] sm:$0xff] %v9706_v8  ;;  %v3230_v24 = vmul.f32 %v13201_v38, %v9400_v36  ;;  %v9734_v23 = vmul.f32 %v13204_v20, %v13203_v31  ;;  %v13206_v61 = vld [vmem:[#allocation177_spill] sm:$0xff]  ;;  %v13208_v25 = vld [vmem:[#allocation42_spill] sm:$0xff]  ;;  %v13209_v34 = vld [vmem:[#allocation204_spill] sm:$0xff]  ;;  %v9743_v3 = vstv %s9629_s20  ;;  %v2781_v15 = vadd.f32 %v2717_v2, %v2268_v35 }
 0x484   : > { %13198 = vst [vmem:[#allocation154_spill] sm:$0xff] %v9722_v47  ;;  %v9738_v17 = vmul.f32 %v13206_v61, %v9345_v46  ;;  %v2718_v19 = vmul.f32 %v13209_v34, %v13208_v25  ;;  %v13210_v36 = vld [vmem:[#allocation179_spill] sm:$0xff]  ;;  %v13212_v9 = vld [vmem:[#allocation46_spill] sm:$0xff]  ;;  %v3423_v46 = vmul.f32 %v9743_v3, %v3293_v55  ;;  %v13214_v20 = vld [vmem:[#allocation80_spill] sm:$0xff]  ;;  %vm3358_vm2 = vcmp.gt.f32.partialorder %v3293_v55, 0.0 }
 0x485   : > { %13200 = vst [vmem:[#allocation153_spill] sm:$0xff] %v9726_v52  ;;  %v9751_v59 = vmul.f32 %v13210_v36, %v9291_v58  ;;  %v13213_v38 = vld [vmem:[#allocation218_spill] sm:$0xff]  ;;  %v13215_v61 = vld [vmem:[#allocation181_spill] sm:$0xff]  ;;  %v13216_v25 = vld [vmem:[#allocation180_spill] sm:$0xff]  ;;  %vm3357_vm3 = vcmp.gt.f32.partialorder %v3292_v7, 0.0 }
 0x486   : > { %13202 = vst [vmem:[#allocation43_spill] sm:$0xff] %v9730_v53  ;;  %v2719_v31 = vmul.f32 %v13213_v38, %v13212_v9  ;;  %v9758_v39 = vmul.f32 %v13215_v61, %v13214_v20  ;;  %v9762_v34 = vmul.f32 %v13216_v25, %v9361_v62  ;;  %v6135_v58 = vld [vmem:[%s12521_s3 + $0x390] sm:$0xff]  ;;  %v13220_v2 = vld [vmem:[#allocation207_spill] sm:$0xff]  ;;  %v3422_v9 = vmul.f32 %v9743_v3, %v3292_v7 }
 0x487   : > { %13205 = vst [vmem:[#allocation215_spill] sm:$0xff] %v9734_v23  ;;  %v13218_v23 = vld [vmem:[#allocation237_spill] sm:$0xff]  ;;  %v3294_v38 = vadd.f32 %v3230_v24, %v2781_v15  ;;  %v13221_v20 = vld [vmem:[#allocation251_spill] sm:$0xff]  ;;  %v2782_v24 = vadd.f32 %v2718_v19, %v9589_v28  ;;  %2647 = vperm.xlu2 %6874, %v6135_v58   ;;  %v13235_v58 = vld [vmem:[#allocation210_spill] sm:$0xff] }
 0x488   : > { %13207 = vst [vmem:[#allocation73_spill] sm:$0xff] %v9738_v17  ;;  %v3231_v53 = vmul.f32 %v13218_v23, %v9434_v27  ;;  %v13219_v35 = vld [vmem:[#allocation45_spill] sm:$0xff]  ;;  %v3232_v61 = vmul.f32 %v13221_v20, %v9430_v37  ;;  %v6197_v62 = vld [vmem:[%s12521_s3 + $0x580] sm:$0xff]  ;;  %v6134_v27 = vld [vmem:[%s12521_s3 + $0x388] sm:$0xff]  ;;  %v2783_v47 = vadd.f32 %v2719_v31, %v9575_v13  ;;  %v9796_v17 = vsel %vm3358_vm2, %v3293_v55, %v3423_v46 }
 0x489   : > { %13211 = vst [vmem:[#allocation155_spill] sm:$0xff] %v9751_v59  ;;  %v2721_v36 = vmul.f32 %v13220_v2, %v13219_v35  ;;  %v13222_v23 = vld [vmem:[#allocation184_spill] sm:$0xff]  ;;  %v13223_v35 = vld [vmem:[#allocation185_spill] sm:$0xff]  ;;  %v13224_v37 = vld [vmem:[#allocation187_spill] sm:$0xff]  ;;  %3150 = vperm.xlu1 %6873, %v6197_v62   ;;  %2642 = vperm.xlu0 %6872, %v6134_v27   ;;  %v9811_v55 = vsel %vm3357_vm3, %v3292_v7, %v3422_v9  ;;  %vm3359_vm4 = vcmp.gt.f32.partialorder %v3294_v38, 0.0 }
 0x48a   : > { %13217 = vst [vmem:[#allocation69_spill] sm:$0xff] %v9762_v34  ;;  %v9782_v25 = vmul.f32 %v13222_v23, %v9287_v6  ;;  %v9786_v2 = vmul.f32 %v13223_v35, %v9315_v29  ;;  %v9791_v15 = vmul.f32 %v13224_v37, %v9299_v56  ;;  %v13225_v20 = vld [vmem:[#allocation47_spill] sm:$0xff]  ;;  %v13226_v34 = vld [vmem:[#allocation217_spill] sm:$0xff]  ;;  %v13228_v6 = vld [vmem:[#allocation188_spill] sm:$0xff]  ;;  %v3295_v19 = vadd.f32 %v3231_v53, %v2782_v24  ;;  %v9822_v24 = vpop.permute.xlu1 %3025 }
 0x48b   : > { %v2720_v59 = vmul.f32 %v13226_v34, %v13225_v20  ;;  %13227 = vst [vmem:[#allocation157_spill] sm:$0xff] %v9796_v17  ;;  %v9800_v23 = vmul.f32 %v13228_v6, %v9327_v44  ;;  %v13229_v29 = vld [vmem:[#allocation191_spill] sm:$0xff]  ;;  %v13230_v56 = vld [vmem:[#allocation125_spill] sm:$0xff]  ;;  %v2785_v13 = vadd.f32 %v2721_v36, %v9603_v4  ;;  %v3424_v31 = vmul.f32 %v9743_v3, %v3294_v38  ;;  %v9814_v44 = vpop.permute.xlu2 %3070  ;;  %v13234_v34 = vld [vmem:[#allocation48_spill] sm:$0xff]  ;;  %v9824_v4 = vpop.permute.xlu0 %3020 }
 0x48c   : > { %v9804_v28 = vmul.f32 %v13229_v29, %v9341_v14  ;;  %v9808_v35 = vsel %vm1817_vm1, %v13230_v56, 0.0  ;;  %13232 = vst [vmem:[#allocation158_spill] sm:$0xff] %v9811_v55  ;;  %v3296_v46 = vadd.f32 %v3232_v61, %v2783_v47  ;;  %v2724_v14 = vmul.f32 %v13235_v58, %v13234_v34  ;;  %v13236_v62 = vld [vmem:[#allocation250_spill] sm:$0xff]  ;;  %v13237_v7 = vld [vmem:[#allocation51_spill] sm:$0xff]  ;;  %v13238_v36 = vld [vmem:[#allocation213_spill] sm:$0xff] }
 0x48d   : > { %13231 = vst [vmem:[#allocation74_spill] sm:$0xff] %v9808_v35  ;;  %v3689_v53 = vmul.f32 %v9796_v17, %v9796_v17  ;;  %v3233_v27 = vmul.f32 %v13236_v62, %v9404_v57  ;;  %v2727_v9 = vmul.f32 %v13238_v36, %v13237_v7  ;;  %v2784_v47 = vadd.f32 %v2720_v59, %v9615_v22  ;;  %v13239_v61 = vld [vmem:[#allocation54_spill] sm:$0xff]  ;;  %v13240_v37 = vld [vmem:[#allocation216_spill] sm:$0xff]  ;;  %v6199_v58 = vld [vmem:[%s12521_s3 + $0x590] sm:$0xff] }
 0x48e   : > { %13233 = vst [vmem:[#allocation156_spill] sm:$0xff] %v9814_v44  ;;  %v2730_v20 = vmul.f32 %v13240_v37, %v13239_v61  ;;  %v3688_v6 = vmul.f32 %v9811_v55, %v9811_v55  ;;  %v3425_v29 = vmul.f32 %v9743_v3, %v3295_v19  ;;  %v13241_v57 = vld [vmem:[#allocation240_spill] sm:$0xff]  ;;  %v3552_v34 = vsel %vm3550_vm5, %v9796_v17, 0.0  ;;  %v13242_v22 = vld [vmem:[#allocation49_spill] sm:$0xff]  ;;  %v13245_v17 = vld [vmem:[#allocation79_spill] sm:$0xff] }
 0x48f   : > { %v3234_v56 = vmul.f32 %v13241_v57, %v9450_v49  ;;  %v13243_v59 = vld [vmem:[#allocation221_spill] sm:$0xff]  ;;  %vm3360_vm6 = vcmp.gt.f32.partialorder %v3295_v19, 0.0  ;;  %v9844_v7 = vsel %vm3359_vm4, %v3294_v38, %v3424_v31  ;;  %v3426_v36 = vmul.f32 %v9743_v3, %v3296_v46  ;;  %v6136_v49 = vld [vmem:[%s12521_s3 + $0x398] sm:$0xff]  ;;  %v6198_v61 = vld [vmem:[%s12521_s3 + $0x588] sm:$0xff]  ;;  %3160 = vperm.xlu2 %6874, %v6199_v58  }
 0x490   : > { %v2722_v62 = vmul.f32 %v13243_v59, %v13242_v22  ;;  %13244 = vst [vmem:[#allocation72_spill] sm:$0xff] %v9844_v7  ;;  %v3551_v37 = vsel %vm3550_vm5, %v9811_v55, 0.0  ;;  %v3753_v57 = vsel %vm3550_vm5, %v3689_v53, 0.0  ;;  %v3297_v22 = vadd.f32 %v3233_v27, %v2784_v47  ;;  %v13247_v27 = vld [vmem:[#allocation50_spill] sm:$0xff]  ;;  %v13260_v55 = vld [vmem:[#allocation223_spill] sm:$0xff] }
 0x491   : > { %vm3361_vm7 = vcmp.gt.f32.partialorder %v3296_v46, 0.0  ;;  %v2788_v38 = vadd.f32 %v2724_v14, %v9619_v30  ;;  %v9858_v31 = vadd.f32 %v2727_v9, %v9637_v10  ;;  %v3553_v59 = vadd.f32 %v3552_v34, %v3551_v37  ;;  %2652 = vperm.xlu1 %6873, %v6136_v49   ;;  %3155 = vperm.xlu0 %6872, %v6198_v61   ;;  %v13248_v30 = vld [vmem:[#allocation220_spill] sm:$0xff] }
 0x492   : > { %v3235_v44 = vmul.f32 %v13245_v17, %v9446_v48  ;;  %v3752_v52 = vsel %vm3550_vm5, %v3688_v6, 0.0  ;;  %v9863_v8 = vsel %vm3360_vm6, %v3295_v19, %v3425_v29  ;;  %v3298_v35 = vadd.f32 %v3234_v56, %v2785_v13  ;;  %v13250_v19 = vld [vmem:[#allocation57_spill] sm:$0xff]  ;;  %v13251_v6 = vld [vmem:[#allocation219_spill] sm:$0xff]  ;;  %v9882_v34 = vpop.permute.xlu1 %3040  ;;  %v6138_v61 = vld [vmem:[%s12521_s3 + $0x3a8] sm:$0xff] }
 0x493   : > { %13246 = vst [vmem:[#allocation160_spill] sm:$0xff] %v9863_v8  ;;  %v3690_v53 = vmul.f32 %v9844_v7, %v9844_v7  ;;  %v2723_v14 = vmul.f32 %v13248_v30, %v13247_v27  ;;  %v2786_v10 = vadd.f32 %v2722_v62, %v9579_v16  ;;  %v3754_v9 = vadd.f32 %v3753_v57, %v3752_v52  ;;  %v2573_v48 = vpop.permute.xlu2 %2572  ;;  %v9884_v58 = vpop.permute.xlu0 %3035  ;;  %v13254_v27 = vld [vmem:[#allocation52_spill] sm:$0xff] }
 0x494   : > { %v9870_v47 = vsel %vm3361_vm7, %v3296_v46, %v3426_v36  ;;  %v9873_v17 = vadd.f32 %v2730_v20, %v9653_v41  ;;  %v9877_v13 = vmul.f32 %v13251_v6, %v13250_v19  ;;  %v3554_v29 = vsel %vm3550_vm5, %v9844_v7, 0.0  ;;  %v13252_v20 = vld [vmem:[#allocation243_spill] sm:$0xff]  ;;  %v13255_v30 = vld [vmem:[#allocation224_spill] sm:$0xff] }
 0x495   : > { %13249 = vst [vmem:[#allocation159_spill] sm:$0xff] %v9870_v47  ;;  %v3427_v56 = vmul.f32 %v9743_v3, %v3297_v22  ;;  %v3691_v16 = vmul.f32 %v9863_v8, %v9863_v8  ;;  %v3555_v52 = vadd.f32 %v3554_v29, %v3553_v59  ;;  %vm3362_vm8 = vcmp.gt.f32.partialorder %v3297_v22, 0.0  ;;  %v13257_v29 = vld [vmem:[#allocation12_spill] sm:$0xff] }
 0x496   : > { %v3299_v41 = vadd.f32 %v3235_v44, %v2786_v10  ;;  %v3428_v46 = vmul.f32 %v9743_v3, %v3298_v35  ;;  %v3237_v62 = vmul.f32 %v13252_v20, %v9466_v51  ;;  %v3755_v36 = vsel %vm3550_vm5, %v3690_v53, 0.0  ;;  %v13253_v44 = vld [vmem:[#allocation78_spill] sm:$0xff]  ;;  %v6137_v53 = vld [vmem:[%s12521_s3 + $0x3a0] sm:$0xff] }
 0x497   : > { %v3692_v49 = vmul.f32 %v9870_v47, %v9870_v47  ;;  %v2787_v37 = vadd.f32 %v2723_v14, %v9623_v54  ;;  %vm3363_vm9 = vcmp.gt.f32.partialorder %v3298_v35, 0.0  ;;  %v3756_v57 = vadd.f32 %v3755_v36, %v3754_v9  ;;  %v6200_v51 = vld [vmem:[%s12521_s3 + $0x598] sm:$0xff]  ;;  %2662 = vperm.xlu2 %6874, %v6138_v61  }
 0x498   : > { %v3236_v59 = vmul.f32 %v13253_v44, %v9422_v0  ;;  %v2725_v10 = vmul.f32 %v13255_v30, %v13254_v27  ;;  %v3556_v19 = vsel %vm3550_vm5, %v9863_v8, 0.0  ;;  %v9910_v54 = vsel %vm3362_vm8, %v3297_v22, %v3427_v56 }
 0x499   : > { %13256 = vst [vmem:[#allocation41_spill] sm:$0xff] %v9910_v54  ;;  %v3558_v14 = vsel %vm3550_vm5, %v9870_v47, 0.0  ;;  %v3757_v0 = vsel %vm3550_vm5, %v3691_v16, 0.0  ;;  %v3557_v9 = vadd.f32 %v3556_v19, %v3555_v52  ;;  %v3429_v6 = vmul.f32 %v9743_v3, %v3299_v41  ;;  %3165 = vperm.xlu1 %6873, %v6200_v51   ;;  %2657 = vperm.xlu0 %6872, %v6137_v53   ;;  %v13259_v19 = vld [vmem:[#allocation53_spill] sm:$0xff] }
 0x49a   : > { %v2750_v20 = vmul.f32 %v2573_v48, %v13257_v29  ;;  %v9917_v36 = vsel %vm3363_vm9, %v3298_v35, %v3428_v46  ;;  %v3301_v44 = vadd.f32 %v3237_v62, %v2788_v38  ;;  %v3759_v27 = vsel %vm3550_vm5, %v3692_v49, 0.0  ;;  %v9927_v38 = vpop.permute.xlu1 %3055 }
 0x49b   : > { %13258 = vst [vmem:[#allocation201_spill] sm:$0xff] %v9917_v36  ;;  %vm3364_vm10 = vcmp.gt.f32.partialorder %v3299_v41, 0.0  ;;  %v3693_v22 = vmul.f32 %v9910_v54, %v9910_v54  ;;  %v3559_v56 = vadd.f32 %v3558_v14, %v3557_v9  ;;  %v3758_v30 = vadd.f32 %v3757_v0, %v3756_v57  ;;  %v3086_v52 = vpop.permute.xlu2 %3085  ;;  %v9929_v46 = vpop.permute.xlu0 %3050  ;;  %v13263_v14 = vld [vmem:[#allocation262_spill] sm:$0xff]  ;;  %v13264_v0 = vld [vmem:[#allocation255_spill] sm:$0xff] }
 0x49c   : > { %v3300_v16 = vadd.f32 %v3236_v59, %v2787_v37  ;;  %v2726_v8 = vmul.f32 %v13260_v55, %v13259_v19  ;;  %v2789_v48 = vadd.f32 %v2725_v10, %v9583_v32  ;;  %v3238_v35 = vmul.f32 %v9353_v40, %v9454_v26  ;;  %v13262_v40 = vld [vmem:[#allocation246_spill] sm:$0xff] }
 0x49d   : > { %v3263_v62 = vmul.f32 %v3086_v52, %v9531_v12  ;;  %v3694_v49 = vmul.f32 %v9917_v36, %v9917_v36  ;;  %v3760_v61 = vadd.f32 %v3759_v27, %v3758_v30  ;;  %v9935_v37 = vsel %vm3364_vm10, %v3299_v41, %v3429_v6  ;;  %v6202_v12 = vld [vmem:[%s12521_s3 + $0x5a8] sm:$0xff]  ;;  %v13266_v27 = vld [vmem:[#allocation222_spill] sm:$0xff] }
 0x49e   : > { %13261 = vst [vmem:[#allocation248_spill] sm:$0xff] %v9935_v37  ;;  %v2814_v55 = vadd.f32 %v2750_v20, %v9786_v2  ;;  %vm3366_vm11 = vcmp.gt.f32.partialorder %v3301_v44, 0.0  ;;  %v3431_v32 = vmul.f32 %v9743_v3, %v3301_v44  ;;  %v3240_v26 = vmul.f32 %v13262_v40, %v9470_v45  ;;  %v6139_v2 = vld [vmem:[%s12521_s3 + $0x3b0] sm:$0xff]  ;;  %v6201_v45 = vld [vmem:[%s12521_s3 + $0x5a0] sm:$0xff]  ;;  %v13265_v20 = vld [vmem:[#allocation60_spill] sm:$0xff] }
 0x49f   : > { %v3560_v57 = vsel %vm3550_vm5, %v9910_v54, 0.0  ;;  %v3761_v59 = vsel %vm3550_vm5, %v3693_v22, 0.0  ;;  %v3430_v41 = vmul.f32 %v9743_v3, %v3300_v16  ;;  %vm3365_vm12 = vcmp.gt.f32.partialorder %v3300_v16, 0.0  ;;  %v13268_v30 = vld [vmem:[#allocation226_spill] sm:$0xff]  ;;  %3175 = vperm.xlu2 %6874, %v6202_v12   ;;  %v13270_v40 = vld [vmem:[#allocation227_spill] sm:$0xff] }
 0x4a0   : > { %v3561_v51 = vadd.f32 %v3560_v57, %v3559_v56  ;;  %v9948_v53 = vadd.f32 %v3263_v62, %v2814_v55  ;;  %v3695_v10 = vmul.f32 %v9935_v37, %v9935_v37  ;;  %v3239_v9 = vmul.f32 %v13264_v0, %v13263_v14  ;;  %v13267_v56 = vld [vmem:[#allocation56_spill] sm:$0xff]  ;;  %v13269_v55 = vld [vmem:[#allocation55_spill] sm:$0xff] }
 0x4a1   : > { %v3302_v6 = vadd.f32 %v3238_v35, %v2789_v48  ;;  %v9962_v29 = vadd.f32 %v9877_v13, %v9668_v33  ;;  %v2736_v22 = vmul.f32 %v13266_v27, %v13265_v20  ;;  %v2729_v52 = vmul.f32 %v13268_v30, %v13267_v56  ;;  %2667 = vperm.xlu1 %6873, %v6139_v2   ;;  %v13275_v0 = vld [vmem:[#allocation267_spill] sm:$0xff]  ;;  %v13278_v56 = vld [vmem:[#allocation58_spill] sm:$0xff] }
 0x4a2   : > { %v3762_v19 = vadd.f32 %v3761_v59, %v3760_v61  ;;  %v2790_v62 = vadd.f32 %v2726_v8, %v9649_v50  ;;  %v2728_v57 = vmul.f32 %v13270_v40, %v13269_v55  ;;  %v3562_v48 = vsel %vm3550_vm5, %v9917_v36, 0.0  ;;  %3170 = vperm.xlu0 %6872, %v6201_v45   ;;  %v2563_v2 = vpop.permute.xlu1 %2562  ;;  %v6141_v20 = vld [vmem:[%s12521_s3 + $0x3c0] sm:$0xff]  ;;  %v6140_v55 = vld [vmem:[%s12521_s3 + $0x3b8] sm:$0xff] }
 0x4a3   : > { %v3763_v35 = vsel %vm3550_vm5, %v3694_v49, 0.0  ;;  %v9975_v33 = vsel %vm3366_vm11, %v3301_v44, %v3431_v32  ;;  %v3304_v13 = vadd.f32 %v3240_v26, %v9858_v31  ;;  %v9979_v61 = vsel %vm3365_vm12, %v3300_v16, %v3430_v41  ;;  %v2588_v8 = vpop.permute.xlu2 %2587  ;;  %v9985_v45 = vpop.permute.xlu0 %3065  ;;  %v13273_v32 = vld [vmem:[#allocation118_spill] sm:$0xff]  ;;  %v13276_v27 = vld [vmem:[#allocation59_spill] sm:$0xff] }
 0x4a4   : > { %13271 = vst [vmem:[#allocation77_spill] sm:$0xff] %v9975_v33  ;;  %v3564_v50 = vsel %vm3550_vm5, %v9935_v37, 0.0  ;;  %v3563_v12 = vadd.f32 %v3562_v48, %v3561_v51  ;;  %v3765_v59 = vsel %vm3550_vm5, %v3695_v10, 0.0  ;;  %v3303_v14 = vadd.f32 %v3239_v9, %v2790_v62  ;;  %v13274_v10 = vld [vmem:[#allocation266_spill] sm:$0xff]  ;;  %v6203_v62 = vld [vmem:[%s12521_s3 + $0x5b0] sm:$0xff]  ;;  %v13281_v48 = vld [vmem:[#allocation15_spill] sm:$0xff] }
 0x4a5   : > { %13272 = vst [vmem:[#allocation161_spill] sm:$0xff] %v9979_v61  ;;  %v3432_v49 = vmul.f32 %v9743_v3, %v3302_v6  ;;  %v9988_v44 = vadd.f32 %v2736_v22, %v9688_v43  ;;  %v2793_v31 = vadd.f32 %v2729_v52, %v9657_v60  ;;  %v3764_v16 = vadd.f32 %v3763_v35, %v3762_v19  ;;  %v13277_v43 = vld [vmem:[#allocation229_spill] sm:$0xff]  ;;  %v13279_v60 = vld [vmem:[#allocation230_spill] sm:$0xff]  ;;  %v13407_v37 = vld [vmem:[#allocation131_spill] sm:$0xff] }
 0x4a6   : > { %vm3367_vm13 = vcmp.gt.f32.partialorder %v3302_v6, 0.0  ;;  %v2792_v26 = vadd.f32 %v2728_v57, %v13273_v32  ;;  %v3696_v51 = vmul.f32 %v9979_v61, %v9979_v61  ;;  %v3565_v41 = vadd.f32 %v3564_v50, %v3563_v12  ;;  %v13283_v32 = vld [vmem:[#allocation100_spill] sm:$0xff] }
 0x4a7   : > { %v3241_v9 = vmul.f32 %v13275_v0, %v13274_v10  ;;  %v2732_v22 = vmul.f32 %v13277_v43, %v13276_v27  ;;  %v2731_v30 = vmul.f32 %v13279_v60, %v13278_v56  ;;  %v3697_v52 = vmul.f32 %v9975_v33, %v9975_v33  ;;  %2677 = vperm.xlu2 %6874, %v6141_v20   ;;  %v13284_v10 = vld [vmem:[#allocation249_spill] sm:$0xff] }
 0x4a8   : > { %v3766_v19 = vadd.f32 %v3765_v59, %v3764_v16  ;;  %vm3369_vm14 = vcmp.gt.f32.partialorder %v3304_v13, 0.0  ;;  %v3433_v40 = vmul.f32 %v9743_v3, %v3303_v14  ;;  %v10012_v57 = vsel %vm3367_vm13, %v3302_v6, %v3432_v49  ;;  %v13282_v59 = vld [vmem:[#allocation40_spill] sm:$0xff] }
 0x4a9   : > { %13280 = vst [vmem:[#allocation71_spill] sm:$0xff] %v10012_v57  ;;  %v2753_v35 = vmul.f32 %v2588_v8, %v13281_v48  ;;  %v3434_v50 = vmul.f32 %v9743_v3, %v3304_v13  ;;  %v3566_v12 = vsel %vm3550_vm5, %v9979_v61, 0.0  ;;  %vm3368_vm15 = vcmp.gt.f32.partialorder %v3303_v14, 0.0  ;;  %3180 = vperm.xlu1 %6873, %v6203_v62   ;;  %v13286_v48 = vld [vmem:[#allocation263_spill] sm:$0xff]  ;;  %v13413_v61 = vld [vmem:[#allocation132_spill] sm:$0xff] }
 0x4aa   : > { %v2748_v16 = vmul.f32 %v2563_v2, %v13282_v59  ;;  %v3243_v0 = vmul.f32 %v13284_v10, %v13283_v32  ;;  %v3767_v27 = vsel %vm3550_vm5, %v3696_v51, 0.0  ;;  %v3567_v43 = vadd.f32 %v3566_v12, %v3565_v41  ;;  %2672 = vperm.xlu0 %6872, %v6140_v55   ;;  %v13287_v59 = vld [vmem:[#allocation101_spill] sm:$0xff]  ;;  %v13290_v12 = vld [vmem:[#allocation115_spill] sm:$0xff] }
 0x4ab   : > { %v3305_v56 = vadd.f32 %v3241_v9, %v2792_v26  ;;  %v3568_v6 = vsel %vm3550_vm5, %v9975_v33, 0.0  ;;  %v3769_v8 = vsel %vm3550_vm5, %v3697_v52, 0.0  ;;  %v3768_v49 = vadd.f32 %v3767_v27, %v3766_v19  ;;  %v3101_v2 = vpop.permute.xlu2 %3100  ;;  %v3076_v26 = vpop.permute.xlu1 %3075  ;;  %v13288_v9 = vld [vmem:[#allocation112_spill] sm:$0xff] }
 0x4ac   : > { %v3698_v60 = vmul.f32 %v10012_v57, %v10012_v57  ;;  %v10027_v20 = vsel %vm3368_vm15, %v3303_v14, %v3433_v40  ;;  %v3242_v32 = vmul.f32 %v13287_v59, %v13286_v48  ;;  %v2817_v51 = vadd.f32 %v2753_v35, %v9800_v23  ;;  %v2568_v41 = vpop.permute.xlu0 %2567  ;;  %v6205_v35 = vld [vmem:[%s12521_s3 + $0x5c0] sm:$0xff]  ;;  %v13292_v48 = vld [vmem:[#allocation148_spill] sm:$0xff] }
 0x4ad   : > { %13285 = vst [vmem:[#allocation163_spill] sm:$0xff] %v10027_v20  ;;  %v3266_v62 = vmul.f32 %v3101_v2, %v13288_v9  ;;  %v10034_v55 = vsel %vm3369_vm14, %v3304_v13, %v3434_v50  ;;  %v3570_v52 = vsel %vm3550_vm5, %v10012_v57, 0.0  ;;  %v2812_v19 = vadd.f32 %v2748_v16, %v9758_v39  ;;  %v6204_v16 = vld [vmem:[%s12521_s3 + $0x5b8] sm:$0xff]  ;;  %v13291_v2 = vld [vmem:[#allocation97_spill] sm:$0xff] }
 0x4ae   : > { %13289 = vst [vmem:[#allocation164_spill] sm:$0xff] %v10034_v55  ;;  %v3261_v14 = vmul.f32 %v3076_v26, %v13290_v12  ;;  %v3307_v40 = vadd.f32 %v3243_v0, %v9873_v17  ;;  %v3569_v10 = vadd.f32 %v3568_v6, %v3567_v43  ;;  %v3435_v27 = vmul.f32 %v9743_v3, %v3305_v56  ;;  %v6142_v17 = vld [vmem:[%s12521_s3 + $0x3c8] sm:$0xff]  ;;  %v13415_v57 = vld [vmem:[#allocation134_spill] sm:$0xff] }
 0x4af   : > { %v10042_v23 = vadd.f32 %v3266_v62, %v2817_v51  ;;  %v3699_v13 = vmul.f32 %v10027_v20, %v10027_v20  ;;  %v3771_v50 = vsel %vm3550_vm5, %v3698_v60, 0.0  ;;  %vm3370_vm2 = vcmp.gt.f32.partialorder %v3305_v56, 0.0  ;;  %v13293_v51 = vld [vmem:[#allocation70_spill] sm:$0xff]  ;;  %v13294_v60 = vld [vmem:[#allocation141_spill] sm:$0xff]  ;;  %3190 = vperm.xlu2 %6874, %v6205_v35  }
 0x4b0   : > { %v10050_v39 = vadd.f32 %v3261_v14, %v2812_v19  ;;  %v3571_v0 = vadd.f32 %v3570_v52, %v3569_v10  ;;  %v3770_v43 = vadd.f32 %v3769_v8, %v3768_v49  ;;  %v3306_v6 = vadd.f32 %v3242_v32, %v2793_v31  ;;  %v13295_v62 = vld [vmem:[#allocation62_spill] sm:$0xff]  ;;  %v13296_v19 = vld [vmem:[#allocation232_spill] sm:$0xff]  ;;  %v13297_v14 = vld [vmem:[#allocation5_spill] sm:$0xff] }
 0x4b1   : > { %v3244_v59 = vmul.f32 %v13292_v48, %v13291_v2  ;;  %v2796_v26 = vadd.f32 %v2732_v22, %v13293_v51  ;;  %v2795_v9 = vadd.f32 %v2731_v30, %v13294_v60  ;;  %v10064_v12 = vmul.f32 %v13296_v19, %v13295_v62  ;;  %2682 = vperm.xlu1 %6873, %v6142_v17   ;;  %v13299_v30 = vld [vmem:[#allocation104_spill] sm:$0xff]  ;;  %v13302_v2 = vld [vmem:[#allocation9_spill] sm:$0xff]  ;;  %v13303_v60 = vld [vmem:[#allocation119_spill] sm:$0xff] }
 0x4b2   : > { %v2749_v7 = vmul.f32 %v2568_v41, %v13297_v14  ;;  %v3700_v54 = vmul.f32 %v10034_v55, %v10034_v55  ;;  %vm3372_vm3 = vcmp.gt.f32.partialorder %v3307_v40, 0.0  ;;  %v3772_v8 = vadd.f32 %v3771_v50, %v3770_v43  ;;  %3185 = vperm.xlu0 %6872, %v6204_v16   ;;  %v13300_v49 = vld [vmem:[#allocation76_spill] sm:$0xff]  ;;  %v13304_v19 = vld [vmem:[#allocation61_spill] sm:$0xff] }
 0x4b3   : > { %v10070_v31 = vsel %vm3370_vm2, %v3305_v56, %v3435_v27  ;;  %v3437_v22 = vmul.f32 %v9743_v3, %v3307_v40  ;;  %v3246_v32 = vmul.f32 %v13300_v49, %v13299_v30  ;;  %v3572_v52 = vsel %vm3550_vm5, %v10027_v20, 0.0  ;;  %v2603_v10 = vpop.permute.xlu2 %2602  ;;  %v2578_v56 = vpop.permute.xlu1 %2577  ;;  %v13301_v16 = vld [vmem:[#allocation264_spill] sm:$0xff]  ;;  %v6144_v30 = vld [vmem:[%s12521_s3 + $0x3d8] sm:$0xff] }
 0x4b4   : > { %13298 = vst [vmem:[#allocation162_spill] sm:$0xff] %v10070_v31  ;;  %v3773_v41 = vsel %vm3550_vm5, %v3699_v13, 0.0  ;;  %v3573_v35 = vadd.f32 %v3572_v52, %v3571_v0  ;;  %vm3371_vm4 = vcmp.gt.f32.partialorder %v3306_v6, 0.0  ;;  %v3436_v50 = vmul.f32 %v9743_v3, %v3306_v6  ;;  %v3081_v27 = vpop.permute.xlu0 %3080  ;;  %v13305_v13 = vld [vmem:[#allocation233_spill] sm:$0xff] }
 0x4b5   : > { %v3308_v43 = vadd.f32 %v3244_v59, %v2795_v9  ;;  %v3701_v17 = vmul.f32 %v10070_v31, %v10070_v31  ;;  %v3245_v48 = vmul.f32 %v13302_v2, %v13301_v16  ;;  %v2813_v51 = vadd.f32 %v2749_v7, %v9700_v42  ;;  %v13309_v2 = vld [vmem:[#allocation16_spill] sm:$0xff] }
 0x4b6   : > { %v3262_v62 = vmul.f32 %v3081_v27, %v13303_v60  ;;  %v2734_v14 = vmul.f32 %v13305_v13, %v13304_v19  ;;  %v3574_v0 = vsel %vm3550_vm5, %v10034_v55, 0.0  ;;  %v3775_v59 = vsel %vm3550_vm5, %v3700_v54, 0.0  ;;  %v6206_v27 = vld [vmem:[%s12521_s3 + $0x5c8] sm:$0xff]  ;;  %v6143_v54 = vld [vmem:[%s12521_s3 + $0x3d0] sm:$0xff]  ;;  %v13310_v19 = vld [vmem:[#allocation103_spill] sm:$0xff] }
 0x4b7   : > { %v3774_v9 = vadd.f32 %v3773_v41, %v3772_v8  ;;  %v10094_v49 = vsel %vm3372_vm3, %v3307_v40, %v3437_v22  ;;  %v3310_v42 = vadd.f32 %v3246_v32, %v9962_v29  ;;  %v3576_v7 = vsel %vm3550_vm5, %v10070_v31, 0.0  ;;  %v13308_v29 = vld [vmem:[#allocation18_spill] sm:$0xff]  ;;  %2692 = vperm.xlu2 %6874, %v6144_v30  }
 0x4b8   : > { %13306 = vst [vmem:[#allocation75_spill] sm:$0xff] %v10094_v49  ;;  %v10099_v52 = vadd.f32 %v3262_v62, %v2813_v51  ;;  %v10108_v8 = vsel %vm3371_vm4, %v3306_v6, %v3436_v50  ;;  %v3575_v40 = vadd.f32 %v3574_v0, %v3573_v35  ;;  %v3438_v22 = vmul.f32 %v9743_v3, %v3308_v43  ;;  %v13311_v6 = vld [vmem:[#allocation124_spill] sm:$0xff]  ;;  %v13312_v50 = vld [vmem:[#allocation147_spill] sm:$0xff] }
 0x4b9   : > { %13307 = vst [vmem:[#allocation166_spill] sm:$0xff] %v10108_v8  ;;  %v2756_v32 = vmul.f32 %v2603_v10, %v13308_v29  ;;  %v3777_v41 = vsel %vm3550_vm5, %v3701_v17, 0.0  ;;  %v3309_v16 = vadd.f32 %v3245_v48, %v2796_v26  ;;  %vm3373_vm6 = vcmp.gt.f32.partialorder %v3308_v43, 0.0  ;;  %3195 = vperm.xlu1 %6873, %v6206_v27   ;;  %v13315_v29 = vld [vmem:[#allocation138_spill] sm:$0xff] }
 0x4ba   : > { %v2751_v51 = vmul.f32 %v2578_v56, %v13309_v2  ;;  %v3577_v60 = vadd.f32 %v3576_v7, %v3575_v40  ;;  %v3776_v62 = vadd.f32 %v3775_v59, %v3774_v9  ;;  %v3247_v13 = vmul.f32 %v9747_v5, %v13310_v19  ;;  %2687 = vperm.xlu0 %6872, %v6143_v54   ;;  %v13314_v7 = vld [vmem:[#allocation111_spill] sm:$0xff] }
 0x4bb   : > { %v10118_v35 = vsel %vm1817_vm1, %v13311_v6, 0.0  ;;  %v2798_v10 = vadd.f32 %v2734_v14, %v13312_v50  ;;  %v3703_v26 = vmul.f32 %v10094_v49, %v10094_v49  ;;  %v3440_v17 = vmul.f32 %v9743_v3, %v3310_v42  ;;  %v3116_v48 = vpop.permute.xlu2 %3115  ;;  %v3091_v9 = vpop.permute.xlu1 %3090 }
 0x4bc   : > { %v3702_v56 = vmul.f32 %v10108_v8, %v10108_v8  ;;  %v3778_v0 = vadd.f32 %v3777_v41, %v3776_v62  ;;  %v10126_v59 = vsel %vm3373_vm6, %v3308_v43, %v3438_v22  ;;  %v2820_v5 = vadd.f32 %v2756_v32, %v9804_v28  ;;  %v2583_v30 = vpop.permute.xlu0 %2582  ;;  %v6208_v28 = vld [vmem:[%s12521_s3 + $0x5d8] sm:$0xff]  ;;  %v13316_v22 = vld [vmem:[#allocation107_spill] sm:$0xff]  ;;  %v13317_v32 = vld [vmem:[#allocation253_spill] sm:$0xff] }
 0x4bd   : > { %13313 = vst [vmem:[#allocation165_spill] sm:$0xff] %v10126_v59  ;;  %v3269_v27 = vmul.f32 %v3116_v48, %v13314_v7  ;;  %v3578_v14 = vsel %vm3550_vm5, %v10108_v8, 0.0  ;;  %v3439_v54 = vmul.f32 %v9743_v3, %v3309_v16  ;;  %v2815_v40 = vadd.f32 %v2751_v51, %v9782_v25  ;;  %v6145_v51 = vld [vmem:[%s12521_s3 + $0x3e0] sm:$0xff]  ;;  %v13318_v48 = vld [vmem:[#allocation265_spill] sm:$0xff] }
 0x4be   : > { %v3264_v2 = vmul.f32 %v3091_v9, %v13315_v29  ;;  %v3579_v19 = vadd.f32 %v3578_v14, %v3577_v60  ;;  %vm3374_vm7 = vcmp.gt.f32.partialorder %v3309_v16, 0.0  ;;  %v3311_v41 = vadd.f32 %v3247_v13, %v2798_v10  ;;  %v6207_v60 = vld [vmem:[%s12521_s3 + $0x5d0] sm:$0xff]  ;;  %v13322_v29 = vld [vmem:[#allocation236_spill] sm:$0xff] }
 0x4bf   : > { %v10135_v43 = vadd.f32 %v3269_v27, %v2820_v5  ;;  %v3249_v62 = vmul.f32 %v13317_v32, %v13316_v22  ;;  %v3779_v6 = vsel %vm3550_vm5, %v3702_v56, 0.0  ;;  %v3704_v50 = vmul.f32 %v10126_v59, %v10126_v59  ;;  %v13320_v27 = vld [vmem:[#allocation6_spill] sm:$0xff]  ;;  %3205 = vperm.xlu2 %6874, %v6208_v28  }
 0x4c0   : > { %v10145_v25 = vadd.f32 %v3264_v2, %v2815_v40  ;;  %v2799_v13 = vadd.f32 %v10064_v12, %v9692_v18  ;;  %vm3375_vm8 = vcmp.gt.f32.partialorder %v3310_v42, 0.0  ;;  %v3780_v10 = vadd.f32 %v3779_v6, %v3778_v0  ;;  %v13321_v40 = vld [vmem:[#allocation64_spill] sm:$0xff] }
 0x4c1   : > { %v3248_v56 = vmul.f32 %v9745_v63, %v13318_v48  ;;  %v3580_v5 = vsel %vm3550_vm5, %v10094_v49, 0.0  ;;  %v10159_v9 = vsel %vm3374_vm7, %v3309_v16, %v3439_v54  ;;  %v3582_v7 = vsel %vm3550_vm5, %v10126_v59, 0.0  ;;  %2697 = vperm.xlu1 %6873, %v6145_v51   ;;  %v13324_v48 = vld [vmem:[#allocation63_spill] sm:$0xff]  ;;  %v13325_v51 = vld [vmem:[#allocation225_spill] sm:$0xff] }
 0x4c2   : > { %13319 = vst [vmem:[#allocation234_spill] sm:$0xff] %v10159_v9  ;;  %v2752_v14 = vmul.f32 %v2583_v30, %v13320_v27  ;;  %v2737_v2 = vmul.f32 %v13322_v29, %v13321_v40  ;;  %v3781_v18 = vsel %vm3550_vm5, %v3703_v26, 0.0  ;;  %v3581_v12 = vadd.f32 %v3580_v5, %v3579_v19  ;;  %3200 = vperm.xlu0 %6872, %v6207_v60   ;;  %v13328_v5 = vld [vmem:[#allocation235_spill] sm:$0xff] }
 0x4c3   : > { %v3441_v0 = vmul.f32 %v9743_v3, %v3311_v41  ;;  %v10168_v63 = vsel %vm3375_vm8, %v3310_v42, %v3440_v17  ;;  %v3313_v16 = vadd.f32 %v3249_v62, %v9988_v44  ;;  %v3783_v54 = vsel %vm3550_vm5, %v3704_v50, 0.0  ;;  %v10172_v22 = vpop.permute.xlu2 %2617  ;;  %v2593_v19 = vpop.permute.xlu1 %2592  ;;  %v13326_v42 = vld [vmem:[#allocation106_spill] sm:$0xff]  ;;  %v13327_v50 = vld [vmem:[#allocation65_spill] sm:$0xff]  ;;  %v13329_v40 = vld [vmem:[#allocation151_spill] sm:$0xff] }
 0x4c4   : > { %13323 = vst [vmem:[#allocation167_spill] sm:$0xff] %v10168_v63  ;;  %vm3376_vm9 = vcmp.gt.f32.partialorder %v3311_v41, 0.0  ;;  %v3705_v30 = vmul.f32 %v10159_v9, %v10159_v9  ;;  %v3583_v28 = vadd.f32 %v3582_v7, %v3581_v12  ;;  %v3782_v32 = vadd.f32 %v3781_v18, %v3780_v10  ;;  %v3096_v6 = vpop.permute.xlu0 %3095  ;;  %v13426_v49 = vld [vmem:[#allocation143_spill] sm:$0xff] }
 0x4c5   : > { %v3312_v26 = vadd.f32 %v3248_v56, %v2799_v13  ;;  %v2739_v60 = vmul.f32 %v13325_v51, %v13324_v48  ;;  %v3250_v17 = vmul.f32 %v9824_v4, %v13326_v42  ;;  %v2816_v44 = vadd.f32 %v2752_v14, %v9714_v1  ;;  %v6147_v13 = vld [vmem:[%s12521_s3 + $0x3f0] sm:$0xff]  ;;  %v6209_v4 = vld [vmem:[%s12521_s3 + $0x5e0] sm:$0xff]  ;;  %v13333_v42 = vld [vmem:[#allocation238_spill] sm:$0xff] }
 0x4c6   : > { %v3265_v62 = vmul.f32 %v3096_v6, %v9718_v21  ;;  %v2738_v27 = vmul.f32 %v13328_v5, %v13327_v50  ;;  %v2801_v29 = vadd.f32 %v2737_v2, %v13329_v40  ;;  %v3784_v7 = vadd.f32 %v3783_v54, %v3782_v32  ;;  %v13331_v32 = vld [vmem:[#allocation19_spill] sm:$0xff] }
 0x4c7   : > { %v10185_v10 = vsel %vm3376_vm9, %v3311_v41, %v3441_v0  ;;  %v3706_v56 = vmul.f32 %v10168_v63, %v10168_v63  ;;  %vm3378_vm10 = vcmp.gt.f32.partialorder %v3313_v16, 0.0  ;;  %v3584_v1 = vsel %vm3550_vm5, %v10159_v9, 0.0  ;;  %v6146_v41 = vld [vmem:[%s12521_s3 + $0x3e8] sm:$0xff]  ;;  %2707 = vperm.xlu2 %6874, %v6147_v13   ;;  %v13332_v51 = vld [vmem:[#allocation67_spill] sm:$0xff] }
 0x4c8   : > { %13330 = vst [vmem:[#allocation169_spill] sm:$0xff] %v10185_v10  ;;  %v10194_v21 = vadd.f32 %v3265_v62, %v2816_v44  ;;  %v3443_v14 = vmul.f32 %v9743_v3, %v3313_v16  ;;  %v3785_v2 = vsel %vm3550_vm5, %v3705_v30, 0.0  ;;  %v3585_v18 = vadd.f32 %v3584_v1, %v3583_v28  ;;  %v13334_v30 = vld [vmem:[#allocation128_spill] sm:$0xff]  ;;  %v13335_v50 = vld [vmem:[#allocation39_spill] sm:$0xff] }
 0x4c9   : > { %v3442_v12 = vmul.f32 %v9743_v3, %v3312_v26  ;;  %vm3377_vm11 = vcmp.gt.f32.partialorder %v3312_v26, 0.0  ;;  %v3707_v0 = vmul.f32 %v10185_v10, %v10185_v10  ;;  %v3314_v54 = vadd.f32 %v3250_v17, %v2801_v29  ;;  %3210 = vperm.xlu1 %6873, %v6209_v4   ;;  %v13336_v5 = vld [vmem:[#allocation239_spill] sm:$0xff] }
 0x4ca   : > { %v2754_v6 = vmul.f32 %v2593_v19, %v13331_v32  ;;  %v2802_v48 = vadd.f32 %v2738_v27, %v9710_v11  ;;  %v2741_v44 = vmul.f32 %v13333_v42, %v13332_v51  ;;  %v3786_v62 = vadd.f32 %v3785_v2, %v3784_v7  ;;  %2702 = vperm.xlu0 %6872, %v6146_v41   ;;  %v13337_v11 = vld [vmem:[#allocation98_spill] sm:$0xff] }
 0x4cb   : > { %v10213_v28 = vsel %vm1817_vm1, %v13334_v30, 0.0  ;;  %v2740_v40 = vmul.f32 %v13336_v5, %v13335_v50  ;;  %v3586_v17 = vsel %vm3550_vm5, %v10168_v63, 0.0  ;;  %v3588_v19 = vsel %vm3550_vm5, %v10185_v10, 0.0  ;;  %v10223_v29 = vpop.permute.xlu2 %3130  ;;  %v3106_v41 = vpop.permute.xlu1 %3105  ;;  %v13341_v50 = vld [vmem:[#allocation110_spill] sm:$0xff]  ;;  %v13342_v5 = vld [vmem:[#allocation96_spill] sm:$0xff] }
 0x4cc   : > { %v3251_v27 = vmul.f32 %v9822_v24, %v13337_v11  ;;  %v3787_v7 = vsel %vm3550_vm5, %v3706_v56, 0.0  ;;  %v10227_v13 = vsel %vm3378_vm10, %v3313_v16, %v3443_v14  ;;  %v10230_v1 = vsel %vm3377_vm11, %v3312_v26, %v3442_v12  ;;  %v2598_v2 = vpop.permute.xlu0 %2597  ;;  %v13340_v24 = vld [vmem:[#allocation74_spill] sm:$0xff]  ;;  %v6211_v26 = vld [vmem:[%s12521_s3 + $0x5f0] sm:$0xff] }
 0x4cd   : > { %13338 = vst [vmem:[#allocation170_spill] sm:$0xff] %v10227_v13  ;;  %v3587_v4 = vadd.f32 %v3586_v17, %v3585_v18  ;;  %v3789_v32 = vsel %vm3550_vm5, %v3707_v0, 0.0  ;;  %v3444_v51 = vmul.f32 %v9743_v3, %v3314_v54  ;;  %v2818_v42 = vadd.f32 %v2754_v6, %v9791_v15  ;;  %v13343_v12 = vld [vmem:[#allocation109_spill] sm:$0xff]  ;;  %v6148_v6 = vld [vmem:[%s12521_s3 + $0x3f8] sm:$0xff]  ;;  %v13344_v17 = vld [vmem:[#allocation68_spill] sm:$0xff] }
 0x4ce   : > { %13339 = vst [vmem:[#allocation168_spill] sm:$0xff] %v10230_v1  ;;  %v3267_v30 = vmul.f32 %v3106_v41, %v13340_v24  ;;  %v3252_v56 = vmul.f32 %v13342_v5, %v13341_v50  ;;  %v3788_v16 = vadd.f32 %v3787_v7, %v3786_v62  ;;  %vm3379_vm12 = vcmp.gt.f32.partialorder %v3314_v54, 0.0  ;;  %v6210_v62 = vld [vmem:[%s12521_s3 + $0x5e8] sm:$0xff]  ;;  %v13345_v7 = vld [vmem:[#allocation66_spill] sm:$0xff]  ;;  %v13347_v24 = vld [vmem:[#allocation153_spill] sm:$0xff] }
 0x4cf   : > { %v3589_v11 = vadd.f32 %v3588_v19, %v3587_v4  ;;  %v3708_v14 = vmul.f32 %v10230_v1, %v10230_v1  ;;  %v3315_v18 = vadd.f32 %v3251_v27, %v2802_v48  ;;  %v3253_v0 = vmul.f32 %v9884_v58, %v13343_v12  ;;  %v13346_v4 = vld [vmem:[#allocation228_spill] sm:$0xff]  ;;  %v13348_v50 = vld [vmem:[#allocation150_spill] sm:$0xff]  ;;  %3220 = vperm.xlu2 %6874, %v6211_v26  }
 0x4d0   : > { %v10245_v15 = vadd.f32 %v3267_v30, %v2818_v42  ;;  %v2803_v19 = vadd.f32 %v2739_v60, %v13344_v17  ;;  %v2742_v41 = vmul.f32 %v13346_v4, %v13345_v7  ;;  %v2805_v48 = vadd.f32 %v2741_v44, %v13347_v24  ;;  %v13350_v5 = vld [vmem:[#allocation8_spill] sm:$0xff]  ;;  %v13351_v7 = vld [vmem:[#allocation127_spill] sm:$0xff]  ;;  %v13365_v63 = vld [vmem:[#allocation154_spill] sm:$0xff] }
 0x4d1   : > { %v3790_v27 = vadd.f32 %v3789_v32, %v3788_v16  ;;  %v2804_v58 = vadd.f32 %v2740_v40, %v13348_v50  ;;  %v3590_v42 = vsel %vm3550_vm5, %v10230_v1, 0.0  ;;  %v10260_v30 = vsel %vm3379_vm12, %v3314_v54, %v3444_v51  ;;  %2712 = vperm.xlu1 %6873, %v6148_v6   ;;  %v13352_v40 = vld [vmem:[#allocation7_spill] sm:$0xff]  ;;  %v13353_v32 = vld [vmem:[#allocation241_spill] sm:$0xff]  ;;  %v13366_v1 = vld [vmem:[#allocation122_spill] sm:$0xff] }
 0x4d2   : > { %13349 = vst [vmem:[#allocation171_spill] sm:$0xff] %v10260_v30  ;;  %v2755_v12 = vmul.f32 %v2598_v2, %v13350_v5  ;;  %v3709_v9 = vmul.f32 %v10227_v13, %v10227_v13  ;;  %v3316_v60 = vadd.f32 %v3252_v56, %v2803_v19  ;;  %v3591_v17 = vadd.f32 %v3590_v42, %v3589_v11  ;;  %v13354_v24 = vld [vmem:[#allocation99_spill] sm:$0xff]  ;;  %v13355_v50 = vld [vmem:[#allocation73_spill] sm:$0xff]  ;;  %v13357_v5 = vld [vmem:[#allocation242_spill] sm:$0xff] }
 0x4d3   : > { %3215 = vperm.xlu0 %6872, %v6210_v62   ;;  %v10267_v44 = vsel %vm1817_vm1, %v13351_v7, 0.0  ;;  %v2744_v16 = vmul.f32 %v13353_v32, %v13352_v40  ;;  %v3791_v54 = vsel %vm3550_vm5, %v3708_v14, 0.0  ;;  %v3445_v51 = vmul.f32 %v9743_v3, %v3315_v18  ;;  %v10273_v26 = vpop.permute.xlu2 %2632  ;;  %v2608_v62 = vpop.permute.xlu1 %2607  ;;  %v13356_v42 = vld [vmem:[#allocation3_spill] sm:$0xff] }
 0x4d4   : > { %v3317_v2 = vadd.f32 %v3253_v0, %v2804_v58  ;;  %v3592_v56 = vsel %vm3550_vm5, %v10227_v13, 0.0  ;;  %v3792_v11 = vadd.f32 %v3791_v54, %v3790_v27  ;;  %vm3380_vm13 = vcmp.gt.f32.partialorder %v3315_v18, 0.0  ;;  %v3111_v19 = vpop.permute.xlu0 %3110 }
 0x4d5   : > { %v3710_v6 = vmul.f32 %v10260_v30, %v10260_v30  ;;  %v3594_v4 = vsel %vm3550_vm5, %v10260_v30, 0.0  ;;  %v3254_v14 = vmul.f32 %v9882_v34, %v13354_v24  ;;  %v2819_v0 = vadd.f32 %v2755_v12, %v13355_v50  ;;  %v6212_v34 = vld [vmem:[%s12521_s3 + $0x5f8] sm:$0xff]  ;;  %v13360_v12 = vld [vmem:[#allocation144_spill] sm:$0xff]  ;;  %v13361_v50 = vld [vmem:[#allocation113_spill] sm:$0xff] }
 0x4d6   : > { %v3268_v58 = vmul.f32 %v3111_v19, %v10118_v35  ;;  %v2743_v7 = vmul.f32 %v13357_v5, %v13356_v42  ;;  %v3793_v27 = vsel %vm3550_vm5, %v3709_v9, 0.0  ;;  %vm3381_vm14 = vcmp.gt.f32.partialorder %v3316_v60, 0.0  ;;  %v13359_v35 = vld [vmem:[#allocation108_spill] sm:$0xff] }
 0x4d7   : > { %v3593_v40 = vadd.f32 %v3592_v56, %v3591_v17  ;;  %v3446_v32 = vmul.f32 %v9743_v3, %v3316_v60  ;;  %v10289_v54 = vsel %vm3380_vm13, %v3315_v18, %v3445_v51  ;;  %v3447_v59 = vmul.f32 %v9743_v3, %v3317_v2  ;;  %v13362_v51 = vld [vmem:[#allocation22_spill] sm:$0xff] }
 0x4d8   : > { %13358 = vst [vmem:[#allocation44_spill] sm:$0xff] %v10289_v54  ;;  %v10292_v10 = vadd.f32 %v3268_v58, %v2819_v0  ;;  %v3255_v19 = vmul.f32 %v13360_v12, %v13359_v35  ;;  %v3795_v9 = vsel %vm3550_vm5, %v3710_v6, 0.0  ;;  %vm3382_vm15 = vcmp.gt.f32.partialorder %v3317_v2, 0.0  ;;  %v13363_v0 = vld [vmem:[#allocation82_spill] sm:$0xff] }
 0x4d9   : > { %v3595_v24 = vadd.f32 %v3594_v4, %v3593_v40  ;;  %v3794_v17 = vadd.f32 %v3793_v27, %v3792_v11  ;;  %v3318_v56 = vadd.f32 %v3254_v14, %v2805_v48  ;;  %v3256_v18 = vmul.f32 %v9929_v46, %v13361_v50  ;;  %v13364_v58 = vld [vmem:[#allocation190_spill] sm:$0xff]  ;;  %v13370_v27 = vld [vmem:[#allocation231_spill] sm:$0xff] }
 0x4da   : > { %v2757_v42 = vmul.f32 %v2608_v62, %v13362_v51  ;;  %v2308_v5 = vmul.f32 %v13364_v58, %v13363_v0  ;;  %v2806_v13 = vadd.f32 %v2742_v41, %v13365_v63  ;;  %v2807_v47 = vadd.f32 %v2743_v7, %v13366_v1  ;;  %v13369_v14 = vld [vmem:[#allocation10_spill] sm:$0xff]  ;;  %v13371_v41 = vld [vmem:[#allocation155_spill] sm:$0xff] }
 0x4db   : > { %v3711_v4 = vmul.f32 %v10289_v54, %v10289_v54  ;;  %3225 = vperm.xlu0 %6872, %v6212_v34   ;;  %v10310_v6 = vsel %vm3381_vm14, %v3316_v60, %v3446_v32  ;;  %v3596_v48 = vsel %vm3550_vm5, %v10289_v54, 0.0  ;;  %v3796_v46 = vadd.f32 %v3795_v9, %v3794_v17  ;;  %v10316_v62 = vpop.permute.xlu2 %3145  ;;  %v3121_v35 = vpop.permute.xlu1 %3120  ;;  %v13374_v17 = vld [vmem:[#allocation102_spill] sm:$0xff] }
 0x4dc   : > { %13367 = vst [vmem:[#allocation214_spill] sm:$0xff] %v10310_v6  ;;  %v10314_v11 = vsel %vm3382_vm15, %v3317_v2, %v3447_v59  ;;  %v2745_v63 = vmul.f32 %v13370_v27, %v13369_v14  ;;  %v2808_v1 = vadd.f32 %v2744_v16, %v13371_v41  ;;  %v3319_v7 = vadd.f32 %v3255_v19, %v2806_v13  ;;  %v2613_v34 = vpop.permute.xlu0 %2612  ;;  %v13372_v16 = vld [vmem:[#allocation13_spill] sm:$0xff]  ;;  %v13377_v14 = vld [vmem:[#allocation114_spill] sm:$0xff]  ;;  %v13378_v27 = vld [vmem:[#allocation43_spill] sm:$0xff] }
 0x4dd   : > { %13368 = vst [vmem:[#allocation172_spill] sm:$0xff] %v10314_v11  ;;  %v3597_v40 = vadd.f32 %v3596_v48, %v3595_v24  ;;  %v3448_v60 = vmul.f32 %v9743_v3, %v3318_v56  ;;  %v3320_v32 = vadd.f32 %v3256_v18, %v2807_v47  ;;  %v2821_v12 = vadd.f32 %v2757_v42, %v2308_v5  ;;  %v13373_v13 = vld [vmem:[#allocation245_spill] sm:$0xff] }
 0x4de   : > { %v3270_v50 = vmul.f32 %v3121_v35, %v10213_v28  ;;  %v3712_v59 = vmul.f32 %v10310_v6, %v10310_v6  ;;  %v3797_v2 = vsel %vm3550_vm5, %v3711_v4, 0.0  ;;  %vm3383_vm2 = vcmp.gt.f32.partialorder %v3318_v56, 0.0  ;;  %v4193_v28 = vld [vmem:[%s12524_s6] sm:$0xff] }
 0x4df   : > { %v3713_v9 = vmul.f32 %v10314_v11, %v10314_v11  ;;  %v2746_v19 = vmul.f32 %v13373_v13, %v13372_v16  ;;  %v3798_v24 = vadd.f32 %v3797_v2, %v3796_v46  ;;  %v3257_v51 = vmul.f32 %v9927_v38, %v13374_v17  ;;  %v13376_v4 = vld [vmem:[#allocation11_spill] sm:$0xff]  ;;  %v13379_v16 = vld [vmem:[#allocation116_spill] sm:$0xff] }
 0x4e0   : > { %v10332_v47 = vadd.f32 %v3270_v50, %v2821_v12  ;;  %v3598_v18 = vsel %vm3550_vm5, %v10310_v6, 0.0  ;;  %vm3384_vm3 = vcmp.gt.f32.partialorder %v3319_v7, 0.0  ;;  %v3449_v42 = vmul.f32 %v9743_v3, %v3319_v7 }
 0x4e1   : > { %v3600_v0 = vsel %vm3550_vm5, %v10314_v11, 0.0  ;;  %v10342_v58 = vsel %vm3383_vm2, %v3318_v56, %v3448_v60  ;;  %v3599_v5 = vadd.f32 %v3598_v18, %v3597_v40  ;;  %v3450_v38 = vmul.f32 %v9743_v3, %v3320_v32  ;;  %v13380_v60 = vld [vmem:[#allocation215_spill] sm:$0xff] }
 0x4e2   : > { %13375 = vst [vmem:[#allocation173_spill] sm:$0xff] %v10342_v58  ;;  %v2758_v48 = vmul.f32 %v2613_v34, %v13376_v4  ;;  %v3799_v46 = vsel %vm3550_vm5, %v3712_v59, 0.0  ;;  %v3258_v41 = vmul.f32 %v13378_v27, %v13377_v14  ;;  %v3801_v35 = vsel %vm3550_vm5, %v3713_v9, 0.0  ;;  %v13381_v34 = vld [vmem:[#allocation152_spill] sm:$0xff] }
 0x4e3   : > { %vm3385_vm4 = vcmp.gt.f32.partialorder %v3320_v32, 0.0  ;;  %4259 = vperm.xlu0 %6872, %v4193_v28   ;;  %v3601_v12 = vadd.f32 %v3600_v0, %v3599_v5  ;;  %v3800_v50 = vadd.f32 %v3799_v46, %v3798_v24  ;;  %v3321_v2 = vadd.f32 %v3257_v51, %v2808_v1  ;;  %v10352_v40 = vpop.permute.xlu2 %2647  ;;  %v10361_v18 = vpop.permute.xlu1 %2622  ;;  %v13384_v51 = vld [vmem:[#allocation69_spill] sm:$0xff]  ;;  %v13385_v5 = vld [vmem:[#allocation84_spill] sm:$0xff] }
 0x4e4   : > { %v3259_v56 = vmul.f32 %v9985_v45, %v13379_v16  ;;  %v2809_v13 = vadd.f32 %v2745_v63, %v13380_v60  ;;  %v2810_v17 = vadd.f32 %v2746_v19, %v13381_v34  ;;  %v10357_v59 = vsel %vm3384_vm3, %v3319_v7, %v3449_v42  ;;  %v3126_v28 = vpop.permute.xlu0 %3125  ;;  %v13386_v63 = vld [vmem:[#allocation182_spill] sm:$0xff]  ;;  %v13387_v19 = vld [vmem:[#allocation4_spill] sm:$0xff] }
 0x4e5   : > { %13382 = vst [vmem:[#allocation174_spill] sm:$0xff] %v10357_v59  ;;  %v3714_v9 = vmul.f32 %v10342_v58, %v10342_v58  ;;  %v3802_v24 = vadd.f32 %v3801_v35, %v3800_v50  ;;  %v10363_v1 = vsel %vm3385_vm4, %v3320_v32, %v3450_v38  ;;  %v2822_v45 = vadd.f32 %v2758_v48, %v13384_v51  ;;  %v13388_v46 = vld [vmem:[#allocation244_spill] sm:$0xff]  ;;  %v13389_v50 = vld [vmem:[#allocation89_spill] sm:$0xff] }
 0x4e6   : > { %13383 = vst [vmem:[#allocation121_spill] sm:$0xff] %v10363_v1  ;;  %v3271_v0 = vmul.f32 %v3126_v28, %v10267_v44  ;;  %v2298_v4 = vmul.f32 %v13386_v63, %v13385_v5  ;;  %v2747_v7 = vmul.f32 %v13388_v46, %v13387_v19  ;;  %v3322_v42 = vadd.f32 %v3258_v41, %v2809_v13  ;;  %v4194_v44 = vld [vmem:[%s12524_s6 + $0x8] sm:$0xff]  ;;  %v13391_v13 = vld [vmem:[#allocation105_spill] sm:$0xff]  ;;  %v13394_v46 = vld [vmem:[#allocation91_spill] sm:$0xff] }
 0x4e7   : > { %v3602_v14 = vsel %vm3550_vm5, %v10342_v58, 0.0  ;;  %v3451_v16 = vmul.f32 %v9743_v3, %v3321_v2  ;;  %v3323_v35 = vadd.f32 %v3259_v56, %v2810_v17  ;;  %v3715_v38 = vmul.f32 %v10357_v59, %v10357_v59  ;;  %v13390_v56 = vld [vmem:[#allocation90_spill] sm:$0xff]  ;;  %v13392_v34 = vld [vmem:[#allocation156_spill] sm:$0xff] }
 0x4e8   : > { %v3603_v27 = vadd.f32 %v3602_v14, %v3601_v12  ;;  %v10374_v32 = vadd.f32 %v3271_v0, %v2822_v45  ;;  %v3803_v48 = vsel %vm3550_vm5, %v3714_v9, 0.0  ;;  %vm3386_vm6 = vcmp.gt.f32.partialorder %v3321_v2, 0.0 }
 0x4e9   : > { %v3716_v41 = vmul.f32 %v10363_v1, %v10363_v1  ;;  %v10386_v12 = vsel %vm1560_vm0, 0.0, %v13389_v50  ;;  %v10390_v60 = vsel %vm1560_vm0, 0.0, %v13390_v56  ;;  %v3260_v17 = vmul.f32 %v13392_v34, %v13391_v13  ;;  %v13396_v13 = vld [vmem:[#allocation93_spill] sm:$0xff] }
 0x4ea   : > { %v3804_v28 = vadd.f32 %v3803_v48, %v3802_v24  ;;  %v2811_v51 = vadd.f32 %v2747_v7, %v2298_v4  ;;  %v3604_v9 = vsel %vm3550_vm5, %v10357_v59, 0.0  ;;  %v3452_v45 = vmul.f32 %v9743_v3, %v3322_v42 }
 0x4eb   : > { %v3606_v0 = vsel %vm3550_vm5, %v10363_v1, 0.0  ;;  %4264 = vperm.xlu0 %6872, %v4194_v44   ;;  %vm3387_vm7 = vcmp.gt.f32.partialorder %v3322_v42, 0.0  ;;  %v10399_v5 = vsel %vm3386_vm6, %v3321_v2, %v3451_v16  ;;  %v3605_v63 = vadd.f32 %v3604_v9, %v3603_v27  ;;  %v10408_v7 = vpop.permute.xlu1 %3135  ;;  %v13395_v44 = vld [vmem:[#allocation92_spill] sm:$0xff]  ;;  %v10416_v56 = vpop.permute.xlu2 %3160 }
 0x4ec   : > { %13393 = vst [vmem:[#allocation175_spill] sm:$0xff] %v10399_v5  ;;  %v3453_v19 = vmul.f32 %v9743_v3, %v3323_v35  ;;  %v10404_v14 = vsel %vm1560_vm0, 0.0, %v13394_v46  ;;  %v3805_v24 = vsel %vm3550_vm5, %v3715_v38, 0.0  ;;  %v3807_v4 = vsel %vm3550_vm5, %v3716_v41, 0.0  ;;  %v10410_v48 = vpop.permute.xlu0 %2627  ;;  %v13397_v38 = vld [vmem:[#allocation94_spill] sm:$0xff] }
 0x4ed   : > { %vm3388_vm8 = vcmp.gt.f32.partialorder %v3323_v35, 0.0  ;;  %v10414_v2 = vsel %vm1560_vm0, 0.0, %v13395_v44  ;;  %v3324_v27 = vadd.f32 %v3260_v17, %v2811_v51  ;;  %v3607_v16 = vadd.f32 %v3606_v0, %v3605_v63  ;;  %v13400_v44 = vld [vmem:[#allocation95_spill] sm:$0xff]  ;;  %v13403_v0 = vld [vmem:[#allocation117_spill] sm:$0xff] }
 0x4ee   : > { %v3806_v50 = vadd.f32 %v3805_v24, %v3804_v28  ;;  %v10420_v34 = vsel %vm1560_vm0, 0.0, %v13396_v13  ;;  %v10424_v41 = vsel %vm1560_vm0, 0.0, %v13397_v38  ;;  %v10427_v9 = vsel %vm3387_vm7, %v3322_v42, %v3452_v45  ;;  %v4195_v24 = vld [vmem:[%s12524_s6 + $0x10] sm:$0xff]  ;;  %v13404_v45 = vld [vmem:[#allocation120_spill] sm:$0xff]  ;;  %v13405_v38 = vld [vmem:[#allocation123_spill] sm:$0xff] }
 0x4ef   : > { %13398 = vst [vmem:[#allocation176_spill] sm:$0xff] %v10424_v41  ;;  %v3717_v46 = vmul.f32 %v10399_v5, %v10399_v5  ;;  %v10433_v17 = vsel %vm1560_vm0, 0.0, %v13400_v44  ;;  %v10435_v51 = vsel %vm3388_vm8, %v3323_v35, %v3453_v19  ;;  %v10439_v63 = vsel %vm1817_vm1, %v13403_v0, 0.0  ;;  %v13406_v35 = vld [vmem:[#allocation126_spill] sm:$0xff] }
 0x4f0   : > { %13399 = vst [vmem:[#allocation247_spill] sm:$0xff] %v10427_v9  ;;  %v3808_v28 = vadd.f32 %v3807_v4, %v3806_v50  ;;  %v3608_v42 = vsel %vm3550_vm5, %v10399_v5, 0.0  ;;  %v10448_v13 = vsel %vm1817_vm1, %v13404_v45, 0.0  ;;  %v10452_v4 = vsel %vm1817_vm1, %v13405_v38, 0.0  ;;  %v13416_v5 = vld [vmem:[#allocation133_spill] sm:$0xff] }
 0x4f1   : > { %13401 = vst [vmem:[#allocation81_spill] sm:$0xff] %v10433_v17  ;;  %v10456_v19 = vsel %vm1817_vm1, %v13406_v35, 0.0  ;;  %v3718_v50 = vmul.f32 %v10427_v9, %v10427_v9  ;;  %v3454_v44 = vmul.f32 %v9743_v3, %v3324_v27  ;;  %v3609_v0 = vadd.f32 %v3608_v42, %v3607_v16  ;;  %v13408_v16 = vld [vmem:[#allocation129_spill] sm:$0xff]  ;;  %v13437_v17 = vld [vmem:[#allocation256_spill] sm:$0xff] }
 0x4f2   : > { %13402 = vst [vmem:[#allocation178_spill] sm:$0xff] %v10435_v51  ;;  %v3455_v54 = vmul.f32 %v9743_v3, %v10050_v39  ;;  %vm3389_vm9 = vcmp.gt.f32.partialorder %v3324_v27, 0.0  ;;  %v3809_v45 = vsel %vm3550_vm5, %v3717_v46, 0.0  ;;  %v3719_v38 = vmul.f32 %v10435_v51, %v10435_v51 }
 0x4f3   : > { %vm3390_vm10 = vcmp.gt.f32.partialorder %v10050_v39, 0.0  ;;  %4269 = vperm.xlu0 %6872, %v4195_v24   ;;  %v3810_v35 = vadd.f32 %v3809_v45, %v3808_v28  ;;  %v3456_v30 = vmul.f32 %v9743_v3, %v10099_v52  ;;  %v10471_v36 = vsel %vm1817_vm1, %v13407_v37, 0.0  ;;  %v10482_v28 = vpop.permute.xlu1 %2637  ;;  %v13410_v24 = vld [vmem:[#allocation130_spill] sm:$0xff] }
 0x4f4   : > { %v10475_v42 = vsel %vm1817_vm1, %v13408_v16, 0.0  ;;  %v3610_v46 = vsel %vm3550_vm5, %v10427_v9, 0.0  ;;  %v3612_v11 = vsel %vm3550_vm5, %v10435_v51, 0.0  ;;  %vm3391_vm11 = vcmp.gt.f32.partialorder %v10099_v52, 0.0  ;;  %v10488_v37 = vpop.permute.xlu0 %3140 }
 0x4f5   : > { %13409 = vst [vmem:[#allocation177_spill] sm:$0xff] %v10475_v42  ;;  %v10486_v45 = vsel %vm1817_vm1, %v13410_v24, 0.0  ;;  %v10490_v6 = vsel %vm3389_vm9, %v3324_v27, %v3454_v44  ;;  %v3611_v16 = vadd.f32 %v3610_v46, %v3609_v0  ;;  %v10493_v33 = vsel %vm3390_vm10, %v10050_v39, %v3455_v54  ;;  %v10514_v0 = vpop.permute.xlu2 %2662  ;;  %v13421_v46 = vld [vmem:[#allocation136_spill] sm:$0xff] }
 0x4f6   : > { %13411 = vst [vmem:[#allocation42_spill] sm:$0xff] %v10490_v6  ;;  %v10497_v59 = vsel %vm1817_vm1, %v13413_v61, 0.0  ;;  %v3811_v58 = vsel %vm3550_vm5, %v3718_v50, 0.0  ;;  %v3813_v20 = vsel %vm3550_vm5, %v3719_v38, 0.0  ;;  %v10503_v24 = vsel %vm1817_vm1, %v13415_v57, 0.0  ;;  %v4196_v50 = vld [vmem:[%s12524_s6 + $0x18] sm:$0xff] }
 0x4f7   : > { %13412 = vst [vmem:[#allocation204_spill] sm:$0xff] %v10493_v33  ;;  %v10507_v27 = vsel %vm1817_vm1, %v13416_v5, 0.0  ;;  %v3457_v39 = vmul.f32 %v9743_v3, %v9948_v53  ;;  %v3613_v54 = vadd.f32 %v3612_v11, %v3611_v16  ;;  %v3812_v44 = vadd.f32 %v3811_v58, %v3810_v35  ;;  %v13418_v38 = vld [vmem:[#allocation135_spill] sm:$0xff]  ;;  %v13420_v58 = vld [vmem:[#allocation137_spill] sm:$0xff] }
 0x4f8   : > { %13414 = vst [vmem:[#allocation179_spill] sm:$0xff] %v10497_v59  ;;  %v10512_v61 = vsel %vm3391_vm11, %v10099_v52, %v3456_v30  ;;  %v3720_v57 = vmul.f32 %v10490_v6, %v10490_v6  ;;  %vm3392_vm12 = vcmp.gt.f32.partialorder %v9948_v53, 0.0  ;;  %v3721_v5 = vmul.f32 %v10493_v33, %v10493_v33 }
 0x4f9   : > { %13417 = vst [vmem:[#allocation46_spill] sm:$0xff] %v10512_v61  ;;  %v10526_v11 = vsel %vm1817_vm1, %v13418_v38, 0.0  ;;  %v3814_v52 = vadd.f32 %v3813_v20, %v3812_v44  ;;  %v3458_v30 = vmul.f32 %v9743_v3, %v10145_v25  ;;  %v10532_v35 = vsel %vm1817_vm1, %v13420_v58, 0.0 }
 0x4fa   : > { %13419 = vst [vmem:[#allocation218_spill] sm:$0xff] %v10526_v11  ;;  %v10536_v16 = vsel %vm1817_vm1, %v13421_v46, 0.0  ;;  %v3614_v1 = vsel %vm3550_vm5, %v10490_v6, 0.0  ;;  %v3616_v31 = vsel %vm3550_vm5, %v10493_v33, 0.0  ;;  %v3722_v20 = vmul.f32 %v10512_v61, %v10512_v61  ;;  %v13423_v46 = vld [vmem:[#allocation140_spill] sm:$0xff]  ;;  %v13438_v11 = vld [vmem:[#allocation194_spill] sm:$0xff] }
 0x4fb   : > { %vm3393_vm13 = vcmp.gt.f32.partialorder %v10145_v25, 0.0  ;;  %4274 = vperm.xlu0 %6872, %v4196_v50   ;;  %v10546_v44 = vsel %vm3392_vm12, %v9948_v53, %v3457_v39  ;;  %v3615_v38 = vadd.f32 %v3614_v1, %v3613_v54  ;;  %v3459_v58 = vmul.f32 %v9743_v3, %v10194_v21  ;;  %v10559_v50 = vpop.permute.xlu1 %3150 }
 0x4fc   : > { %13422 = vst [vmem:[#allocation80_spill] sm:$0xff] %v10546_v44  ;;  %v10552_v55 = vsel %vm1817_vm1, %v13423_v46, 0.0  ;;  %v3815_v6 = vsel %vm3550_vm5, %v3720_v57, 0.0  ;;  %v3817_v33 = vsel %vm3550_vm5, %v3721_v5, 0.0  ;;  %v3618_v51 = vsel %vm3550_vm5, %v10512_v61, 0.0  ;;  %v10561_v53 = vpop.permute.xlu0 %2642  ;;  %v13425_v46 = vld [vmem:[#allocation139_spill] sm:$0xff] }
 0x4fd   : > { %vm3394_vm14 = vcmp.gt.f32.partialorder %v10194_v21, 0.0  ;;  %v3617_v1 = vadd.f32 %v3616_v31, %v3615_v38  ;;  %v3816_v39 = vadd.f32 %v3815_v6, %v3814_v52  ;;  %v10564_v54 = vsel %vm3393_vm13, %v10145_v25, %v3458_v30  ;;  %v4197_v52 = vld [vmem:[%s12524_s6 + $0x20] sm:$0xff]  ;;  %v13429_v30 = vld [vmem:[#allocation85_spill] sm:$0xff]  ;;  %v10608_v59 = vpop.permute.xlu2 %3175 }
 0x4fe   : > { %13424 = vst [vmem:[#allocation181_spill] sm:$0xff] %v10564_v54  ;;  %v10568_v9 = vsel %vm1817_vm1, %v13425_v46, 0.0  ;;  %v3723_v57 = vmul.f32 %v10546_v44, %v10546_v44  ;;  %v3460_v5 = vmul.f32 %v9743_v3, %v10042_v23  ;;  %v3819_v61 = vsel %vm3550_vm5, %v3722_v20, 0.0  ;;  %v13430_v38 = vld [vmem:[#allocation183_spill] sm:$0xff] }
 0x4ff   : > { %v10577_v8 = vsel %vm1817_vm1, %v13426_v49, 0.0  ;;  %v3818_v31 = vadd.f32 %v3817_v33, %v3816_v39  ;;  %vm3395_vm15 = vcmp.gt.f32.partialorder %v10042_v23, 0.0  ;;  %v3619_v25 = vadd.f32 %v3618_v51, %v3617_v1  ;;  %v13431_v49 = vld [vmem:[#allocation142_spill] sm:$0xff] }
 0x500   : > { %13427 = vst [vmem:[#allocation180_spill] sm:$0xff] %v10577_v8  ;;  %v10581_v6 = vsel %vm3394_vm14, %v10194_v21, %v3459_v58  ;;  %v10588_v46 = vmul.f32 %v13430_v38, %v13429_v30  ;;  %v3724_v20 = vmul.f32 %v10564_v54, %v10564_v54  ;;  %v10594_v33 = vsel %vm1817_vm1, %v13431_v49, 0.0  ;;  %v13433_v39 = vld [vmem:[#allocation146_spill] sm:$0xff]  ;;  %v13435_v21 = vld [vmem:[#allocation87_spill] sm:$0xff] }
 0x501   : > { %13428 = vst [vmem:[#allocation237_spill] sm:$0xff] %v10581_v6  ;;  %v10598_v51 = vsel %vm1817_vm1, %v13433_v39, 0.0  ;;  %v13436_v58 = vld [vmem:[#allocation186_spill] sm:$0xff]  ;;  %v2310_v41 = vmul.f32 %v13438_v11, %v13437_v17  ;;  %v3620_v30 = vsel %vm3550_vm5, %v10546_v44, 0.0  ;;  %v3820_v38 = vadd.f32 %v3819_v61, %v3818_v31  ;;  %v13440_v17 = vld [vmem:[#allocation21_spill] sm:$0xff] }
 0x502   : > { %13432 = vst [vmem:[#allocation45_spill] sm:$0xff] %v10594_v33  ;;  %v10602_v1 = vmul.f32 %v13436_v58, %v13435_v21  ;;  %v3821_v49 = vsel %vm3550_vm5, %v3723_v57, 0.0  ;;  %v10612_v33 = vsel %vm3395_vm15, %v10042_v23, %v3460_v5  ;;  %v3622_v39 = vsel %vm3550_vm5, %v10564_v54, 0.0 }
 0x503   : > { %13434 = vst [vmem:[#allocation207_spill] sm:$0xff] %v10598_v51  ;;  %v3725_v21 = vmul.f32 %v10581_v6, %v10581_v6  ;;  %4279 = vperm.xlu0 %6872, %v4197_v52   ;;  %v3621_v58 = vadd.f32 %v3620_v30, %v3619_v25  ;;  %vm3398_vm2 = vcmp.gt.f32.partialorder %v10135_v43, 0.0  ;;  %v2759_v61 = vmul.f32 %v10172_v22, %v13440_v17  ;;  %v10629_v31 = vpop.permute.xlu1 %2652  ;;  %v13441_v17 = vld [vmem:[#allocation189_spill] sm:$0xff] }
 0x504   : > { %13439 = vst [vmem:[#allocation251_spill] sm:$0xff] %v10612_v33  ;;  %v3461_v11 = vmul.f32 %v9743_v3, %v10245_v15  ;;  %v3823_v57 = vsel %vm3550_vm5, %v3724_v20, 0.0  ;;  %v3463_v23 = vmul.f32 %v9743_v3, %v10135_v43  ;;  %v3624_v5 = vsel %vm3550_vm5, %v10581_v6, 0.0  ;;  %v10631_v25 = vpop.permute.xlu0 %3155 }
 0x505   : > { %vm3396_vm3 = vcmp.gt.f32.partialorder %v10245_v15, 0.0  ;;  %v3623_v52 = vadd.f32 %v3622_v39, %v3621_v58  ;;  %v3822_v30 = vadd.f32 %v3821_v49, %v3820_v38  ;;  %v3272_v22 = vmul.f32 %v10223_v29, %v10439_v63  ;;  %v4200_v29 = vld [vmem:[%s12524_s6 + $0x38] sm:$0xff]  ;;  %v13443_v63 = vld [vmem:[#allocation83_spill] sm:$0xff] }
 0x506   : > { %v3462_v20 = vmul.f32 %v9743_v3, %v10292_v10  ;;  %v10639_v44 = vmul.f32 %v13441_v17, %v10386_v12  ;;  %v3726_v6 = vmul.f32 %v10612_v33, %v10612_v33  ;;  %v3825_v54 = vsel %vm3550_vm5, %v3725_v21, 0.0  ;;  %v13444_v12 = vld [vmem:[#allocation193_spill] sm:$0xff]  ;;  %v13445_v17 = vld [vmem:[#allocation192_spill] sm:$0xff]  ;;  %v13446_v21 = vld [vmem:[#allocation195_spill] sm:$0xff] }
 0x507   : > { %vm3397_vm4 = vcmp.gt.f32.partialorder %v10292_v10, 0.0  ;;  %v3824_v51 = vadd.f32 %v3823_v57, %v3822_v30  ;;  %v3625_v39 = vadd.f32 %v3624_v5, %v3623_v52  ;;  %v2823_v38 = vadd.f32 %v2759_v61, %v2310_v41  ;;  %v13448_v41 = vld [vmem:[#allocation252_spill] sm:$0xff]  ;;  %v13452_v30 = vld [vmem:[#allocation197_spill] sm:$0xff] }
 0x508   : > { %v10646_v49 = vsel %vm3396_vm3, %v10245_v15, %v3461_v11  ;;  %v2311_v58 = vmul.f32 %v13444_v12, %v13443_v63  ;;  %v10655_v8 = vmul.f32 %v13445_v17, %v10404_v14  ;;  %v10659_v42 = vmul.f32 %v13446_v21, %v10420_v34  ;;  %v13449_v61 = vld [vmem:[#allocation196_spill] sm:$0xff]  ;;  %v13451_v14 = vld [vmem:[#allocation259_spill] sm:$0xff]  ;;  %v13454_v17 = vld [vmem:[#allocation254_spill] sm:$0xff] }
 0x509   : > { %13442 = vst [vmem:[#allocation184_spill] sm:$0xff] %v10646_v49  ;;  %v10664_v15 = vsel %vm3398_vm2, %v10135_v43, %v3463_v23  ;;  %v10668_v11 = vmul.f32 %v13449_v61, %v13448_v41  ;;  %v3826_v57 = vadd.f32 %v3825_v54, %v3824_v51  ;;  %v3336_v5 = vadd.f32 %v3272_v22, %v2823_v38  ;;  %v13453_v43 = vld [vmem:[#allocation24_spill] sm:$0xff]  ;;  %v13455_v21 = vld [vmem:[#allocation199_spill] sm:$0xff] }
 0x50a   : > { %13447 = vst [vmem:[#allocation185_spill] sm:$0xff] %v10659_v42  ;;  %v10671_v52 = vsel %vm3397_vm4, %v10292_v10, %v3462_v20  ;;  %v2313_v63 = vmul.f32 %v13452_v30, %v13451_v14  ;;  %v3626_v34 = vsel %vm3550_vm5, %v10612_v33, 0.0  ;;  %v3727_v12 = vmul.f32 %v10646_v49, %v10646_v49  ;;  %v10688_v20 = vpop.permute.xlu2 %2677  ;;  %v13461_v33 = vld [vmem:[#allocation202_spill] sm:$0xff]  ;;  %v13462_v42 = vld [vmem:[#allocation261_spill] sm:$0xff] }
 0x50b   : > { %13450 = vst [vmem:[#allocation187_spill] sm:$0xff] %v10671_v52  ;;  %v2762_v23 = vmul.f32 %v10273_v26, %v13453_v43  ;;  %4294 = vperm.xlu0 %6872, %v4200_v29   ;;  %v10683_v54 = vmul.f32 %v13455_v21, %v13454_v17  ;;  %v3827_v10 = vsel %vm3550_vm5, %v3726_v6, 0.0  ;;  %v3729_v51 = vmul.f32 %v10664_v15, %v10664_v15  ;;  %v13456_v29 = vld [vmem:[#allocation25_spill] sm:$0xff]  ;;  %v10698_v14 = vpop.permute.xlu1 %3165  ;;  %v13457_v21 = vld [vmem:[#allocation14_spill] sm:$0xff] }
 0x50c   : > { %v3627_v22 = vadd.f32 %v3626_v34, %v3625_v39  ;;  %v3628_v38 = vsel %vm3550_vm5, %v10646_v49, 0.0  ;;  %v3728_v41 = vmul.f32 %v10671_v52, %v10671_v52  ;;  %v3275_v26 = vmul.f32 %v10316_v62, %v10448_v13  ;;  %v10700_v6 = vpop.permute.xlu0 %2657 }
 0x50d   : > { %v2760_v61 = vmul.f32 %v10361_v18, %v13456_v29  ;;  %v3828_v30 = vadd.f32 %v3827_v10, %v3826_v57  ;;  %vm3401_vm6 = vcmp.gt.f32.partialorder %v3336_v5, 0.0  ;;  %v3466_v39 = vmul.f32 %v9743_v3, %v3336_v5 }
 0x50e   : > { %v3464_v34 = vmul.f32 %v9743_v3, %v10332_v47  ;;  %v3829_v43 = vsel %vm3550_vm5, %v3727_v12, 0.0  ;;  %v2826_v17 = vadd.f32 %v2762_v23, %v2313_v63  ;;  %vm3399_vm7 = vcmp.gt.f32.partialorder %v10332_v47, 0.0  ;;  %v4201_v12 = vld [vmem:[%s12524_s6 + $0x40] sm:$0xff] }
 0x50f   : > { %v3273_v62 = vmul.f32 %v10408_v7, %v10471_v36  ;;  %v3629_v18 = vadd.f32 %v3628_v38, %v3627_v22  ;;  %v3630_v13 = vsel %vm3550_vm5, %v10671_v52, 0.0  ;;  %v3465_v57 = vmul.f32 %v9743_v3, %v10374_v32  ;;  %v13458_v36 = vld [vmem:[#allocation260_spill] sm:$0xff] }
 0x510   : > { %v2761_v10 = vmul.f32 %v10410_v48, %v13457_v21  ;;  %v3831_v63 = vsel %vm3550_vm5, %v3728_v41, 0.0  ;;  %v3339_v23 = vadd.f32 %v3275_v26, %v2826_v17  ;;  %v2824_v29 = vadd.f32 %v2760_v61, %v2311_v58  ;;  %v13459_v7 = vld [vmem:[#allocation200_spill] sm:$0xff]  ;;  %v13460_v21 = vld [vmem:[#allocation257_spill] sm:$0xff]  ;;  %v13463_v41 = vld [vmem:[#allocation203_spill] sm:$0xff] }
 0x511   : > { %vm3400_vm8 = vcmp.gt.f32.partialorder %v10374_v32, 0.0  ;;  %v2316_v22 = vmul.f32 %v13459_v7, %v13458_v36  ;;  %v3830_v38 = vadd.f32 %v3829_v43, %v3828_v30  ;;  %v10723_v49 = vsel %vm3399_vm7, %v10332_v47, %v3464_v34 }
 0x512   : > { %v3274_v48 = vmul.f32 %v10488_v37, %v10486_v45  ;;  %v10729_v52 = vmul.f32 %v13461_v33, %v13460_v21  ;;  %v10733_v26 = vmul.f32 %v13463_v41, %v13462_v42  ;;  %v3631_v58 = vadd.f32 %v3630_v13, %v3629_v18  ;;  %v10756_v13 = vpop.permute.xlu2 %3190 }
 0x513   : > { %v3337_v61 = vadd.f32 %v3273_v62, %v2824_v29  ;;  %4299 = vperm.xlu0 %6872, %v4201_v12   ;;  %v10736_v17 = vsel %vm3401_vm6, %v3336_v5, %v3466_v39  ;;  %v3832_v30 = vadd.f32 %v3831_v63, %v3830_v38  ;;  %v10739_v47 = vsel %vm3400_vm8, %v10374_v32, %v3465_v57  ;;  %v10748_v43 = vpop.permute.xlu1 %2667  ;;  %v13464_v39 = vld [vmem:[#allocation27_spill] sm:$0xff]  ;;  %v13465_v62 = vld [vmem:[#allocation28_spill] sm:$0xff] }
 0x514   : > { %v2825_v45 = vadd.f32 %v2761_v10, %v10588_v46  ;;  %v3632_v37 = vsel %vm3550_vm5, %v10664_v15, 0.0  ;;  %v3833_v33 = vsel %vm3550_vm5, %v3729_v51, 0.0  ;;  %v3730_v42 = vmul.f32 %v10723_v49, %v10723_v49  ;;  %v10750_v5 = vpop.permute.xlu0 %3170  ;;  %v4202_v29 = vld [vmem:[%s12524_s6 + $0x48] sm:$0xff] }
 0x515   : > { %v3469_v34 = vmul.f32 %v9743_v3, %v3339_v23  ;;  %vm3404_vm9 = vcmp.gt.f32.partialorder %v3339_v23, 0.0  ;;  %v2765_v32 = vmul.f32 %v10352_v40, %v13464_v39  ;;  %v2763_v46 = vmul.f32 %v10482_v28, %v13465_v62 }
 0x516   : > { %v3338_v18 = vadd.f32 %v3274_v48, %v2825_v45  ;;  %v3732_v51 = vmul.f32 %v10736_v17, %v10736_v17  ;;  %v3633_v57 = vadd.f32 %v3632_v37, %v3631_v58  ;;  %v3731_v10 = vmul.f32 %v10739_v47, %v10739_v47  ;;  %v13466_v48 = vld [vmem:[#allocation17_spill] sm:$0xff] }
 0x517   : > { %v3467_v12 = vmul.f32 %v9743_v3, %v3337_v61  ;;  %v3834_v63 = vadd.f32 %v3833_v33, %v3832_v30  ;;  %vm3402_vm10 = vcmp.gt.f32.partialorder %v3337_v61, 0.0  ;;  %v3278_v40 = vmul.f32 %v10416_v56, %v10452_v4  ;;  %v13467_v33 = vld [vmem:[#allocation258_spill] sm:$0xff] }
 0x518   : > { %v3276_v28 = vmul.f32 %v10559_v50, %v10503_v24  ;;  %v3634_v36 = vsel %vm3550_vm5, %v10723_v49, 0.0  ;;  %v3835_v7 = vsel %vm3550_vm5, %v3730_v42, 0.0  ;;  %v10774_v38 = vsel %vm3404_vm9, %v3339_v23, %v3469_v34  ;;  %v13468_v42 = vld [vmem:[#allocation205_spill] sm:$0xff] }
 0x519   : > { %v2764_v21 = vmul.f32 %v10561_v53, %v13466_v48  ;;  %v3636_v56 = vsel %vm3550_vm5, %v10739_v47, 0.0  ;;  %v2829_v4 = vadd.f32 %v2765_v32, %v2316_v22  ;;  %v2827_v24 = vadd.f32 %v2763_v46, %v10668_v11  ;;  %v13469_v11 = vld [vmem:[#allocation206_spill] sm:$0xff] }
 0x51a   : > { %v3468_v50 = vmul.f32 %v9743_v3, %v3338_v18  ;;  %v3837_v41 = vsel %vm3550_vm5, %v3731_v10, 0.0  ;;  %v10783_v58 = vsel %vm3402_vm10, %v3337_v61, %v3467_v12  ;;  %vm3403_vm11 = vcmp.gt.f32.partialorder %v3338_v18, 0.0  ;;  %v13470_v12 = vld [vmem:[#allocation31_spill] sm:$0xff] }
 0x51b   : > { %v3277_v23 = vmul.f32 %v10631_v25, %v10507_v27  ;;  %4304 = vperm.xlu0 %6872, %v4202_v29   ;;  %v3635_v30 = vadd.f32 %v3634_v36, %v3633_v57  ;;  %v3836_v45 = vadd.f32 %v3835_v7, %v3834_v63  ;;  %v3342_v53 = vadd.f32 %v3278_v40, %v2829_v4  ;;  %v3181_v32 = vpop.permute.xlu1 %3180  ;;  %v10812_v36 = vpop.permute.xlu2 %2692  ;;  %v13471_v7 = vld [vmem:[#allocation20_spill] sm:$0xff] }
 0x51c   : > { %v3340_v37 = vadd.f32 %v3276_v28, %v2827_v24  ;;  %v10789_v22 = vmul.f32 %v13468_v42, %v13467_v33  ;;  %v10793_v34 = vmul.f32 %v13469_v11, %v10390_v60  ;;  %v3638_v61 = vsel %vm3550_vm5, %v10736_v17, 0.0  ;;  %v2673_v27 = vpop.permute.xlu0 %2672  ;;  %v13472_v24 = vld [vmem:[#allocation30_spill] sm:$0xff] }
 0x51d   : > { %v2828_v39 = vadd.f32 %v2764_v21, %v10602_v1  ;;  %v3637_v25 = vadd.f32 %v3636_v56, %v3635_v30  ;;  %v3838_v62 = vadd.f32 %v3837_v41, %v3836_v45  ;;  %v3733_v46 = vmul.f32 %v10783_v58, %v10783_v58 }
 0x51e   : > { %v10801_v57 = vsel %vm3403_vm11, %v3338_v18, %v3468_v50  ;;  %v3839_v10 = vsel %vm3550_vm5, %v3732_v51, 0.0  ;;  %v3735_v60 = vmul.f32 %v10774_v38, %v10774_v38  ;;  %v2766_v63 = vmul.f32 %v10629_v31, %v13470_v12  ;;  %v4205_v18 = vld [vmem:[%s12524_s6 + $0x60] sm:$0xff] }
 0x51f   : > { %v3341_v40 = vadd.f32 %v3277_v23, %v2828_v39  ;;  %v3640_v1 = vsel %vm3550_vm5, %v10783_v58, 0.0  ;;  %vm3407_vm12 = vcmp.gt.f32.partialorder %v3342_v53, 0.0  ;;  %v3472_v28 = vmul.f32 %v9743_v3, %v3342_v53 }
 0x520   : > { %v3470_v29 = vmul.f32 %v9743_v3, %v3340_v37  ;;  %v3734_v51 = vmul.f32 %v10801_v57, %v10801_v57  ;;  %vm3405_vm13 = vcmp.gt.f32.partialorder %v3340_v37, 0.0  ;;  %v3279_v31 = vmul.f32 %v10698_v14, %v10532_v35 }
 0x521   : > { %v2767_v48 = vmul.f32 %v10700_v6, %v13471_v7  ;;  %v3639_v21 = vadd.f32 %v3638_v61, %v3637_v25  ;;  %v3840_v56 = vadd.f32 %v3839_v10, %v3838_v62  ;;  %v3841_v4 = vsel %vm3550_vm5, %v3733_v46, 0.0  ;;  %v13477_v46 = vld [vmem:[#allocation33_spill] sm:$0xff] }
 0x522   : > { %v2768_v50 = vmul.f32 %v10514_v0, %v13472_v24  ;;  %v3642_v41 = vsel %vm3550_vm5, %v10801_v57, 0.0  ;;  %v2830_v23 = vadd.f32 %v2766_v63, %v10683_v54  ;;  %v3471_v30 = vmul.f32 %v9743_v3, %v3341_v40 }
 0x523   : > { %v3280_v35 = vmul.f32 %v10750_v5, %v10536_v16  ;;  %4319 = vperm.xlu0 %6872, %v4205_v18   ;;  %v3641_v14 = vadd.f32 %v3640_v1, %v3639_v21  ;;  %v10833_v6 = vsel %vm3407_vm12, %v3342_v53, %v3472_v28  ;;  %v10835_v45 = vsel %vm3405_vm13, %v3340_v37, %v3470_v29  ;;  %v2683_v11 = vpop.permute.xlu1 %2682  ;;  %v13475_v16 = vld [vmem:[#allocation209_spill] sm:$0xff]  ;;  %v13479_v21 = vld [vmem:[#allocation32_spill] sm:$0xff] }
 0x524   : > { %13473 = vst [vmem:[#allocation47_spill] sm:$0xff] %v10833_v6  ;;  %vm3406_vm14 = vcmp.gt.f32.partialorder %v3341_v40, 0.0  ;;  %v3843_v0 = vsel %vm3550_vm5, %v3734_v51, 0.0  ;;  %v3281_v33 = vmul.f32 %v10608_v59, %v10456_v19  ;;  %v3343_v42 = vadd.f32 %v3279_v31, %v2830_v23  ;;  %v3186_v61 = vpop.permute.xlu0 %3185  ;;  %v10867_v51 = vpop.permute.xlu2 %3205 }
 0x525   : > { %13474 = vst [vmem:[#allocation217_spill] sm:$0xff] %v10835_v45  ;;  %v2831_v54 = vadd.f32 %v2767_v48, %v10639_v44  ;;  %v10843_v5 = vmul.f32 %v13475_v16, %v10414_v2  ;;  %v3842_v39 = vadd.f32 %v3841_v4, %v3840_v56  ;;  %v3643_v53 = vadd.f32 %v3642_v41, %v3641_v14  ;;  %v13483_v16 = vld [vmem:[#allocation35_spill] sm:$0xff] }
 0x526   : > { %v2832_v37 = vadd.f32 %v2768_v50, %v10733_v26  ;;  %v3736_v25 = vmul.f32 %v10835_v45, %v10835_v45  ;;  %v10848_v62 = vsel %vm3406_vm14, %v3341_v40, %v3471_v30  ;;  %v2769_v59 = vmul.f32 %v10748_v43, %v13477_v46  ;;  %v4208_v26 = vld [vmem:[%s12524_s6 + $0x78] sm:$0xff]  ;;  %v13478_v43 = vld [vmem:[#allocation23_spill] sm:$0xff] }
 0x527   : > { %13476 = vst [vmem:[#allocation188_spill] sm:$0xff] %v10848_v62  ;;  %v3344_v19 = vadd.f32 %v3280_v35, %v2831_v54  ;;  %v3644_v44 = vsel %vm3550_vm5, %v10774_v38, 0.0  ;;  %v3845_v10 = vsel %vm3550_vm5, %v3735_v60, 0.0  ;;  %v3738_v2 = vmul.f32 %v10833_v6, %v10833_v6 }
 0x528   : > { %v3844_v12 = vadd.f32 %v3843_v0, %v3842_v39  ;;  %v3345_v63 = vadd.f32 %v3281_v33, %v2832_v37  ;;  %v3473_v40 = vmul.f32 %v9743_v3, %v3343_v42  ;;  %v3282_v1 = vmul.f32 %v3181_v32, %v10552_v55  ;;  %v13481_v33 = vld [vmem:[#allocation177_spill] sm:$0xff] }
 0x529   : > { %v2770_v28 = vmul.f32 %v2673_v27, %v13478_v43  ;;  %v3645_v29 = vadd.f32 %v3644_v44, %v3643_v53  ;;  %v3646_v18 = vsel %vm3550_vm5, %v10835_v45, 0.0  ;;  %v3737_v60 = vmul.f32 %v10848_v62, %v10848_v62  ;;  %v4211_v53 = vld [vmem:[%s12524_s6 + $0x90] sm:$0xff] }
 0x52a   : > { %vm3408_vm15 = vcmp.gt.f32.partialorder %v3343_v42, 0.0  ;;  %v3847_v31 = vsel %vm3550_vm5, %v3736_v25, 0.0  ;;  %v2833_v7 = vadd.f32 %v2769_v59, %v10729_v52  ;;  %v3474_v48 = vmul.f32 %v9743_v3, %v3344_v19 }
 0x52b   : > { %v3283_v55 = vmul.f32 %v3186_v61, %v10568_v9  ;;  %4334 = vperm.xlu0 %6872, %v4208_v26   ;;  %v3846_v32 = vadd.f32 %v3845_v10, %v3844_v12  ;;  %v3648_v27 = vsel %vm3550_vm5, %v10848_v62, 0.0  ;;  %v2771_v56 = vmul.f32 %v10688_v20, %v13479_v21  ;;  %v3196_v52 = vpop.permute.xlu1 %3195  ;;  %v13485_v10 = vld [vmem:[#allocation26_spill] sm:$0xff] }
 0x52c   : > { %vm3409_vm2 = vcmp.gt.f32.partialorder %v3344_v19, 0.0  ;;  %v3647_v4 = vadd.f32 %v3646_v18, %v3645_v29  ;;  %v10877_v24 = vsel %vm3408_vm15, %v3343_v42, %v3473_v40  ;;  %v3346_v50 = vadd.f32 %v3282_v1, %v2833_v7  ;;  %v2688_v23 = vpop.permute.xlu0 %2687 }
 0x52d   : > { %13480 = vst [vmem:[#allocation191_spill] sm:$0xff] %v10877_v24  ;;  %v2834_v41 = vadd.f32 %v2770_v28, %v10655_v8  ;;  %v3650_v9 = vsel %vm3550_vm5, %v10833_v6, 0.0  ;;  %v3848_v30 = vadd.f32 %v3847_v31, %v3846_v32  ;;  %v3475_v35 = vmul.f32 %v9743_v3, %v3345_v63  ;;  %v2708_v28 = vpop.permute.xlu2 %2707 }
 0x52e   : > { %v3849_v14 = vsel %vm3550_vm5, %v3737_v60, 0.0  ;;  %v3649_v0 = vadd.f32 %v3648_v27, %v3647_v4  ;;  %v3284_v20 = vmul.f32 %v10756_v13, %v13481_v33  ;;  %v10886_v54 = vsel %vm3409_vm2, %v3344_v19, %v3474_v48  ;;  %v13484_v19 = vld [vmem:[#allocation180_spill] sm:$0xff]  ;;  %v13487_v60 = vld [vmem:[#allocation34_spill] sm:$0xff]  ;;  %v13488_v27 = vld [vmem:[#allocation185_spill] sm:$0xff] }
 0x52f   : > { %13482 = vst [vmem:[#allocation125_spill] sm:$0xff] %v10886_v54  ;;  %v3347_v42 = vadd.f32 %v3283_v55, %v2834_v41  ;;  %v3851_v61 = vsel %vm3550_vm5, %v3738_v2, 0.0  ;;  %vm3410_vm3 = vcmp.gt.f32.partialorder %v3345_v63, 0.0  ;;  %v3739_v8 = vmul.f32 %v10877_v24, %v10877_v24 }
 0x530   : > { %v2772_v39 = vmul.f32 %v2683_v11, %v13483_v16  ;;  %v3850_v37 = vadd.f32 %v3849_v14, %v3848_v30  ;;  %v2835_v25 = vadd.f32 %v2771_v56, %v10793_v34  ;;  %v3652_v13 = vsel %vm3550_vm5, %v10877_v24, 0.0  ;;  %v13489_v56 = vld [vmem:[#allocation45_spill] sm:$0xff]  ;;  %v4214_v14 = vld [vmem:[%s12524_s6 + $0xa8] sm:$0xff] }
 0x531   : > { %v3476_v46 = vmul.f32 %v9743_v3, %v3346_v50  ;;  %v3740_v59 = vmul.f32 %v10886_v54, %v10886_v54  ;;  %vm3411_vm4 = vcmp.gt.f32.partialorder %v3346_v50, 0.0  ;;  %v3285_v44 = vmul.f32 %v3196_v52, %v13484_v19 }
 0x532   : > { %v2773_v11 = vmul.f32 %v2688_v23, %v13485_v10  ;;  %v10903_v2 = vsel %vm3410_vm3, %v3345_v63, %v3475_v35  ;;  %v3651_v12 = vadd.f32 %v3650_v9, %v3649_v0  ;;  %v3348_v26 = vadd.f32 %v3284_v20, %v2835_v25  ;;  %v13490_v9 = vld [vmem:[#allocation179_spill] sm:$0xff] }
 0x533   : > { %13486 = vst [vmem:[#allocation48_spill] sm:$0xff] %v10903_v2  ;;  %v3477_v40 = vmul.f32 %v9743_v3, %v3347_v42  ;;  %4349 = vperm.xlu0 %6872, %v4211_v53   ;;  %v3853_v34 = vsel %vm3550_vm5, %v3739_v8, 0.0  ;;  %v3654_v1 = vsel %vm3550_vm5, %v10886_v54, 0.0  ;;  %v2836_v43 = vadd.f32 %v2772_v39, %v10789_v22  ;;  %v2698_v7 = vpop.permute.xlu1 %2697  ;;  %v13491_v8 = vld [vmem:[#allocation37_spill] sm:$0xff]  ;;  %v13492_v39 = vld [vmem:[#allocation86_spill] sm:$0xff]  ;;  %v13493_v53 = vld [vmem:[#allocation208_spill] sm:$0xff] }
 0x534   : > { %vm3412_vm6 = vcmp.gt.f32.partialorder %v3347_v42, 0.0  ;;  %v3653_v29 = vadd.f32 %v3652_v13, %v3651_v12  ;;  %v3852_v18 = vadd.f32 %v3851_v61, %v3850_v37  ;;  %v2774_v63 = vmul.f32 %v10812_v36, %v13487_v60  ;;  %v3201_v48 = vpop.permute.xlu0 %3200  ;;  %v13495_v60 = vld [vmem:[#allocation176_spill] sm:$0xff] }
 0x535   : > { %v10913_v31 = vsel %vm3411_vm4, %v3346_v50, %v3476_v46  ;;  %v3855_v55 = vsel %vm3550_vm5, %v3740_v59, 0.0  ;;  %v3349_v32 = vadd.f32 %v3285_v44, %v2836_v43  ;;  %v2837_v21 = vadd.f32 %v2773_v11, %v13488_v27  ;;  %v3221_v43 = vpop.permute.xlu2 %3220  ;;  %v13497_v27 = vld [vmem:[#allocation36_spill] sm:$0xff] }
 0x536   : > { %v3286_v4 = vmul.f32 %v3201_v48, %v13489_v56  ;;  %v3741_v22 = vmul.f32 %v10903_v2, %v10903_v2  ;;  %v3854_v41 = vadd.f32 %v3853_v34, %v3852_v18  ;;  %v3655_v52 = vadd.f32 %v3654_v1, %v3653_v29  ;;  %v13494_v29 = vld [vmem:[#allocation207_spill] sm:$0xff] }
 0x537   : > { %v10920_v23 = vsel %vm3412_vm6, %v3347_v42, %v3477_v40  ;;  %v3478_v36 = vmul.f32 %v9743_v3, %v3348_v26  ;;  %v3742_v50 = vmul.f32 %v10913_v31, %v10913_v31  ;;  %v3287_v30 = vmul.f32 %v10867_v51, %v13490_v9 }
 0x538   : > { %v3350_v35 = vadd.f32 %v3286_v4, %v2837_v21  ;;  %v3656_v0 = vsel %vm3550_vm5, %v10903_v2, 0.0  ;;  %vm3413_vm7 = vcmp.gt.f32.partialorder %v3348_v26, 0.0  ;;  %v3856_v33 = vadd.f32 %v3855_v55, %v3854_v41  ;;  %v4217_v41 = vld [vmem:[%s12524_s6 + $0xc0] sm:$0xff] }
 0x539   : > { %v2838_v20 = vadd.f32 %v2774_v63, %v10843_v5  ;;  %v3658_v42 = vsel %vm3550_vm5, %v10913_v31, 0.0  ;;  %v3743_v61 = vmul.f32 %v10920_v23, %v10920_v23  ;;  %v3479_v51 = vmul.f32 %v9743_v3, %v3349_v32  ;;  %v13496_v63 = vld [vmem:[#allocation212_spill] sm:$0xff] }
 0x53a   : > { %v2775_v16 = vmul.f32 %v2698_v7, %v13491_v8  ;;  %v2326_v37 = vmul.f32 %v13493_v53, %v13492_v39  ;;  %v3857_v25 = vsel %vm3550_vm5, %v3741_v22, 0.0  ;;  %v3657_v13 = vadd.f32 %v3656_v0, %v3655_v52  ;;  %v13500_v0 = vld [vmem:[#allocation145_spill] sm:$0xff]  ;;  %v13502_v8 = vld [vmem:[#allocation198_spill] sm:$0xff] }
 0x53b   : > { %vm3414_vm8 = vcmp.gt.f32.partialorder %v3349_v32, 0.0  ;;  %4364 = vperm.xlu0 %6872, %v4214_v14   ;;  %v10942_v46 = vsel %vm3413_vm7, %v3348_v26, %v3478_v36  ;;  %v3859_v5 = vsel %vm3550_vm5, %v3742_v50, 0.0  ;;  %v3351_v59 = vadd.f32 %v3287_v30, %v2838_v20  ;;  %v3211_v12 = vpop.permute.xlu1 %3210  ;;  %v13498_v50 = vld [vmem:[#allocation218_spill] sm:$0xff]  ;;  %v13499_v14 = vld [vmem:[#allocation29_spill] sm:$0xff] }
 0x53c   : > { %v3480_v19 = vmul.f32 %v9743_v3, %v3350_v35  ;;  %v3659_v44 = vadd.f32 %v3658_v42, %v3657_v13  ;;  %v3858_v10 = vadd.f32 %v3857_v25, %v3856_v33  ;;  %v3660_v11 = vsel %vm3550_vm5, %v10920_v23, 0.0  ;;  %v2703_v40 = vpop.permute.xlu0 %2702 }
 0x53d   : > { %vm3415_vm9 = vcmp.gt.f32.partialorder %v3350_v35, 0.0  ;;  %v3861_v34 = vsel %vm3550_vm5, %v3743_v61, 0.0  ;;  %v10949_v1 = vsel %vm3414_vm8, %v3349_v32, %v3479_v51  ;;  %v2839_v26 = vadd.f32 %v2775_v16, %v2326_v37  ;;  %v13501_v51 = vld [vmem:[#allocation81_spill] sm:$0xff] }
 0x53e   : > { %v3288_v18 = vmul.f32 %v3211_v12, %v13494_v29  ;;  %v2328_v7 = vmul.f32 %v13496_v63, %v13495_v60  ;;  %v3744_v48 = vmul.f32 %v10942_v46, %v10942_v46  ;;  %v3860_v55 = vadd.f32 %v3859_v5, %v3858_v10  ;;  %v4220_v60 = vld [vmem:[%s12524_s6 + $0xd8] sm:$0xff] }
 0x53f   : > { %v2777_v21 = vmul.f32 %v2708_v28, %v13497_v27  ;;  %v3481_v56 = vmul.f32 %v9743_v3, %v3351_v59  ;;  %v3661_v4 = vadd.f32 %v3660_v11, %v3659_v44  ;;  %v10958_v22 = vsel %vm3415_vm9, %v3350_v35, %v3480_v19 }
 0x540   : > { %v3352_v32 = vadd.f32 %v3288_v18, %v2839_v26  ;;  %vm3416_vm10 = vcmp.gt.f32.partialorder %v3351_v59, 0.0  ;;  %v3862_v52 = vadd.f32 %v3861_v34, %v3860_v55  ;;  %v3745_v36 = vmul.f32 %v10949_v1, %v10949_v1  ;;  %v13503_v55 = vld [vmem:[#allocation38_spill] sm:$0xff] }
 0x541   : > { %v3290_v9 = vmul.f32 %v3221_v43, %v13498_v50  ;;  %v3662_v28 = vsel %vm3550_vm5, %v10942_v46, 0.0  ;;  %v2776_v35 = vmul.f32 %v2703_v40, %v13499_v14  ;;  %v1879_v33 = vsel %vm1817_vm1, %v13500_v0, 0.0  ;;  %v13506_v50 = vld [vmem:[#allocation211_spill] sm:$0xff] }
 0x542   : > { %v3482_v30 = vmul.f32 %v9743_v3, %v3352_v32  ;;  %v2841_v20 = vadd.f32 %v2777_v21, %v2328_v7  ;;  %v3664_v42 = vsel %vm3550_vm5, %v10949_v1, 0.0  ;;  %v3746_v61 = vmul.f32 %v10958_v22, %v10958_v22 }
 0x543   : > { %vm3417_vm11 = vcmp.gt.f32.partialorder %v3352_v32, 0.0  ;;  %4379 = vperm.xlu0 %6872, %v4217_v41   ;;  %v2327_v16 = vmul.f32 %v13502_v8, %v13501_v51  ;;  %v3863_v39 = vsel %vm3550_vm5, %v3744_v48, 0.0  ;;  %v10979_v53 = vsel %vm3416_vm10, %v3351_v59, %v3481_v56  ;;  %v2713_v43 = vpop.permute.xlu1 %2712  ;;  %v13504_v56 = vld [vmem:[#allocation88_spill] sm:$0xff] }
 0x544   : > { %v3663_v37 = vadd.f32 %v3662_v28, %v3661_v4  ;;  %v3864_v25 = vadd.f32 %v3863_v39, %v3862_v52  ;;  %v3865_v13 = vsel %vm3550_vm5, %v3745_v36, 0.0  ;;  %v3354_v5 = vadd.f32 %v3290_v9, %v2841_v20  ;;  %v13505_v52 = vld [vmem:[#allocation149_spill] sm:$0xff] }
 0x545   : > { %v3666_v19 = vsel %vm3550_vm5, %v10958_v22, 0.0  ;;  %v3216_v44 = vpop.permute.xlu0 %3215  ;;  %v10984_v11 = vsel %vm3417_vm11, %v3352_v32, %v3482_v30  ;;  %v2840_v12 = vadd.f32 %v2776_v35, %v2327_v16  ;;  %v3867_v34 = vsel %vm3550_vm5, %v3746_v61, 0.0 }
 0x546   : > { %v3665_v10 = vadd.f32 %v3664_v42, %v3663_v37  ;;  %v3289_v40 = vmul.f32 %v3216_v44, %v1879_v33  ;;  %v3747_v59 = vmul.f32 %v10979_v53, %v10979_v53  ;;  %v3866_v26 = vadd.f32 %v3865_v13, %v3864_v25  ;;  %v4223_v25 = vld [vmem:[%s12524_s6 + $0xf0] sm:$0xff] }
 0x547   : > { %vm3419_vm12 = vcmp.gt.f32.partialorder %v3354_v5, 0.0  ;;  %v3484_v63 = vmul.f32 %v9743_v3, %v3354_v5  ;;  %v3748_v7 = vmul.f32 %v10984_v11, %v10984_v11  ;;  %v2778_v27 = vmul.f32 %v2713_v43, %v13503_v55  ;;  %v4199_v55 = vld [vmem:[%s12524_s6 + $0x30] sm:$0xff] }
 0x548   : > { %v3667_v29 = vadd.f32 %v3666_v19, %v3665_v10  ;;  %v3353_v18 = vadd.f32 %v3289_v40, %v2840_v12  ;;  %v3868_v48 = vadd.f32 %v3867_v34, %v3866_v26  ;;  %v1624_v4 = vsel %vm1560_vm0, 0.0, %v13504_v56  ;;  %v4204_v56 = vld [vmem:[%s12524_s6 + $0x58] sm:$0xff] }
 0x549   : > { %v3668_v32 = vsel %vm3550_vm5, %v10979_v53, 0.0  ;;  %v3670_v41 = vsel %vm3550_vm5, %v10984_v11, 0.0  ;;  %v1881_v36 = vsel %vm1817_vm1, %v13505_v52, 0.0  ;;  %v2329_v9 = vmul.f32 %v13506_v50, %v1624_v4  ;;  %v4203_v4 = vld [vmem:[%s12524_s6 + $0x50] sm:$0xff]  ;;  %v4206_v52 = vld [vmem:[%s12524_s6 + $0x68] sm:$0xff] }
 0x54a   : > { %vm3418_vm13 = vcmp.gt.f32.partialorder %v3353_v18, 0.0  ;;  %v3483_v21 = vmul.f32 %v9743_v3, %v3353_v18  ;;  %v3869_v28 = vsel %vm3550_vm5, %v3747_v59, 0.0  ;;  %v3669_v14 = vadd.f32 %v3668_v32, %v3667_v29  ;;  %v4238_v32 = vld [vmem:[%s12524_s6 + $0x168] sm:$0xff] }
 0x54b   : > { %4394 = vperm.xlu0 %6872, %v4220_v60   ;;  %v11010_v35 = vsel %vm3419_vm12, %v3354_v5, %v3484_v63  ;;  %v3871_v42 = vsel %vm3550_vm5, %v3748_v7, 0.0  ;;  %v2842_v61 = vadd.f32 %v2778_v27, %v2329_v9  ;;  %v3870_v16 = vadd.f32 %v3869_v28, %v3868_v48  ;;  %v4226_v63 = vld [vmem:[%s12524_s6 + $0x108] sm:$0xff]  ;;  %v4229_v7 = vld [vmem:[%s12524_s6 + $0x120] sm:$0xff]  ;;  %v4232_v48 = vld [vmem:[%s12524_s6 + $0x138] sm:$0xff] }
 0x54c   : > { %v11007_v30 = vsel %vm3418_vm13, %v3353_v18, %v3483_v21  ;;  %v3671_v8 = vadd.f32 %v3670_v41, %v3669_v14  ;;  %v3750_v19 = vmul.f32 %v11010_v35, %v11010_v35  ;;  %v3674_v12 = vsel %vm3550_vm5, %v11010_v35, 0.0  ;;  %v4198_v27 = vld [vmem:[%s12524_s6 + $0x28] sm:$0xff]  ;;  %v4235_v21 = vld [vmem:[%s12524_s6 + $0x150] sm:$0xff]  ;;  %v4209_v9 = vld [vmem:[%s12524_s6 + $0x80] sm:$0xff] }
 0x54d   : > { %v3749_v0 = vmul.f32 %v11007_v30, %v11007_v30  ;;  %v3226_v33 = vpop.permute.xlu0 %3225  ;;  %v3672_v20 = vsel %vm3550_vm5, %v11007_v30, 0.0  ;;  %v3872_v5 = vadd.f32 %v3871_v42, %v3870_v16  ;;  %v4207_v41 = vld [vmem:[%s12524_s6 + $0x70] sm:$0xff]  ;;  %v4210_v50 = vld [vmem:[%s12524_s6 + $0x88] sm:$0xff]  ;;  %v4244_v28 = vld [vmem:[%s12524_s6 + $0x198] sm:$0xff] }
 0x54e   : > { %v3291_v51 = vmul.f32 %v3226_v33, %v1881_v36  ;;  %v3673_v13 = vadd.f32 %v3672_v20, %v3671_v8  ;;  %v3875_v26 = vsel %vm3550_vm5, %v3750_v19, 0.0  ;;  %v4241_v36 = vld [vmem:[%s12524_s6 + $0x180] sm:$0xff]  ;;  %v4247_v33 = vld [vmem:[%s12524_s6 + $0x1b0] sm:$0xff]  ;;  %v4216_v20 = vld [vmem:[%s12524_s6 + $0xb8] sm:$0xff] }
 0x54f   : > { %v3873_v39 = vsel %vm3550_vm5, %v3749_v0, 0.0  ;;  %v4213_v14 = vld [vmem:[%s12524_s6 + $0xa0] sm:$0xff]  ;;  %v4212_v0 = vld [vmem:[%s12524_s6 + $0x98] sm:$0xff]  ;;  %v4215_v42 = vld [vmem:[%s12524_s6 + $0xb0] sm:$0xff] }
 0x550   : > { %v3355_v37 = vadd.f32 %v3291_v51, %v2842_v61  ;;  %v3874_v10 = vadd.f32 %v3873_v39, %v3872_v5  ;;  %v3675_v34 = vadd.f32 %v3674_v12, %v3673_v13  ;;  %v4250_v61 = vld [vmem:[%s12524_s6 + $0x1c8] sm:$0xff]  ;;  %v4219_v51 = vld [vmem:[%s12524_s6 + $0xd0] sm:$0xff]  ;;  %v4253_v16 = vld [vmem:[%s12524_s6 + $0x1e0] sm:$0xff] }
 0x551   : > { %v4218_v8 = vld [vmem:[%s12524_s6 + $0xc8] sm:$0xff]  ;;  %v4225_v13 = vld [vmem:[%s12524_s6 + $0x100] sm:$0xff]  ;;  %v4224_v5 = vld [vmem:[%s12524_s6 + $0xf8] sm:$0xff] }
 0x552   : > { %vm3420_vm0 = vcmp.gt.f32.partialorder %v3355_v37, 0.0  ;;  %v3485_v44 = vmul.f32 %v9743_v3, %v3355_v37  ;;  %v3876_v18 = vadd.f32 %v3875_v26, %v3874_v10  ;;  %v4222_v39 = vld [vmem:[%s12524_s6 + $0xe8] sm:$0xff]  ;;  %v4228_v19 = vld [vmem:[%s12524_s6 + $0x118] sm:$0xff]  ;;  %v4231_v10 = vld [vmem:[%s12524_s6 + $0x130] sm:$0xff] }
 0x553   : > { %4409 = vperm.xlu0 %6872, %v4223_v25   ;;  %v4256_v25 = vld [vmem:[%s12524_s6 + $0x1f8] sm:$0xff]  ;;  %v4230_v12 = vld [vmem:[%s12524_s6 + $0x128] sm:$0xff] }
 0x554   : > { %v11026_v40 = vsel %vm3420_vm0, %v3355_v37, %v3485_v44  ;;  %v4221_v37 = vld [vmem:[%s12524_s6 + $0xe0] sm:$0xff]  ;;  %v4227_v44 = vld [vmem:[%s12524_s6 + $0x110] sm:$0xff] }
 0x555   : > { %v3676_v43 = vsel %vm3550_vm5, %v11026_v40, 0.0  ;;  %v3751_v59 = vmul.f32 %v11026_v40, %v11026_v40 }
 0x556   : > { %v3677_v29 = vadd.f32 %v3676_v43, %v3675_v34  ;;  %v4234_v34 = vld [vmem:[%s12524_s6 + $0x148] sm:$0xff]  ;;  %v4233_v43 = vld [vmem:[%s12524_s6 + $0x140] sm:$0xff] }
 0x557   : > { %v3877_v3 = vsel %vm3550_vm5, %v3751_v59, 0.0 }
 0x558   : > { %3678 = vadd.xlane.f32.xlu1 %v3677_v29  ;;  %v3878_v60 = vadd.f32 %v3877_v3, %v3876_v18 }
 0x55a   : > { %3879 = vadd.xlane.f32.xlu2 %v3878_v60  ;;  %v4237_v60 = vld [vmem:[%s12524_s6 + $0x160] sm:$0xff] }
 0x55b   : > { %4424 = vperm.xlu0 %6872, %v4226_v63   ;;  %v4236_v63 = vld [vmem:[%s12524_s6 + $0x158] sm:$0xff] }
 0x563   : > { %4439 = vperm.xlu0 %6872, %v4229_v7  }
 0x56b   : > { %4454 = vperm.xlu0 %6872, %v4232_v48  }
 0x571   : > { %4289 = vperm.xlu1 %6873, %v4199_v55  }
 0x572   : > { %4284 = vperm.xlu2 %6874, %v4198_v27  }
 0x573   : > { %4469 = vperm.xlu0 %6872, %v4235_v21  }
 0x579   : > { %4314 = vperm.xlu1 %6873, %v4204_v56  }
 0x57a   : > { %4309 = vperm.xlu2 %6874, %v4203_v4  }
 0x57b   : > { %4484 = vperm.xlu0 %6872, %v4238_v32   ;;  %v4240_v32 = vld [vmem:[%s12524_s6 + $0x178] sm:$0xff] }
 0x581   : > { %4329 = vperm.xlu1 %6873, %v4207_v41  }
 0x582   : > { %4324 = vperm.xlu2 %6874, %v4206_v52   ;;  %v4239_v52 = vld [vmem:[%s12524_s6 + $0x170] sm:$0xff] }
 0x583   : > { %4499 = vperm.xlu0 %6872, %v4241_v36  }
 0x589   : > { %4344 = vperm.xlu1 %6873, %v4210_v50   ;;  %v4243_v50 = vld [vmem:[%s12524_s6 + $0x190] sm:$0xff] }
 0x58a   : > { %4339 = vperm.xlu2 %6874, %v4209_v9   ;;  %v4242_v9 = vld [vmem:[%s12524_s6 + $0x188] sm:$0xff] }
 0x58b   : > { %4514 = vperm.xlu0 %6872, %v4244_v28   ;;  %v4246_v28 = vld [vmem:[%s12524_s6 + $0x1a8] sm:$0xff] }
 0x591   : > { %4359 = vperm.xlu1 %6873, %v4213_v14   ;;  %v4245_v14 = vld [vmem:[%s12524_s6 + $0x1a0] sm:$0xff] }
 0x592   : > { %4354 = vperm.xlu2 %6874, %v4212_v0   ;;  %v4249_v0 = vld [vmem:[%s12524_s6 + $0x1c0] sm:$0xff] }
 0x593   : > { %4529 = vperm.xlu0 %6872, %v4247_v33   ;;  %v4248_v33 = vld [vmem:[%s12524_s6 + $0x1b8] sm:$0xff] }
 0x599   : > { %4374 = vperm.xlu1 %6873, %v4216_v20   ;;  %v4252_v20 = vld [vmem:[%s12524_s6 + $0x1d8] sm:$0xff] }
 0x59a   : > { %4369 = vperm.xlu2 %6874, %v4215_v42   ;;  %v4251_v42 = vld [vmem:[%s12524_s6 + $0x1d0] sm:$0xff] }
 0x59b   : > { %4544 = vperm.xlu0 %6872, %v4250_v61   ;;  %v4255_v61 = vld [vmem:[%s12524_s6 + $0x1f0] sm:$0xff] }
 0x5a1   : > { %4389 = vperm.xlu1 %6873, %v4219_v51   ;;  %v4254_v51 = vld [vmem:[%s12524_s6 + $0x1e8] sm:$0xff] }
 0x5a2   : > { %4384 = vperm.xlu2 %6874, %v4218_v8  }
 0x5a3   : > { %4559 = vperm.xlu0 %6872, %v4253_v16  }
 0x5a9   : > { %4404 = vperm.xlu1 %6873, %v4222_v39  }
 0x5aa   : > { %4399 = vperm.xlu2 %6874, %v4221_v37  }
 0x5ab   : > { %4574 = vperm.xlu0 %6872, %v4256_v25  }
 0x5b1   : > { %4419 = vperm.xlu1 %6873, %v4225_v13  }
 0x5b2   : > { %4414 = vperm.xlu2 %6874, %v4224_v5  }
 0x5b9   : > { %4434 = vperm.xlu1 %6873, %v4228_v19  }
 0x5ba   : > { %4429 = vperm.xlu2 %6874, %v4227_v44   ;;  %v13507_v44 = vld [vmem:[#allocation166_spill] sm:$0xff] }
 0x5c1   : > { %4449 = vperm.xlu1 %6873, %v4231_v10  }
 0x5c2   : > { %4444 = vperm.xlu2 %6874, %v4230_v12   ;;  %v13508_v12 = vld [vmem:[#allocation75_spill] sm:$0xff] }
 0x5c9   : > { %4464 = vperm.xlu1 %6873, %v4234_v34   ;;  %v13540_v34 = vld [vmem:[#allocation46_spill] sm:$0xff] }
 0x5ca   : > { %4459 = vperm.xlu2 %6874, %v4233_v43   ;;  %v13509_v43 = vld [vmem:[#allocation247_spill] sm:$0xff] }
 0x5cb   : > { %v3679_v59 = vpop.xlane.xlu1 %3678 }
 0x5cc   : > { %v3680_v26 = vrot.slane %v3679_v59, 4 }
 0x5cd   : > { %v3880_v29 = vpop.xlane.xlu2 %3879 }
 0x5ce   : > { %v3681_v18 = vadd.f32 %v3680_v26, %v3679_v59  ;;  %v3881_v3 = vrot.slane %v3880_v29, 4  ;;  %v13510_v26 = vld [vmem:[#allocation178_spill] sm:$0xff]  ;;  %v13534_v59 = vld [vmem:[#allocation181_spill] sm:$0xff] }
 0x5d0   : > { %v3682_v7 = vrot.slane %v3681_v18, 2  ;;  %v3882_v48 = vadd.f32 %v3881_v3, %v3880_v29  ;;  %v13531_v3 = vld [vmem:[#allocation41_spill] sm:$0xff]  ;;  %v13533_v29 = vld [vmem:[#allocation170_spill] sm:$0xff] }
 0x5d1   : > { %4479 = vperm.xlu1 %6873, %v4237_v60   ;;  %v13537_v60 = vld [vmem:[#allocation160_spill] sm:$0xff] }
 0x5d2   : > { %v3883_v55 = vrot.slane %v3882_v48, 2  ;;  %4474 = vperm.xlu2 %6874, %v4236_v63   ;;  %v3683_v27 = vadd.f32 %v3682_v7, %v3681_v18  ;;  %v13511_v7 = vld [vmem:[#allocation164_spill] sm:$0xff] }
 0x5d3   : > { %v13532_v18 = vld [vmem:[#allocation168_spill] sm:$0xff] }
 0x5d4   : > { %v3684_v21 = vrot.slane %v3683_v27, 1  ;;  %v3884_v56 = vadd.f32 %v3883_v55, %v3882_v48  ;;  %v13512_v55 = vld [vmem:[#allocation162_spill] sm:$0xff]  ;;  %v13536_v48 = vld [vmem:[#allocation72_spill] sm:$0xff] }
 0x5d6   : > { %v3685_v4 = vadd.f32 %v3684_v21, %v3683_v27  ;;  %v3885_v41 = vrot.slane %v3884_v56, 1  ;;  %v13513_v21 = vld [vmem:[#allocation121_spill] sm:$0xff]  ;;  %v13541_v27 = vld [vmem:[#allocation80_spill] sm:$0xff] }
 0x5d8   : > { %6857 = vpush %v3685_v4  ;;  %v3886_v36 = vadd.f32 %v3885_v41, %v3884_v56  ;;  %v13514_v4 = vld [vmem:[#allocation175_spill] sm:$0xff]  ;;  %v13524_v41 = vld [vmem:[#allocation201_spill] sm:$0xff] }
 0x5d9   : > { %4494 = vperm.xlu1 %6873, %v4240_v32   ;;  %v13525_v32 = vld [vmem:[#allocation248_spill] sm:$0xff]  ;;  %v13530_v56 = vld [vmem:[#allocation159_spill] sm:$0xff] }
 0x5da   : > { %4489 = vperm.xlu2 %6874, %v4239_v52   ;;  %6859 = vpush %v3886_v36  ;;  %v13523_v52 = vld [vmem:[#allocation187_spill] sm:$0xff] }
 0x5e1   : > { %4509 = vperm.xlu1 %6873, %v4243_v50  }
 0x5e2   : > { %4504 = vperm.xlu2 %6874, %v4242_v9  }
 0x5e9   : > { %4524 = vperm.xlu1 %6873, %v4246_v28   ;;  %v13515_v28 = vld [vmem:[#allocation71_spill] sm:$0xff] }
 0x5ea   : > { %4519 = vperm.xlu2 %6874, %v4245_v14   ;;  %v13538_v14 = vld [vmem:[#allocation167_spill] sm:$0xff] }
 0x5f1   : > { %4539 = vperm.xlu1 %6873, %v4249_v0   ;;  %v13516_v0 = vld [vmem:[#allocation163_spill] sm:$0xff] }
 0x5f2   : > { %4534 = vperm.xlu2 %6874, %v4248_v33   ;;  %v13529_v33 = vld [vmem:[#allocation184_spill] sm:$0xff] }
 0x5f9   : > { %4554 = vperm.xlu1 %6873, %v4252_v20   ;;  %v13517_v20 = vld [vmem:[#allocation173_spill] sm:$0xff] }
 0x5fa   : > { %4549 = vperm.xlu2 %6874, %v4251_v42   ;;  %v13520_v42 = vld [vmem:[#allocation77_spill] sm:$0xff] }
 0x601   : > { %4569 = vperm.xlu1 %6873, %v4255_v61   ;;  %v13518_v61 = vld [vmem:[#allocation174_spill] sm:$0xff] }
 0x602   : > { %4564 = vperm.xlu2 %6874, %v4254_v51   ;;  %v13521_v51 = vld [vmem:[#allocation214_spill] sm:$0xff] }
 0x609   : > { %s6858_s17 = spop %6857 }
 0x60a   : > { %v3687_v8 = vstv %s6858_s17 }
 0x60b   : > { %v11181_v16 = vmul.f32 0.00012207031, %v3687_v8  ;;  %s6860_s18 = spop %6859 }
 0x60c   : > { %v3888_v39 = vstv %s6860_s18 }
 0x60d   : > { %v3890_v37 = vmul.f32 0.00012207031, %v3888_v39  ;;  %v3891_v25 = vmul.f32 %v11181_v16, %v11181_v16  ;;  %v13522_v39 = vld [vmem:[#allocation172_spill] sm:$0xff]  ;;  %v13542_v45 = vsub.f32 %v13507_v44, %v11181_v16  ;;  %v13546_v44 = vsub.f32 %v10801_v57, %v11181_v16 }
 0x60e   : > { %v13550_v57 = vsub.f32 %v13511_v7, %v11181_v16  ;;  %v13554_v7 = vsub.f32 %v10736_v17, %v11181_v16 }
 0x60f   : > { %v3892_v13 = vsub.f32 %v3890_v37, %v3891_v25  ;;  %v13526_v37 = vld [vmem:[#allocation171_spill] sm:$0xff]  ;;  %v13527_v25 = vld [vmem:[#allocation44_spill] sm:$0xff] }
 0x611   : > { %v3893_v5 = vmax.f32 %v3892_v13, 0.0  ;;  %v13528_v13 = vld [vmem:[#allocation251_spill] sm:$0xff] }
 0x613   : > { %v3958_v19 = vadd.f32 1e-08, %v3893_v5  ;;  %v13519_v5 = vld [vmem:[#allocation161_spill] sm:$0xff] }
 0x615   : > { %6875 = vrsqrt.f32 %v3958_v19  ;;  %vm3965_vm1 = vweird.f32 %v3958_v19 }
 0x61b   : > { %v6876_v9 = vpop.eup %6875 }
 0x61c   : > { %v3960_v8 = vmul.f32 %v6876_v9, %v3958_v19  ;;  %vm3966_vm14 = vweird.f32 %v6876_v9  ;;  %v13545_v19 = vsub.f32 %v13510_v26, %v11181_v16  ;;  %v13549_v26 = vsub.f32 %v11026_v40, %v11181_v16 }
 0x61d   : > { %vm3967_vm15 = vmor %vm3965_vm1, %vm3966_vm14 }
 0x61e   : > { %v3961_v36 = vmul.f32 %v6876_v9, %v3960_v8 }
 0x620   : > { %v3962_v8 = vmul.f32 0.5, %v3961_v36  ;;  %v13539_v36 = vld [vmem:[#allocation169_spill] sm:$0xff] }
 0x622   : > { %v3963_v50 = vsub.f32 1.5, %v3962_v8 }
 0x624   : > { %v3964_v8 = vmul.f32 %v6876_v9, %v3963_v50  ;;  %v13543_v50 = vsub.f32 %v13508_v12, %v11181_v16  ;;  %v13547_v12 = vsub.f32 %v10774_v38, %v11181_v16  ;;  %v13551_v38 = vsub.f32 %v13512_v55, %v11181_v16 }
 0x626   : > { %v11292_v54 = vsel %vm3967_vm15, %v6876_v9, %v3964_v8  ;;  %v13544_v8 = vsub.f32 %v13509_v43, %v11181_v16  ;;  %v13548_v43 = vsub.f32 %v11010_v35, %v11181_v16 }
 0x627   : > { %v3983_v62 = vmul.f32 %v11292_v54, %v13542_v45  ;;  %v3984_v9 = vmul.f32 %v11292_v54, %v13543_v50  ;;  %v4000_v63 = vmul.f32 %v11292_v54, %v13545_v19  ;;  %v4015_v45 = vmul.f32 %v11292_v54, %v13546_v44 }
 0x628   : > { %v3999_v2 = vmul.f32 %v11292_v54, %v13544_v8  ;;  %v4016_v50 = vmul.f32 %v11292_v54, %v13547_v12  ;;  %v4031_v8 = vmul.f32 %v11292_v54, %v13548_v43  ;;  %v4032_v19 = vmul.f32 %v11292_v54, %v13549_v26 }
 0x629   : > { %v4168_v10 = vpack.c.bf16 %v3984_v9, %v3983_v62  ;;  %v3981_v44 = vmul.f32 %v11292_v54, %v13550_v57  ;;  %v3982_v12 = vmul.f32 %v11292_v54, %v13551_v38  ;;  %v13552_v43 = vsub.f32 %v13513_v21, %v11181_v16 }
 0x62a   : > { %v4176_v24 = vpack.c.bf16 %v4000_v63, %v3999_v2  ;;  %v4184_v35 = vpack.c.bf16 %v4016_v50, %v4015_v45  ;;  %v4192_v6 = vpack.c.bf16 %v4032_v19, %v4031_v8  ;;  %v13553_v62 = vsub.f32 %v13514_v4, %v11181_v16 }
 0x62b   : > { %v3997_v40 = vmul.f32 %v11292_v54, %v13552_v43  ;;  %5217 = vmatpush.bf16.msra.mxu0 %v4168_v10  ;;  %v4167_v63 = vpack.c.bf16 %v3982_v12, %v3981_v44  ;;  %v4013_v55 = vmul.f32 %v11292_v54, %v13554_v7  ;;  %v13555_v9 = vsub.f32 %v10783_v58, %v11181_v16 }
 0x62c   : > { %v3998_v2 = vmul.f32 %v11292_v54, %v13553_v62  ;;  %5386 = vmatpush.bf16.msra.mxu1 %v4176_v24  ;;  %5555 = vmatpush.bf16.msra.mxu2 %v4184_v35  ;;  %v13556_v4 = vsub.f32 %v10984_v11, %v11181_v16  ;;  %v13557_v24 = vsub.f32 %v11007_v30, %v11181_v16 }
 0x62d   : > { %v4014_v21 = vmul.f32 %v11292_v54, %v13555_v9  ;;  %5724 = vmatpush.bf16.msra.mxu3 %v4192_v6  ;;  %v13558_v8 = vsub.f32 %v13515_v28, %v11181_v16  ;;  %v13559_v6 = vsub.f32 %v13516_v0, %v11181_v16  ;;  %v13560_v11 = vsub.f32 %v13517_v20, %v11181_v16 }
 0x62e   : > { %v4175_v45 = vpack.c.bf16 %v3998_v2, %v3997_v40  ;;  %v4029_v10 = vmul.f32 %v11292_v54, %v13556_v4  ;;  %v4030_v17 = vmul.f32 %v11292_v54, %v13557_v24  ;;  %v13561_v30 = vsub.f32 %v13518_v61, %v11181_v16 }
 0x62f   : > { %v4183_v50 = vpack.c.bf16 %v4014_v21, %v4013_v55  ;;  %v3979_v58 = vmul.f32 %v11292_v54, %v13558_v8  ;;  %v3980_v26 = vmul.f32 %v11292_v54, %v13559_v6  ;;  %v3995_v19 = vmul.f32 %v11292_v54, %v13560_v11  ;;  %5218 = vmatpush.bf16.msra.mxu0 %v4167_v63 }
 0x630   : > { %v4191_v57 = vpack.c.bf16 %v4030_v17, %v4029_v10  ;;  %v3996_v44 = vmul.f32 %v11292_v54, %v13561_v30  ;;  %v13562_v28 = vsub.f32 %v10723_v49, %v11181_v16  ;;  %v13563_v0 = vsub.f32 %v10739_v47, %v11181_v16  ;;  %5387 = vmatpush.bf16.msra.mxu1 %v4175_v45  ;;  %v13574_v17 = vld [vmem:[#allocation158_spill] sm:$0xff] }
 0x631   : > { %v4166_v20 = vpack.c.bf16 %v3980_v26, %v3979_v58  ;;  %v13564_v35 = vsub.f32 %v10958_v22, %v11181_v16  ;;  %v13565_v43 = vsub.f32 %v10979_v53, %v11181_v16  ;;  %5556 = vmatpush.bf16.msra.mxu2 %v4183_v50  ;;  %v13566_v47 = vsub.f32 %v13519_v5, %v11181_v16 }
 0x632   : > { %v4011_v38 = vmul.f32 %v11292_v54, %v13562_v28  ;;  %v4012_v12 = vmul.f32 %v11292_v54, %v13563_v0  ;;  %5725 = vmatpush.bf16.msra.mxu3 %v4191_v57  ;;  %v4174_v40 = vpack.c.bf16 %v3996_v44, %v3995_v19  ;;  %v13567_v22 = vsub.f32 %v13520_v42, %v11181_v16 }
 0x633   : > { %v4027_v61 = vmul.f32 %v11292_v54, %v13564_v35  ;;  %v4028_v49 = vmul.f32 %v11292_v54, %v13565_v43  ;;  %v3977_v2 = vmul.f32 %v11292_v54, %v13566_v47  ;;  %v13568_v53 = vsub.f32 %v13521_v51, %v11181_v16  ;;  %5219 = vmatpush.bf16.msra.mxu0 %v4166_v20 }
 0x634   : > { %v4182_v62 = vpack.c.bf16 %v4012_v12, %v4011_v38  ;;  %v3978_v7 = vmul.f32 %v11292_v54, %v13567_v22  ;;  %v13569_v9 = vsub.f32 %v13522_v39, %v11181_v16  ;;  %v13570_v5 = vsub.f32 %v13523_v52, %v11181_v16  ;;  %5388 = vmatpush.bf16.msra.mxu1 %v4174_v40 }
 0x635   : > { %v4190_v63 = vpack.c.bf16 %v4028_v49, %v4027_v61  ;;  %v3993_v55 = vmul.f32 %v11292_v54, %v13568_v53  ;;  %v13571_v42 = vsub.f32 %v10664_v15, %v11181_v16  ;;  %v13572_v51 = vsub.f32 %v10942_v46, %v11181_v16  ;;  %v13575_v15 = vld [vmem:[#allocation157_spill] sm:$0xff] }
 0x636   : > { %v3994_v21 = vmul.f32 %v11292_v54, %v13569_v9  ;;  %v4009_v45 = vmul.f32 %v11292_v54, %v13570_v5  ;;  %v13573_v39 = vsub.f32 %v10949_v1, %v11181_v16  ;;  %v4165_v52 = vpack.c.bf16 %v3978_v7, %v3977_v2  ;;  %5557 = vmatpush.bf16.msra.mxu2 %v4182_v62  ;;  %v13589_v62 = vld [vmem:[#allocation234_spill] sm:$0xff] }
 0x637   : > { %v4010_v4 = vmul.f32 %v11292_v54, %v13571_v42  ;;  %v4025_v10 = vmul.f32 %v11292_v54, %v13572_v51  ;;  %v3894_v50 = vsub.f32 %v13574_v17, %v11181_v16  ;;  %v3895_v8 = vsub.f32 %v13575_v15, %v11181_v16  ;;  %5726 = vmatpush.bf16.msra.mxu3 %v4190_v63 }
 0x638   : > { %v4026_v24 = vmul.f32 %v11292_v54, %v13573_v39  ;;  %v4173_v58 = vpack.c.bf16 %v3994_v21, %v3993_v55  ;;  %v13576_v46 = vsub.f32 %v13524_v41, %v11181_v16  ;;  %v13577_v1 = vsub.f32 %v13525_v32, %v11181_v16  ;;  %5220 = vmatpush.bf16.msra.mxu0 %v4165_v52 }
 0x639   : > { %v13578_v11 = vsub.f32 %v13526_v37, %v11181_v16  ;;  %v13579_v57 = vsub.f32 %v13527_v25, %v11181_v16  ;;  %v13580_v41 = vsub.f32 %v13528_v13, %v11181_v16  ;;  %v13581_v32 = vsub.f32 %v13529_v33, %v11181_v16 }
 0x63a   : > { %v3975_v6 = vmul.f32 %v11292_v54, %v13576_v46  ;;  %v3976_v26 = vmul.f32 %v11292_v54, %v13577_v1  ;;  %v4181_v38 = vpack.c.bf16 %v4010_v4, %v4009_v45  ;;  %v4189_v0 = vpack.c.bf16 %v4026_v24, %v4025_v10  ;;  %5389 = vmatpush.bf16.msra.mxu1 %v4173_v58  ;;  %v13595_v45 = vld [vmem:[#allocation48_spill] sm:$0xff] }
 0x63b   : > { %v3991_v19 = vmul.f32 %v11292_v54, %v13578_v11  ;;  %v3992_v30 = vmul.f32 %v11292_v54, %v13579_v57  ;;  %v4007_v44 = vmul.f32 %v11292_v54, %v13580_v41  ;;  %v4008_v28 = vmul.f32 %v11292_v54, %v13581_v32  ;;  %v13608_v32 = vld [vmem:[#allocation204_spill] sm:$0xff] }
 0x63c   : > { %v13582_v37 = vsub.f32 %v10913_v31, %v11181_v16  ;;  %v13583_v25 = vsub.f32 %v10920_v23, %v11181_v16  ;;  %v13584_v13 = vsub.f32 %v13530_v56, %v11181_v16  ;;  %v13585_v35 = vsub.f32 %v13531_v3, %v11181_v16  ;;  %v13586_v31 = vld [vmem:[#allocation165_spill] sm:$0xff]  ;;  %5558 = vmatpush.bf16.msra.mxu2 %v4181_v38 }
 0x63d   : > { %v3910_v43 = vsub.f32 %v13586_v31, %v11181_v16  ;;  %5727 = vmatpush.bf16.msra.mxu3 %v4189_v0  ;;  %v13587_v23 = vsub.f32 %v13532_v18, %v11181_v16  ;;  %v13588_v56 = vsub.f32 %v13533_v29, %v11181_v16  ;;  %v3911_v3 = vsub.f32 %v13589_v62, %v11181_v16  ;;  %v13591_v18 = vld [vmem:[#allocation237_spill] sm:$0xff]  ;;  %v6732_v62 = vld [vmem:[%s12523_s5 + $0x14] sm:$0xf0] }
 0x63e   : > { %v4023_v12 = vmul.f32 %v11292_v54, %v13582_v37  ;;  %v4024_v20 = vmul.f32 %v11292_v54, %v13583_v25  ;;  %v3973_v33 = vmul.f32 %v11292_v54, %v13584_v13  ;;  %v3974_v61 = vmul.f32 %v11292_v54, %v13585_v35  ;;  %v13593_v29 = vld [vmem:[#allocation125_spill] sm:$0xff]  ;;  %v13610_v37 = vld [vmem:[#allocation188_spill] sm:$0xff] }
 0x63f   : > { %v3989_v49 = vmul.f32 %v11292_v54, %v13587_v23  ;;  %v3990_v40 = vmul.f32 %v11292_v54, %v13588_v56  ;;  %v4164_v47 = vpack.c.bf16 %v3976_v26, %v3975_v6  ;;  %v4172_v2 = vpack.c.bf16 %v3992_v30, %v3991_v19  ;;  %v13603_v26 = vld [vmem:[#allocation47_spill] sm:$0xff]  ;;  %v13609_v38 = vld [vmem:[#allocation217_spill] sm:$0xff] }
 0x640   : > { %v4180_v63 = vpack.c.bf16 %v4008_v28, %v4007_v44  ;;  %v4188_v22 = vpack.c.bf16 %v4024_v20, %v4023_v12  ;;  %v13590_v7 = vsub.f32 %v13534_v59, %v11181_v16  ;;  %v13592_v55 = vsub.f32 %v13591_v18, %v11181_v16  ;;  %v13605_v19 = vld [vmem:[#allocation191_spill] sm:$0xff] }
 0x641   : > { %v13594_v21 = vsub.f32 %v13593_v29, %v11181_v16  ;;  %v13596_v42 = vsub.f32 %v13595_v45, %v11181_v16  ;;  %5221 = vmatpush.bf16.msra.mxu0 %v4164_v47  ;;  %5390 = vmatpush.bf16.msra.mxu1 %v4172_v2  ;;  %v4163_v59 = vpack.c.bf16 %v3974_v61, %v3973_v33  ;;  %v6225_v47 = vld [vmem:[%s12523_s5 + $0x18] sm:$0xf0]  ;;  %v6231_v29 = vld [vmem:[%s12523_s5 + $0x20] sm:$0xf]  ;;  %v6233_v45 = vld [vmem:[%s12523_s5 + $0x30] sm:$0xf0] }
 0x642   : > { %v4005_v53 = vmul.f32 %v11292_v54, %v13590_v7  ;;  %v4006_v9 = vmul.f32 %v11292_v54, %v13592_v55  ;;  %v13597_v51 = vsub.f32 %v13536_v48, %v11181_v16  ;;  %v13598_v39 = vsub.f32 %v13537_v60, %v11181_v16  ;;  %5559 = vmatpush.bf16.msra.mxu2 %v4180_v63 }
 0x643   : > { %v4021_v5 = vmul.f32 %v11292_v54, %v13594_v21  ;;  %v4022_v4 = vmul.f32 %v11292_v54, %v13596_v42  ;;  %5728 = vmatpush.bf16.msra.mxu3 %v4188_v22  ;;  %v4171_v52 = vpack.c.bf16 %v3990_v40, %v3989_v49  ;;  %v13599_v17 = vsub.f32 %v13538_v14, %v11181_v16  ;;  %v6217_v40 = vld [vmem:[%s12523_s5 + $0x10] sm:$0xf0]  ;;  %v6735_v21 = vld [vmem:[%s12523_s5 + $0x2c] sm:$0xf0]  ;;  %v6239_v42 = vld [vmem:[%s12523_s5 + $0x28] sm:$0xf] }
 0x644   : > { %v3971_v10 = vmul.f32 %v11292_v54, %v13597_v51  ;;  %v3972_v24 = vmul.f32 %v11292_v54, %v13598_v39  ;;  %v13600_v58 = vsub.f32 %v13539_v36, %v11181_v16  ;;  %v13601_v46 = vsub.f32 %v13540_v34, %v11181_v16  ;;  %v13607_v34 = vld [vmem:[#allocation42_spill] sm:$0xff] }
 0x645   : > { %v3987_v15 = vmul.f32 %v11292_v54, %v13599_v17  ;;  %v13602_v6 = vsub.f32 %v13541_v27, %v11181_v16  ;;  %v13604_v14 = vsub.f32 %v13603_v26, %v11181_v16  ;;  %v13606_v36 = vsub.f32 %v13605_v19, %v11181_v16  ;;  %5222 = vmatpush.bf16.msra.mxu0 %v4163_v59  ;;  %v6734_v59 = vld [vmem:[%s12523_s5 + $0x2c] sm:$0xf]  ;;  %v6241_v51 = vld [vmem:[%s12523_s5 + $0x38] sm:$0xf0]  ;;  %v6247_v17 = vld [vmem:[%s12523_s5 + $0x40] sm:$0xf] }
 0x646   : > { %v3988_v48 = vmul.f32 %v11292_v54, %v13600_v58  ;;  %v4003_v60 = vmul.f32 %v11292_v54, %v13601_v46  ;;  %v4179_v30 = vpack.c.bf16 %v4006_v9, %v4005_v53  ;;  %v4187_v41 = vpack.c.bf16 %v4022_v4, %v4021_v5  ;;  %5391 = vmatpush.bf16.msra.mxu1 %v4171_v52  ;;  %v6733_v5 = vld [vmem:[%s12523_s5 + $0x24] sm:$0xf]  ;;  %v6736_v4 = vld [vmem:[%s12523_s5 + $0x34] sm:$0xf0]  ;;  %v6255_v46 = vld [vmem:[%s12523_s5 + $0x48] sm:$0xf] }
 0x647   : > { %v4004_v1 = vmul.f32 %v11292_v54, %v13602_v6  ;;  %v4019_v11 = vmul.f32 %v11292_v54, %v13604_v14  ;;  %v4020_v57 = vmul.f32 %v11292_v54, %v13606_v36  ;;  %v3926_v44 = vsub.f32 %v13607_v34, %v11181_v16  ;;  %v6737_v58 = vld [vmem:[%s12523_s5 + $0x44] sm:$0xf]  ;;  %v6738_v6 = vld [vmem:[%s12523_s5 + $0x4c] sm:$0xf]  ;;  %v6263_v36 = vld [vmem:[%s12523_s5 + $0x60] sm:$0xf] }
 0x648   : > { %v3927_v27 = vsub.f32 %v13608_v32, %v11181_v16  ;;  %v4162_v28 = vpack.c.bf16 %v3972_v24, %v3971_v10  ;;  %v3942_v0 = vsub.f32 %v13609_v38, %v11181_v16  ;;  %v3943_v12 = vsub.f32 %v13610_v37, %v11181_v16  ;;  %5560 = vmatpush.bf16.msra.mxu2 %v4179_v30  ;;  %v6741_v30 = vld [vmem:[%s12523_s5 + $0x64] sm:$0xf]  ;;  %v6271_v34 = vld [vmem:[%s12523_s5 + $0x68] sm:$0xf]  ;;  %v6742_v32 = vld [vmem:[%s12523_s5 + $0x6c] sm:$0xf] }
 0x649   : > { %5729 = vmatpush.bf16.msra.mxu3 %v4187_v41  ;;  %v4170_v25 = vpack.c.bf16 %v3988_v48, %v3987_v15  ;;  %v3969_v20 = vmul.f32 %v11292_v54, %v3894_v50  ;;  %v3970_v13 = vmul.f32 %v11292_v54, %v3895_v8  ;;  %v4178_v33 = vpack.c.bf16 %v4004_v1, %v4003_v60  ;;  %v6215_v50 = vld [vmem:[%s12523_s5] sm:$0xf]  ;;  %v6731_v8 = vld [vmem:[%s12523_s5 + $0xc] sm:$0xf0]  ;;  %v6249_v48 = vld [vmem:[%s12523_s5 + $0x50] sm:$0xf0] }
 0x64a   : > { %v4186_v35 = vpack.c.bf16 %v4020_v57, %v4019_v11  ;;  %v3985_v61 = vmul.f32 %v11292_v54, %v3910_v43  ;;  %v3986_v31 = vmul.f32 %v11292_v54, %v3911_v3  ;;  %v4001_v23 = vmul.f32 %v11292_v54, %v3926_v44  ;;  %5223 = vmatpush.bf16.msra.mxu0 %v4162_v28  ;;  %v6729_v43 = vld [vmem:[%s12523_s5 + $0x4] sm:$0xf]  ;;  %v6730_v3 = vld [vmem:[%s12523_s5 + $0xc] sm:$0xf]  ;;  %v6739_v15 = vld [vmem:[%s12523_s5 + $0x4c] sm:$0xf0] }
 0x64b   : > { %v4002_v49 = vmul.f32 %v11292_v54, %v3927_v27  ;;  %v4017_v56 = vmul.f32 %v11292_v54, %v3942_v0  ;;  %v4018_v16 = vmul.f32 %v11292_v54, %v3943_v12  ;;  %5392 = vmatpush.bf16.msra.mxu1 %v4170_v25  ;;  %v6223_v54 = vld [vmem:[%s12523_s5 + $0x8] sm:$0xf]  ;;  %v4161_v2 = vpack.c.bf16 %v3970_v13, %v3969_v20  ;;  %v6740_v60 = vld [vmem:[%s12523_s5 + $0x54] sm:$0xf0]  ;;  %v6257_v1 = vld [vmem:[%s12523_s5 + $0x58] sm:$0xf0] }
 0x64c   : > { %5561 = vmatpush.bf16.msra.mxu2 %v4178_v33  ;;  %v4169_v63 = vpack.c.bf16 %v3986_v31, %v3985_v61  ;;  %v6216_v53 = vor.u32 %v6731_v8, %v6215_v50  ;;  %v6220_v18 = vor.u32 %v6729_v43, %v6217_v40  ;;  %v6224_v55 = vor.u32 %v6732_v62, %v6223_v54  ;;  %v6743_v57 = vld [vmem:[%s12523_s5 + $0x6c] sm:$0xf0]  ;;  %v6265_v41 = vld [vmem:[%s12523_s5 + $0x70] sm:$0xf0]  ;;  %v6744_v44 = vld [vmem:[%s12523_s5 + $0x74] sm:$0xf0] }
 0x64d   : > { %5730 = vmatpush.bf16.msra.mxu3 %v4186_v35  ;;  %v4177_v22 = vpack.c.bf16 %v4002_v49, %v4001_v23  ;;  %v4185_v7 = vpack.c.bf16 %v4018_v16, %v4017_v56  ;;  %v6228_v9 = vor.u32 %v6730_v3, %v6225_v47  ;;  %v6232_v10 = vor.u32 %v6735_v21, %v6231_v29  ;;  %v6273_v27 = vld [vmem:[%s12523_s5 + $0x78] sm:$0xf0]  ;;  %v6279_v12 = vld [vmem:[%s12523_s5 + $0x80] sm:$0xf]  ;;  %v6747_v25 = vld [vmem:[%s12523_s5 + $0x8c] sm:$0xf0] }
 0x64e   : > { %5224 = vmatpush.bf16.msra.mxu0 %v4161_v2  ;;  %v6236_v39 = vor.u32 %v6733_v5, %v6233_v45  ;;  %v6240_v24 = vor.u32 %v6736_v4, %v6239_v42  ;;  %v6244_v52 = vor.u32 %v6734_v59, %v6241_v51  ;;  %v6248_v26 = vor.u32 %v6739_v15, %v6247_v17  ;;  %v6745_v20 = vld [vmem:[%s12523_s5 + $0x84] sm:$0xf]  ;;  %v6281_v13 = vld [vmem:[%s12523_s5 + $0x90] sm:$0xf0]  ;;  %v6287_v33 = vld [vmem:[%s12523_s5 + $0x88] sm:$0xf] }
 0x64f   : > { %5393 = vmatpush.bf16.msra.mxu1 %v4169_v63  ;;  %v6252_v14 = vor.u32 %v6737_v58, %v6249_v48  ;;  %v6256_v11 = vor.u32 %v6740_v60, %v6255_v46  ;;  %v6260_v19 = vor.u32 %v6738_v6, %v6257_v1  ;;  %v6264_v28 = vor.u32 %v6743_v57, %v6263_v36  ;;  %v6748_v35 = vld [vmem:[%s12523_s5 + $0x94] sm:$0xf0]  ;;  %v6746_v61 = vld [vmem:[%s12523_s5 + $0x8c] sm:$0xf]  ;;  %v6289_v31 = vld [vmem:[%s12523_s5 + $0x98] sm:$0xf0] }
 0x650   : > { %5562 = vmatpush.bf16.msra.mxu2 %v4177_v22  ;;  %v6268_v38 = vor.u32 %v6741_v30, %v6265_v41  ;;  %v6272_v0 = vor.u32 %v6744_v44, %v6271_v34  ;;  %v6276_v37 = vor.u32 %v6742_v32, %v6273_v27  ;;  %v6280_v23 = vor.u32 %v6747_v25, %v6279_v12  ;;  %v6295_v50 = vld [vmem:[%s12523_s5 + $0xa0] sm:$0xf]  ;;  %v6751_v8 = vld [vmem:[%s12523_s5 + $0xac] sm:$0xf0]  ;;  %v6749_v43 = vld [vmem:[%s12523_s5 + $0xa4] sm:$0xf] }
 0x651   : > { %5731 = vmatpush.bf16.msra.mxu3 %v4185_v7  ;;  %5225 = vmatmul.bf16.vlgmr.msra.gmra.mxu0 %v6216_v53  ;;  %v6284_v49 = vor.u32 %v6745_v20, %v6281_v13  ;;  %v6288_v56 = vor.u32 %v6748_v35, %v6287_v33  ;;  %v6292_v16 = vor.u32 %v6746_v61, %v6289_v31  ;;  %v6297_v40 = vld [vmem:[%s12523_s5 + $0xb0] sm:$0xf0]  ;;  %v6303_v54 = vld [vmem:[%s12523_s5 + $0xa8] sm:$0xf]  ;;  %v6752_v62 = vld [vmem:[%s12523_s5 + $0xb4] sm:$0xf0] }
 0x652   : > { %5394 = vmatmul.bf16.vlgmr.msra.gmra.mxu1 %v6220_v18  ;;  %v6750_v3 = vld [vmem:[%s12523_s5 + $0xac] sm:$0xf]  ;;  %v6305_v47 = vld [vmem:[%s12523_s5 + $0xb8] sm:$0xf0]  ;;  %v6296_v2 = vor.u32 %v6751_v8, %v6295_v50  ;;  %v6300_v63 = vor.u32 %v6749_v43, %v6297_v40  ;;  %v6304_v22 = vor.u32 %v6752_v62, %v6303_v54  ;;  %v6311_v53 = vld [vmem:[%s12523_s5 + $0xc0] sm:$0xf] }
 0x653   : > { %5563 = vmatmul.bf16.vlgmr.msra.gmra.mxu2 %v6224_v55  ;;  %v6308_v7 = vor.u32 %v6750_v3, %v6305_v47  ;;  %v6755_v18 = vld [vmem:[%s12523_s5 + $0xcc] sm:$0xf0]  ;;  %v6753_v55 = vld [vmem:[%s12523_s5 + $0xc4] sm:$0xf]  ;;  %v6319_v29 = vld [vmem:[%s12523_s5 + $0xc8] sm:$0xf] }
 0x654   : > { %5732 = vmatmul.bf16.vlgmr.msra.gmra.mxu3 %v6228_v9  ;;  %v6313_v9 = vld [vmem:[%s12523_s5 + $0xd0] sm:$0xf0]  ;;  %v6756_v21 = vld [vmem:[%s12523_s5 + $0xd4] sm:$0xf0]  ;;  %v6754_v5 = vld [vmem:[%s12523_s5 + $0xcc] sm:$0xf]  ;;  %v6312_v42 = vor.u32 %v6755_v18, %v6311_v53 }
 0x655   : > { %v6321_v45 = vld [vmem:[%s12523_s5 + $0xd8] sm:$0xf0]  ;;  %v6316_v4 = vor.u32 %v6753_v55, %v6313_v9  ;;  %v6320_v59 = vor.u32 %v6756_v21, %v6319_v29  ;;  %v6335_v17 = vld [vmem:[%s12523_s5 + $0xe8] sm:$0xf]  ;;  %v6760_v15 = vld [vmem:[%s12523_s5 + $0xf4] sm:$0xf0] }
 0x656   : > { %v6324_v51 = vor.u32 %v6754_v5, %v6321_v45  ;;  %v6758_v58 = vld [vmem:[%s12523_s5 + $0xec] sm:$0xf]  ;;  %v6337_v48 = vld [vmem:[%s12523_s5 + $0xf8] sm:$0xf0]  ;;  %v6336_v6 = vor.u32 %v6760_v15, %v6335_v17  ;;  %v6345_v36 = vld [vmem:[%s12523_s5 + $0x110] sm:$0xf0] }
 0x657   : > { %v6340_v1 = vor.u32 %v6758_v58, %v6337_v48  ;;  %v6351_v57 = vld [vmem:[%s12523_s5 + $0x108] sm:$0xf]  ;;  %v6764_v30 = vld [vmem:[%s12523_s5 + $0x114] sm:$0xf0]  ;;  %v6762_v41 = vld [vmem:[%s12523_s5 + $0x10c] sm:$0xf] }
 0x658   : > { %v6353_v34 = vld [vmem:[%s12523_s5 + $0x118] sm:$0xf0]  ;;  %v6877_v50 = vld [vmem:[%s7546_s11] sm:$0xff]  ;;  %v6361_v40 = vld [vmem:[%s12523_s5 + $0x130] sm:$0xf0] }
 0x659   : > { %v6765_v43 = vld [vmem:[%s12523_s5 + $0x124] sm:$0xf]  ;;  %v6367_v54 = vld [vmem:[%s12523_s5 + $0x128] sm:$0xf]  ;;  %v6768_v62 = vld [vmem:[%s12523_s5 + $0x134] sm:$0xf0] }
 0x65a   : > { %v6766_v3 = vld [vmem:[%s12523_s5 + $0x12c] sm:$0xf]  ;;  %v6369_v47 = vld [vmem:[%s12523_s5 + $0x138] sm:$0xf0]  ;;  %v6364_v53 = vor.u32 %v6765_v43, %v6361_v40  ;;  %v6368_v29 = vor.u32 %v6768_v62, %v6367_v54  ;;  %v6375_v48 = vld [vmem:[%s12523_s5 + $0x140] sm:$0xf] }
 0x65b   : > { %v6372_v21 = vor.u32 %v6766_v3, %v6369_v47  ;;  %v6775_v43 = vld [vmem:[%s12523_s5 + $0x16c] sm:$0xf0]  ;;  %v6881_v40 = vld [vmem:[%s7546_s11 + $0x20] sm:$0xff]  ;;  %v6393_v3 = vld [vmem:[%s12523_s5 + $0x170] sm:$0xf0] }
 0x65c   : > { %v6773_v62 = vld [vmem:[%s12523_s5 + $0x164] sm:$0xf]  ;;  %v6399_v47 = vld [vmem:[%s12523_s5 + $0x168] sm:$0xf] }
 0x661   : > { %5230 = vmatmul.bf16.gmra.mxu0 %v6232_v10  ;;  %v6327_v10 = vld [vmem:[%s12523_s5 + $0xe0] sm:$0xf] }
 0x662   : > { %5399 = vmatmul.bf16.gmra.mxu1 %v6236_v39  ;;  %v6759_v39 = vld [vmem:[%s12523_s5 + $0xec] sm:$0xf0] }
 0x663   : > { %5568 = vmatmul.bf16.gmra.mxu2 %v6240_v24  ;;  %v6757_v24 = vld [vmem:[%s12523_s5 + $0xe4] sm:$0xf]  ;;  %v6328_v46 = vor.u32 %v6759_v39, %v6327_v10 }
 0x664   : > { %5737 = vmatmul.bf16.gmra.mxu3 %v6244_v52  ;;  %v6329_v52 = vld [vmem:[%s12523_s5 + $0xf0] sm:$0xf0] }
 0x665   : > { %v6332_v60 = vor.u32 %v6757_v24, %v6329_v52 }
 0x671   : > { %5235 = vmatmul.bf16.gmra.mxu0 %v6248_v26  ;;  %v4260_v26 = vpop.permute.xlu0 %4259 }
 0x672   : > { %5404 = vmatmul.bf16.gmra.mxu1 %v6252_v14  ;;  %v6343_v14 = vld [vmem:[%s12523_s5 + $0x100] sm:$0xf] }
 0x673   : > { %5573 = vmatmul.bf16.gmra.mxu2 %v6256_v11  ;;  %v6763_v11 = vld [vmem:[%s12523_s5 + $0x10c] sm:$0xf0] }
 0x674   : > { %5742 = vmatmul.bf16.gmra.mxu3 %v6260_v19  ;;  %v6761_v19 = vld [vmem:[%s12523_s5 + $0x104] sm:$0xf]  ;;  %v6344_v44 = vor.u32 %v6763_v11, %v6343_v14  ;;  %v6383_v14 = vld [vmem:[%s12523_s5 + $0x148] sm:$0xf]  ;;  %v6772_v11 = vld [vmem:[%s12523_s5 + $0x154] sm:$0xf0] }
 0x675   : > { %v6348_v32 = vor.u32 %v6761_v19, %v6345_v36  ;;  %v6770_v19 = vld [vmem:[%s12523_s5 + $0x14c] sm:$0xf]  ;;  %v6385_v36 = vld [vmem:[%s12523_s5 + $0x158] sm:$0xf0] }
 0x681   : > { %5240 = vmatmul.bf16.gmra.mxu0 %v6264_v28 }
 0x682   : > { %5409 = vmatmul.bf16.gmra.mxu1 %v6268_v38  ;;  %v6352_v38 = vor.u32 %v6764_v30, %v6351_v57 }
 0x683   : > { %5578 = vmatmul.bf16.gmra.mxu2 %v6272_v0  ;;  %v6356_v0 = vor.u32 %v6762_v41, %v6353_v34 }
 0x684   : > { %5747 = vmatmul.bf16.gmra.mxu3 %v6276_v37  ;;  %v4265_v37 = vpop.permute.xlu0 %4264 }
 0x691   : > { %5245 = vmatmul.bf16.gmra.mxu0 %v6280_v23 }
 0x692   : > { %5414 = vmatmul.bf16.gmra.mxu1 %v6284_v49  ;;  %v6359_v49 = vld [vmem:[%s12523_s5 + $0x120] sm:$0xf] }
 0x693   : > { %5583 = vmatmul.bf16.gmra.mxu2 %v6288_v56  ;;  %v6767_v56 = vld [vmem:[%s12523_s5 + $0x12c] sm:$0xf0] }
 0x694   : > { %5752 = vmatmul.bf16.gmra.mxu3 %v6292_v16  ;;  %v4270_v16 = vpop.permute.xlu0 %4269 }
 0x6a1   : > { %5250 = vmatmul.bf16.gmra.mxu0 %v6296_v2 }
 0x6a2   : > { %5419 = vmatmul.bf16.gmra.mxu1 %v6300_v63 }
 0x6a3   : > { %5588 = vmatmul.bf16.gmra.mxu2 %v6304_v22 }
 0x6a4   : > { %5757 = vmatmul.bf16.gmra.mxu3 %v6308_v7  ;;  %v6360_v7 = vor.u32 %v6767_v56, %v6359_v49  ;;  %v4285_v56 = vpop.permute.xlu2 %4284 }
 0x6b1   : > { %5255 = vmatmul.bf16.gmra.mxu0 %v6312_v42  ;;  %v6878_v42 = vld [vmem:[%s7546_s11 + $0x8] sm:$0xff] }
 0x6b2   : > { %5424 = vmatmul.bf16.gmra.mxu1 %v6316_v4 }
 0x6b3   : > { %5593 = vmatmul.bf16.gmra.mxu2 %v6320_v59  ;;  %v4275_v59 = vpop.permute.xlu0 %4274 }
 0x6b4   : > { %5762 = vmatmul.bf16.gmra.mxu3 %v6324_v51 }
 0x6c1   : > { %5260 = vmatmul.bf16.gmra.mxu0 %v6328_v46  ;;  %v6771_v46 = vld [vmem:[%s12523_s5 + $0x14c] sm:$0xf0] }
 0x6c2   : > { %5429 = vmatmul.bf16.gmra.mxu1 %v6332_v60  ;;  %v6879_v60 = vld [vmem:[%s7546_s11 + $0x10] sm:$0xff]  ;;  %v6376_v34 = vor.u32 %v6771_v46, %v6375_v48 }
 0x6c3   : > { %5598 = vmatmul.bf16.gmra.mxu2 %v6336_v6 }
 0x6c4   : > { %5767 = vmatmul.bf16.gmra.mxu3 %v6340_v1  ;;  %v6769_v1 = vld [vmem:[%s12523_s5 + $0x144] sm:$0xf] }
 0x6ce   : > { %v5226_v27 = vpop.f32.mrf.mxu0 }
 0x6cf   : > { %v5395_v28 = vpop.f32.mrf.mxu1  ;;  %v5227_v12 = vadd.f32 %v5226_v27, %v4260_v26  ;;  %v6377_v26 = vld [vmem:[%s12523_s5 + $0x150] sm:$0xf0] }
 0x6d1   : > { %5265 = vmatmul.bf16.gmra.mxu0 %v6344_v44  ;;  %v5396_v25 = vadd.f32 %v5395_v28, %v5227_v12  ;;  %v6380_v44 = vor.u32 %v6769_v1, %v6377_v26  ;;  %v6407_v1 = vld [vmem:[%s12523_s5 + $0x180] sm:$0xf]  ;;  %v6779_v26 = vld [vmem:[%s12523_s5 + $0x18c] sm:$0xf0] }
 0x6d2   : > { %5434 = vmatmul.bf16.gmra.mxu1 %v6348_v32 }
 0x6d3   : > { %5603 = vmatmul.bf16.gmra.mxu2 %v6352_v38  ;;  %v6384_v38 = vor.u32 %v6772_v11, %v6383_v14  ;;  %v6883_v14 = vld [vmem:[%s7546_s11 + $0x30] sm:$0xff] }
 0x6d4   : > { %5772 = vmatmul.bf16.gmra.mxu3 %v6356_v0  ;;  %v6388_v0 = vor.u32 %v6770_v19, %v6385_v36  ;;  %v6777_v19 = vld [vmem:[%s12523_s5 + $0x184] sm:$0xf]  ;;  %v6409_v36 = vld [vmem:[%s12523_s5 + $0x190] sm:$0xf0] }
 0x6d6   : > { %v5564_v20 = vpop.f32.mrf.mxu2  ;;  %v5228_v35 = vpop.f32.mrf.mxu0 }
 0x6d7   : > { %v5733_v13 = vpop.f32.mrf.mxu3  ;;  %v5565_v33 = vadd.f32 %v5564_v20, %v5396_v25  ;;  %v5397_v61 = vpop.f32.mrf.mxu1  ;;  %v5229_v23 = vadd.f32 %v5228_v35, %v4265_v37  ;;  %v6880_v20 = vld [vmem:[%s7546_s11 + $0x18] sm:$0xff] }
 0x6d8   : > { %v4280_v37 = vpop.permute.xlu0 %4279 }
 0x6d9   : > { %v5734_v31 = vadd.f32 %v5733_v13, %v5565_v33  ;;  %v5398_v2 = vadd.f32 %v5397_v61, %v5229_v23 }
 0x6db   : > { %v5893_v8 = vadd.f32 %v6877_v50, %v5734_v31 }
 0x6dd   : > { %5957 = vst.msk [vmem:[%s11769_s25] sm:$0xff] %vm3550_vm5, %v5893_v8  ;;  %v6391_v8 = vld [vmem:[%s12523_s5 + $0x160] sm:$0xf] }
 0x6de   : > { %v5566_v63 = vpop.f32.mrf.mxu2  ;;  %v5231_v55 = vpop.f32.mrf.mxu0 }
 0x6df   : > { %v5735_v22 = vpop.f32.mrf.mxu3  ;;  %v5567_v18 = vadd.f32 %v5566_v63, %v5398_v2  ;;  %v5400_v9 = vpop.f32.mrf.mxu1  ;;  %v5232_v45 = vadd.f32 %v5231_v55, %v4270_v16  ;;  %v6776_v2 = vld [vmem:[%s12523_s5 + $0x174] sm:$0xf0]  ;;  %v6774_v63 = vld [vmem:[%s12523_s5 + $0x16c] sm:$0xf]  ;;  %v6392_v55 = vor.u32 %v6775_v43, %v6391_v8 }
 0x6e1   : > { %v5736_v5 = vadd.f32 %v5735_v22, %v5567_v18  ;;  %5270 = vmatmul.bf16.gmra.mxu0 %v6360_v7  ;;  %v5401_v51 = vadd.f32 %v5400_v9, %v5232_v45  ;;  %v6401_v22 = vld [vmem:[%s12523_s5 + $0x178] sm:$0xf0]  ;;  %v6396_v9 = vor.u32 %v6773_v62, %v6393_v3  ;;  %v6400_v45 = vor.u32 %v6776_v2, %v6399_v47  ;;  %v6423_v62 = vld [vmem:[%s12523_s5 + $0x1a0] sm:$0xf]  ;;  %v6783_v3 = vld [vmem:[%s12523_s5 + $0x1ac] sm:$0xf0] }
 0x6e2   : > { %5439 = vmatmul.bf16.gmra.mxu1 %v6364_v53  ;;  %v6885_v47 = vld [vmem:[%s7546_s11 + $0x40] sm:$0xff] }
 0x6e3   : > { %v5894_v4 = vadd.f32 %v6878_v42, %v5736_v5  ;;  %5608 = vmatmul.bf16.gmra.mxu2 %v6368_v29  ;;  %v6404_v42 = vor.u32 %v6774_v63, %v6401_v22  ;;  %v6781_v63 = vld [vmem:[%s12523_s5 + $0x1a4] sm:$0xf]  ;;  %v6425_v22 = vld [vmem:[%s12523_s5 + $0x1b0] sm:$0xf0] }
 0x6e4   : > { %5777 = vmatmul.bf16.gmra.mxu3 %v6372_v21 }
 0x6e5   : > { %5958 = vst.msk [vmem:[%s11769_s25 + $0x8] sm:$0xff] %vm3550_vm5, %v5894_v4  ;;  %v4290_v4 = vpop.permute.xlu1 %4289 }
 0x6e6   : > { %v5569_v10 = vpop.f32.mrf.mxu2  ;;  %v5233_v52 = vpop.f32.mrf.mxu0 }
 0x6e7   : > { %v5738_v39 = vpop.f32.mrf.mxu3  ;;  %v5570_v24 = vadd.f32 %v5569_v10, %v5401_v51  ;;  %v5402_v17 = vpop.f32.mrf.mxu1  ;;  %v5234_v58 = vadd.f32 %v5233_v52, %v4275_v59 }
 0x6e8   : > { %v4295_v10 = vpop.permute.xlu0 %4294 }
 0x6e9   : > { %v5739_v15 = vadd.f32 %v5738_v39, %v5570_v24  ;;  %v5403_v57 = vadd.f32 %v5402_v17, %v5234_v58  ;;  %v6882_v39 = vld [vmem:[%s7546_s11 + $0x28] sm:$0xff] }
 0x6eb   : > { %v5895_v6 = vadd.f32 %v6879_v60, %v5739_v15 }
 0x6ed   : > { %5959 = vst.msk [vmem:[%s11769_s25 + $0x10] sm:$0xff] %vm3550_vm5, %v5895_v6 }
 0x6ee   : > { %v5571_v30 = vpop.f32.mrf.mxu2  ;;  %v5236_v27 = vpop.f32.mrf.mxu0 }
 0x6ef   : > { %v5740_v41 = vpop.f32.mrf.mxu3  ;;  %v5572_v32 = vadd.f32 %v5571_v30, %v5403_v57  ;;  %v5405_v28 = vpop.f32.mrf.mxu1  ;;  %v5237_v25 = vadd.f32 %v5236_v27, %v4280_v37  ;;  %v6415_v57 = vld [vmem:[%s12523_s5 + $0x188] sm:$0xf]  ;;  %v6780_v30 = vld [vmem:[%s12523_s5 + $0x194] sm:$0xf0] }
 0x6f1   : > { %v5741_v12 = vadd.f32 %v5740_v41, %v5572_v32  ;;  %5275 = vmatmul.bf16.gmra.mxu0 %v6376_v34  ;;  %v5406_v33 = vadd.f32 %v5405_v28, %v5237_v25  ;;  %v6778_v41 = vld [vmem:[%s12523_s5 + $0x18c] sm:$0xf]  ;;  %v6417_v34 = vld [vmem:[%s12523_s5 + $0x198] sm:$0xf0] }
 0x6f2   : > { %5444 = vmatmul.bf16.gmra.mxu1 %v6380_v44  ;;  %v4300_v44 = vpop.permute.xlu0 %4299 }
 0x6f3   : > { %v5896_v13 = vadd.f32 %v6880_v20, %v5741_v12  ;;  %5613 = vmatmul.bf16.gmra.mxu2 %v6384_v38  ;;  %v6408_v38 = vor.u32 %v6779_v26, %v6407_v1  ;;  %v6416_v20 = vor.u32 %v6780_v30, %v6415_v57  ;;  %v4315_v26 = vpop.permute.xlu1 %4314  ;;  %v6887_v57 = vld [vmem:[%s7546_s11 + $0x50] sm:$0xff] }
 0x6f4   : > { %5782 = vmatmul.bf16.gmra.mxu3 %v6388_v0  ;;  %v6412_v0 = vor.u32 %v6777_v19, %v6409_v36  ;;  %v6439_v19 = vld [vmem:[%s12523_s5 + $0x1c0] sm:$0xf]  ;;  %v6787_v36 = vld [vmem:[%s12523_s5 + $0x1cc] sm:$0xf0] }
 0x6f5   : > { %5960 = vst.msk [vmem:[%s11769_s25 + $0x18] sm:$0xff] %vm3550_vm5, %v5896_v13  ;;  %v6420_v13 = vor.u32 %v6778_v41, %v6417_v34  ;;  %v6785_v41 = vld [vmem:[%s12523_s5 + $0x1c4] sm:$0xf]  ;;  %v6441_v34 = vld [vmem:[%s12523_s5 + $0x1d0] sm:$0xf0] }
 0x6f6   : > { %v5574_v35 = vpop.f32.mrf.mxu2  ;;  %v5238_v23 = vpop.f32.mrf.mxu0 }
 0x6f7   : > { %v5743_v61 = vpop.f32.mrf.mxu3  ;;  %v5575_v31 = vadd.f32 %v5574_v35, %v5406_v33  ;;  %v5407_v49 = vpop.f32.mrf.mxu1  ;;  %v5239_v50 = vadd.f32 %v5238_v23, %v4285_v56 }
 0x6f9   : > { %v5744_v16 = vadd.f32 %v5743_v61, %v5575_v31  ;;  %v5408_v7 = vadd.f32 %v5407_v49, %v5239_v50  ;;  %v6884_v61 = vld [vmem:[%s7546_s11 + $0x38] sm:$0xff] }
 0x6fa   : > { %v4305_v43 = vpop.permute.xlu0 %4304 }
 0x6fb   : > { %v5897_v54 = vadd.f32 %v6881_v40, %v5744_v16 }
 0x6fd   : > { %5961 = vst.msk [vmem:[%s11769_s25 + $0x20] sm:$0xff] %vm3550_vm5, %v5897_v54 }
 0x6fe   : > { %v5576_v53 = vpop.f32.mrf.mxu2  ;;  %v5241_v21 = vpop.f32.mrf.mxu0 }
 0x6ff   : > { %v5745_v18 = vpop.f32.mrf.mxu3  ;;  %v5577_v29 = vadd.f32 %v5576_v53, %v5408_v7  ;;  %v5410_v5 = vpop.f32.mrf.mxu1  ;;  %v5242_v51 = vadd.f32 %v5241_v21, %v4290_v4  ;;  %v6431_v7 = vld [vmem:[%s12523_s5 + $0x1a8] sm:$0xf]  ;;  %v6784_v53 = vld [vmem:[%s12523_s5 + $0x1b4] sm:$0xf0] }
 0x701   : > { %v5746_v59 = vadd.f32 %v5745_v18, %v5577_v29  ;;  %5280 = vmatmul.bf16.gmra.mxu0 %v6392_v55  ;;  %v5411_v52 = vadd.f32 %v5410_v5, %v5242_v51  ;;  %v6782_v18 = vld [vmem:[%s12523_s5 + $0x1ac] sm:$0xf]  ;;  %v6433_v55 = vld [vmem:[%s12523_s5 + $0x1b8] sm:$0xf0]  ;;  %v6424_v5 = vor.u32 %v6783_v3, %v6423_v62  ;;  %v6432_v51 = vor.u32 %v6784_v53, %v6431_v7  ;;  %v6889_v7 = vld [vmem:[%s7546_s11 + $0x60] sm:$0xff] }
 0x702   : > { %5449 = vmatmul.bf16.gmra.mxu1 %v6396_v9 }
 0x703   : > { %v5898_v24 = vadd.f32 %v6882_v39, %v5746_v59  ;;  %5618 = vmatmul.bf16.gmra.mxu2 %v6400_v45  ;;  %v6428_v45 = vor.u32 %v6781_v63, %v6425_v22  ;;  %v4310_v39 = vpop.permute.xlu2 %4309  ;;  %v6455_v63 = vld [vmem:[%s12523_s5 + $0x1e0] sm:$0xf]  ;;  %v6791_v22 = vld [vmem:[%s12523_s5 + $0x1ec] sm:$0xf0] }
 0x704   : > { %5787 = vmatmul.bf16.gmra.mxu3 %v6404_v42 }
 0x705   : > { %5962 = vst.msk [vmem:[%s11769_s25 + $0x28] sm:$0xff] %vm3550_vm5, %v5898_v24 }
 0x706   : > { %v5579_v17 = vpop.f32.mrf.mxu2  ;;  %v5243_v48 = vpop.f32.mrf.mxu0 }
 0x707   : > { %v5748_v15 = vpop.f32.mrf.mxu3  ;;  %v5580_v58 = vadd.f32 %v5579_v17, %v5411_v52  ;;  %v5412_v46 = vpop.f32.mrf.mxu1  ;;  %v5244_v6 = vadd.f32 %v5243_v48, %v4295_v10  ;;  %v6436_v10 = vor.u32 %v6782_v18, %v6433_v55  ;;  %v6886_v17 = vld [vmem:[%s7546_s11 + $0x48] sm:$0xff]  ;;  %v6789_v18 = vld [vmem:[%s12523_s5 + $0x1e4] sm:$0xf]  ;;  %v6457_v55 = vld [vmem:[%s12523_s5 + $0x1f0] sm:$0xf0] }
 0x709   : > { %v5749_v60 = vadd.f32 %v5748_v15, %v5580_v58  ;;  %v5413_v32 = vadd.f32 %v5412_v46, %v5244_v6 }
 0x70b   : > { %v5899_v11 = vadd.f32 %v6883_v14, %v5749_v60  ;;  %v4325_v3 = vpop.permute.xlu2 %4324 }
 0x70d   : > { %5963 = vst.msk [vmem:[%s11769_s25 + $0x30] sm:$0xff] %vm3550_vm5, %v5899_v11 }
 0x70e   : > { %v5581_v27 = vpop.f32.mrf.mxu2  ;;  %v5246_v12 = vpop.f32.mrf.mxu0 }
 0x70f   : > { %v5750_v28 = vpop.f32.mrf.mxu3  ;;  %v5582_v37 = vadd.f32 %v5581_v27, %v5413_v32  ;;  %v5415_v25 = vpop.f32.mrf.mxu1  ;;  %v5247_v35 = vadd.f32 %v5246_v12, %v4300_v44  ;;  %v6447_v44 = vld [vmem:[%s12523_s5 + $0x1c8] sm:$0xf]  ;;  %v6788_v32 = vld [vmem:[%s12523_s5 + $0x1d4] sm:$0xf0]  ;;  %v6786_v27 = vld [vmem:[%s12523_s5 + $0x1cc] sm:$0xf]  ;;  %v6440_v12 = vor.u32 %v6787_v36, %v6439_v19 }
 0x711   : > { %v5751_v33 = vadd.f32 %v5750_v28, %v5582_v37  ;;  %5285 = vmatmul.bf16.gmra.mxu0 %v6408_v38  ;;  %v5416_v23 = vadd.f32 %v5415_v25, %v5247_v35  ;;  %v6449_v28 = vld [vmem:[%s12523_s5 + $0x1d8] sm:$0xf0]  ;;  %v6444_v25 = vor.u32 %v6785_v41, %v6441_v34  ;;  %v6448_v35 = vor.u32 %v6788_v32, %v6447_v44  ;;  %v6471_v41 = vld [vmem:[%s12523_s5 + $0x200] sm:$0xf]  ;;  %v6795_v34 = vld [vmem:[%s12523_s5 + $0x20c] sm:$0xf0] }
 0x712   : > { %5454 = vmatmul.bf16.gmra.mxu1 %v6412_v0  ;;  %v6891_v44 = vld [vmem:[%s7546_s11 + $0x70] sm:$0xff] }
 0x713   : > { %v5900_v31 = vadd.f32 %v6884_v61, %v5751_v33  ;;  %5623 = vmatmul.bf16.gmra.mxu2 %v6416_v20  ;;  %v6452_v61 = vor.u32 %v6786_v27, %v6449_v28  ;;  %v6793_v27 = vld [vmem:[%s12523_s5 + $0x204] sm:$0xf]  ;;  %v6473_v28 = vld [vmem:[%s12523_s5 + $0x210] sm:$0xf0] }
 0x714   : > { %5792 = vmatmul.bf16.gmra.mxu3 %v6420_v13 }
 0x715   : > { %5964 = vst.msk [vmem:[%s11769_s25 + $0x38] sm:$0xff] %vm3550_vm5, %v5900_v31  ;;  %v4320_v31 = vpop.permute.xlu0 %4319 }
 0x716   : > { %v5584_v49 = vpop.f32.mrf.mxu2  ;;  %v5248_v50 = vpop.f32.mrf.mxu0 }
 0x717   : > { %v5753_v56 = vpop.f32.mrf.mxu3  ;;  %v5585_v16 = vadd.f32 %v5584_v49, %v5416_v23  ;;  %v5417_v8 = vpop.f32.mrf.mxu1  ;;  %v5249_v54 = vadd.f32 %v5248_v50, %v4305_v43 }
 0x719   : > { %v5754_v40 = vadd.f32 %v5753_v56, %v5585_v16  ;;  %v5418_v9 = vadd.f32 %v5417_v8, %v5249_v54  ;;  %v6888_v56 = vld [vmem:[%s7546_s11 + $0x58] sm:$0xff] }
 0x71b   : > { %v5901_v2 = vadd.f32 %v6885_v47, %v5754_v40 }
 0x71d   : > { %5965 = vst.msk [vmem:[%s11769_s25 + $0x40] sm:$0xff] %vm3550_vm5, %v5901_v2  ;;  %v4335_v36 = vpop.permute.xlu0 %4334 }
 0x71e   : > { %v5586_v29 = vpop.f32.mrf.mxu2  ;;  %v5251_v4 = vpop.f32.mrf.mxu0 }
 0x71f   : > { %v5755_v21 = vpop.f32.mrf.mxu3  ;;  %v5587_v42 = vadd.f32 %v5586_v29, %v5418_v9  ;;  %v5420_v59 = vpop.f32.mrf.mxu1  ;;  %v5252_v52 = vadd.f32 %v5251_v4, %v4310_v39  ;;  %v6463_v9 = vld [vmem:[%s12523_s5 + $0x1e8] sm:$0xf]  ;;  %v6792_v29 = vld [vmem:[%s12523_s5 + $0x1f4] sm:$0xf0] }
 0x721   : > { %v5756_v24 = vadd.f32 %v5755_v21, %v5587_v42  ;;  %5290 = vmatmul.bf16.gmra.mxu0 %v6424_v5  ;;  %v5421_v58 = vadd.f32 %v5420_v59, %v5252_v52  ;;  %v6790_v21 = vld [vmem:[%s12523_s5 + $0x1ec] sm:$0xf]  ;;  %v6465_v5 = vld [vmem:[%s12523_s5 + $0x1f8] sm:$0xf0]  ;;  %v6456_v59 = vor.u32 %v6791_v22, %v6455_v63  ;;  %v6464_v52 = vor.u32 %v6792_v29, %v6463_v9  ;;  %v6893_v9 = vld [vmem:[%s7546_s11 + $0x80] sm:$0xff] }
 0x722   : > { %5459 = vmatmul.bf16.gmra.mxu1 %v6428_v45 }
 0x723   : > { %v5902_v15 = vadd.f32 %v6886_v17, %v5756_v24  ;;  %5628 = vmatmul.bf16.gmra.mxu2 %v6432_v51  ;;  %v6460_v51 = vor.u32 %v6789_v18, %v6457_v55  ;;  %v6468_v17 = vor.u32 %v6790_v21, %v6465_v5  ;;  %v6487_v18 = vld [vmem:[%s12523_s5 + $0x220] sm:$0xf]  ;;  %v6799_v55 = vld [vmem:[%s12523_s5 + $0x22c] sm:$0xf0]  ;;  %v6797_v21 = vld [vmem:[%s12523_s5 + $0x224] sm:$0xf] }
 0x724   : > { %5797 = vmatmul.bf16.gmra.mxu3 %v6436_v10  ;;  %v6489_v5 = vld [vmem:[%s12523_s5 + $0x230] sm:$0xf0] }
 0x725   : > { %5966 = vst.msk [vmem:[%s11769_s25 + $0x48] sm:$0xff] %vm3550_vm5, %v5902_v15  ;;  %v4330_v15 = vpop.permute.xlu1 %4329 }
 0x726   : > { %v5589_v48 = vpop.f32.mrf.mxu2  ;;  %v5253_v6 = vpop.f32.mrf.mxu0 }
 0x727   : > { %v5758_v46 = vpop.f32.mrf.mxu3  ;;  %v5590_v60 = vadd.f32 %v5589_v48, %v5421_v58  ;;  %v5422_v1 = vpop.f32.mrf.mxu1  ;;  %v5254_v11 = vadd.f32 %v5253_v6, %v4315_v26 }
 0x729   : > { %v5759_v14 = vadd.f32 %v5758_v46, %v5590_v60  ;;  %v5423_v38 = vadd.f32 %v5422_v1, %v5254_v11  ;;  %v6890_v46 = vld [vmem:[%s7546_s11 + $0x68] sm:$0xff] }
 0x72b   : > { %v5903_v30 = vadd.f32 %v6887_v57, %v5759_v14 }
 0x72d   : > { %5967 = vst.msk [vmem:[%s11769_s25 + $0x50] sm:$0xff] %vm3550_vm5, %v5903_v30  ;;  %v4345_v22 = vpop.permute.xlu1 %4344 }
 0x72e   : > { %v5591_v0 = vpop.f32.mrf.mxu2  ;;  %v5256_v13 = vpop.f32.mrf.mxu0 }
 0x72f   : > { %v5760_v37 = vpop.f32.mrf.mxu3  ;;  %v5592_v20 = vadd.f32 %v5591_v0, %v5423_v38  ;;  %v5425_v33 = vpop.f32.mrf.mxu1  ;;  %v5257_v49 = vadd.f32 %v5256_v13, %v4320_v31  ;;  %v6479_v38 = vld [vmem:[%s12523_s5 + $0x208] sm:$0xf]  ;;  %v6796_v0 = vld [vmem:[%s12523_s5 + $0x214] sm:$0xf0] }
 0x731   : > { %v5761_v23 = vadd.f32 %v5760_v37, %v5592_v20  ;;  %5295 = vmatmul.bf16.gmra.mxu0 %v6440_v12  ;;  %v5426_v50 = vadd.f32 %v5425_v33, %v5257_v49  ;;  %v6794_v37 = vld [vmem:[%s12523_s5 + $0x20c] sm:$0xf]  ;;  %v6481_v12 = vld [vmem:[%s12523_s5 + $0x218] sm:$0xf0]  ;;  %v6472_v33 = vor.u32 %v6795_v34, %v6471_v41  ;;  %v6480_v49 = vor.u32 %v6796_v0, %v6479_v38  ;;  %v6895_v38 = vld [vmem:[%s7546_s11 + $0x90] sm:$0xff] }
 0x732   : > { %5464 = vmatmul.bf16.gmra.mxu1 %v6444_v25 }
 0x733   : > { %v5904_v16 = vadd.f32 %v6888_v56, %v5761_v23  ;;  %5633 = vmatmul.bf16.gmra.mxu2 %v6448_v35  ;;  %v6476_v35 = vor.u32 %v6793_v27, %v6473_v28  ;;  %v6484_v56 = vor.u32 %v6794_v37, %v6481_v12  ;;  %v6503_v27 = vld [vmem:[%s12523_s5 + $0x240] sm:$0xf]  ;;  %v6803_v28 = vld [vmem:[%s12523_s5 + $0x24c] sm:$0xf0]  ;;  %v6801_v37 = vld [vmem:[%s12523_s5 + $0x244] sm:$0xf] }
 0x734   : > { %5802 = vmatmul.bf16.gmra.mxu3 %v6452_v61  ;;  %v6505_v12 = vld [vmem:[%s12523_s5 + $0x250] sm:$0xf0] }
 0x735   : > { %5968 = vst.msk [vmem:[%s11769_s25 + $0x58] sm:$0xff] %vm3550_vm5, %v5904_v16  ;;  %v4340_v16 = vpop.permute.xlu2 %4339 }
 0x736   : > { %v5594_v8 = vpop.f32.mrf.mxu2  ;;  %v5258_v54 = vpop.f32.mrf.mxu0 }
 0x737   : > { %v5763_v43 = vpop.f32.mrf.mxu3  ;;  %v5595_v40 = vadd.f32 %v5594_v8, %v5426_v50  ;;  %v5427_v62 = vpop.f32.mrf.mxu1  ;;  %v5259_v2 = vadd.f32 %v5258_v54, %v4325_v3 }
 0x739   : > { %v5764_v47 = vadd.f32 %v5763_v43, %v5595_v40  ;;  %v5428_v45 = vadd.f32 %v5427_v62, %v5259_v2  ;;  %v6892_v43 = vld [vmem:[%s7546_s11 + $0x78] sm:$0xff] }
 0x73b   : > { %v5905_v53 = vadd.f32 %v6889_v7, %v5764_v47 }
 0x73d   : > { %5969 = vst.msk [vmem:[%s11769_s25 + $0x60] sm:$0xff] %vm3550_vm5, %v5905_v53  ;;  %v4355_v34 = vpop.permute.xlu2 %4354 }
 0x73e   : > { %v5596_v42 = vpop.f32.mrf.mxu2  ;;  %v5261_v39 = vpop.f32.mrf.mxu0 }
 0x73f   : > { %v5765_v4 = vpop.f32.mrf.mxu3  ;;  %v5597_v10 = vadd.f32 %v5596_v42, %v5428_v45  ;;  %v5430_v24 = vpop.f32.mrf.mxu1  ;;  %v5262_v48 = vadd.f32 %v5261_v39, %v4330_v15  ;;  %v6495_v45 = vld [vmem:[%s12523_s5 + $0x228] sm:$0xf]  ;;  %v6800_v42 = vld [vmem:[%s12523_s5 + $0x234] sm:$0xf0] }
 0x741   : > { %v5766_v58 = vadd.f32 %v5765_v4, %v5597_v10  ;;  %5300 = vmatmul.bf16.gmra.mxu0 %v6456_v59  ;;  %v5431_v6 = vadd.f32 %v5430_v24, %v5262_v48  ;;  %v6798_v4 = vld [vmem:[%s12523_s5 + $0x22c] sm:$0xf]  ;;  %v6497_v59 = vld [vmem:[%s12523_s5 + $0x238] sm:$0xf0]  ;;  %v6488_v24 = vor.u32 %v6799_v55, %v6487_v18  ;;  %v6496_v48 = vor.u32 %v6800_v42, %v6495_v45  ;;  %v6897_v45 = vld [vmem:[%s7546_s11 + $0xa0] sm:$0xff] }
 0x742   : > { %5469 = vmatmul.bf16.gmra.mxu1 %v6460_v51 }
 0x743   : > { %v5906_v60 = vadd.f32 %v6890_v46, %v5766_v58  ;;  %5638 = vmatmul.bf16.gmra.mxu2 %v6464_v52  ;;  %v6492_v52 = vor.u32 %v6797_v21, %v6489_v5  ;;  %v6500_v46 = vor.u32 %v6798_v4, %v6497_v59  ;;  %v6519_v21 = vld [vmem:[%s12523_s5 + $0x260] sm:$0xf]  ;;  %v6807_v5 = vld [vmem:[%s12523_s5 + $0x26c] sm:$0xf0]  ;;  %v6805_v4 = vld [vmem:[%s12523_s5 + $0x264] sm:$0xf] }
 0x744   : > { %5807 = vmatmul.bf16.gmra.mxu3 %v6468_v17  ;;  %v6521_v59 = vld [vmem:[%s12523_s5 + $0x270] sm:$0xf0] }
 0x745   : > { %5970 = vst.msk [vmem:[%s11769_s25 + $0x68] sm:$0xff] %vm3550_vm5, %v5906_v60  ;;  %v4350_v60 = vpop.permute.xlu0 %4349 }
 0x746   : > { %v5599_v1 = vpop.f32.mrf.mxu2  ;;  %v5263_v11 = vpop.f32.mrf.mxu0 }
 0x747   : > { %v5768_v26 = vpop.f32.mrf.mxu3  ;;  %v5600_v14 = vadd.f32 %v5599_v1, %v5431_v6  ;;  %v5432_v19 = vpop.f32.mrf.mxu1  ;;  %v5264_v30 = vadd.f32 %v5263_v11, %v4335_v36 }
 0x749   : > { %v5769_v57 = vadd.f32 %v5768_v26, %v5600_v14  ;;  %v5433_v25 = vadd.f32 %v5432_v19, %v5264_v30  ;;  %v6894_v26 = vld [vmem:[%s7546_s11 + $0x88] sm:$0xff] }
 0x74b   : > { %v5907_v32 = vadd.f32 %v6891_v44, %v5769_v57 }
 0x74d   : > { %5971 = vst.msk [vmem:[%s11769_s25 + $0x70] sm:$0xff] %vm3550_vm5, %v5907_v32  ;;  %v4365_v55 = vpop.permute.xlu0 %4364 }
 0x74e   : > { %v5601_v20 = vpop.f32.mrf.mxu2  ;;  %v5266_v31 = vpop.f32.mrf.mxu0 }
 0x74f   : > { %v5770_v13 = vpop.f32.mrf.mxu3  ;;  %v5602_v61 = vadd.f32 %v5601_v20, %v5433_v25  ;;  %v5435_v23 = vpop.f32.mrf.mxu1  ;;  %v5267_v8 = vadd.f32 %v5266_v31, %v4340_v16  ;;  %v6511_v25 = vld [vmem:[%s12523_s5 + $0x248] sm:$0xf]  ;;  %v6804_v20 = vld [vmem:[%s12523_s5 + $0x254] sm:$0xf0] }
 0x751   : > { %v5771_v50 = vadd.f32 %v5770_v13, %v5602_v61  ;;  %5305 = vmatmul.bf16.gmra.mxu0 %v6472_v33  ;;  %v5436_v54 = vadd.f32 %v5435_v23, %v5267_v8  ;;  %v6802_v13 = vld [vmem:[%s12523_s5 + $0x24c] sm:$0xf]  ;;  %v6513_v33 = vld [vmem:[%s12523_s5 + $0x258] sm:$0xf0]  ;;  %v6504_v23 = vor.u32 %v6803_v28, %v6503_v27  ;;  %v6512_v8 = vor.u32 %v6804_v20, %v6511_v25  ;;  %v6899_v25 = vld [vmem:[%s7546_s11 + $0xb0] sm:$0xff] }
 0x752   : > { %5474 = vmatmul.bf16.gmra.mxu1 %v6476_v35 }
 0x753   : > { %v5908_v40 = vadd.f32 %v6892_v43, %v5771_v50  ;;  %5643 = vmatmul.bf16.gmra.mxu2 %v6480_v49  ;;  %v6508_v49 = vor.u32 %v6801_v37, %v6505_v12  ;;  %v6516_v43 = vor.u32 %v6802_v13, %v6513_v33  ;;  %v6535_v37 = vld [vmem:[%s12523_s5 + $0x280] sm:$0xf]  ;;  %v6811_v12 = vld [vmem:[%s12523_s5 + $0x28c] sm:$0xf0]  ;;  %v6809_v13 = vld [vmem:[%s12523_s5 + $0x284] sm:$0xf] }
 0x754   : > { %5812 = vmatmul.bf16.gmra.mxu3 %v6484_v56  ;;  %v6537_v33 = vld [vmem:[%s12523_s5 + $0x290] sm:$0xf0] }
 0x755   : > { %5972 = vst.msk [vmem:[%s11769_s25 + $0x78] sm:$0xff] %vm3550_vm5, %v5908_v40  ;;  %v4360_v40 = vpop.permute.xlu1 %4359 }
 0x756   : > { %v5604_v62 = vpop.f32.mrf.mxu2  ;;  %v5268_v2 = vpop.f32.mrf.mxu0 }
 0x757   : > { %v5773_v3 = vpop.f32.mrf.mxu3  ;;  %v5605_v47 = vadd.f32 %v5604_v62, %v5436_v54  ;;  %v5437_v63 = vpop.f32.mrf.mxu1  ;;  %v5269_v53 = vadd.f32 %v5268_v2, %v4345_v22 }
 0x759   : > { %v5774_v7 = vadd.f32 %v5773_v3, %v5605_v47  ;;  %v5438_v51 = vadd.f32 %v5437_v63, %v5269_v53  ;;  %v6896_v3 = vld [vmem:[%s7546_s11 + $0x98] sm:$0xff] }
 0x75b   : > { %v5909_v29 = vadd.f32 %v6893_v9, %v5774_v7 }
 0x75d   : > { %5973 = vst.msk [vmem:[%s11769_s25 + $0x80] sm:$0xff] %vm3550_vm5, %v5909_v29  ;;  %v4375_v28 = vpop.permute.xlu1 %4374 }
 0x75e   : > { %v5606_v10 = vpop.f32.mrf.mxu2  ;;  %v5271_v15 = vpop.f32.mrf.mxu0 }
 0x75f   : > { %v5775_v39 = vpop.f32.mrf.mxu3  ;;  %v5607_v17 = vadd.f32 %v5606_v10, %v5438_v51  ;;  %v5440_v58 = vpop.f32.mrf.mxu1  ;;  %v5272_v1 = vadd.f32 %v5271_v15, %v4350_v60  ;;  %v6527_v51 = vld [vmem:[%s12523_s5 + $0x268] sm:$0xf]  ;;  %v6808_v10 = vld [vmem:[%s12523_s5 + $0x274] sm:$0xf0] }
 0x761   : > { %v5776_v6 = vadd.f32 %v5775_v39, %v5607_v17  ;;  %5310 = vmatmul.bf16.gmra.mxu0 %v6488_v24  ;;  %v5441_v11 = vadd.f32 %v5440_v58, %v5272_v1  ;;  %v6806_v39 = vld [vmem:[%s12523_s5 + $0x26c] sm:$0xf]  ;;  %v6529_v24 = vld [vmem:[%s12523_s5 + $0x278] sm:$0xf0]  ;;  %v6520_v58 = vor.u32 %v6807_v5, %v6519_v21  ;;  %v6528_v1 = vor.u32 %v6808_v10, %v6527_v51  ;;  %v6901_v51 = vld [vmem:[%s7546_s11 + $0xc0] sm:$0xff] }
 0x762   : > { %5479 = vmatmul.bf16.gmra.mxu1 %v6492_v52 }
 0x763   : > { %v5910_v14 = vadd.f32 %v6894_v26, %v5776_v6  ;;  %5648 = vmatmul.bf16.gmra.mxu2 %v6496_v48  ;;  %v6524_v48 = vor.u32 %v6805_v4, %v6521_v59  ;;  %v6532_v26 = vor.u32 %v6806_v39, %v6529_v24  ;;  %v6551_v4 = vld [vmem:[%s12523_s5 + $0x2a0] sm:$0xf]  ;;  %v6815_v59 = vld [vmem:[%s12523_s5 + $0x2ac] sm:$0xf0]  ;;  %v6813_v39 = vld [vmem:[%s12523_s5 + $0x2a4] sm:$0xf] }
 0x764   : > { %5817 = vmatmul.bf16.gmra.mxu3 %v6500_v46  ;;  %v6553_v24 = vld [vmem:[%s12523_s5 + $0x2b0] sm:$0xf0] }
 0x765   : > { %5974 = vst.msk [vmem:[%s11769_s25 + $0x88] sm:$0xff] %vm3550_vm5, %v5910_v14  ;;  %v4370_v14 = vpop.permute.xlu2 %4369 }
 0x766   : > { %v5609_v19 = vpop.f32.mrf.mxu2  ;;  %v5273_v30 = vpop.f32.mrf.mxu0 }
 0x767   : > { %v5778_v36 = vpop.f32.mrf.mxu3  ;;  %v5610_v57 = vadd.f32 %v5609_v19, %v5441_v11  ;;  %v5442_v41 = vpop.f32.mrf.mxu1  ;;  %v5274_v32 = vadd.f32 %v5273_v30, %v4355_v34 }
 0x769   : > { %v5779_v44 = vadd.f32 %v5778_v36, %v5610_v57  ;;  %v5443_v35 = vadd.f32 %v5442_v41, %v5274_v32  ;;  %v6898_v36 = vld [vmem:[%s7546_s11 + $0xa8] sm:$0xff] }
 0x76b   : > { %v5911_v0 = vadd.f32 %v6895_v38, %v5779_v44 }
 0x76d   : > { %5975 = vst.msk [vmem:[%s11769_s25 + $0x90] sm:$0xff] %vm3550_vm5, %v5911_v0  ;;  %v4385_v5 = vpop.permute.xlu2 %4384 }
 0x76e   : > { %v5611_v61 = vpop.f32.mrf.mxu2  ;;  %v5276_v16 = vpop.f32.mrf.mxu0 }
 0x76f   : > { %v5780_v31 = vpop.f32.mrf.mxu3  ;;  %v5612_v56 = vadd.f32 %v5611_v61, %v5443_v35  ;;  %v5445_v50 = vpop.f32.mrf.mxu1  ;;  %v5277_v62 = vadd.f32 %v5276_v16, %v4360_v40  ;;  %v6543_v35 = vld [vmem:[%s12523_s5 + $0x288] sm:$0xf]  ;;  %v6812_v61 = vld [vmem:[%s12523_s5 + $0x294] sm:$0xf0] }
 0x771   : > { %v5781_v54 = vadd.f32 %v5780_v31, %v5612_v56  ;;  %5315 = vmatmul.bf16.gmra.mxu0 %v6504_v23  ;;  %v5446_v2 = vadd.f32 %v5445_v50, %v5277_v62  ;;  %v6810_v31 = vld [vmem:[%s12523_s5 + $0x28c] sm:$0xf]  ;;  %v6545_v23 = vld [vmem:[%s12523_s5 + $0x298] sm:$0xf0]  ;;  %v6536_v50 = vor.u32 %v6811_v12, %v6535_v37  ;;  %v6544_v62 = vor.u32 %v6812_v61, %v6543_v35  ;;  %v6903_v35 = vld [vmem:[%s7546_s11 + $0xd0] sm:$0xff] }
 0x772   : > { %5484 = vmatmul.bf16.gmra.mxu1 %v6508_v49 }
 0x773   : > { %v5912_v47 = vadd.f32 %v6896_v3, %v5781_v54  ;;  %5653 = vmatmul.bf16.gmra.mxu2 %v6512_v8  ;;  %v6540_v8 = vor.u32 %v6809_v13, %v6537_v33  ;;  %v6548_v3 = vor.u32 %v6810_v31, %v6545_v23  ;;  %v6567_v13 = vld [vmem:[%s12523_s5 + $0x2c0] sm:$0xf]  ;;  %v6819_v33 = vld [vmem:[%s12523_s5 + $0x2cc] sm:$0xf0]  ;;  %v6817_v31 = vld [vmem:[%s12523_s5 + $0x2c4] sm:$0xf] }
 0x774   : > { %5822 = vmatmul.bf16.gmra.mxu3 %v6516_v43  ;;  %v6569_v23 = vld [vmem:[%s12523_s5 + $0x2d0] sm:$0xf0] }
 0x775   : > { %5976 = vst.msk [vmem:[%s11769_s25 + $0x98] sm:$0xff] %vm3550_vm5, %v5912_v47  ;;  %v4380_v47 = vpop.permute.xlu0 %4379 }
 0x776   : > { %v5614_v63 = vpop.f32.mrf.mxu2  ;;  %v5278_v53 = vpop.f32.mrf.mxu0 }
 0x777   : > { %v5783_v22 = vpop.f32.mrf.mxu3  ;;  %v5615_v7 = vadd.f32 %v5614_v63, %v5446_v2  ;;  %v5447_v18 = vpop.f32.mrf.mxu1  ;;  %v5279_v29 = vadd.f32 %v5278_v53, %v4365_v55 }
 0x779   : > { %v5784_v9 = vadd.f32 %v5783_v22, %v5615_v7  ;;  %v5448_v52 = vadd.f32 %v5447_v18, %v5279_v29  ;;  %v6900_v22 = vld [vmem:[%s7546_s11 + $0xb8] sm:$0xff] }
 0x77b   : > { %v5913_v42 = vadd.f32 %v6897_v45, %v5784_v9 }
 0x77d   : > { %5977 = vst.msk [vmem:[%s11769_s25 + $0xa0] sm:$0xff] %vm3550_vm5, %v5913_v42  ;;  %v4395_v12 = vpop.permute.xlu0 %4394 }
 0x77e   : > { %v5616_v17 = vpop.f32.mrf.mxu2  ;;  %v5281_v60 = vpop.f32.mrf.mxu0 }
 0x77f   : > { %v5785_v15 = vpop.f32.mrf.mxu3  ;;  %v5617_v46 = vadd.f32 %v5616_v17, %v5448_v52  ;;  %v5450_v6 = vpop.f32.mrf.mxu1  ;;  %v5282_v19 = vadd.f32 %v5281_v60, %v4370_v14  ;;  %v6559_v52 = vld [vmem:[%s12523_s5 + $0x2a8] sm:$0xf]  ;;  %v6816_v17 = vld [vmem:[%s12523_s5 + $0x2b4] sm:$0xf0] }
 0x781   : > { %v5786_v11 = vadd.f32 %v5785_v15, %v5617_v46  ;;  %5320 = vmatmul.bf16.gmra.mxu0 %v6520_v58  ;;  %v5451_v30 = vadd.f32 %v5450_v6, %v5282_v19  ;;  %v6814_v15 = vld [vmem:[%s12523_s5 + $0x2ac] sm:$0xf]  ;;  %v6561_v58 = vld [vmem:[%s12523_s5 + $0x2b8] sm:$0xf0]  ;;  %v6552_v6 = vor.u32 %v6815_v59, %v6551_v4  ;;  %v6560_v19 = vor.u32 %v6816_v17, %v6559_v52  ;;  %v6905_v52 = vld [vmem:[%s7546_s11 + $0xe0] sm:$0xff] }
 0x782   : > { %5489 = vmatmul.bf16.gmra.mxu1 %v6524_v48 }
 0x783   : > { %v5914_v57 = vadd.f32 %v6898_v36, %v5786_v11  ;;  %5658 = vmatmul.bf16.gmra.mxu2 %v6528_v1  ;;  %v6556_v1 = vor.u32 %v6813_v39, %v6553_v24  ;;  %v6564_v36 = vor.u32 %v6814_v15, %v6561_v58  ;;  %v6583_v39 = vld [vmem:[%s12523_s5 + $0x2e0] sm:$0xf]  ;;  %v6823_v24 = vld [vmem:[%s12523_s5 + $0x2ec] sm:$0xf0]  ;;  %v6821_v15 = vld [vmem:[%s12523_s5 + $0x2e4] sm:$0xf] }
 0x784   : > { %5827 = vmatmul.bf16.gmra.mxu3 %v6532_v26  ;;  %v6585_v58 = vld [vmem:[%s12523_s5 + $0x2f0] sm:$0xf0] }
 0x785   : > { %5978 = vst.msk [vmem:[%s11769_s25 + $0xa8] sm:$0xff] %vm3550_vm5, %v5914_v57  ;;  %v4390_v57 = vpop.permute.xlu1 %4389 }
 0x786   : > { %v5619_v41 = vpop.f32.mrf.mxu2  ;;  %v5283_v32 = vpop.f32.mrf.mxu0 }
 0x787   : > { %v5788_v34 = vpop.f32.mrf.mxu3  ;;  %v5620_v44 = vadd.f32 %v5619_v41, %v5451_v30  ;;  %v5452_v27 = vpop.f32.mrf.mxu1  ;;  %v5284_v0 = vadd.f32 %v5283_v32, %v4375_v28 }
 0x789   : > { %v5789_v38 = vadd.f32 %v5788_v34, %v5620_v44  ;;  %v5453_v49 = vadd.f32 %v5452_v27, %v5284_v0  ;;  %v6902_v34 = vld [vmem:[%s7546_s11 + $0xc8] sm:$0xff] }
 0x78b   : > { %v5915_v20 = vadd.f32 %v6899_v25, %v5789_v38 }
 0x78d   : > { %5979 = vst.msk [vmem:[%s11769_s25 + $0xb0] sm:$0xff] %vm3550_vm5, %v5915_v20  ;;  %v4405_v59 = vpop.permute.xlu1 %4404 }
 0x78e   : > { %v5621_v56 = vpop.f32.mrf.mxu2  ;;  %v5286_v40 = vpop.f32.mrf.mxu0 }
 0x78f   : > { %v5790_v16 = vpop.f32.mrf.mxu3  ;;  %v5622_v43 = vadd.f32 %v5621_v56, %v5453_v49  ;;  %v5455_v54 = vpop.f32.mrf.mxu1  ;;  %v5287_v63 = vadd.f32 %v5286_v40, %v4380_v47  ;;  %v6575_v49 = vld [vmem:[%s12523_s5 + $0x2c8] sm:$0xf]  ;;  %v6820_v56 = vld [vmem:[%s12523_s5 + $0x2d4] sm:$0xf0] }
 0x791   : > { %v5791_v2 = vadd.f32 %v5790_v16, %v5622_v43  ;;  %5325 = vmatmul.bf16.gmra.mxu0 %v6536_v50  ;;  %v5456_v53 = vadd.f32 %v5455_v54, %v5287_v63  ;;  %v6818_v16 = vld [vmem:[%s12523_s5 + $0x2cc] sm:$0xf]  ;;  %v6577_v50 = vld [vmem:[%s12523_s5 + $0x2d8] sm:$0xf0]  ;;  %v6568_v54 = vor.u32 %v6819_v33, %v6567_v13  ;;  %v6576_v63 = vor.u32 %v6820_v56, %v6575_v49  ;;  %v6907_v49 = vld [vmem:[%s7546_s11 + $0xf0] sm:$0xff] }
 0x792   : > { %5494 = vmatmul.bf16.gmra.mxu1 %v6540_v8 }
 0x793   : > { %v5916_v7 = vadd.f32 %v6900_v22, %v5791_v2  ;;  %5663 = vmatmul.bf16.gmra.mxu2 %v6544_v62  ;;  %v6572_v62 = vor.u32 %v6817_v31, %v6569_v23  ;;  %v6580_v22 = vor.u32 %v6818_v16, %v6577_v50  ;;  %v6599_v31 = vld [vmem:[%s12523_s5 + $0x300] sm:$0xf]  ;;  %v6827_v23 = vld [vmem:[%s12523_s5 + $0x30c] sm:$0xf0]  ;;  %v6825_v16 = vld [vmem:[%s12523_s5 + $0x304] sm:$0xf] }
 0x794   : > { %5832 = vmatmul.bf16.gmra.mxu3 %v6548_v3  ;;  %v6601_v50 = vld [vmem:[%s12523_s5 + $0x310] sm:$0xf0] }
 0x795   : > { %5980 = vst.msk [vmem:[%s11769_s25 + $0xb8] sm:$0xff] %vm3550_vm5, %v5916_v7  ;;  %v4400_v7 = vpop.permute.xlu2 %4399 }
 0x796   : > { %v5624_v18 = vpop.f32.mrf.mxu2  ;;  %v5288_v29 = vpop.f32.mrf.mxu0 }
 0x797   : > { %v5793_v55 = vpop.f32.mrf.mxu3  ;;  %v5625_v9 = vadd.f32 %v5624_v18, %v5456_v53  ;;  %v5457_v21 = vpop.f32.mrf.mxu1  ;;  %v5289_v42 = vadd.f32 %v5288_v29, %v4385_v5 }
 0x799   : > { %v5794_v45 = vadd.f32 %v5793_v55, %v5625_v9  ;;  %v5458_v48 = vadd.f32 %v5457_v21, %v5289_v42  ;;  %v6904_v55 = vld [vmem:[%s7546_s11 + $0xd8] sm:$0xff] }
 0x79b   : > { %v5917_v10 = vadd.f32 %v6901_v51, %v5794_v45 }
 0x79d   : > { %5981 = vst.msk [vmem:[%s11769_s25 + $0xc0] sm:$0xff] %vm3550_vm5, %v5917_v10  ;;  %v4415_v33 = vpop.permute.xlu2 %4414 }
 0x79e   : > { %v5626_v46 = vpop.f32.mrf.mxu2  ;;  %v5291_v14 = vpop.f32.mrf.mxu0 }
 0x79f   : > { %v5795_v60 = vpop.f32.mrf.mxu3  ;;  %v5627_v26 = vadd.f32 %v5626_v46, %v5458_v48  ;;  %v5460_v11 = vpop.f32.mrf.mxu1  ;;  %v5292_v41 = vadd.f32 %v5291_v14, %v4390_v57  ;;  %v6591_v48 = vld [vmem:[%s12523_s5 + $0x2e8] sm:$0xf]  ;;  %v6824_v46 = vld [vmem:[%s12523_s5 + $0x2f4] sm:$0xf0] }
 0x7a1   : > { %v5796_v30 = vadd.f32 %v5795_v60, %v5627_v26  ;;  %5330 = vmatmul.bf16.gmra.mxu0 %v6552_v6  ;;  %v5461_v32 = vadd.f32 %v5460_v11, %v5292_v41  ;;  %v6822_v60 = vld [vmem:[%s12523_s5 + $0x2ec] sm:$0xf]  ;;  %v6593_v6 = vld [vmem:[%s12523_s5 + $0x2f8] sm:$0xf0]  ;;  %v6584_v11 = vor.u32 %v6823_v24, %v6583_v39  ;;  %v6592_v41 = vor.u32 %v6824_v46, %v6591_v48  ;;  %v6909_v48 = vld [vmem:[%s7546_s11 + $0x100] sm:$0xff] }
 0x7a2   : > { %5499 = vmatmul.bf16.gmra.mxu1 %v6556_v1 }
 0x7a3   : > { %v5918_v44 = vadd.f32 %v6902_v34, %v5796_v30  ;;  %5668 = vmatmul.bf16.gmra.mxu2 %v6560_v19  ;;  %v6588_v19 = vor.u32 %v6821_v15, %v6585_v58  ;;  %v6596_v34 = vor.u32 %v6822_v60, %v6593_v6  ;;  %v6615_v15 = vld [vmem:[%s12523_s5 + $0x320] sm:$0xf]  ;;  %v6831_v58 = vld [vmem:[%s12523_s5 + $0x32c] sm:$0xf0]  ;;  %v6829_v60 = vld [vmem:[%s12523_s5 + $0x324] sm:$0xf] }
 0x7a4   : > { %5837 = vmatmul.bf16.gmra.mxu3 %v6564_v36  ;;  %v6617_v6 = vld [vmem:[%s12523_s5 + $0x330] sm:$0xf0] }
 0x7a5   : > { %5982 = vst.msk [vmem:[%s11769_s25 + $0xc8] sm:$0xff] %vm3550_vm5, %v5918_v44  ;;  %v4410_v44 = vpop.permute.xlu0 %4409 }
 0x7a6   : > { %v5629_v27 = vpop.f32.mrf.mxu2  ;;  %v5293_v0 = vpop.f32.mrf.mxu0 }
 0x7a7   : > { %v5798_v28 = vpop.f32.mrf.mxu3  ;;  %v5630_v38 = vadd.f32 %v5629_v27, %v5461_v32  ;;  %v5462_v37 = vpop.f32.mrf.mxu1  ;;  %v5294_v20 = vadd.f32 %v5293_v0, %v4395_v12 }
 0x7a9   : > { %v5799_v25 = vadd.f32 %v5798_v28, %v5630_v38  ;;  %v5463_v8 = vadd.f32 %v5462_v37, %v5294_v20  ;;  %v6906_v28 = vld [vmem:[%s7546_s11 + $0xe8] sm:$0xff] }
 0x7ab   : > { %v5919_v61 = vadd.f32 %v6903_v35, %v5799_v25 }
 0x7ad   : > { %5983 = vst.msk [vmem:[%s11769_s25 + $0xd0] sm:$0xff] %vm3550_vm5, %v5919_v61  ;;  %v4425_v24 = vpop.permute.xlu0 %4424 }
 0x7ae   : > { %v5631_v43 = vpop.f32.mrf.mxu2  ;;  %v5296_v47 = vpop.f32.mrf.mxu0 }
 0x7af   : > { %v5800_v40 = vpop.f32.mrf.mxu3  ;;  %v5632_v3 = vadd.f32 %v5631_v43, %v5463_v8  ;;  %v5465_v2 = vpop.f32.mrf.mxu1  ;;  %v5297_v18 = vadd.f32 %v5296_v47, %v4400_v7  ;;  %v6607_v8 = vld [vmem:[%s12523_s5 + $0x308] sm:$0xf]  ;;  %v6828_v43 = vld [vmem:[%s12523_s5 + $0x314] sm:$0xf0] }
 0x7b1   : > { %v5801_v53 = vadd.f32 %v5800_v40, %v5632_v3  ;;  %5335 = vmatmul.bf16.gmra.mxu0 %v6568_v54  ;;  %v5466_v29 = vadd.f32 %v5465_v2, %v5297_v18  ;;  %v6826_v40 = vld [vmem:[%s12523_s5 + $0x30c] sm:$0xf]  ;;  %v6609_v54 = vld [vmem:[%s12523_s5 + $0x318] sm:$0xf0]  ;;  %v6600_v2 = vor.u32 %v6827_v23, %v6599_v31  ;;  %v6608_v18 = vor.u32 %v6828_v43, %v6607_v8  ;;  %v6911_v8 = vld [vmem:[%s7546_s11 + $0x110] sm:$0xff] }
 0x7b2   : > { %5504 = vmatmul.bf16.gmra.mxu1 %v6572_v62 }
 0x7b3   : > { %v5920_v9 = vadd.f32 %v6904_v55, %v5801_v53  ;;  %5673 = vmatmul.bf16.gmra.mxu2 %v6576_v63  ;;  %v6604_v63 = vor.u32 %v6825_v16, %v6601_v50  ;;  %v6612_v55 = vor.u32 %v6826_v40, %v6609_v54  ;;  %v6631_v16 = vld [vmem:[%s12523_s5 + $0x340] sm:$0xf]  ;;  %v6835_v50 = vld [vmem:[%s12523_s5 + $0x34c] sm:$0xf0]  ;;  %v6833_v40 = vld [vmem:[%s12523_s5 + $0x344] sm:$0xf] }
 0x7b4   : > { %5842 = vmatmul.bf16.gmra.mxu3 %v6580_v22  ;;  %v6633_v54 = vld [vmem:[%s12523_s5 + $0x350] sm:$0xf0] }
 0x7b5   : > { %5984 = vst.msk [vmem:[%s11769_s25 + $0xd8] sm:$0xff] %vm3550_vm5, %v5920_v9  ;;  %v4420_v9 = vpop.permute.xlu1 %4419 }
 0x7b6   : > { %v5634_v21 = vpop.f32.mrf.mxu2  ;;  %v5298_v42 = vpop.f32.mrf.mxu0 }
 0x7b7   : > { %v5803_v5 = vpop.f32.mrf.mxu3  ;;  %v5635_v45 = vadd.f32 %v5634_v21, %v5466_v29  ;;  %v5467_v4 = vpop.f32.mrf.mxu1  ;;  %v5299_v10 = vadd.f32 %v5298_v42, %v4405_v59 }
 0x7b9   : > { %v5804_v51 = vadd.f32 %v5803_v5, %v5635_v45  ;;  %v5468_v1 = vadd.f32 %v5467_v4, %v5299_v10  ;;  %v6908_v5 = vld [vmem:[%s7546_s11 + $0xf8] sm:$0xff] }
 0x7bb   : > { %v5921_v17 = vadd.f32 %v6905_v52, %v5804_v51 }
 0x7bd   : > { %5985 = vst.msk [vmem:[%s11769_s25 + $0xe0] sm:$0xff] %vm3550_vm5, %v5921_v17  ;;  %v4435_v23 = vpop.permute.xlu1 %4434 }
 0x7be   : > { %v5636_v26 = vpop.f32.mrf.mxu2  ;;  %v5301_v57 = vpop.f32.mrf.mxu0 }
 0x7bf   : > { %v5805_v14 = vpop.f32.mrf.mxu3  ;;  %v5637_v36 = vadd.f32 %v5636_v26, %v5468_v1  ;;  %v5470_v30 = vpop.f32.mrf.mxu1  ;;  %v5302_v27 = vadd.f32 %v5301_v57, %v4410_v44  ;;  %v6623_v1 = vld [vmem:[%s12523_s5 + $0x328] sm:$0xf]  ;;  %v6832_v26 = vld [vmem:[%s12523_s5 + $0x334] sm:$0xf0] }
 0x7c1   : > { %v5806_v32 = vadd.f32 %v5805_v14, %v5637_v36  ;;  %5340 = vmatmul.bf16.gmra.mxu0 %v6584_v11  ;;  %v5471_v0 = vadd.f32 %v5470_v30, %v5302_v27  ;;  %v6830_v14 = vld [vmem:[%s12523_s5 + $0x32c] sm:$0xf]  ;;  %v6625_v11 = vld [vmem:[%s12523_s5 + $0x338] sm:$0xf0]  ;;  %v6616_v30 = vor.u32 %v6831_v58, %v6615_v15  ;;  %v6624_v27 = vor.u32 %v6832_v26, %v6623_v1  ;;  %v6913_v1 = vld [vmem:[%s7546_s11 + $0x120] sm:$0xff] }
 0x7c2   : > { %5509 = vmatmul.bf16.gmra.mxu1 %v6588_v19 }
 0x7c3   : > { %v5922_v38 = vadd.f32 %v6906_v28, %v5806_v32  ;;  %5678 = vmatmul.bf16.gmra.mxu2 %v6592_v41  ;;  %v6620_v41 = vor.u32 %v6829_v60, %v6617_v6  ;;  %v6628_v28 = vor.u32 %v6830_v14, %v6625_v11  ;;  %v6647_v60 = vld [vmem:[%s12523_s5 + $0x360] sm:$0xf]  ;;  %v6839_v6 = vld [vmem:[%s12523_s5 + $0x36c] sm:$0xf0]  ;;  %v6837_v14 = vld [vmem:[%s12523_s5 + $0x364] sm:$0xf] }
 0x7c4   : > { %5847 = vmatmul.bf16.gmra.mxu3 %v6596_v34  ;;  %v6649_v11 = vld [vmem:[%s12523_s5 + $0x370] sm:$0xf0] }
 0x7c5   : > { %5986 = vst.msk [vmem:[%s11769_s25 + $0xe8] sm:$0xff] %vm3550_vm5, %v5922_v38  ;;  %v4430_v38 = vpop.permute.xlu2 %4429 }
 0x7c6   : > { %v5639_v37 = vpop.f32.mrf.mxu2  ;;  %v5303_v20 = vpop.f32.mrf.mxu0 }
 0x7c7   : > { %v5808_v12 = vpop.f32.mrf.mxu3  ;;  %v5640_v25 = vadd.f32 %v5639_v37, %v5471_v0  ;;  %v5472_v13 = vpop.f32.mrf.mxu1  ;;  %v5304_v61 = vadd.f32 %v5303_v20, %v4415_v33 }
 0x7c9   : > { %v5809_v35 = vadd.f32 %v5808_v12, %v5640_v25  ;;  %v5473_v62 = vadd.f32 %v5472_v13, %v5304_v61  ;;  %v6910_v12 = vld [vmem:[%s7546_s11 + $0x108] sm:$0xff] }
 0x7cb   : > { %v5923_v56 = vadd.f32 %v6907_v49, %v5809_v35 }
 0x7cd   : > { %5987 = vst.msk [vmem:[%s11769_s25 + $0xf0] sm:$0xff] %vm3550_vm5, %v5923_v56  ;;  %v4445_v58 = vpop.permute.xlu2 %4444 }
 0x7ce   : > { %v5641_v3 = vpop.f32.mrf.mxu2  ;;  %v5306_v7 = vpop.f32.mrf.mxu0 }
 0x7cf   : > { %v5810_v47 = vpop.f32.mrf.mxu3  ;;  %v5642_v22 = vadd.f32 %v5641_v3, %v5473_v62  ;;  %v5475_v53 = vpop.f32.mrf.mxu1  ;;  %v5307_v21 = vadd.f32 %v5306_v7, %v4420_v9  ;;  %v6639_v62 = vld [vmem:[%s12523_s5 + $0x348] sm:$0xf]  ;;  %v6836_v3 = vld [vmem:[%s12523_s5 + $0x354] sm:$0xf0] }
 0x7d1   : > { %v5811_v29 = vadd.f32 %v5810_v47, %v5642_v22  ;;  %5345 = vmatmul.bf16.gmra.mxu0 %v6600_v2  ;;  %v5476_v42 = vadd.f32 %v5475_v53, %v5307_v21  ;;  %v6834_v47 = vld [vmem:[%s12523_s5 + $0x34c] sm:$0xf]  ;;  %v6641_v2 = vld [vmem:[%s12523_s5 + $0x358] sm:$0xf0]  ;;  %v6632_v53 = vor.u32 %v6835_v50, %v6631_v16  ;;  %v6640_v21 = vor.u32 %v6836_v3, %v6639_v62  ;;  %v6915_v62 = vld [vmem:[%s7546_s11 + $0x130] sm:$0xff] }
 0x7d2   : > { %5514 = vmatmul.bf16.gmra.mxu1 %v6604_v63 }
 0x7d3   : > { %v5924_v45 = vadd.f32 %v6908_v5, %v5811_v29  ;;  %5683 = vmatmul.bf16.gmra.mxu2 %v6608_v18  ;;  %v6636_v18 = vor.u32 %v6833_v40, %v6633_v54  ;;  %v6644_v5 = vor.u32 %v6834_v47, %v6641_v2  ;;  %v6663_v40 = vld [vmem:[%s12523_s5 + $0x380] sm:$0xf]  ;;  %v6843_v54 = vld [vmem:[%s12523_s5 + $0x38c] sm:$0xf0]  ;;  %v6841_v47 = vld [vmem:[%s12523_s5 + $0x384] sm:$0xf] }
 0x7d4   : > { %5852 = vmatmul.bf16.gmra.mxu3 %v6612_v55  ;;  %v6665_v2 = vld [vmem:[%s12523_s5 + $0x390] sm:$0xf0] }
 0x7d5   : > { %5988 = vst.msk [vmem:[%s11769_s25 + $0xf8] sm:$0xff] %vm3550_vm5, %v5924_v45  ;;  %v4440_v45 = vpop.permute.xlu0 %4439 }
 0x7d6   : > { %v5644_v4 = vpop.f32.mrf.mxu2  ;;  %v5308_v10 = vpop.f32.mrf.mxu0 }
 0x7d7   : > { %v5813_v59 = vpop.f32.mrf.mxu3  ;;  %v5645_v51 = vadd.f32 %v5644_v4, %v5476_v42  ;;  %v5477_v39 = vpop.f32.mrf.mxu1  ;;  %v5309_v17 = vadd.f32 %v5308_v10, %v4425_v24 }
 0x7d9   : > { %v5814_v52 = vadd.f32 %v5813_v59, %v5645_v51  ;;  %v5478_v19 = vadd.f32 %v5477_v39, %v5309_v17  ;;  %v6912_v59 = vld [vmem:[%s7546_s11 + $0x118] sm:$0xff] }
 0x7db   : > { %v5925_v46 = vadd.f32 %v6909_v48, %v5814_v52 }
 0x7dd   : > { %5989 = vst.msk [vmem:[%s11769_s25 + $0x100] sm:$0xff] %vm3550_vm5, %v5925_v46  ;;  %v4455_v50 = vpop.permute.xlu0 %4454 }
 0x7de   : > { %v5646_v36 = vpop.f32.mrf.mxu2  ;;  %v5311_v44 = vpop.f32.mrf.mxu0 }
 0x7df   : > { %v5815_v57 = vpop.f32.mrf.mxu3  ;;  %v5647_v34 = vadd.f32 %v5646_v36, %v5478_v19  ;;  %v5480_v32 = vpop.f32.mrf.mxu1  ;;  %v5312_v37 = vadd.f32 %v5311_v44, %v4430_v38  ;;  %v6655_v19 = vld [vmem:[%s12523_s5 + $0x368] sm:$0xf]  ;;  %v6840_v36 = vld [vmem:[%s12523_s5 + $0x374] sm:$0xf0] }
 0x7e1   : > { %v5816_v0 = vadd.f32 %v5815_v57, %v5647_v34  ;;  %5350 = vmatmul.bf16.gmra.mxu0 %v6616_v30  ;;  %v5481_v20 = vadd.f32 %v5480_v32, %v5312_v37  ;;  %v6838_v57 = vld [vmem:[%s12523_s5 + $0x36c] sm:$0xf]  ;;  %v6657_v30 = vld [vmem:[%s12523_s5 + $0x378] sm:$0xf0]  ;;  %v6648_v32 = vor.u32 %v6839_v6, %v6647_v60  ;;  %v6656_v37 = vor.u32 %v6840_v36, %v6655_v19  ;;  %v6917_v19 = vld [vmem:[%s7546_s11 + $0x140] sm:$0xff] }
 0x7e2   : > { %5519 = vmatmul.bf16.gmra.mxu1 %v6620_v41 }
 0x7e3   : > { %v5926_v25 = vadd.f32 %v6910_v12, %v5816_v0  ;;  %5688 = vmatmul.bf16.gmra.mxu2 %v6624_v27  ;;  %v6652_v27 = vor.u32 %v6837_v14, %v6649_v11  ;;  %v6660_v12 = vor.u32 %v6838_v57, %v6657_v30  ;;  %v6679_v14 = vld [vmem:[%s12523_s5 + $0x3a0] sm:$0xf]  ;;  %v6847_v11 = vld [vmem:[%s12523_s5 + $0x3ac] sm:$0xf0]  ;;  %v6845_v57 = vld [vmem:[%s12523_s5 + $0x3a4] sm:$0xf] }
 0x7e4   : > { %5857 = vmatmul.bf16.gmra.mxu3 %v6628_v28  ;;  %v6681_v30 = vld [vmem:[%s12523_s5 + $0x3b0] sm:$0xf0] }
 0x7e5   : > { %5990 = vst.msk [vmem:[%s11769_s25 + $0x108] sm:$0xff] %vm3550_vm5, %v5926_v25  ;;  %v4450_v25 = vpop.permute.xlu1 %4449 }
 0x7e6   : > { %v5649_v13 = vpop.f32.mrf.mxu2  ;;  %v5313_v61 = vpop.f32.mrf.mxu0 }
 0x7e7   : > { %v5818_v33 = vpop.f32.mrf.mxu3  ;;  %v5650_v35 = vadd.f32 %v5649_v13, %v5481_v20  ;;  %v5482_v31 = vpop.f32.mrf.mxu1  ;;  %v5314_v56 = vadd.f32 %v5313_v61, %v4435_v23 }
 0x7e9   : > { %v5819_v49 = vadd.f32 %v5818_v33, %v5650_v35  ;;  %v5483_v63 = vadd.f32 %v5482_v31, %v5314_v56  ;;  %v6914_v33 = vld [vmem:[%s7546_s11 + $0x128] sm:$0xff] }
 0x7eb   : > { %v5927_v43 = vadd.f32 %v6911_v8, %v5819_v49 }
 0x7ed   : > { %5991 = vst.msk [vmem:[%s11769_s25 + $0x110] sm:$0xff] %vm3550_vm5, %v5927_v43  ;;  %v4465_v6 = vpop.permute.xlu1 %4464 }
 0x7ee   : > { %v5651_v22 = vpop.f32.mrf.mxu2  ;;  %v5316_v9 = vpop.f32.mrf.mxu0 }
 0x7ef   : > { %v5820_v7 = vpop.f32.mrf.mxu3  ;;  %v5652_v55 = vadd.f32 %v5651_v22, %v5483_v63  ;;  %v5485_v29 = vpop.f32.mrf.mxu1  ;;  %v5317_v4 = vadd.f32 %v5316_v9, %v4440_v45  ;;  %v6671_v63 = vld [vmem:[%s12523_s5 + $0x388] sm:$0xf]  ;;  %v6844_v22 = vld [vmem:[%s12523_s5 + $0x394] sm:$0xf0] }
 0x7f1   : > { %v5821_v42 = vadd.f32 %v5820_v7, %v5652_v55  ;;  %5355 = vmatmul.bf16.gmra.mxu0 %v6632_v53  ;;  %v5486_v10 = vadd.f32 %v5485_v29, %v5317_v4  ;;  %v6842_v7 = vld [vmem:[%s12523_s5 + $0x38c] sm:$0xf]  ;;  %v6673_v53 = vld [vmem:[%s12523_s5 + $0x398] sm:$0xf0]  ;;  %v6664_v29 = vor.u32 %v6843_v54, %v6663_v40  ;;  %v6672_v4 = vor.u32 %v6844_v22, %v6671_v63  ;;  %v6919_v63 = vld [vmem:[%s7546_s11 + $0x150] sm:$0xff] }
 0x7f2   : > { %5524 = vmatmul.bf16.gmra.mxu1 %v6636_v18 }
 0x7f3   : > { %v5928_v51 = vadd.f32 %v6912_v59, %v5821_v42  ;;  %5693 = vmatmul.bf16.gmra.mxu2 %v6640_v21  ;;  %v6668_v21 = vor.u32 %v6841_v47, %v6665_v2  ;;  %v6676_v59 = vor.u32 %v6842_v7, %v6673_v53  ;;  %v6695_v47 = vld [vmem:[%s12523_s5 + $0x3c0] sm:$0xf]  ;;  %v6851_v2 = vld [vmem:[%s12523_s5 + $0x3cc] sm:$0xf0]  ;;  %v6849_v7 = vld [vmem:[%s12523_s5 + $0x3c4] sm:$0xf] }
 0x7f4   : > { %5862 = vmatmul.bf16.gmra.mxu3 %v6644_v5  ;;  %v6697_v53 = vld [vmem:[%s12523_s5 + $0x3d0] sm:$0xf0] }
 0x7f5   : > { %5992 = vst.msk [vmem:[%s11769_s25 + $0x118] sm:$0xff] %vm3550_vm5, %v5928_v51  ;;  %v4460_v51 = vpop.permute.xlu2 %4459 }
 0x7f6   : > { %v5654_v39 = vpop.f32.mrf.mxu2  ;;  %v5318_v17 = vpop.f32.mrf.mxu0 }
 0x7f7   : > { %v5823_v24 = vpop.f32.mrf.mxu3  ;;  %v5655_v52 = vadd.f32 %v5654_v39, %v5486_v10  ;;  %v5487_v15 = vpop.f32.mrf.mxu1  ;;  %v5319_v46 = vadd.f32 %v5318_v17, %v4445_v58 }
 0x7f9   : > { %v5824_v48 = vadd.f32 %v5823_v24, %v5655_v52  ;;  %v5488_v41 = vadd.f32 %v5487_v15, %v5319_v46  ;;  %v6916_v24 = vld [vmem:[%s7546_s11 + $0x138] sm:$0xff] }
 0x7fb   : > { %v5929_v26 = vadd.f32 %v6913_v1, %v5824_v48 }
 0x7fd   : > { %5993 = vst.msk [vmem:[%s11769_s25 + $0x120] sm:$0xff] %vm3550_vm5, %v5929_v26  ;;  %v4475_v54 = vpop.permute.xlu2 %4474 }
 0x7fe   : > { %v5656_v34 = vpop.f32.mrf.mxu2  ;;  %v5321_v38 = vpop.f32.mrf.mxu0 }
 0x7ff   : > { %v5825_v44 = vpop.f32.mrf.mxu3  ;;  %v5657_v28 = vadd.f32 %v5656_v34, %v5488_v41  ;;  %v5490_v0 = vpop.f32.mrf.mxu1  ;;  %v5322_v13 = vadd.f32 %v5321_v38, %v4450_v25  ;;  %v6687_v41 = vld [vmem:[%s12523_s5 + $0x3a8] sm:$0xf]  ;;  %v6848_v34 = vld [vmem:[%s12523_s5 + $0x3b4] sm:$0xf0] }
 0x801   : > { %v5826_v20 = vadd.f32 %v5825_v44, %v5657_v28  ;;  %5360 = vmatmul.bf16.gmra.mxu0 %v6648_v32  ;;  %v5491_v61 = vadd.f32 %v5490_v0, %v5322_v13  ;;  %v6846_v44 = vld [vmem:[%s12523_s5 + $0x3ac] sm:$0xf]  ;;  %v6689_v32 = vld [vmem:[%s12523_s5 + $0x3b8] sm:$0xf0]  ;;  %v6680_v0 = vor.u32 %v6847_v11, %v6679_v14  ;;  %v6688_v13 = vor.u32 %v6848_v34, %v6687_v41  ;;  %v6921_v41 = vld [vmem:[%s7546_s11 + $0x160] sm:$0xff] }
 0x802   : > { %5529 = vmatmul.bf16.gmra.mxu1 %v6652_v27 }
 0x803   : > { %v5930_v35 = vadd.f32 %v6914_v33, %v5826_v20  ;;  %5698 = vmatmul.bf16.gmra.mxu2 %v6656_v37  ;;  %v6684_v37 = vor.u32 %v6845_v57, %v6681_v30  ;;  %v6692_v33 = vor.u32 %v6846_v44, %v6689_v32  ;;  %v6711_v57 = vld [vmem:[%s12523_s5 + $0x3e0] sm:$0xf]  ;;  %v6855_v30 = vld [vmem:[%s12523_s5 + $0x3ec] sm:$0xf0]  ;;  %v6853_v44 = vld [vmem:[%s12523_s5 + $0x3e4] sm:$0xf] }
 0x804   : > { %5867 = vmatmul.bf16.gmra.mxu3 %v6660_v12  ;;  %v6713_v32 = vld [vmem:[%s12523_s5 + $0x3f0] sm:$0xf0] }
 0x805   : > { %5994 = vst.msk [vmem:[%s11769_s25 + $0x128] sm:$0xff] %vm3550_vm5, %v5930_v35  ;;  %v4470_v35 = vpop.permute.xlu0 %4469 }
 0x806   : > { %v5659_v31 = vpop.f32.mrf.mxu2  ;;  %v5323_v56 = vpop.f32.mrf.mxu0 }
 0x807   : > { %v5828_v23 = vpop.f32.mrf.mxu3  ;;  %v5660_v49 = vadd.f32 %v5659_v31, %v5491_v61  ;;  %v5492_v16 = vpop.f32.mrf.mxu1  ;;  %v5324_v43 = vadd.f32 %v5323_v56, %v4455_v50 }
 0x809   : > { %v5829_v8 = vadd.f32 %v5828_v23, %v5660_v49  ;;  %v5493_v18 = vadd.f32 %v5492_v16, %v5324_v43  ;;  %v6918_v23 = vld [vmem:[%s7546_s11 + $0x148] sm:$0xff] }
 0x80b   : > { %v5931_v3 = vadd.f32 %v6915_v62, %v5829_v8 }
 0x80d   : > { %5995 = vst.msk [vmem:[%s11769_s25 + $0x130] sm:$0xff] %vm3550_vm5, %v5931_v3  ;;  %v4485_v11 = vpop.permute.xlu0 %4484 }
 0x80e   : > { %v5661_v55 = vpop.f32.mrf.mxu2  ;;  %v5326_v45 = vpop.f32.mrf.mxu0 }
 0x80f   : > { %v5830_v9 = vpop.f32.mrf.mxu3  ;;  %v5662_v5 = vadd.f32 %v5661_v55, %v5493_v18  ;;  %v5495_v42 = vpop.f32.mrf.mxu1  ;;  %v5327_v39 = vadd.f32 %v5326_v45, %v4460_v51  ;;  %v6703_v18 = vld [vmem:[%s12523_s5 + $0x3c8] sm:$0xf]  ;;  %v6852_v55 = vld [vmem:[%s12523_s5 + $0x3d4] sm:$0xf0] }
 0x811   : > { %v5831_v10 = vadd.f32 %v5830_v9, %v5662_v5  ;;  %5365 = vmatmul.bf16.gmra.mxu0 %v6664_v29  ;;  %v5496_v17 = vadd.f32 %v5495_v42, %v5327_v39  ;;  %v6850_v9 = vld [vmem:[%s12523_s5 + $0x3cc] sm:$0xf]  ;;  %v6705_v29 = vld [vmem:[%s12523_s5 + $0x3d8] sm:$0xf0]  ;;  %v6696_v42 = vor.u32 %v6851_v2, %v6695_v47  ;;  %v6704_v39 = vor.u32 %v6852_v55, %v6703_v18 }
 0x812   : > { %5534 = vmatmul.bf16.gmra.mxu1 %v6668_v21 }
 0x813   : > { %v5932_v52 = vadd.f32 %v6916_v24, %v5831_v10  ;;  %5703 = vmatmul.bf16.gmra.mxu2 %v6672_v4  ;;  %v6700_v4 = vor.u32 %v6849_v7, %v6697_v53  ;;  %v6708_v24 = vor.u32 %v6850_v9, %v6705_v29  ;;  %v6923_v7 = vld [vmem:[%s7546_s11 + $0x170] sm:$0xff] }
 0x814   : > { %5872 = vmatmul.bf16.gmra.mxu3 %v6676_v59 }
 0x815   : > { %5996 = vst.msk [vmem:[%s11769_s25 + $0x138] sm:$0xff] %vm3550_vm5, %v5932_v52  ;;  %v4480_v52 = vpop.permute.xlu1 %4479 }
 0x816   : > { %v5664_v15 = vpop.f32.mrf.mxu2  ;;  %v5328_v46 = vpop.f32.mrf.mxu0 }
 0x817   : > { %v5833_v58 = vpop.f32.mrf.mxu3  ;;  %v5665_v48 = vadd.f32 %v5664_v15, %v5496_v17  ;;  %v5497_v60 = vpop.f32.mrf.mxu1  ;;  %v5329_v26 = vadd.f32 %v5328_v46, %v4465_v6 }
 0x819   : > { %v5834_v1 = vadd.f32 %v5833_v58, %v5665_v48  ;;  %v5498_v27 = vadd.f32 %v5497_v60, %v5329_v26  ;;  %v6920_v58 = vld [vmem:[%s7546_s11 + $0x158] sm:$0xff] }
 0x81b   : > { %v5933_v36 = vadd.f32 %v6917_v19, %v5834_v1 }
 0x81d   : > { %5997 = vst.msk [vmem:[%s11769_s25 + $0x140] sm:$0xff] %vm3550_vm5, %v5933_v36  ;;  %v4495_v2 = vpop.permute.xlu1 %4494 }
 0x81e   : > { %v5666_v28 = vpop.f32.mrf.mxu2  ;;  %v5331_v25 = vpop.f32.mrf.mxu0 }
 0x81f   : > { %v5835_v38 = vpop.f32.mrf.mxu3  ;;  %v5667_v12 = vadd.f32 %v5666_v28, %v5498_v27  ;;  %v5500_v20 = vpop.f32.mrf.mxu1  ;;  %v5332_v31 = vadd.f32 %v5331_v25, %v4470_v35  ;;  %v6719_v27 = vld [vmem:[%s12523_s5 + $0x3e8] sm:$0xf]  ;;  %v6856_v28 = vld [vmem:[%s12523_s5 + $0x3f4] sm:$0xf0] }
 0x821   : > { %v5836_v61 = vadd.f32 %v5835_v38, %v5667_v12  ;;  %5370 = vmatmul.bf16.gmra.mxu0 %v6680_v0  ;;  %v5501_v56 = vadd.f32 %v5500_v20, %v5332_v31  ;;  %v6854_v38 = vld [vmem:[%s12523_s5 + $0x3ec] sm:$0xf]  ;;  %v6721_v0 = vld [vmem:[%s12523_s5 + $0x3f8] sm:$0xf0]  ;;  %v6712_v20 = vor.u32 %v6855_v30, %v6711_v57  ;;  %v6720_v31 = vor.u32 %v6856_v28, %v6719_v27 }
 0x822   : > { %5539 = vmatmul.bf16.gmra.mxu1 %v6684_v37 }
 0x823   : > { %v5934_v49 = vadd.f32 %v6918_v23, %v5836_v61  ;;  %5708 = vmatmul.bf16.gmra.mxu2 %v6688_v13  ;;  %v6716_v13 = vor.u32 %v6853_v44, %v6713_v32  ;;  %v6724_v23 = vor.u32 %v6854_v38, %v6721_v0 }
 0x824   : > { %5877 = vmatmul.bf16.gmra.mxu3 %v6692_v33 }
 0x825   : > { %5998 = vst.msk [vmem:[%s11769_s25 + $0x148] sm:$0xff] %vm3550_vm5, %v5934_v49  ;;  %v4490_v49 = vpop.permute.xlu2 %4489  ;;  %v4510_v57 = vpop.permute.xlu1 %4509 }
 0x826   : > { %v5669_v16 = vpop.f32.mrf.mxu2  ;;  %v5333_v43 = vpop.f32.mrf.mxu0 }
 0x827   : > { %v5838_v50 = vpop.f32.mrf.mxu3  ;;  %v5670_v8 = vadd.f32 %v5669_v16, %v5501_v56  ;;  %v5502_v40 = vpop.f32.mrf.mxu1  ;;  %v5334_v3 = vadd.f32 %v5333_v43, %v4475_v54 }
 0x829   : > { %v5839_v62 = vadd.f32 %v5838_v50, %v5670_v8  ;;  %v5503_v21 = vadd.f32 %v5502_v40, %v5334_v3  ;;  %v6922_v50 = vld [vmem:[%s7546_s11 + $0x168] sm:$0xff] }
 0x82b   : > { %v5935_v22 = vadd.f32 %v6919_v63, %v5839_v62 }
 0x82d   : > { %5999 = vst.msk [vmem:[%s11769_s25 + $0x150] sm:$0xff] %vm3550_vm5, %v5935_v22 }
 0x82e   : > { %v5671_v5 = vpop.f32.mrf.mxu2  ;;  %v5336_v51 = vpop.f32.mrf.mxu0 }
 0x82f   : > { %v5840_v45 = vpop.f32.mrf.mxu3  ;;  %v5672_v59 = vadd.f32 %v5671_v5, %v5503_v21  ;;  %v5505_v10 = vpop.f32.mrf.mxu1  ;;  %v5337_v15 = vadd.f32 %v5336_v51, %v4480_v52 }
 0x831   : > { %v5841_v17 = vadd.f32 %v5840_v45, %v5672_v59  ;;  %5375 = vmatmul.bf16.gmra.mxu0 %v6696_v42  ;;  %v5506_v46 = vadd.f32 %v5505_v10, %v5337_v15  ;;  %v4500_v45 = vpop.permute.xlu0 %4499  ;;  %v6924_v59 = vld [vmem:[%s7546_s11 + $0x178] sm:$0xff] }
 0x832   : > { %5544 = vmatmul.bf16.gmra.mxu1 %v6700_v4 }
 0x833   : > { %v5936_v48 = vadd.f32 %v6920_v58, %v5841_v17  ;;  %5713 = vmatmul.bf16.gmra.mxu2 %v6704_v39  ;;  %v4505_v58 = vpop.permute.xlu2 %4504 }
 0x834   : > { %5882 = vmatmul.bf16.gmra.mxu3 %v6708_v24 }
 0x835   : > { %6000 = vst.msk [vmem:[%s11769_s25 + $0x158] sm:$0xff] %vm3550_vm5, %v5936_v48 }
 0x836   : > { %v5674_v60 = vpop.f32.mrf.mxu2  ;;  %v5338_v26 = vpop.f32.mrf.mxu0 }
 0x837   : > { %v5843_v6 = vpop.f32.mrf.mxu3  ;;  %v5675_v1 = vadd.f32 %v5674_v60, %v5506_v46  ;;  %v5507_v14 = vpop.f32.mrf.mxu1  ;;  %v5339_v36 = vadd.f32 %v5338_v26, %v4485_v11  ;;  %v6925_v60 = vld [vmem:[%s7546_s11 + $0x180] sm:$0xff] }
 0x839   : > { %v5844_v19 = vadd.f32 %v5843_v6, %v5675_v1  ;;  %v5508_v37 = vadd.f32 %v5507_v14, %v5339_v36 }
 0x83b   : > { %v5937_v34 = vadd.f32 %v6921_v41, %v5844_v19 }
 0x83d   : > { %6001 = vst.msk [vmem:[%s11769_s25 + $0x160] sm:$0xff] %vm3550_vm5, %v5937_v34  ;;  %v6926_v34 = vld [vmem:[%s7546_s11 + $0x188] sm:$0xff] }
 0x83e   : > { %v5676_v12 = vpop.f32.mrf.mxu2  ;;  %v5341_v35 = vpop.f32.mrf.mxu0 }
 0x83f   : > { %v5845_v25 = vpop.f32.mrf.mxu3  ;;  %v5677_v33 = vadd.f32 %v5676_v12, %v5508_v37  ;;  %v5510_v61 = vpop.f32.mrf.mxu1  ;;  %v5342_v16 = vadd.f32 %v5341_v35, %v4490_v49 }
 0x840   : > { %v4515_v12 = vpop.permute.xlu0 %4514 }
 0x841   : > { %v5846_v56 = vadd.f32 %v5845_v25, %v5677_v33  ;;  %5380 = vmatmul.bf16.gmra.mxu0 %v6712_v20  ;;  %v5511_v43 = vadd.f32 %v5510_v61, %v5342_v16  ;;  %v4520_v16 = vpop.permute.xlu2 %4519 }
 0x842   : > { %5549 = vmatmul.bf16.gmra.mxu1 %v6716_v13  ;;  %v6927_v13 = vld [vmem:[%s7546_s11 + $0x190] sm:$0xff] }
 0x843   : > { %v5938_v8 = vadd.f32 %v6922_v50, %v5846_v56  ;;  %5718 = vmatmul.bf16.gmra.mxu2 %v6720_v31 }
 0x844   : > { %5887 = vmatmul.bf16.gmra.mxu3 %v6724_v23 }
 0x845   : > { %6002 = vst.msk [vmem:[%s11769_s25 + $0x168] sm:$0xff] %vm3550_vm5, %v5938_v8 }
 0x846   : > { %v5679_v40 = vpop.f32.mrf.mxu2  ;;  %v5343_v3 = vpop.f32.mrf.mxu0 }
 0x847   : > { %v5848_v54 = vpop.f32.mrf.mxu3  ;;  %v5680_v62 = vadd.f32 %v5679_v40, %v5511_v43  ;;  %v5512_v47 = vpop.f32.mrf.mxu1  ;;  %v5344_v22 = vadd.f32 %v5343_v3, %v4495_v2  ;;  %v6928_v43 = vld [vmem:[%s7546_s11 + $0x198] sm:$0xff] }
 0x849   : > { %v5849_v63 = vadd.f32 %v5848_v54, %v5680_v62  ;;  %v5513_v18 = vadd.f32 %v5512_v47, %v5344_v22  ;;  %v4525_v22 = vpop.permute.xlu1 %4524 }
 0x84b   : > { %v5939_v53 = vadd.f32 %v6923_v7, %v5849_v63 }
 0x84d   : > { %6003 = vst.msk [vmem:[%s11769_s25 + $0x170] sm:$0xff] %vm3550_vm5, %v5939_v53 }
 0x84e   : > { %v5681_v55 = vpop.f32.mrf.mxu2  ;;  %v5346_v21 = vpop.f32.mrf.mxu0 }
 0x84f   : > { %v5850_v9 = vpop.f32.mrf.mxu3  ;;  %v5682_v29 = vadd.f32 %v5681_v55, %v5513_v18  ;;  %v5515_v5 = vpop.f32.mrf.mxu1  ;;  %v5347_v4 = vadd.f32 %v5346_v21, %v4500_v45  ;;  %v6929_v18 = vld [vmem:[%s7546_s11 + $0x1a0] sm:$0xff] }
 0x851   : > { %v5851_v42 = vadd.f32 %v5850_v9, %v5682_v29  ;;  %v5516_v10 = vadd.f32 %v5515_v5, %v5347_v4  ;;  %v4530_v4 = vpop.permute.xlu0 %4529 }
 0x853   : > { %v5940_v51 = vadd.f32 %v6924_v59, %v5851_v42 }
 0x855   : > { %6004 = vst.msk [vmem:[%s11769_s25 + $0x178] sm:$0xff] %vm3550_vm5, %v5940_v51 }
 0x856   : > { %v5684_v39 = vpop.f32.mrf.mxu2  ;;  %v5348_v17 = vpop.f32.mrf.mxu0 }
 0x857   : > { %v5853_v24 = vpop.f32.mrf.mxu3  ;;  %v5685_v52 = vadd.f32 %v5684_v39, %v5516_v10  ;;  %v5517_v15 = vpop.f32.mrf.mxu1  ;;  %v5349_v46 = vadd.f32 %v5348_v17, %v4505_v58  ;;  %v6930_v10 = vld [vmem:[%s7546_s11 + $0x1a8] sm:$0xff] }
 0x859   : > { %v5854_v48 = vadd.f32 %v5853_v24, %v5685_v52  ;;  %v5518_v1 = vadd.f32 %v5517_v15, %v5349_v46  ;;  %v4535_v46 = vpop.permute.xlu2 %4534 }
 0x85b   : > { %v5941_v6 = vadd.f32 %v6925_v60, %v5854_v48 }
 0x85d   : > { %6005 = vst.msk [vmem:[%s11769_s25 + $0x180] sm:$0xff] %vm3550_vm5, %v5941_v6 }
 0x85e   : > { %v5686_v26 = vpop.f32.mrf.mxu2  ;;  %v5351_v19 = vpop.f32.mrf.mxu0 }
 0x85f   : > { %v5855_v14 = vpop.f32.mrf.mxu3  ;;  %v5687_v11 = vadd.f32 %v5686_v26, %v5518_v1  ;;  %v5520_v36 = vpop.f32.mrf.mxu1  ;;  %v5352_v41 = vadd.f32 %v5351_v19, %v4510_v57  ;;  %v6931_v1 = vld [vmem:[%s7546_s11 + $0x1b0] sm:$0xff] }
 0x861   : > { %v5856_v30 = vadd.f32 %v5855_v14, %v5687_v11  ;;  %v5521_v32 = vadd.f32 %v5520_v36, %v5352_v41  ;;  %v4540_v41 = vpop.permute.xlu1 %4539 }
 0x863   : > { %v5942_v44 = vadd.f32 %v6926_v34, %v5856_v30 }
 0x865   : > { %6006 = vst.msk [vmem:[%s11769_s25 + $0x188] sm:$0xff] %vm3550_vm5, %v5942_v44 }
 0x866   : > { %v5689_v27 = vpop.f32.mrf.mxu2  ;;  %v5353_v0 = vpop.f32.mrf.mxu0 }
 0x867   : > { %v5858_v28 = vpop.f32.mrf.mxu3  ;;  %v5690_v38 = vadd.f32 %v5689_v27, %v5521_v32  ;;  %v5522_v37 = vpop.f32.mrf.mxu1  ;;  %v5354_v20 = vadd.f32 %v5353_v0, %v4515_v12  ;;  %v6932_v32 = vld [vmem:[%s7546_s11 + $0x1b8] sm:$0xff] }
 0x869   : > { %v5859_v25 = vadd.f32 %v5858_v28, %v5690_v38  ;;  %v5523_v35 = vadd.f32 %v5522_v37, %v5354_v20  ;;  %v4545_v20 = vpop.permute.xlu0 %4544 }
 0x86b   : > { %v5943_v33 = vadd.f32 %v6927_v13, %v5859_v25 }
 0x86d   : > { %6007 = vst.msk [vmem:[%s11769_s25 + $0x190] sm:$0xff] %vm3550_vm5, %v5943_v33 }
 0x86e   : > { %v5691_v61 = vpop.f32.mrf.mxu2  ;;  %v5356_v49 = vpop.f32.mrf.mxu0 }
 0x86f   : > { %v5860_v31 = vpop.f32.mrf.mxu3  ;;  %v5692_v23 = vadd.f32 %v5691_v61, %v5523_v35  ;;  %v5525_v56 = vpop.f32.mrf.mxu1  ;;  %v5357_v8 = vadd.f32 %v5356_v49, %v4520_v16  ;;  %v6933_v35 = vld [vmem:[%s7546_s11 + $0x1c0] sm:$0xff] }
 0x871   : > { %v5861_v50 = vadd.f32 %v5860_v31, %v5692_v23  ;;  %v5526_v54 = vadd.f32 %v5525_v56, %v5357_v8  ;;  %v4550_v8 = vpop.permute.xlu2 %4549 }
 0x873   : > { %v5944_v40 = vadd.f32 %v6928_v43, %v5861_v50 }
 0x875   : > { %6008 = vst.msk [vmem:[%s11769_s25 + $0x198] sm:$0xff] %vm3550_vm5, %v5944_v40 }
 0x876   : > { %v5694_v62 = vpop.f32.mrf.mxu2  ;;  %v5358_v2 = vpop.f32.mrf.mxu0 }
 0x877   : > { %v5863_v3 = vpop.f32.mrf.mxu3  ;;  %v5695_v47 = vadd.f32 %v5694_v62, %v5526_v54  ;;  %v5527_v63 = vpop.f32.mrf.mxu1  ;;  %v5359_v53 = vadd.f32 %v5358_v2, %v4525_v22  ;;  %v6934_v54 = vld [vmem:[%s7546_s11 + $0x1c8] sm:$0xff] }
 0x879   : > { %v5864_v7 = vadd.f32 %v5863_v3, %v5695_v47  ;;  %v5528_v9 = vadd.f32 %v5527_v63, %v5359_v53  ;;  %v4555_v53 = vpop.permute.xlu1 %4554 }
 0x87b   : > { %v5945_v55 = vadd.f32 %v6929_v18, %v5864_v7 }
 0x87d   : > { %6009 = vst.msk [vmem:[%s11769_s25 + $0x1a0] sm:$0xff] %vm3550_vm5, %v5945_v55 }
 0x87e   : > { %v5696_v29 = vpop.f32.mrf.mxu2  ;;  %v5361_v45 = vpop.f32.mrf.mxu0 }
 0x87f   : > { %v5865_v21 = vpop.f32.mrf.mxu3  ;;  %v5697_v5 = vadd.f32 %v5696_v29, %v5528_v9  ;;  %v5530_v42 = vpop.f32.mrf.mxu1  ;;  %v5362_v51 = vadd.f32 %v5361_v45, %v4530_v4  ;;  %v6935_v9 = vld [vmem:[%s7546_s11 + $0x1d0] sm:$0xff] }
 0x881   : > { %v5866_v59 = vadd.f32 %v5865_v21, %v5697_v5  ;;  %v5531_v24 = vadd.f32 %v5530_v42, %v5362_v51  ;;  %v4560_v51 = vpop.permute.xlu0 %4559 }
 0x883   : > { %v5946_v39 = vadd.f32 %v6930_v10, %v5866_v59 }
 0x885   : > { %6010 = vst.msk [vmem:[%s11769_s25 + $0x1a8] sm:$0xff] %vm3550_vm5, %v5946_v39 }
 0x886   : > { %v5699_v52 = vpop.f32.mrf.mxu2  ;;  %v5363_v58 = vpop.f32.mrf.mxu0 }
 0x887   : > { %v5868_v17 = vpop.f32.mrf.mxu3  ;;  %v5700_v15 = vadd.f32 %v5699_v52, %v5531_v24  ;;  %v5532_v48 = vpop.f32.mrf.mxu1  ;;  %v5364_v6 = vadd.f32 %v5363_v58, %v4535_v46  ;;  %v6936_v24 = vld [vmem:[%s7546_s11 + $0x1d8] sm:$0xff] }
 0x889   : > { %v5869_v60 = vadd.f32 %v5868_v17, %v5700_v15  ;;  %v5533_v14 = vadd.f32 %v5532_v48, %v5364_v6 }
 0x88b   : > { %v5947_v26 = vadd.f32 %v6931_v1, %v5869_v60  ;;  %v4565_v60 = vpop.permute.xlu2 %4564 }
 0x88d   : > { %6011 = vst.msk [vmem:[%s11769_s25 + $0x1b0] sm:$0xff] %vm3550_vm5, %v5947_v26 }
 0x88e   : > { %v5701_v11 = vpop.f32.mrf.mxu2  ;;  %v5366_v57 = vpop.f32.mrf.mxu0 }
 0x88f   : > { %v5870_v19 = vpop.f32.mrf.mxu3  ;;  %v5702_v36 = vadd.f32 %v5701_v11, %v5533_v14  ;;  %v5535_v30 = vpop.f32.mrf.mxu1  ;;  %v5367_v44 = vadd.f32 %v5366_v57, %v4540_v41  ;;  %v6937_v14 = vld [vmem:[%s7546_s11 + $0x1e0] sm:$0xff] }
 0x891   : > { %v5871_v34 = vadd.f32 %v5870_v19, %v5702_v36  ;;  %v5536_v28 = vadd.f32 %v5535_v30, %v5367_v44 }
 0x893   : > { %v5948_v27 = vadd.f32 %v6932_v32, %v5871_v34  ;;  %v4570_v34 = vpop.permute.xlu1 %4569 }
 0x895   : > { %6012 = vst.msk [vmem:[%s11769_s25 + $0x1b8] sm:$0xff] %vm3550_vm5, %v5948_v27 }
 0x896   : > { %v5704_v38 = vpop.f32.mrf.mxu2  ;;  %v5368_v12 = vpop.f32.mrf.mxu0 }
 0x897   : > { %v5873_v0 = vpop.f32.mrf.mxu3  ;;  %v5705_v37 = vadd.f32 %v5704_v38, %v5536_v28  ;;  %v5537_v25 = vpop.f32.mrf.mxu1  ;;  %v5369_v33 = vadd.f32 %v5368_v12, %v4545_v20  ;;  %v6938_v28 = vld [vmem:[%s7546_s11 + $0x1e8] sm:$0xff] }
 0x899   : > { %v5874_v13 = vadd.f32 %v5873_v0, %v5705_v37  ;;  %v5538_v31 = vadd.f32 %v5537_v25, %v5369_v33 }
 0x89b   : > { %v5949_v61 = vadd.f32 %v6933_v35, %v5874_v13  ;;  %v4575_v13 = vpop.permute.xlu0 %4574 }
 0x89d   : > { %6013 = vst.msk [vmem:[%s11769_s25 + $0x1c0] sm:$0xff] %vm3550_vm5, %v5949_v61  ;;  %v6939_v61 = vld [vmem:[%s7546_s11 + $0x1f0] sm:$0xff] }
 0x89e   : > { %v5706_v23 = vpop.f32.mrf.mxu2  ;;  %v5371_v16 = vpop.f32.mrf.mxu0 }
 0x89f   : > { %v5875_v49 = vpop.f32.mrf.mxu3  ;;  %v5707_v56 = vadd.f32 %v5706_v23, %v5538_v31  ;;  %v5540_v50 = vpop.f32.mrf.mxu1  ;;  %v5372_v40 = vadd.f32 %v5371_v16, %v4550_v8 }
 0x8a1   : > { %v5876_v43 = vadd.f32 %v5875_v49, %v5707_v56  ;;  %v5541_v3 = vadd.f32 %v5540_v50, %v5372_v40 }
 0x8a3   : > { %v5950_v62 = vadd.f32 %v6934_v54, %v5876_v43  ;;  %v6940_v43 = vld [vmem:[%s7546_s11 + $0x1f8] sm:$0xff] }
 0x8a5   : > { %6014 = vst.msk [vmem:[%s11769_s25 + $0x1c8] sm:$0xff] %vm3550_vm5, %v5950_v62 }
 0x8a6   : > { %v5709_v47 = vpop.f32.mrf.mxu2  ;;  %v5373_v22 = vpop.f32.mrf.mxu0 }
 0x8a7   : > { %v5878_v2 = vpop.f32.mrf.mxu3  ;;  %v5710_v63 = vadd.f32 %v5709_v47, %v5541_v3  ;;  %v5542_v7 = vpop.f32.mrf.mxu1  ;;  %v5374_v55 = vadd.f32 %v5373_v22, %v4555_v53 }
 0x8a9   : > { %v5879_v18 = vadd.f32 %v5878_v2, %v5710_v63  ;;  %v5543_v21 = vadd.f32 %v5542_v7, %v5374_v55 }
 0x8ab   : > { %v5951_v29 = vadd.f32 %v6935_v9, %v5879_v18 }
 0x8ad   : > { %6015 = vst.msk [vmem:[%s11769_s25 + $0x1d0] sm:$0xff] %vm3550_vm5, %v5951_v29 }
 0x8ae   : > { %v5711_v5 = vpop.f32.mrf.mxu2  ;;  %v5376_v4 = vpop.f32.mrf.mxu0 }
 0x8af   : > { %v5880_v45 = vpop.f32.mrf.mxu3  ;;  %v5712_v42 = vadd.f32 %v5711_v5, %v5543_v21  ;;  %v5545_v59 = vpop.f32.mrf.mxu1  ;;  %v5377_v39 = vadd.f32 %v5376_v4, %v4560_v51 }
 0x8b1   : > { %v5881_v10 = vadd.f32 %v5880_v45, %v5712_v42  ;;  %v5546_v17 = vadd.f32 %v5545_v59, %v5377_v39 }
 0x8b3   : > { %v5952_v52 = vadd.f32 %v6936_v24, %v5881_v10 }
 0x8b5   : > { %6016 = vst.msk [vmem:[%s11769_s25 + $0x1d8] sm:$0xff] %vm3550_vm5, %v5952_v52 }
 0x8b6   : > { %v5714_v15 = vpop.f32.mrf.mxu2  ;;  %v5378_v46 = vpop.f32.mrf.mxu0 }
 0x8b7   : > { %v5883_v58 = vpop.f32.mrf.mxu3  ;;  %v5715_v48 = vadd.f32 %v5714_v15, %v5546_v17  ;;  %v5547_v6 = vpop.f32.mrf.mxu1  ;;  %v5379_v26 = vadd.f32 %v5378_v46, %v4565_v60 }
 0x8b9   : > { %v5884_v1 = vadd.f32 %v5883_v58, %v5715_v48  ;;  %v5548_v19 = vadd.f32 %v5547_v6, %v5379_v26 }
 0x8bb   : > { %v5953_v11 = vadd.f32 %v6937_v14, %v5884_v1 }
 0x8bd   : > { %6017 = vst.msk [vmem:[%s11769_s25 + $0x1e0] sm:$0xff] %vm3550_vm5, %v5953_v11 }
 0x8be   : > { %v5716_v36 = vpop.f32.mrf.mxu2  ;;  %v5381_v41 = vpop.f32.mrf.mxu0 }
 0x8bf   : > { %v5885_v57 = vpop.f32.mrf.mxu3  ;;  %v5717_v30 = vadd.f32 %v5716_v36, %v5548_v19  ;;  %v5382_v32 = vadd.f32 %v5381_v41, %v4570_v34  ;;  %v5550_v27 = vpop.f32.mrf.mxu1 }
 0x8c1   : > { %v5886_v44 = vadd.f32 %v5885_v57, %v5717_v30  ;;  %v5551_v0 = vadd.f32 %v5550_v27, %v5382_v32 }
 0x8c3   : > { %v5954_v38 = vadd.f32 %v6938_v28, %v5886_v44 }
 0x8c5   : > { %6018 = vst.msk [vmem:[%s11769_s25 + $0x1e8] sm:$0xff] %vm3550_vm5, %v5954_v38 }
 0x8c6   : > { %v5719_v37 = vpop.f32.mrf.mxu2  ;;  %v5383_v20 = vpop.f32.mrf.mxu0 }
 0x8c7   : > { %v5888_v12 = vpop.f32.mrf.mxu3  ;;  %v5720_v25 = vadd.f32 %v5719_v37, %v5551_v0  ;;  %v5384_v35 = vadd.f32 %v5383_v20, %v4575_v13  ;;  %v5552_v23 = vpop.f32.mrf.mxu1 }
 0x8c9   : > { %v5889_v33 = vadd.f32 %v5888_v12, %v5720_v25  ;;  %v5553_v49 = vadd.f32 %v5552_v23, %v5384_v35 }
 0x8cb   : > { %v5955_v31 = vadd.f32 %v6939_v61, %v5889_v33 }
 0x8cd   : > { %6019 = vst.msk [vmem:[%s11769_s25 + $0x1f0] sm:$0xff] %vm3550_vm5, %v5955_v31 }
 0x8ce   : > { %v5721_v56 = vpop.f32.mrf.mxu2 }
 0x8cf   : > { %v5722_v16 = vadd.f32 %v5721_v56, %v5553_v49  ;;  %v5890_v50 = vpop.f32.mrf.mxu3 }
 0x8d1   : > { %v5891_v8 = vadd.f32 %v5890_v50, %v5722_v16 }
 0x8d3   : > { %v5956_v40 = vadd.f32 %v6940_v43, %v5891_v8 }
 0x8d5   : > { %6020 = vst.msk [vmem:[%s11769_s25 + $0x1f8] sm:$0xff] %vm3550_vm5, %v5956_v40 }
 0x8d6 PF: > { %s18_s26 = sadd.s32 1, %s6947_s26  }
 0x8d7   : > { %p15_p4 = scmp.ge.s32.totalorder %s18_s26, 4  }
 0x8d9   :  { %17 = sbr.rel (!%p15_p4) target bundleno = 2 (0x2), region = 80 }

</bundles_post_ra>
